<compile_context>
chip_gen: v7x
topology: tpu7x:2x2x1
jax: 0.10.0
libtpu: 0.0.40
codegen_flags: <defaults>
</compile_context>

<pallas_src>
import jax
import jax.numpy as jnp
from jax import lax
from jax.experimental import pallas as pl
from jax.experimental.pallas import tpu as pltpu


def _sigmoid(v):
    # exact sigmoid (review: no approx reciprocal on the eval path)
    return 1.0 / (1.0 + jnp.exp(-v))


# --------------------------------------------------------------------------
# Fused conv stack (conv+BN+ReLU [+pool] x4) + GRU input projection.
# grid=(B,), one whole image per grid step, everything in VMEM scratch.
# --------------------------------------------------------------------------
def _fused_conv_gru_input_kernel(
        x_ref, w1, s1, w2, s2, w3, s3, w4, s4, wih_ref, bih_ref,
        o_ref, p1, p2, p3, p4):
    H, W = x_ref.shape[1], x_ref.shape[2]
    H2, W2 = H // 2, W // 2
    nf = s1.shape[0]
    c3 = s3.shape[0]                       # 2 * nf
    nh = wih_ref.shape[3]
    H4, W4 = wih_ref.shape[2], o_ref.shape[0]

    def pad_into(p_ref, chans):
        # zero-filled 1-px halo in VMEM (replaces jnp.pad in HBM)
        hi, wi = chans[0].shape
        p_ref[...] = jnp.zeros(p_ref.shape, jnp.float32)
        for ci, a in enumerate(chans):
            p_ref[ci, 1:hi + 1, 1:wi + 1] = a

    def conv_bn_relu(p_ref, w_sm, s_sm, cin, cout, hi, wi):
        # 3x3 conv as 9*cin*cout VPU scalar-broadcast MACs, W on the lane axis.
        # BN scale folded into w_sm; conv-bias/BN shift folded into s_sm.
        accs = [jnp.zeros((hi, wi), jnp.float32) for _ in range(cout)]
        for ci in range(cin):
            for k in range(9):
                ky, kx = divmod(k, 3)
                win = p_ref[ci, ky:ky + hi, kx:kx + wi]        # (hi, wi)
                for co in range(cout):
                    accs[co] = accs[co] + w_sm[(co * cin + ci) * 9 + k] * win
        return [jnp.maximum(accs[co] + s_sm[co], 0.0) for co in range(cout)]

    def sel_rows(n_out, n_in, off):
        # (n_out, n_in): [i, j] = 1 where j == 2*i + off
        i = lax.broadcasted_iota(jnp.int32, (n_out, n_in), 0)
        j = lax.broadcasted_iota(jnp.int32, (n_out, n_in), 1)
        return (j == 2 * i + off).astype(jnp.float32)

    def sel_cols(n_in, n_out, off):
        # (n_in, n_out): [j, c] = 1 where j == 2*c + off
        j = lax.broadcasted_iota(jnp.int32, (n_in, n_out), 0)
        c = lax.broadcasted_iota(jnp.int32, (n_in, n_out), 1)
        return (j == 2 * c + off).astype(jnp.float32)

    def maxpool2(chans, hi, wi):
        # 2x2 max pool via tiny even/odd selection matmuls (in VMEM, per image)
        re, ro = sel_rows(hi // 2, hi, 0), sel_rows(hi // 2, hi, 1)
        ce, cd = sel_cols(wi, wi // 2, 0), sel_cols(wi, wi // 2, 1)
        out = []
        for m in chans:
            mr = jnp.maximum(
                jnp.dot(re, m, preferred_element_type=jnp.float32),
                jnp.dot(ro, m, preferred_element_type=jnp.float32))
            out.append(jnp.maximum(
                jnp.dot(mr, ce, preferred_element_type=jnp.float32),
                jnp.dot(mr, cd, preferred_element_type=jnp.float32)))
        return out

    # conv1 .. conv4 (+ pool after conv2 / conv4), all in VMEM
    pad_into(p1, [x_ref[0]])
    a1 = conv_bn_relu(p1, w1, s1, 1, nf, H, W)
    pad_into(p2, a1)
    a2 = maxpool2(conv_bn_relu(p2, w2, s2, nf, nf, H, W), H, W)
    pad_into(p3, a2)
    a3 = conv_bn_relu(p3, w3, s3, nf, c3, H2, W2)
    pad_into(p4, a3)
    a4 = maxpool2(conv_bn_relu(p4, w4, s4, c3, c3, H2, W2), H2, W2)

    # MixDIM + transpose(1, 2) + GRU input projection, gate-major output:
    #   xp[t, b, g, j] = b_ih[g, j] + sum_{c,h} a4[c][h, t] * W_ih^T[g][c*H4+h, j]
    for g in range(3):
        acc = jnp.zeros((W4, nh), jnp.float32) + bih_ref[g]
        for c in range(c3):
            acc = acc + lax.dot_general(
                a4[c], wih_ref[g, c],
                dimension_numbers=(((0,), (0,)), ((), ())),
                preferred_element_type=jnp.float32)
        o_ref[:, 0, g, :] = acc


def fused_conv_stack(x_bhw, P):
    """x: (B, H, W) single-channel images -> xp (T, B, 3, nh) gate-major."""
    B, H, W = x_bhw.shape
    assert H % 4 == 0 and W % 4 == 0, "H and W must be divisible by 4"
    nf = int(P["s1"].shape[0])
    c3 = 2 * nf
    nh = int(P["bih3"].shape[2])
    H4, W4 = H // 4, W // 4
    assert int(P["wih4"].shape[2]) == H4, "nin inconsistent with image height"
    T = W4

    smem = pl.BlockSpec(memory_space=pltpu.MemorySpace.SMEM)
    return pl.pallas_call(
        _fused_conv_gru_input_kernel,
        out_shape=jax.ShapeDtypeStruct((T, B, 3, nh), jnp.float32),
        grid=(B,),
        in_specs=[pl.BlockSpec((1, H, W), lambda b: (b, 0, 0)),
                  smem, smem, smem, smem, smem, smem, smem, smem,
                  pl.BlockSpec((3, c3, H4, nh), lambda b: (0, 0, 0, 0)),
                  pl.BlockSpec((3, 1, nh), lambda b: (0, 0, 0))],
        out_specs=pl.BlockSpec((T, 1, 3, nh), lambda b: (0, b, 0, 0)),
        scratch_shapes=[pltpu.VMEM((1, H + 2, W + 2), jnp.float32),
                        pltpu.VMEM((nf, H + 2, W + 2), jnp.float32),
                        pltpu.VMEM((nf, H // 2 + 2, W // 2 + 2), jnp.float32),
                        pltpu.VMEM((c3, H // 2 + 2, W // 2 + 2), jnp.float32)],
        compiler_params=pltpu.CompilerParams(
            dimension_semantics=("parallel",),
            vmem_limit_bytes=32 * 1024 * 1024),
    )(x_bhw, P["w1"], P["s1"], P["w2"], P["s2"], P["w3"], P["s3"],
      P["w4"], P["s4"], P["wih4"], P["bih3"])


# --------------------------------------------------------------------------
# GRU recurrence (PyTorch equations, h_0 = 0) + fused output Linear.
# Gate-major xp (no lane-offset slicing on the serial path); hidden state
# carried in VMEM scratch across time chunks; output Linear = one matmul
# + one block store per chunk.
# --------------------------------------------------------------------------
def _gru_kernel(xp_ref, whh_ref, bhh_ref, wout_ref, bout_ref, y_ref,
                h_scr, hs_scr):
    tt, B = xp_ref.shape[0], xp_ref.shape[1]

    @pl.when(pl.program_id(0) == 0)
    def _():
        h_scr[...] = jnp.zeros(h_scr.shape, jnp.float32)

    h = h_scr[...]                                   # (B, nh)
    for t in range(tt):                              # static unroll (tt <= 32)
        xg = xp_ref[t]                               # (B, 3, nh), gate-major
        gr = jnp.dot(h, whh_ref[0], preferred_element_type=jnp.float32) + bhh_ref[0]
        gz = jnp.dot(h, whh_ref[1], preferred_element_type=jnp.float32) + bhh_ref[1]
        gn = jnp.dot(h, whh_ref[2], preferred_element_type=jnp.float32) + bhh_ref[2]
        r = _sigmoid(xg[:, 0, :] + gr)
        z = _sigmoid(xg[:, 1, :] + gz)
        n = jnp.tanh(xg[:, 2, :] + r * gn)
        h = (1.0 - z) * n + z * h
        hs_scr[t * B:(t + 1) * B, :] = h
    h_scr[...] = h

    # fused output Linear: one matmul on the whole chunk, one block store
    y_ref[...] = (jnp.dot(hs_scr[...], wout_ref[...],
                          preferred_element_type=jnp.float32) + bout_ref[...])


def gru_with_output(xp, P, tt):
    """xp: (Tp, B, 3, nh) gate-major precomputed input gates -> (Tp*B, nout+1)."""
    Tp, B = xp.shape[0], xp.shape[1]
    nh = int(P["whh3"].shape[1])
    nout1 = int(P["wout_t"].shape[1])
    assert Tp % tt == 0
    return pl.pallas_call(
        _gru_kernel,
        out_shape=jax.ShapeDtypeStruct((Tp * B, nout1), jnp.float32),
        grid=(Tp // tt,),
        in_specs=[pl.BlockSpec((tt, B, 3, nh), lambda i: (i, 0, 0, 0)),
                  pl.BlockSpec((3, nh, nh), lambda i: (0, 0, 0)),
                  pl.BlockSpec((3, 1, nh), lambda i: (0, 0, 0)),
                  pl.BlockSpec((nh, nout1), lambda i: (0, 0)),
                  pl.BlockSpec((1, nout1), lambda i: (0, 0))],
        out_specs=pl.BlockSpec((tt * B, nout1), lambda i: (i, 0)),
        scratch_shapes=[pltpu.VMEM((B, nh), jnp.float32),
                        pltpu.VMEM((tt * B, nh), jnp.float32)],
        compiler_params=pltpu.CompilerParams(
            dimension_semantics=("arbitrary",),
            vmem_limit_bytes=32 * 1024 * 1024),
    )(xp, P["whh3"], P["bhh3"], P["wout_t"], P["bout"])


# --------------------------------------------------------------------------
# Parameter preparation (done ONCE, not per forward call)
# --------------------------------------------------------------------------
def prepare_params(params, eps=1e-5):
    P = {}
    for idx, (cname, bname) in enumerate(
            [("conv1", "bn1"), ("conv2", "bn2"),
             ("conv3", "bn3"), ("conv4", "bn4")], start=1):
        w, b = params[cname]                      # w: (Cout, Cin, 3, 3)
        gamma, beta, mean, var = params[bname]
        s = gamma / jnp.sqrt(var + eps)           # BN scale (Cout,)
        # fold BN scale into the conv weights; fold conv bias + BN shift
        P[f"w{idx}"] = (w * s[:, None, None, None]).reshape(-1)   # SMEM table
        P[f"s{idx}"] = beta + s * (b - mean)                      # (Cout,)
    w_ih = params["w_ih"]                         # (3*nh, F), gates [r|z|n]
    nh = params["w_hh"].shape[1]
    C4 = params["conv4"][0].shape[0]
    F = w_ih.shape[1]
    H4 = F // C4
    # wih4[g, c, h, j] = w_ih[g*nh + j, c*H4 + h]  (per-gate, per-channel-block)
    P["wih4"] = w_ih.reshape(3, nh, C4, H4).transpose(0, 2, 3, 1)
    P["bih3"] = params["b_ih"].reshape(3, 1, nh)
    # whh3[g] = W_h<gate>^T  (split so the recurrence never lane-slices gates)
    P["whh3"] = params["w_hh"].reshape(3, nh, nh).transpose(0, 2, 1)
    P["bhh3"] = params["b_hh"].reshape(3, 1, nh)
    P["wout_t"] = params["out_w"].T               # (nh, nout+1)
    P["bout"] = params["out_b"].reshape(1, -1)
    return P


# --------------------------------------------------------------------------
# Full IMG2SEQ forward
# --------------------------------------------------------------------------
def img2seq_forward(x_nchw, P):
    B, Cin, H, W = x_nchw.shape
    assert Cin == 1
    # fused conv stack + GRU input projection: (T, B, 3, nh), gate-major
    xp = fused_conv_stack(x_nchw.reshape(B, H, W), P)
    T = xp.shape[0]
    # time chunking with padding (no chunk=1 cliff for awkward T)
    tt = min(T, 32)
    Tp = -(-T // tt) * tt
    if Tp != T:
        xp = jnp.pad(xp, ((0, Tp - T), (0, 0), (0, 0), (0, 0)))
    y = gru_with_output(xp, P, tt)                # (Tp*B, nout+1)
    nout1 = y.shape[1]
    y = y.reshape(Tp, B, nout1)[:T]
    return jnp.transpose(y, (1, 0, 2))            # (B, T, nout+1)


# --------------------------------------------------------------------------
# Deterministic parameter init (shapes from IMG2SEQ.__init__, torch layout)
# --------------------------------------------------------------------------
def init_params(key, nin, nout, nh, nf=2):
    keys = iter(jax.random.split(key, 32))

    def conv_p(cin, cout):
        w = 0.1 * jax.random.normal(next(keys), (cout, cin, 3, 3), jnp.float32)
        b = 0.1 * jax.random.normal(next(keys), (cout,), jnp.float32)
        return (w, b)

    def bn_p(c):
        gamma = 1.0 + 0.1 * jax.random.normal(next(keys), (c,), jnp.float32)
        beta = 0.1 * jax.random.normal(next(keys), (c,), jnp.float32)
        mean = 0.1 * jax.random.normal(next(keys), (c,), jnp.float32)
        var = jnp.abs(jax.random.normal(next(keys), (c,), jnp.float32)) + 0.5
        return (gamma, beta, mean, var)

    params = {
        "conv1": conv_p(1, nf), "bn1": bn_p(nf),
        "conv2": conv_p(nf, nf), "bn2": bn_p(nf),
        "conv3": conv_p(nf, 2 * nf), "bn3": bn_p(2 * nf),
        "conv4": conv_p(2 * nf, 2 * nf), "bn4": bn_p(2 * nf),
        "w_ih": 0.1 * jax.random.normal(next(keys), (3 * nh, nin), jnp.float32),
        "w_hh": 0.1 * jax.random.normal(next(keys), (3 * nh, nh), jnp.float32),
        "b_ih": 0.1 * jax.random.normal(next(keys), (3 * nh,), jnp.float32),
        "b_hh": 0.1 * jax.random.normal(next(keys), (3 * nh,), jnp.float32),
        "out_w": 0.1 * jax.random.normal(next(keys), (nout + 1, nh), jnp.float32),
        "out_b": 0.1 * jax.random.normal(next(keys), (nout + 1,), jnp.float32),
    }
    return params


if __name__ == "__main__":
    # Shapes consistent with the module: input (B, 1, H, W);
    # after the conv stack nin = 2*nf*(H//4), sequence length T = W//4.
    B, H, W = 2, 16, 16
    nf = 2
    nin = 2 * nf * (H // 4)   # 16
    nh = 32
    nout = 7                  # Linear output dim = nout + 1 = 8

    key = jax.random.PRNGKey(0)
    kx, kp = jax.random.split(key)
    x = jax.random.normal(kx, (B, 1, H, W), jnp.float32)
    params = init_params(kp, nin, nout, nh, nf)
    prepared = prepare_params(params)

    fwd = jax.jit(img2seq_forward)
    y = jax.block_until_ready(fwd(x, prepared))

    assert y.shape == (B, W // 4, nout + 1), y.shape
    assert bool(jnp.all(jnp.isfinite(y)))
    print("KERNEL_OK")
</pallas_src>

<mosaic_0001>
module attributes {stable_mosaic.version = 11 : i64} {
  func.func @_fused_conv_gru_input_kernel(%arg0: i32, %arg1: memref<1x16x16xf32, #tpu.memory_space<vmem>>, %arg2: memref<18xf32, #tpu.memory_space<smem>>, %arg3: memref<2xf32, #tpu.memory_space<smem>>, %arg4: memref<36xf32, #tpu.memory_space<smem>>, %arg5: memref<2xf32, #tpu.memory_space<smem>>, %arg6: memref<72xf32, #tpu.memory_space<smem>>, %arg7: memref<4xf32, #tpu.memory_space<smem>>, %arg8: memref<144xf32, #tpu.memory_space<smem>>, %arg9: memref<4xf32, #tpu.memory_space<smem>>, %arg10: memref<3x4x4x32xf32, #tpu.memory_space<vmem>>, %arg11: memref<3x1x32xf32, #tpu.memory_space<vmem>>, %arg12: memref<4x1x3x32xf32, #tpu.memory_space<vmem>>, %arg13: memref<1x18x18xf32, #tpu.memory_space<vmem>>, %arg14: memref<2x18x18xf32, #tpu.memory_space<vmem>>, %arg15: memref<2x10x10xf32, #tpu.memory_space<vmem>>, %arg16: memref<4x10x10xf32, #tpu.memory_space<vmem>>) attributes {dimension_semantics = [#tpu.dimension_semantics<parallel>], iteration_bounds = array<i64: 2>, scalar_prefetch = 0 : i64, scratch_operands = 4 : i64, tpu.core_type = #tpu.core_type<tc>, window_params = [{transform_indices = @transform_0, window_bounds = array<i64: 1, 16, 16>}, {transform_indices = @transform_1, window_bounds = array<i64: 18>}, {transform_indices = @transform_2, window_bounds = array<i64: 2>}, {transform_indices = @transform_3, window_bounds = array<i64: 36>}, {transform_indices = @transform_4, window_bounds = array<i64: 2>}, {transform_indices = @transform_5, window_bounds = array<i64: 72>}, {transform_indices = @transform_6, window_bounds = array<i64: 4>}, {transform_indices = @transform_7, window_bounds = array<i64: 144>}, {transform_indices = @transform_8, window_bounds = array<i64: 4>}, {pipeline_mode = #tpu.pipeline_mode<synchronous>, transform_indices = @transform_9, window_bounds = array<i64: 3, 4, 4, 32>}, {pipeline_mode = #tpu.pipeline_mode<synchronous>, transform_indices = @transform_10, window_bounds = array<i64: 3, 1, 32>}, {transform_indices = @transform_11, window_bounds = array<i64: 4, 1, 3, 32>}]} {
    %c0 = arith.constant 0 : index
    %c0_0 = arith.constant 0 : index
    %c0_1 = arith.constant 0 : index
    %0 = vector.load %arg1[%c0, %c0_0, %c0_1] : memref<1x16x16xf32, #tpu.memory_space<vmem>>, vector<1x16x16xf32>
    %1 = vector.shape_cast %0 : vector<1x16x16xf32> to vector<16x16xf32>
    %cst = arith.constant 0.000000e+00 : f32
    %2 = vector.broadcast %cst : f32 to vector<1x18x18xf32>
    %c0_2 = arith.constant 0 : index
    %c0_3 = arith.constant 0 : index
    %c0_4 = arith.constant 0 : index
    %3 = vector.load %arg13[%c0_2, %c0_3, %c0_4] : memref<1x18x18xf32, #tpu.memory_space<vmem>>, vector<1x18x18xf32>
    tpu.vector_store %arg13[%c0_2, %c0_3, %c0_4], %2 {strides = array<i32>} : memref<1x18x18xf32, #tpu.memory_space<vmem>>, vector<1x18x18xf32>,
    %c0_5 = arith.constant 0 : index
    %c1 = arith.constant 1 : index
    %c1_6 = arith.constant 1 : index
    %4 = vector.load %arg13[%c0_5, %c1, %c1_6] : memref<1x18x18xf32, #tpu.memory_space<vmem>>, vector<1x16x16xf32>
    %5 = vector.shape_cast %4 : vector<1x16x16xf32> to vector<16x16xf32>
    %6 = vector.shape_cast %1 : vector<16x16xf32> to vector<1x16x16xf32>
    tpu.vector_store %arg13[%c0_5, %c1, %c1_6], %6 {strides = array<i32>} : memref<1x18x18xf32, #tpu.memory_space<vmem>>, vector<1x16x16xf32>,
    %cst_7 = arith.constant 0.000000e+00 : f32
    %7 = vector.broadcast %cst_7 : f32 to vector<16x16xf32>
    %cst_8 = arith.constant 0.000000e+00 : f32
    %8 = vector.broadcast %cst_8 : f32 to vector<16x16xf32>
    %c0_9 = arith.constant 0 : index
    %c0_10 = arith.constant 0 : index
    %c0_11 = arith.constant 0 : index
    %9 = vector.load %arg13[%c0_9, %c0_10, %c0_11] : memref<1x18x18xf32, #tpu.memory_space<vmem>>, vector<1x16x16xf32>
    %10 = vector.shape_cast %9 : vector<1x16x16xf32> to vector<16x16xf32>
    %c0_12 = arith.constant 0 : index
    %11 = memref.load %arg2[%c0_12] : memref<18xf32, #tpu.memory_space<smem>>
    %12 = vector.broadcast %11 : f32 to vector<16x16xf32>
    %13 = arith.mulf %12, %10 : vector<16x16xf32>
    %14 = arith.addf %7, %13 : vector<16x16xf32>
    %c9 = arith.constant 9 : index
    %15 = memref.load %arg2[%c9] : memref<18xf32, #tpu.memory_space<smem>>
    %16 = vector.broadcast %15 : f32 to vector<16x16xf32>
    %17 = arith.mulf %16, %10 : vector<16x16xf32>
    %18 = arith.addf %8, %17 : vector<16x16xf32>
    %c0_13 = arith.constant 0 : index
    %c0_14 = arith.constant 0 : index
    %c1_15 = arith.constant 1 : index
    %19 = vector.load %arg13[%c0_13, %c0_14, %c1_15] : memref<1x18x18xf32, #tpu.memory_space<vmem>>, vector<1x16x16xf32>
    %20 = vector.shape_cast %19 : vector<1x16x16xf32> to vector<16x16xf32>
    %c1_16 = arith.constant 1 : index
    %21 = memref.load %arg2[%c1_16] : memref<18xf32, #tpu.memory_space<smem>>
    %22 = vector.broadcast %21 : f32 to vector<16x16xf32>
    %23 = arith.mulf %22, %20 : vector<16x16xf32>
    %24 = arith.addf %14, %23 : vector<16x16xf32>
    %c10 = arith.constant 10 : index
    %25 = memref.load %arg2[%c10] : memref<18xf32, #tpu.memory_space<smem>>
    %26 = vector.broadcast %25 : f32 to vector<16x16xf32>
    %27 = arith.mulf %26, %20 : vector<16x16xf32>
    %28 = arith.addf %18, %27 : vector<16x16xf32>
    %c0_17 = arith.constant 0 : index
    %c0_18 = arith.constant 0 : index
    %c2 = arith.constant 2 : index
    %29 = vector.load %arg13[%c0_17, %c0_18, %c2] : memref<1x18x18xf32, #tpu.memory_space<vmem>>, vector<1x16x16xf32>
    %30 = vector.shape_cast %29 : vector<1x16x16xf32> to vector<16x16xf32>
    %c2_19 = arith.constant 2 : index
    %31 = memref.load %arg2[%c2_19] : memref<18xf32, #tpu.memory_space<smem>>
    %32 = vector.broadcast %31 : f32 to vector<16x16xf32>
    %33 = arith.mulf %32, %30 : vector<16x16xf32>
    %34 = arith.addf %24, %33 : vector<16x16xf32>
    %c11 = arith.constant 11 : index
    %35 = memref.load %arg2[%c11] : memref<18xf32, #tpu.memory_space<smem>>
    %36 = vector.broadcast %35 : f32 to vector<16x16xf32>
    %37 = arith.mulf %36, %30 : vector<16x16xf32>
    %38 = arith.addf %28, %37 : vector<16x16xf32>
    %c0_20 = arith.constant 0 : index
    %c1_21 = arith.constant 1 : index
    %c0_22 = arith.constant 0 : index
    %39 = vector.load %arg13[%c0_20, %c1_21, %c0_22] : memref<1x18x18xf32, #tpu.memory_space<vmem>>, vector<1x16x16xf32>
    %40 = vector.shape_cast %39 : vector<1x16x16xf32> to vector<16x16xf32>
    %c3 = arith.constant 3 : index
    %41 = memref.load %arg2[%c3] : memref<18xf32, #tpu.memory_space<smem>>
    %42 = vector.broadcast %41 : f32 to vector<16x16xf32>
    %43 = arith.mulf %42, %40 : vector<16x16xf32>
    %44 = arith.addf %34, %43 : vector<16x16xf32>
    %c12 = arith.constant 12 : index
    %45 = memref.load %arg2[%c12] : memref<18xf32, #tpu.memory_space<smem>>
    %46 = vector.broadcast %45 : f32 to vector<16x16xf32>
    %47 = arith.mulf %46, %40 : vector<16x16xf32>
    %48 = arith.addf %38, %47 : vector<16x16xf32>
    %c0_23 = arith.constant 0 : index
    %c1_24 = arith.constant 1 : index
    %c1_25 = arith.constant 1 : index
    %49 = vector.load %arg13[%c0_23, %c1_24, %c1_25] : memref<1x18x18xf32, #tpu.memory_space<vmem>>, vector<1x16x16xf32>
    %50 = vector.shape_cast %49 : vector<1x16x16xf32> to vector<16x16xf32>
    %c4 = arith.constant 4 : index
    %51 = memref.load %arg2[%c4] : memref<18xf32, #tpu.memory_space<smem>>
    %52 = vector.broadcast %51 : f32 to vector<16x16xf32>
    %53 = arith.mulf %52, %50 : vector<16x16xf32>
    %54 = arith.addf %44, %53 : vector<16x16xf32>
    %c13 = arith.constant 13 : index
    %55 = memref.load %arg2[%c13] : memref<18xf32, #tpu.memory_space<smem>>
    %56 = vector.broadcast %55 : f32 to vector<16x16xf32>
    %57 = arith.mulf %56, %50 : vector<16x16xf32>
    %58 = arith.addf %48, %57 : vector<16x16xf32>
    %c0_26 = arith.constant 0 : index
    %c1_27 = arith.constant 1 : index
    %c2_28 = arith.constant 2 : index
    %59 = vector.load %arg13[%c0_26, %c1_27, %c2_28] : memref<1x18x18xf32, #tpu.memory_space<vmem>>, vector<1x16x16xf32>
    %60 = vector.shape_cast %59 : vector<1x16x16xf32> to vector<16x16xf32>
    %c5 = arith.constant 5 : index
    %61 = memref.load %arg2[%c5] : memref<18xf32, #tpu.memory_space<smem>>
    %62 = vector.broadcast %61 : f32 to vector<16x16xf32>
    %63 = arith.mulf %62, %60 : vector<16x16xf32>
    %64 = arith.addf %54, %63 : vector<16x16xf32>
    %c14 = arith.constant 14 : index
    %65 = memref.load %arg2[%c14] : memref<18xf32, #tpu.memory_space<smem>>
    %66 = vector.broadcast %65 : f32 to vector<16x16xf32>
    %67 = arith.mulf %66, %60 : vector<16x16xf32>
    %68 = arith.addf %58, %67 : vector<16x16xf32>
    %c0_29 = arith.constant 0 : index
    %c2_30 = arith.constant 2 : index
    %c0_31 = arith.constant 0 : index
    %69 = vector.load %arg13[%c0_29, %c2_30, %c0_31] : memref<1x18x18xf32, #tpu.memory_space<vmem>>, vector<1x16x16xf32>
    %70 = vector.shape_cast %69 : vector<1x16x16xf32> to vector<16x16xf32>
    %c6 = arith.constant 6 : index
    %71 = memref.load %arg2[%c6] : memref<18xf32, #tpu.memory_space<smem>>
    %72 = vector.broadcast %71 : f32 to vector<16x16xf32>
    %73 = arith.mulf %72, %70 : vector<16x16xf32>
    %74 = arith.addf %64, %73 : vector<16x16xf32>
    %c15 = arith.constant 15 : index
    %75 = memref.load %arg2[%c15] : memref<18xf32, #tpu.memory_space<smem>>
    %76 = vector.broadcast %75 : f32 to vector<16x16xf32>
    %77 = arith.mulf %76, %70 : vector<16x16xf32>
    %78 = arith.addf %68, %77 : vector<16x16xf32>
    %c0_32 = arith.constant 0 : index
    %c2_33 = arith.constant 2 : index
    %c1_34 = arith.constant 1 : index
    %79 = vector.load %arg13[%c0_32, %c2_33, %c1_34] : memref<1x18x18xf32, #tpu.memory_space<vmem>>, vector<1x16x16xf32>
    %80 = vector.shape_cast %79 : vector<1x16x16xf32> to vector<16x16xf32>
    %c7 = arith.constant 7 : index
    %81 = memref.load %arg2[%c7] : memref<18xf32, #tpu.memory_space<smem>>
    %82 = vector.broadcast %81 : f32 to vector<16x16xf32>
    %83 = arith.mulf %82, %80 : vector<16x16xf32>
    %84 = arith.addf %74, %83 : vector<16x16xf32>
    %c16 = arith.constant 16 : index
    %85 = memref.load %arg2[%c16] : memref<18xf32, #tpu.memory_space<smem>>
    %86 = vector.broadcast %85 : f32 to vector<16x16xf32>
    %87 = arith.mulf %86, %80 : vector<16x16xf32>
    %88 = arith.addf %78, %87 : vector<16x16xf32>
    %c0_35 = arith.constant 0 : index
    %c2_36 = arith.constant 2 : index
    %c2_37 = arith.constant 2 : index
    %89 = vector.load %arg13[%c0_35, %c2_36, %c2_37] : memref<1x18x18xf32, #tpu.memory_space<vmem>>, vector<1x16x16xf32>
    %90 = vector.shape_cast %89 : vector<1x16x16xf32> to vector<16x16xf32>
    %c8 = arith.constant 8 : index
    %91 = memref.load %arg2[%c8] : memref<18xf32, #tpu.memory_space<smem>>
    %92 = vector.broadcast %91 : f32 to vector<16x16xf32>
    %93 = arith.mulf %92, %90 : vector<16x16xf32>
    %94 = arith.addf %84, %93 : vector<16x16xf32>
    %c17 = arith.constant 17 : index
    %95 = memref.load %arg2[%c17] : memref<18xf32, #tpu.memory_space<smem>>
    %96 = vector.broadcast %95 : f32 to vector<16x16xf32>
    %97 = arith.mulf %96, %90 : vector<16x16xf32>
    %98 = arith.addf %88, %97 : vector<16x16xf32>
    %c0_38 = arith.constant 0 : index
    %99 = memref.load %arg3[%c0_38] : memref<2xf32, #tpu.memory_space<smem>>
    %100 = vector.broadcast %99 : f32 to vector<16x16xf32>
    %101 = arith.addf %94, %100 : vector<16x16xf32>
    %cst_39 = arith.constant 0.000000e+00 : f32
    %102 = vector.broadcast %cst_39 : f32 to vector<16x16xf32>
    %103 = arith.maximumf %101, %102 : vector<16x16xf32>
    %c1_40 = arith.constant 1 : index
    %104 = memref.load %arg3[%c1_40] : memref<2xf32, #tpu.memory_space<smem>>
    %105 = vector.broadcast %104 : f32 to vector<16x16xf32>
    %106 = arith.addf %98, %105 : vector<16x16xf32>
    %cst_41 = arith.constant 0.000000e+00 : f32
    %107 = vector.broadcast %cst_41 : f32 to vector<16x16xf32>
    %108 = arith.maximumf %106, %107 : vector<16x16xf32>
    %cst_42 = arith.constant 0.000000e+00 : f32
    %109 = vector.broadcast %cst_42 : f32 to vector<2x18x18xf32>
    %c0_43 = arith.constant 0 : index
    %c0_44 = arith.constant 0 : index
    %c0_45 = arith.constant 0 : index
    %110 = vector.load %arg14[%c0_43, %c0_44, %c0_45] : memref<2x18x18xf32, #tpu.memory_space<vmem>>, vector<2x18x18xf32>
    tpu.vector_store %arg14[%c0_43, %c0_44, %c0_45], %109 {strides = array<i32>} : memref<2x18x18xf32, #tpu.memory_space<vmem>>, vector<2x18x18xf32>,
    %c0_46 = arith.constant 0 : index
    %c1_47 = arith.constant 1 : index
    %c1_48 = arith.constant 1 : index
    %111 = vector.load %arg14[%c0_46, %c1_47, %c1_48] : memref<2x18x18xf32, #tpu.memory_space<vmem>>, vector<1x16x16xf32>
    %112 = vector.shape_cast %111 : vector<1x16x16xf32> to vector<16x16xf32>
    %113 = vector.shape_cast %103 : vector<16x16xf32> to vector<1x16x16xf32>
    tpu.vector_store %arg14[%c0_46, %c1_47, %c1_48], %113 {strides = array<i32>} : memref<2x18x18xf32, #tpu.memory_space<vmem>>, vector<1x16x16xf32>,
    %c1_49 = arith.constant 1 : index
    %c1_50 = arith.constant 1 : index
    %c1_51 = arith.constant 1 : index
    %114 = vector.load %arg14[%c1_49, %c1_50, %c1_51] : memref<2x18x18xf32, #tpu.memory_space<vmem>>, vector<1x16x16xf32>
    %115 = vector.shape_cast %114 : vector<1x16x16xf32> to vector<16x16xf32>
    %116 = vector.shape_cast %108 : vector<16x16xf32> to vector<1x16x16xf32>
    tpu.vector_store %arg14[%c1_49, %c1_50, %c1_51], %116 {strides = array<i32>} : memref<2x18x18xf32, #tpu.memory_space<vmem>>, vector<1x16x16xf32>,
    %cst_52 = arith.constant 0.000000e+00 : f32
    %117 = vector.broadcast %cst_52 : f32 to vector<16x16xf32>
    %cst_53 = arith.constant 0.000000e+00 : f32
    %118 = vector.broadcast %cst_53 : f32 to vector<16x16xf32>
    %c0_54 = arith.constant 0 : index
    %c0_55 = arith.constant 0 : index
    %c0_56 = arith.constant 0 : index
    %119 = vector.load %arg14[%c0_54, %c0_55, %c0_56] : memref<2x18x18xf32, #tpu.memory_space<vmem>>, vector<1x16x16xf32>
    %120 = vector.shape_cast %119 : vector<1x16x16xf32> to vector<16x16xf32>
    %c0_57 = arith.constant 0 : index
    %121 = memref.load %arg4[%c0_57] : memref<36xf32, #tpu.memory_space<smem>>
    %122 = vector.broadcast %121 : f32 to vector<16x16xf32>
    %123 = arith.mulf %122, %120 : vector<16x16xf32>
    %124 = arith.addf %117, %123 : vector<16x16xf32>
    %c18 = arith.constant 18 : index
    %125 = memref.load %arg4[%c18] : memref<36xf32, #tpu.memory_space<smem>>
    %126 = vector.broadcast %125 : f32 to vector<16x16xf32>
    %127 = arith.mulf %126, %120 : vector<16x16xf32>
    %128 = arith.addf %118, %127 : vector<16x16xf32>
    %c0_58 = arith.constant 0 : index
    %c0_59 = arith.constant 0 : index
    %c1_60 = arith.constant 1 : index
    %129 = vector.load %arg14[%c0_58, %c0_59, %c1_60] : memref<2x18x18xf32, #tpu.memory_space<vmem>>, vector<1x16x16xf32>
    %130 = vector.shape_cast %129 : vector<1x16x16xf32> to vector<16x16xf32>
    %c1_61 = arith.constant 1 : index
    %131 = memref.load %arg4[%c1_61] : memref<36xf32, #tpu.memory_space<smem>>
    %132 = vector.broadcast %131 : f32 to vector<16x16xf32>
    %133 = arith.mulf %132, %130 : vector<16x16xf32>
    %134 = arith.addf %124, %133 : vector<16x16xf32>
    %c19 = arith.constant 19 : index
    %135 = memref.load %arg4[%c19] : memref<36xf32, #tpu.memory_space<smem>>
    %136 = vector.broadcast %135 : f32 to vector<16x16xf32>
    %137 = arith.mulf %136, %130 : vector<16x16xf32>
    %138 = arith.addf %128, %137 : vector<16x16xf32>
    %c0_62 = arith.constant 0 : index
    %c0_63 = arith.constant 0 : index
    %c2_64 = arith.constant 2 : index
    %139 = vector.load %arg14[%c0_62, %c0_63, %c2_64] : memref<2x18x18xf32, #tpu.memory_space<vmem>>, vector<1x16x16xf32>
    %140 = vector.shape_cast %139 : vector<1x16x16xf32> to vector<16x16xf32>
    %c2_65 = arith.constant 2 : index
    %141 = memref.load %arg4[%c2_65] : memref<36xf32, #tpu.memory_space<smem>>
    %142 = vector.broadcast %141 : f32 to vector<16x16xf32>
    %143 = arith.mulf %142, %140 : vector<16x16xf32>
    %144 = arith.addf %134, %143 : vector<16x16xf32>
    %c20 = arith.constant 20 : index
    %145 = memref.load %arg4[%c20] : memref<36xf32, #tpu.memory_space<smem>>
    %146 = vector.broadcast %145 : f32 to vector<16x16xf32>
    %147 = arith.mulf %146, %140 : vector<16x16xf32>
    %148 = arith.addf %138, %147 : vector<16x16xf32>
    %c0_66 = arith.constant 0 : index
    %c1_67 = arith.constant 1 : index
    %c0_68 = arith.constant 0 : index
    %149 = vector.load %arg14[%c0_66, %c1_67, %c0_68] : memref<2x18x18xf32, #tpu.memory_space<vmem>>, vector<1x16x16xf32>
    %150 = vector.shape_cast %149 : vector<1x16x16xf32> to vector<16x16xf32>
    %c3_69 = arith.constant 3 : index
    %151 = memref.load %arg4[%c3_69] : memref<36xf32, #tpu.memory_space<smem>>
    %152 = vector.broadcast %151 : f32 to vector<16x16xf32>
    %153 = arith.mulf %152, %150 : vector<16x16xf32>
    %154 = arith.addf %144, %153 : vector<16x16xf32>
    %c21 = arith.constant 21 : index
    %155 = memref.load %arg4[%c21] : memref<36xf32, #tpu.memory_space<smem>>
    %156 = vector.broadcast %155 : f32 to vector<16x16xf32>
    %157 = arith.mulf %156, %150 : vector<16x16xf32>
    %158 = arith.addf %148, %157 : vector<16x16xf32>
    %c0_70 = arith.constant 0 : index
    %c1_71 = arith.constant 1 : index
    %c1_72 = arith.constant 1 : index
    %159 = vector.load %arg14[%c0_70, %c1_71, %c1_72] : memref<2x18x18xf32, #tpu.memory_space<vmem>>, vector<1x16x16xf32>
    %160 = vector.shape_cast %159 : vector<1x16x16xf32> to vector<16x16xf32>
    %c4_73 = arith.constant 4 : index
    %161 = memref.load %arg4[%c4_73] : memref<36xf32, #tpu.memory_space<smem>>
    %162 = vector.broadcast %161 : f32 to vector<16x16xf32>
    %163 = arith.mulf %162, %160 : vector<16x16xf32>
    %164 = arith.addf %154, %163 : vector<16x16xf32>
    %c22 = arith.constant 22 : index
    %165 = memref.load %arg4[%c22] : memref<36xf32, #tpu.memory_space<smem>>
    %166 = vector.broadcast %165 : f32 to vector<16x16xf32>
    %167 = arith.mulf %166, %160 : vector<16x16xf32>
    %168 = arith.addf %158, %167 : vector<16x16xf32>
    %c0_74 = arith.constant 0 : index
    %c1_75 = arith.constant 1 : index
    %c2_76 = arith.constant 2 : index
    %169 = vector.load %arg14[%c0_74, %c1_75, %c2_76] : memref<2x18x18xf32, #tpu.memory_space<vmem>>, vector<1x16x16xf32>
    %170 = vector.shape_cast %169 : vector<1x16x16xf32> to vector<16x16xf32>
    %c5_77 = arith.constant 5 : index
    %171 = memref.load %arg4[%c5_77] : memref<36xf32, #tpu.memory_space<smem>>
    %172 = vector.broadcast %171 : f32 to vector<16x16xf32>
    %173 = arith.mulf %172, %170 : vector<16x16xf32>
    %174 = arith.addf %164, %173 : vector<16x16xf32>
    %c23 = arith.constant 23 : index
    %175 = memref.load %arg4[%c23] : memref<36xf32, #tpu.memory_space<smem>>
    %176 = vector.broadcast %175 : f32 to vector<16x16xf32>
    %177 = arith.mulf %176, %170 : vector<16x16xf32>
    %178 = arith.addf %168, %177 : vector<16x16xf32>
    %c0_78 = arith.constant 0 : index
    %c2_79 = arith.constant 2 : index
    %c0_80 = arith.constant 0 : index
    %179 = vector.load %arg14[%c0_78, %c2_79, %c0_80] : memref<2x18x18xf32, #tpu.memory_space<vmem>>, vector<1x16x16xf32>
    %180 = vector.shape_cast %179 : vector<1x16x16xf32> to vector<16x16xf32>
    %c6_81 = arith.constant 6 : index
    %181 = memref.load %arg4[%c6_81] : memref<36xf32, #tpu.memory_space<smem>>
    %182 = vector.broadcast %181 : f32 to vector<16x16xf32>
    %183 = arith.mulf %182, %180 : vector<16x16xf32>
    %184 = arith.addf %174, %183 : vector<16x16xf32>
    %c24 = arith.constant 24 : index
    %185 = memref.load %arg4[%c24] : memref<36xf32, #tpu.memory_space<smem>>
    %186 = vector.broadcast %185 : f32 to vector<16x16xf32>
    %187 = arith.mulf %186, %180 : vector<16x16xf32>
    %188 = arith.addf %178, %187 : vector<16x16xf32>
    %c0_82 = arith.constant 0 : index
    %c2_83 = arith.constant 2 : index
    %c1_84 = arith.constant 1 : index
    %189 = vector.load %arg14[%c0_82, %c2_83, %c1_84] : memref<2x18x18xf32, #tpu.memory_space<vmem>>, vector<1x16x16xf32>
    %190 = vector.shape_cast %189 : vector<1x16x16xf32> to vector<16x16xf32>
    %c7_85 = arith.constant 7 : index
    %191 = memref.load %arg4[%c7_85] : memref<36xf32, #tpu.memory_space<smem>>
    %192 = vector.broadcast %191 : f32 to vector<16x16xf32>
    %193 = arith.mulf %192, %190 : vector<16x16xf32>
    %194 = arith.addf %184, %193 : vector<16x16xf32>
    %c25 = arith.constant 25 : index
    %195 = memref.load %arg4[%c25] : memref<36xf32, #tpu.memory_space<smem>>
    %196 = vector.broadcast %195 : f32 to vector<16x16xf32>
    %197 = arith.mulf %196, %190 : vector<16x16xf32>
    %198 = arith.addf %188, %197 : vector<16x16xf32>
    %c0_86 = arith.constant 0 : index
    %c2_87 = arith.constant 2 : index
    %c2_88 = arith.constant 2 : index
    %199 = vector.load %arg14[%c0_86, %c2_87, %c2_88] : memref<2x18x18xf32, #tpu.memory_space<vmem>>, vector<1x16x16xf32>
    %200 = vector.shape_cast %199 : vector<1x16x16xf32> to vector<16x16xf32>
    %c8_89 = arith.constant 8 : index
    %201 = memref.load %arg4[%c8_89] : memref<36xf32, #tpu.memory_space<smem>>
    %202 = vector.broadcast %201 : f32 to vector<16x16xf32>
    %203 = arith.mulf %202, %200 : vector<16x16xf32>
    %204 = arith.addf %194, %203 : vector<16x16xf32>
    %c26 = arith.constant 26 : index
    %205 = memref.load %arg4[%c26] : memref<36xf32, #tpu.memory_space<smem>>
    %206 = vector.broadcast %205 : f32 to vector<16x16xf32>
    %207 = arith.mulf %206, %200 : vector<16x16xf32>
    %208 = arith.addf %198, %207 : vector<16x16xf32>
    %c1_90 = arith.constant 1 : index
    %c0_91 = arith.constant 0 : index
    %c0_92 = arith.constant 0 : index
    %209 = vector.load %arg14[%c1_90, %c0_91, %c0_92] : memref<2x18x18xf32, #tpu.memory_space<vmem>>, vector<1x16x16xf32>
    %210 = vector.shape_cast %209 : vector<1x16x16xf32> to vector<16x16xf32>
    %c9_93 = arith.constant 9 : index
    %211 = memref.load %arg4[%c9_93] : memref<36xf32, #tpu.memory_space<smem>>
    %212 = vector.broadcast %211 : f32 to vector<16x16xf32>
    %213 = arith.mulf %212, %210 : vector<16x16xf32>
    %214 = arith.addf %204, %213 : vector<16x16xf32>
    %c27 = arith.constant 27 : index
    %215 = memref.load %arg4[%c27] : memref<36xf32, #tpu.memory_space<smem>>
    %216 = vector.broadcast %215 : f32 to vector<16x16xf32>
    %217 = arith.mulf %216, %210 : vector<16x16xf32>
    %218 = arith.addf %208, %217 : vector<16x16xf32>
    %c1_94 = arith.constant 1 : index
    %c0_95 = arith.constant 0 : index
    %c1_96 = arith.constant 1 : index
    %219 = vector.load %arg14[%c1_94, %c0_95, %c1_96] : memref<2x18x18xf32, #tpu.memory_space<vmem>>, vector<1x16x16xf32>
    %220 = vector.shape_cast %219 : vector<1x16x16xf32> to vector<16x16xf32>
    %c10_97 = arith.constant 10 : index
    %221 = memref.load %arg4[%c10_97] : memref<36xf32, #tpu.memory_space<smem>>
    %222 = vector.broadcast %221 : f32 to vector<16x16xf32>
    %223 = arith.mulf %222, %220 : vector<16x16xf32>
    %224 = arith.addf %214, %223 : vector<16x16xf32>
    %c28 = arith.constant 28 : index
    %225 = memref.load %arg4[%c28] : memref<36xf32, #tpu.memory_space<smem>>
    %226 = vector.broadcast %225 : f32 to vector<16x16xf32>
    %227 = arith.mulf %226, %220 : vector<16x16xf32>
    %228 = arith.addf %218, %227 : vector<16x16xf32>
    %c1_98 = arith.constant 1 : index
    %c0_99 = arith.constant 0 : index
    %c2_100 = arith.constant 2 : index
    %229 = vector.load %arg14[%c1_98, %c0_99, %c2_100] : memref<2x18x18xf32, #tpu.memory_space<vmem>>, vector<1x16x16xf32>
    %230 = vector.shape_cast %229 : vector<1x16x16xf32> to vector<16x16xf32>
    %c11_101 = arith.constant 11 : index
    %231 = memref.load %arg4[%c11_101] : memref<36xf32, #tpu.memory_space<smem>>
    %232 = vector.broadcast %231 : f32 to vector<16x16xf32>
    %233 = arith.mulf %232, %230 : vector<16x16xf32>
    %234 = arith.addf %224, %233 : vector<16x16xf32>
    %c29 = arith.constant 29 : index
    %235 = memref.load %arg4[%c29] : memref<36xf32, #tpu.memory_space<smem>>
    %236 = vector.broadcast %235 : f32 to vector<16x16xf32>
    %237 = arith.mulf %236, %230 : vector<16x16xf32>
    %238 = arith.addf %228, %237 : vector<16x16xf32>
    %c1_102 = arith.constant 1 : index
    %c1_103 = arith.constant 1 : index
    %c0_104 = arith.constant 0 : index
    %239 = vector.load %arg14[%c1_102, %c1_103, %c0_104] : memref<2x18x18xf32, #tpu.memory_space<vmem>>, vector<1x16x16xf32>
    %240 = vector.shape_cast %239 : vector<1x16x16xf32> to vector<16x16xf32>
    %c12_105 = arith.constant 12 : index
    %241 = memref.load %arg4[%c12_105] : memref<36xf32, #tpu.memory_space<smem>>
    %242 = vector.broadcast %241 : f32 to vector<16x16xf32>
    %243 = arith.mulf %242, %240 : vector<16x16xf32>
    %244 = arith.addf %234, %243 : vector<16x16xf32>
    %c30 = arith.constant 30 : index
    %245 = memref.load %arg4[%c30] : memref<36xf32, #tpu.memory_space<smem>>
    %246 = vector.broadcast %245 : f32 to vector<16x16xf32>
    %247 = arith.mulf %246, %240 : vector<16x16xf32>
    %248 = arith.addf %238, %247 : vector<16x16xf32>
    %c1_106 = arith.constant 1 : index
    %c1_107 = arith.constant 1 : index
    %c1_108 = arith.constant 1 : index
    %249 = vector.load %arg14[%c1_106, %c1_107, %c1_108] : memref<2x18x18xf32, #tpu.memory_space<vmem>>, vector<1x16x16xf32>
    %250 = vector.shape_cast %249 : vector<1x16x16xf32> to vector<16x16xf32>
    %c13_109 = arith.constant 13 : index
    %251 = memref.load %arg4[%c13_109] : memref<36xf32, #tpu.memory_space<smem>>
    %252 = vector.broadcast %251 : f32 to vector<16x16xf32>
    %253 = arith.mulf %252, %250 : vector<16x16xf32>
    %254 = arith.addf %244, %253 : vector<16x16xf32>
    %c31 = arith.constant 31 : index
    %255 = memref.load %arg4[%c31] : memref<36xf32, #tpu.memory_space<smem>>
    %256 = vector.broadcast %255 : f32 to vector<16x16xf32>
    %257 = arith.mulf %256, %250 : vector<16x16xf32>
    %258 = arith.addf %248, %257 : vector<16x16xf32>
    %c1_110 = arith.constant 1 : index
    %c1_111 = arith.constant 1 : index
    %c2_112 = arith.constant 2 : index
    %259 = vector.load %arg14[%c1_110, %c1_111, %c2_112] : memref<2x18x18xf32, #tpu.memory_space<vmem>>, vector<1x16x16xf32>
    %260 = vector.shape_cast %259 : vector<1x16x16xf32> to vector<16x16xf32>
    %c14_113 = arith.constant 14 : index
    %261 = memref.load %arg4[%c14_113] : memref<36xf32, #tpu.memory_space<smem>>
    %262 = vector.broadcast %261 : f32 to vector<16x16xf32>
    %263 = arith.mulf %262, %260 : vector<16x16xf32>
    %264 = arith.addf %254, %263 : vector<16x16xf32>
    %c32 = arith.constant 32 : index
    %265 = memref.load %arg4[%c32] : memref<36xf32, #tpu.memory_space<smem>>
    %266 = vector.broadcast %265 : f32 to vector<16x16xf32>
    %267 = arith.mulf %266, %260 : vector<16x16xf32>
    %268 = arith.addf %258, %267 : vector<16x16xf32>
    %c1_114 = arith.constant 1 : index
    %c2_115 = arith.constant 2 : index
    %c0_116 = arith.constant 0 : index
    %269 = vector.load %arg14[%c1_114, %c2_115, %c0_116] : memref<2x18x18xf32, #tpu.memory_space<vmem>>, vector<1x16x16xf32>
    %270 = vector.shape_cast %269 : vector<1x16x16xf32> to vector<16x16xf32>
    %c15_117 = arith.constant 15 : index
    %271 = memref.load %arg4[%c15_117] : memref<36xf32, #tpu.memory_space<smem>>
    %272 = vector.broadcast %271 : f32 to vector<16x16xf32>
    %273 = arith.mulf %272, %270 : vector<16x16xf32>
    %274 = arith.addf %264, %273 : vector<16x16xf32>
    %c33 = arith.constant 33 : index
    %275 = memref.load %arg4[%c33] : memref<36xf32, #tpu.memory_space<smem>>
    %276 = vector.broadcast %275 : f32 to vector<16x16xf32>
    %277 = arith.mulf %276, %270 : vector<16x16xf32>
    %278 = arith.addf %268, %277 : vector<16x16xf32>
    %c1_118 = arith.constant 1 : index
    %c2_119 = arith.constant 2 : index
    %c1_120 = arith.constant 1 : index
    %279 = vector.load %arg14[%c1_118, %c2_119, %c1_120] : memref<2x18x18xf32, #tpu.memory_space<vmem>>, vector<1x16x16xf32>
    %280 = vector.shape_cast %279 : vector<1x16x16xf32> to vector<16x16xf32>
    %c16_121 = arith.constant 16 : index
    %281 = memref.load %arg4[%c16_121] : memref<36xf32, #tpu.memory_space<smem>>
    %282 = vector.broadcast %281 : f32 to vector<16x16xf32>
    %283 = arith.mulf %282, %280 : vector<16x16xf32>
    %284 = arith.addf %274, %283 : vector<16x16xf32>
    %c34 = arith.constant 34 : index
    %285 = memref.load %arg4[%c34] : memref<36xf32, #tpu.memory_space<smem>>
    %286 = vector.broadcast %285 : f32 to vector<16x16xf32>
    %287 = arith.mulf %286, %280 : vector<16x16xf32>
    %288 = arith.addf %278, %287 : vector<16x16xf32>
    %c1_122 = arith.constant 1 : index
    %c2_123 = arith.constant 2 : index
    %c2_124 = arith.constant 2 : index
    %289 = vector.load %arg14[%c1_122, %c2_123, %c2_124] : memref<2x18x18xf32, #tpu.memory_space<vmem>>, vector<1x16x16xf32>
    %290 = vector.shape_cast %289 : vector<1x16x16xf32> to vector<16x16xf32>
    %c17_125 = arith.constant 17 : index
    %291 = memref.load %arg4[%c17_125] : memref<36xf32, #tpu.memory_space<smem>>
    %292 = vector.broadcast %291 : f32 to vector<16x16xf32>
    %293 = arith.mulf %292, %290 : vector<16x16xf32>
    %294 = arith.addf %284, %293 : vector<16x16xf32>
    %c35 = arith.constant 35 : index
    %295 = memref.load %arg4[%c35] : memref<36xf32, #tpu.memory_space<smem>>
    %296 = vector.broadcast %295 : f32 to vector<16x16xf32>
    %297 = arith.mulf %296, %290 : vector<16x16xf32>
    %298 = arith.addf %288, %297 : vector<16x16xf32>
    %c0_126 = arith.constant 0 : index
    %299 = memref.load %arg5[%c0_126] : memref<2xf32, #tpu.memory_space<smem>>
    %300 = vector.broadcast %299 : f32 to vector<16x16xf32>
    %301 = arith.addf %294, %300 : vector<16x16xf32>
    %cst_127 = arith.constant 0.000000e+00 : f32
    %302 = vector.broadcast %cst_127 : f32 to vector<16x16xf32>
    %303 = arith.maximumf %301, %302 : vector<16x16xf32>
    %c1_128 = arith.constant 1 : index
    %304 = memref.load %arg5[%c1_128] : memref<2xf32, #tpu.memory_space<smem>>
    %305 = vector.broadcast %304 : f32 to vector<16x16xf32>
    %306 = arith.addf %298, %305 : vector<16x16xf32>
    %cst_129 = arith.constant 0.000000e+00 : f32
    %307 = vector.broadcast %cst_129 : f32 to vector<16x16xf32>
    %308 = arith.maximumf %306, %307 : vector<16x16xf32>
    %309 = tpu.iota {dimensions = array<i32: 0>} : vector<8x16xi32>
    %310 = tpu.iota {dimensions = array<i32: 1>} : vector<8x16xi32>
    %c2_i32 = arith.constant 2 : i32
    %311 = vector.broadcast %c2_i32 : i32 to vector<8x16xi32>
    %312 = arith.muli %311, %309 : vector<8x16xi32>
    %c0_i32 = arith.constant 0 : i32
    %313 = vector.broadcast %c0_i32 : i32 to vector<8x16xi32>
    %314 = arith.addi %312, %313 : vector<8x16xi32>
    %315 = arith.cmpi eq, %310, %314 : vector<8x16xi32>
    %316 = arith.extui %315 : vector<8x16xi1> to vector<8x16xi32>
    %317 = arith.sitofp %316 : vector<8x16xi32> to vector<8x16xf32>
    %318 = tpu.iota {dimensions = array<i32: 0>} : vector<8x16xi32>
    %319 = tpu.iota {dimensions = array<i32: 1>} : vector<8x16xi32>
    %c2_i32_130 = arith.constant 2 : i32
    %320 = vector.broadcast %c2_i32_130 : i32 to vector<8x16xi32>
    %321 = arith.muli %320, %318 : vector<8x16xi32>
    %c1_i32 = arith.constant 1 : i32
    %322 = vector.broadcast %c1_i32 : i32 to vector<8x16xi32>
    %323 = arith.addi %321, %322 : vector<8x16xi32>
    %324 = arith.cmpi eq, %319, %323 : vector<8x16xi32>
    %325 = arith.extui %324 : vector<8x16xi1> to vector<8x16xi32>
    %326 = arith.sitofp %325 : vector<8x16xi32> to vector<8x16xf32>
    %327 = tpu.iota {dimensions = array<i32: 0>} : vector<16x8xi32>
    %328 = tpu.iota {dimensions = array<i32: 1>} : vector<16x8xi32>
    %c2_i32_131 = arith.constant 2 : i32
    %329 = vector.broadcast %c2_i32_131 : i32 to vector<16x8xi32>
    %330 = arith.muli %329, %328 : vector<16x8xi32>
    %c0_i32_132 = arith.constant 0 : i32
    %331 = vector.broadcast %c0_i32_132 : i32 to vector<16x8xi32>
    %332 = arith.addi %330, %331 : vector<16x8xi32>
    %333 = arith.cmpi eq, %327, %332 : vector<16x8xi32>
    %334 = arith.extui %333 : vector<16x8xi1> to vector<16x8xi32>
    %335 = arith.sitofp %334 : vector<16x8xi32> to vector<16x8xf32>
    %336 = tpu.iota {dimensions = array<i32: 0>} : vector<16x8xi32>
    %337 = tpu.iota {dimensions = array<i32: 1>} : vector<16x8xi32>
    %c2_i32_133 = arith.constant 2 : i32
    %338 = vector.broadcast %c2_i32_133 : i32 to vector<16x8xi32>
    %339 = arith.muli %338, %337 : vector<16x8xi32>
    %c1_i32_134 = arith.constant 1 : i32
    %340 = vector.broadcast %c1_i32_134 : i32 to vector<16x8xi32>
    %341 = arith.addi %339, %340 : vector<16x8xi32>
    %342 = arith.cmpi eq, %336, %341 : vector<16x8xi32>
    %343 = arith.extui %342 : vector<16x8xi1> to vector<16x8xi32>
    %344 = arith.sitofp %343 : vector<16x8xi32> to vector<16x8xf32>
    %cst_135 = arith.constant dense<0.000000e+00> : vector<8x16xf32>
    %345 = tpu.matmul %317, %303, %cst_135 {dimension_numbers = #tpu.dot_dimension_numbers<[1], [0], [0], [1], [0, 0, 1, 1], [], []>} : vector<8x16xf32>, vector<16x16xf32>, vector<8x16xf32> -> vector<8x16xf32>
    %cst_136 = arith.constant dense<0.000000e+00> : vector<8x16xf32>
    %346 = tpu.matmul %326, %303, %cst_136 {dimension_numbers = #tpu.dot_dimension_numbers<[1], [0], [0], [1], [0, 0, 1, 1], [], []>} : vector<8x16xf32>, vector<16x16xf32>, vector<8x16xf32> -> vector<8x16xf32>
    %347 = arith.maximumf %345, %346 : vector<8x16xf32>
    %cst_137 = arith.constant dense<0.000000e+00> : vector<8x8xf32>
    %348 = tpu.matmul %347, %335, %cst_137 {dimension_numbers = #tpu.dot_dimension_numbers<[1], [0], [0], [1], [0, 0, 1, 1], [], []>} : vector<8x16xf32>, vector<16x8xf32>, vector<8x8xf32> -> vector<8x8xf32>
    %cst_138 = arith.constant dense<0.000000e+00> : vector<8x8xf32>
    %349 = tpu.matmul %347, %344, %cst_138 {dimension_numbers = #tpu.dot_dimension_numbers<[1], [0], [0], [1], [0, 0, 1, 1], [], []>} : vector<8x16xf32>, vector<16x8xf32>, vector<8x8xf32> -> vector<8x8xf32>
    %350 = arith.maximumf %348, %349 : vector<8x8xf32>
    %cst_139 = arith.constant dense<0.000000e+00> : vector<8x16xf32>
    %351 = tpu.matmul %317, %308, %cst_139 {dimension_numbers = #tpu.dot_dimension_numbers<[1], [0], [0], [1], [0, 0, 1, 1], [], []>} : vector<8x16xf32>, vector<16x16xf32>, vector<8x16xf32> -> vector<8x16xf32>
    %cst_140 = arith.constant dense<0.000000e+00> : vector<8x16xf32>
    %352 = tpu.matmul %326, %308, %cst_140 {dimension_numbers = #tpu.dot_dimension_numbers<[1], [0], [0], [1], [0, 0, 1, 1], [], []>} : vector<8x16xf32>, vector<16x16xf32>, vector<8x16xf32> -> vector<8x16xf32>
    %353 = arith.maximumf %351, %352 : vector<8x16xf32>
    %cst_141 = arith.constant dense<0.000000e+00> : vector<8x8xf32>
    %354 = tpu.matmul %353, %335, %cst_141 {dimension_numbers = #tpu.dot_dimension_numbers<[1], [0], [0], [1], [0, 0, 1, 1], [], []>} : vector<8x16xf32>, vector<16x8xf32>, vector<8x8xf32> -> vector<8x8xf32>
    %cst_142 = arith.constant dense<0.000000e+00> : vector<8x8xf32>
    %355 = tpu.matmul %353, %344, %cst_142 {dimension_numbers = #tpu.dot_dimension_numbers<[1], [0], [0], [1], [0, 0, 1, 1], [], []>} : vector<8x16xf32>, vector<16x8xf32>, vector<8x8xf32> -> vector<8x8xf32>
    %356 = arith.maximumf %354, %355 : vector<8x8xf32>
    %cst_143 = arith.constant 0.000000e+00 : f32
    %357 = vector.broadcast %cst_143 : f32 to vector<2x10x10xf32>
    %c0_144 = arith.constant 0 : index
    %c0_145 = arith.constant 0 : index
    %c0_146 = arith.constant 0 : index
    %358 = vector.load %arg15[%c0_144, %c0_145, %c0_146] : memref<2x10x10xf32, #tpu.memory_space<vmem>>, vector<2x10x10xf32>
    tpu.vector_store %arg15[%c0_144, %c0_145, %c0_146], %357 {strides = array<i32>} : memref<2x10x10xf32, #tpu.memory_space<vmem>>, vector<2x10x10xf32>,
    %c0_147 = arith.constant 0 : index
    %c1_148 = arith.constant 1 : index
    %c1_149 = arith.constant 1 : index
    %359 = vector.load %arg15[%c0_147, %c1_148, %c1_149] : memref<2x10x10xf32, #tpu.memory_space<vmem>>, vector<1x8x8xf32>
    %360 = vector.shape_cast %359 : vector<1x8x8xf32> to vector<8x8xf32>
    %361 = vector.shape_cast %350 : vector<8x8xf32> to vector<1x8x8xf32>
    tpu.vector_store %arg15[%c0_147, %c1_148, %c1_149], %361 {strides = array<i32>} : memref<2x10x10xf32, #tpu.memory_space<vmem>>, vector<1x8x8xf32>,
    %c1_150 = arith.constant 1 : index
    %c1_151 = arith.constant 1 : index
    %c1_152 = arith.constant 1 : index
    %362 = vector.load %arg15[%c1_150, %c1_151, %c1_152] : memref<2x10x10xf32, #tpu.memory_space<vmem>>, vector<1x8x8xf32>
    %363 = vector.shape_cast %362 : vector<1x8x8xf32> to vector<8x8xf32>
    %364 = vector.shape_cast %356 : vector<8x8xf32> to vector<1x8x8xf32>
    tpu.vector_store %arg15[%c1_150, %c1_151, %c1_152], %364 {strides = array<i32>} : memref<2x10x10xf32, #tpu.memory_space<vmem>>, vector<1x8x8xf32>,
    %cst_153 = arith.constant 0.000000e+00 : f32
    %365 = vector.broadcast %cst_153 : f32 to vector<8x8xf32>
    %cst_154 = arith.constant 0.000000e+00 : f32
    %366 = vector.broadcast %cst_154 : f32 to vector<8x8xf32>
    %cst_155 = arith.constant 0.000000e+00 : f32
    %367 = vector.broadcast %cst_155 : f32 to vector<8x8xf32>
    %cst_156 = arith.constant 0.000000e+00 : f32
    %368 = vector.broadcast %cst_156 : f32 to vector<8x8xf32>
    %c0_157 = arith.constant 0 : index
    %c0_158 = arith.constant 0 : index
    %c0_159 = arith.constant 0 : index
    %369 = vector.load %arg15[%c0_157, %c0_158, %c0_159] : memref<2x10x10xf32, #tpu.memory_space<vmem>>, vector<1x8x8xf32>
    %370 = vector.shape_cast %369 : vector<1x8x8xf32> to vector<8x8xf32>
    %c0_160 = arith.constant 0 : index
    %371 = memref.load %arg6[%c0_160] : memref<72xf32, #tpu.memory_space<smem>>
    %372 = vector.broadcast %371 : f32 to vector<8x8xf32>
    %373 = arith.mulf %372, %370 : vector<8x8xf32>
    %374 = arith.addf %365, %373 : vector<8x8xf32>
    %c18_161 = arith.constant 18 : index
    %375 = memref.load %arg6[%c18_161] : memref<72xf32, #tpu.memory_space<smem>>
    %376 = vector.broadcast %375 : f32 to vector<8x8xf32>
    %377 = arith.mulf %376, %370 : vector<8x8xf32>
    %378 = arith.addf %366, %377 : vector<8x8xf32>
    %c36 = arith.constant 36 : index
    %379 = memref.load %arg6[%c36] : memref<72xf32, #tpu.memory_space<smem>>
    %380 = vector.broadcast %379 : f32 to vector<8x8xf32>
    %381 = arith.mulf %380, %370 : vector<8x8xf32>
    %382 = arith.addf %367, %381 : vector<8x8xf32>
    %c54 = arith.constant 54 : index
    %383 = memref.load %arg6[%c54] : memref<72xf32, #tpu.memory_space<smem>>
    %384 = vector.broadcast %383 : f32 to vector<8x8xf32>
    %385 = arith.mulf %384, %370 : vector<8x8xf32>
    %386 = arith.addf %368, %385 : vector<8x8xf32>
    %c0_162 = arith.constant 0 : index
    %c0_163 = arith.constant 0 : index
    %c1_164 = arith.constant 1 : index
    %387 = vector.load %arg15[%c0_162, %c0_163, %c1_164] : memref<2x10x10xf32, #tpu.memory_space<vmem>>, vector<1x8x8xf32>
    %388 = vector.shape_cast %387 : vector<1x8x8xf32> to vector<8x8xf32>
    %c1_165 = arith.constant 1 : index
    %389 = memref.load %arg6[%c1_165] : memref<72xf32, #tpu.memory_space<smem>>
    %390 = vector.broadcast %389 : f32 to vector<8x8xf32>
    %391 = arith.mulf %390, %388 : vector<8x8xf32>
    %392 = arith.addf %374, %391 : vector<8x8xf32>
    %c19_166 = arith.constant 19 : index
    %393 = memref.load %arg6[%c19_166] : memref<72xf32, #tpu.memory_space<smem>>
    %394 = vector.broadcast %393 : f32 to vector<8x8xf32>
    %395 = arith.mulf %394, %388 : vector<8x8xf32>
    %396 = arith.addf %378, %395 : vector<8x8xf32>
    %c37 = arith.constant 37 : index
    %397 = memref.load %arg6[%c37] : memref<72xf32, #tpu.memory_space<smem>>
    %398 = vector.broadcast %397 : f32 to vector<8x8xf32>
    %399 = arith.mulf %398, %388 : vector<8x8xf32>
    %400 = arith.addf %382, %399 : vector<8x8xf32>
    %c55 = arith.constant 55 : index
    %401 = memref.load %arg6[%c55] : memref<72xf32, #tpu.memory_space<smem>>
    %402 = vector.broadcast %401 : f32 to vector<8x8xf32>
    %403 = arith.mulf %402, %388 : vector<8x8xf32>
    %404 = arith.addf %386, %403 : vector<8x8xf32>
    %c0_167 = arith.constant 0 : index
    %c0_168 = arith.constant 0 : index
    %c2_169 = arith.constant 2 : index
    %405 = vector.load %arg15[%c0_167, %c0_168, %c2_169] : memref<2x10x10xf32, #tpu.memory_space<vmem>>, vector<1x8x8xf32>
    %406 = vector.shape_cast %405 : vector<1x8x8xf32> to vector<8x8xf32>
    %c2_170 = arith.constant 2 : index
    %407 = memref.load %arg6[%c2_170] : memref<72xf32, #tpu.memory_space<smem>>
    %408 = vector.broadcast %407 : f32 to vector<8x8xf32>
    %409 = arith.mulf %408, %406 : vector<8x8xf32>
    %410 = arith.addf %392, %409 : vector<8x8xf32>
    %c20_171 = arith.constant 20 : index
    %411 = memref.load %arg6[%c20_171] : memref<72xf32, #tpu.memory_space<smem>>
    %412 = vector.broadcast %411 : f32 to vector<8x8xf32>
    %413 = arith.mulf %412, %406 : vector<8x8xf32>
    %414 = arith.addf %396, %413 : vector<8x8xf32>
    %c38 = arith.constant 38 : index
    %415 = memref.load %arg6[%c38] : memref<72xf32, #tpu.memory_space<smem>>
    %416 = vector.broadcast %415 : f32 to vector<8x8xf32>
    %417 = arith.mulf %416, %406 : vector<8x8xf32>
    %418 = arith.addf %400, %417 : vector<8x8xf32>
    %c56 = arith.constant 56 : index
    %419 = memref.load %arg6[%c56] : memref<72xf32, #tpu.memory_space<smem>>
    %420 = vector.broadcast %419 : f32 to vector<8x8xf32>
    %421 = arith.mulf %420, %406 : vector<8x8xf32>
    %422 = arith.addf %404, %421 : vector<8x8xf32>
    %c0_172 = arith.constant 0 : index
    %c1_173 = arith.constant 1 : index
    %c0_174 = arith.constant 0 : index
    %423 = vector.load %arg15[%c0_172, %c1_173, %c0_174] : memref<2x10x10xf32, #tpu.memory_space<vmem>>, vector<1x8x8xf32>
    %424 = vector.shape_cast %423 : vector<1x8x8xf32> to vector<8x8xf32>
    %c3_175 = arith.constant 3 : index
    %425 = memref.load %arg6[%c3_175] : memref<72xf32, #tpu.memory_space<smem>>
    %426 = vector.broadcast %425 : f32 to vector<8x8xf32>
    %427 = arith.mulf %426, %424 : vector<8x8xf32>
    %428 = arith.addf %410, %427 : vector<8x8xf32>
    %c21_176 = arith.constant 21 : index
    %429 = memref.load %arg6[%c21_176] : memref<72xf32, #tpu.memory_space<smem>>
    %430 = vector.broadcast %429 : f32 to vector<8x8xf32>
    %431 = arith.mulf %430, %424 : vector<8x8xf32>
    %432 = arith.addf %414, %431 : vector<8x8xf32>
    %c39 = arith.constant 39 : index
    %433 = memref.load %arg6[%c39] : memref<72xf32, #tpu.memory_space<smem>>
    %434 = vector.broadcast %433 : f32 to vector<8x8xf32>
    %435 = arith.mulf %434, %424 : vector<8x8xf32>
    %436 = arith.addf %418, %435 : vector<8x8xf32>
    %c57 = arith.constant 57 : index
    %437 = memref.load %arg6[%c57] : memref<72xf32, #tpu.memory_space<smem>>
    %438 = vector.broadcast %437 : f32 to vector<8x8xf32>
    %439 = arith.mulf %438, %424 : vector<8x8xf32>
    %440 = arith.addf %422, %439 : vector<8x8xf32>
    %c0_177 = arith.constant 0 : index
    %c1_178 = arith.constant 1 : index
    %c1_179 = arith.constant 1 : index
    %441 = vector.load %arg15[%c0_177, %c1_178, %c1_179] : memref<2x10x10xf32, #tpu.memory_space<vmem>>, vector<1x8x8xf32>
    %442 = vector.shape_cast %441 : vector<1x8x8xf32> to vector<8x8xf32>
    %c4_180 = arith.constant 4 : index
    %443 = memref.load %arg6[%c4_180] : memref<72xf32, #tpu.memory_space<smem>>
    %444 = vector.broadcast %443 : f32 to vector<8x8xf32>
    %445 = arith.mulf %444, %442 : vector<8x8xf32>
    %446 = arith.addf %428, %445 : vector<8x8xf32>
    %c22_181 = arith.constant 22 : index
    %447 = memref.load %arg6[%c22_181] : memref<72xf32, #tpu.memory_space<smem>>
    %448 = vector.broadcast %447 : f32 to vector<8x8xf32>
    %449 = arith.mulf %448, %442 : vector<8x8xf32>
    %450 = arith.addf %432, %449 : vector<8x8xf32>
    %c40 = arith.constant 40 : index
    %451 = memref.load %arg6[%c40] : memref<72xf32, #tpu.memory_space<smem>>
    %452 = vector.broadcast %451 : f32 to vector<8x8xf32>
    %453 = arith.mulf %452, %442 : vector<8x8xf32>
    %454 = arith.addf %436, %453 : vector<8x8xf32>
    %c58 = arith.constant 58 : index
    %455 = memref.load %arg6[%c58] : memref<72xf32, #tpu.memory_space<smem>>
    %456 = vector.broadcast %455 : f32 to vector<8x8xf32>
    %457 = arith.mulf %456, %442 : vector<8x8xf32>
    %458 = arith.addf %440, %457 : vector<8x8xf32>
    %c0_182 = arith.constant 0 : index
    %c1_183 = arith.constant 1 : index
    %c2_184 = arith.constant 2 : index
    %459 = vector.load %arg15[%c0_182, %c1_183, %c2_184] : memref<2x10x10xf32, #tpu.memory_space<vmem>>, vector<1x8x8xf32>
    %460 = vector.shape_cast %459 : vector<1x8x8xf32> to vector<8x8xf32>
    %c5_185 = arith.constant 5 : index
    %461 = memref.load %arg6[%c5_185] : memref<72xf32, #tpu.memory_space<smem>>
    %462 = vector.broadcast %461 : f32 to vector<8x8xf32>
    %463 = arith.mulf %462, %460 : vector<8x8xf32>
    %464 = arith.addf %446, %463 : vector<8x8xf32>
    %c23_186 = arith.constant 23 : index
    %465 = memref.load %arg6[%c23_186] : memref<72xf32, #tpu.memory_space<smem>>
    %466 = vector.broadcast %465 : f32 to vector<8x8xf32>
    %467 = arith.mulf %466, %460 : vector<8x8xf32>
    %468 = arith.addf %450, %467 : vector<8x8xf32>
    %c41 = arith.constant 41 : index
    %469 = memref.load %arg6[%c41] : memref<72xf32, #tpu.memory_space<smem>>
    %470 = vector.broadcast %469 : f32 to vector<8x8xf32>
    %471 = arith.mulf %470, %460 : vector<8x8xf32>
    %472 = arith.addf %454, %471 : vector<8x8xf32>
    %c59 = arith.constant 59 : index
    %473 = memref.load %arg6[%c59] : memref<72xf32, #tpu.memory_space<smem>>
    %474 = vector.broadcast %473 : f32 to vector<8x8xf32>
    %475 = arith.mulf %474, %460 : vector<8x8xf32>
    %476 = arith.addf %458, %475 : vector<8x8xf32>
    %c0_187 = arith.constant 0 : index
    %c2_188 = arith.constant 2 : index
    %c0_189 = arith.constant 0 : index
    %477 = vector.load %arg15[%c0_187, %c2_188, %c0_189] : memref<2x10x10xf32, #tpu.memory_space<vmem>>, vector<1x8x8xf32>
    %478 = vector.shape_cast %477 : vector<1x8x8xf32> to vector<8x8xf32>
    %c6_190 = arith.constant 6 : index
    %479 = memref.load %arg6[%c6_190] : memref<72xf32, #tpu.memory_space<smem>>
    %480 = vector.broadcast %479 : f32 to vector<8x8xf32>
    %481 = arith.mulf %480, %478 : vector<8x8xf32>
    %482 = arith.addf %464, %481 : vector<8x8xf32>
    %c24_191 = arith.constant 24 : index
    %483 = memref.load %arg6[%c24_191] : memref<72xf32, #tpu.memory_space<smem>>
    %484 = vector.broadcast %483 : f32 to vector<8x8xf32>
    %485 = arith.mulf %484, %478 : vector<8x8xf32>
    %486 = arith.addf %468, %485 : vector<8x8xf32>
    %c42 = arith.constant 42 : index
    %487 = memref.load %arg6[%c42] : memref<72xf32, #tpu.memory_space<smem>>
    %488 = vector.broadcast %487 : f32 to vector<8x8xf32>
    %489 = arith.mulf %488, %478 : vector<8x8xf32>
    %490 = arith.addf %472, %489 : vector<8x8xf32>
    %c60 = arith.constant 60 : index
    %491 = memref.load %arg6[%c60] : memref<72xf32, #tpu.memory_space<smem>>
    %492 = vector.broadcast %491 : f32 to vector<8x8xf32>
    %493 = arith.mulf %492, %478 : vector<8x8xf32>
    %494 = arith.addf %476, %493 : vector<8x8xf32>
    %c0_192 = arith.constant 0 : index
    %c2_193 = arith.constant 2 : index
    %c1_194 = arith.constant 1 : index
    %495 = vector.load %arg15[%c0_192, %c2_193, %c1_194] : memref<2x10x10xf32, #tpu.memory_space<vmem>>, vector<1x8x8xf32>
    %496 = vector.shape_cast %495 : vector<1x8x8xf32> to vector<8x8xf32>
    %c7_195 = arith.constant 7 : index
    %497 = memref.load %arg6[%c7_195] : memref<72xf32, #tpu.memory_space<smem>>
    %498 = vector.broadcast %497 : f32 to vector<8x8xf32>
    %499 = arith.mulf %498, %496 : vector<8x8xf32>
    %500 = arith.addf %482, %499 : vector<8x8xf32>
    %c25_196 = arith.constant 25 : index
    %501 = memref.load %arg6[%c25_196] : memref<72xf32, #tpu.memory_space<smem>>
    %502 = vector.broadcast %501 : f32 to vector<8x8xf32>
    %503 = arith.mulf %502, %496 : vector<8x8xf32>
    %504 = arith.addf %486, %503 : vector<8x8xf32>
    %c43 = arith.constant 43 : index
    %505 = memref.load %arg6[%c43] : memref<72xf32, #tpu.memory_space<smem>>
    %506 = vector.broadcast %505 : f32 to vector<8x8xf32>
    %507 = arith.mulf %506, %496 : vector<8x8xf32>
    %508 = arith.addf %490, %507 : vector<8x8xf32>
    %c61 = arith.constant 61 : index
    %509 = memref.load %arg6[%c61] : memref<72xf32, #tpu.memory_space<smem>>
    %510 = vector.broadcast %509 : f32 to vector<8x8xf32>
    %511 = arith.mulf %510, %496 : vector<8x8xf32>
    %512 = arith.addf %494, %511 : vector<8x8xf32>
    %c0_197 = arith.constant 0 : index
    %c2_198 = arith.constant 2 : index
    %c2_199 = arith.constant 2 : index
    %513 = vector.load %arg15[%c0_197, %c2_198, %c2_199] : memref<2x10x10xf32, #tpu.memory_space<vmem>>, vector<1x8x8xf32>
    %514 = vector.shape_cast %513 : vector<1x8x8xf32> to vector<8x8xf32>
    %c8_200 = arith.constant 8 : index
    %515 = memref.load %arg6[%c8_200] : memref<72xf32, #tpu.memory_space<smem>>
    %516 = vector.broadcast %515 : f32 to vector<8x8xf32>
    %517 = arith.mulf %516, %514 : vector<8x8xf32>
    %518 = arith.addf %500, %517 : vector<8x8xf32>
    %c26_201 = arith.constant 26 : index
    %519 = memref.load %arg6[%c26_201] : memref<72xf32, #tpu.memory_space<smem>>
    %520 = vector.broadcast %519 : f32 to vector<8x8xf32>
    %521 = arith.mulf %520, %514 : vector<8x8xf32>
    %522 = arith.addf %504, %521 : vector<8x8xf32>
    %c44 = arith.constant 44 : index
    %523 = memref.load %arg6[%c44] : memref<72xf32, #tpu.memory_space<smem>>
    %524 = vector.broadcast %523 : f32 to vector<8x8xf32>
    %525 = arith.mulf %524, %514 : vector<8x8xf32>
    %526 = arith.addf %508, %525 : vector<8x8xf32>
    %c62 = arith.constant 62 : index
    %527 = memref.load %arg6[%c62] : memref<72xf32, #tpu.memory_space<smem>>
    %528 = vector.broadcast %527 : f32 to vector<8x8xf32>
    %529 = arith.mulf %528, %514 : vector<8x8xf32>
    %530 = arith.addf %512, %529 : vector<8x8xf32>
    %c1_202 = arith.constant 1 : index
    %c0_203 = arith.constant 0 : index
    %c0_204 = arith.constant 0 : index
    %531 = vector.load %arg15[%c1_202, %c0_203, %c0_204] : memref<2x10x10xf32, #tpu.memory_space<vmem>>, vector<1x8x8xf32>
    %532 = vector.shape_cast %531 : vector<1x8x8xf32> to vector<8x8xf32>
    %c9_205 = arith.constant 9 : index
    %533 = memref.load %arg6[%c9_205] : memref<72xf32, #tpu.memory_space<smem>>
    %534 = vector.broadcast %533 : f32 to vector<8x8xf32>
    %535 = arith.mulf %534, %532 : vector<8x8xf32>
    %536 = arith.addf %518, %535 : vector<8x8xf32>
    %c27_206 = arith.constant 27 : index
    %537 = memref.load %arg6[%c27_206] : memref<72xf32, #tpu.memory_space<smem>>
    %538 = vector.broadcast %537 : f32 to vector<8x8xf32>
    %539 = arith.mulf %538, %532 : vector<8x8xf32>
    %540 = arith.addf %522, %539 : vector<8x8xf32>
    %c45 = arith.constant 45 : index
    %541 = memref.load %arg6[%c45] : memref<72xf32, #tpu.memory_space<smem>>
    %542 = vector.broadcast %541 : f32 to vector<8x8xf32>
    %543 = arith.mulf %542, %532 : vector<8x8xf32>
    %544 = arith.addf %526, %543 : vector<8x8xf32>
    %c63 = arith.constant 63 : index
    %545 = memref.load %arg6[%c63] : memref<72xf32, #tpu.memory_space<smem>>
    %546 = vector.broadcast %545 : f32 to vector<8x8xf32>
    %547 = arith.mulf %546, %532 : vector<8x8xf32>
    %548 = arith.addf %530, %547 : vector<8x8xf32>
    %c1_207 = arith.constant 1 : index
    %c0_208 = arith.constant 0 : index
    %c1_209 = arith.constant 1 : index
    %549 = vector.load %arg15[%c1_207, %c0_208, %c1_209] : memref<2x10x10xf32, #tpu.memory_space<vmem>>, vector<1x8x8xf32>
    %550 = vector.shape_cast %549 : vector<1x8x8xf32> to vector<8x8xf32>
    %c10_210 = arith.constant 10 : index
    %551 = memref.load %arg6[%c10_210] : memref<72xf32, #tpu.memory_space<smem>>
    %552 = vector.broadcast %551 : f32 to vector<8x8xf32>
    %553 = arith.mulf %552, %550 : vector<8x8xf32>
    %554 = arith.addf %536, %553 : vector<8x8xf32>
    %c28_211 = arith.constant 28 : index
    %555 = memref.load %arg6[%c28_211] : memref<72xf32, #tpu.memory_space<smem>>
    %556 = vector.broadcast %555 : f32 to vector<8x8xf32>
    %557 = arith.mulf %556, %550 : vector<8x8xf32>
    %558 = arith.addf %540, %557 : vector<8x8xf32>
    %c46 = arith.constant 46 : index
    %559 = memref.load %arg6[%c46] : memref<72xf32, #tpu.memory_space<smem>>
    %560 = vector.broadcast %559 : f32 to vector<8x8xf32>
    %561 = arith.mulf %560, %550 : vector<8x8xf32>
    %562 = arith.addf %544, %561 : vector<8x8xf32>
    %c64 = arith.constant 64 : index
    %563 = memref.load %arg6[%c64] : memref<72xf32, #tpu.memory_space<smem>>
    %564 = vector.broadcast %563 : f32 to vector<8x8xf32>
    %565 = arith.mulf %564, %550 : vector<8x8xf32>
    %566 = arith.addf %548, %565 : vector<8x8xf32>
    %c1_212 = arith.constant 1 : index
    %c0_213 = arith.constant 0 : index
    %c2_214 = arith.constant 2 : index
    %567 = vector.load %arg15[%c1_212, %c0_213, %c2_214] : memref<2x10x10xf32, #tpu.memory_space<vmem>>, vector<1x8x8xf32>
    %568 = vector.shape_cast %567 : vector<1x8x8xf32> to vector<8x8xf32>
    %c11_215 = arith.constant 11 : index
    %569 = memref.load %arg6[%c11_215] : memref<72xf32, #tpu.memory_space<smem>>
    %570 = vector.broadcast %569 : f32 to vector<8x8xf32>
    %571 = arith.mulf %570, %568 : vector<8x8xf32>
    %572 = arith.addf %554, %571 : vector<8x8xf32>
    %c29_216 = arith.constant 29 : index
    %573 = memref.load %arg6[%c29_216] : memref<72xf32, #tpu.memory_space<smem>>
    %574 = vector.broadcast %573 : f32 to vector<8x8xf32>
    %575 = arith.mulf %574, %568 : vector<8x8xf32>
    %576 = arith.addf %558, %575 : vector<8x8xf32>
    %c47 = arith.constant 47 : index
    %577 = memref.load %arg6[%c47] : memref<72xf32, #tpu.memory_space<smem>>
    %578 = vector.broadcast %577 : f32 to vector<8x8xf32>
    %579 = arith.mulf %578, %568 : vector<8x8xf32>
    %580 = arith.addf %562, %579 : vector<8x8xf32>
    %c65 = arith.constant 65 : index
    %581 = memref.load %arg6[%c65] : memref<72xf32, #tpu.memory_space<smem>>
    %582 = vector.broadcast %581 : f32 to vector<8x8xf32>
    %583 = arith.mulf %582, %568 : vector<8x8xf32>
    %584 = arith.addf %566, %583 : vector<8x8xf32>
    %c1_217 = arith.constant 1 : index
    %c1_218 = arith.constant 1 : index
    %c0_219 = arith.constant 0 : index
    %585 = vector.load %arg15[%c1_217, %c1_218, %c0_219] : memref<2x10x10xf32, #tpu.memory_space<vmem>>, vector<1x8x8xf32>
    %586 = vector.shape_cast %585 : vector<1x8x8xf32> to vector<8x8xf32>
    %c12_220 = arith.constant 12 : index
    %587 = memref.load %arg6[%c12_220] : memref<72xf32, #tpu.memory_space<smem>>
    %588 = vector.broadcast %587 : f32 to vector<8x8xf32>
    %589 = arith.mulf %588, %586 : vector<8x8xf32>
    %590 = arith.addf %572, %589 : vector<8x8xf32>
    %c30_221 = arith.constant 30 : index
    %591 = memref.load %arg6[%c30_221] : memref<72xf32, #tpu.memory_space<smem>>
    %592 = vector.broadcast %591 : f32 to vector<8x8xf32>
    %593 = arith.mulf %592, %586 : vector<8x8xf32>
    %594 = arith.addf %576, %593 : vector<8x8xf32>
    %c48 = arith.constant 48 : index
    %595 = memref.load %arg6[%c48] : memref<72xf32, #tpu.memory_space<smem>>
    %596 = vector.broadcast %595 : f32 to vector<8x8xf32>
    %597 = arith.mulf %596, %586 : vector<8x8xf32>
    %598 = arith.addf %580, %597 : vector<8x8xf32>
    %c66 = arith.constant 66 : index
    %599 = memref.load %arg6[%c66] : memref<72xf32, #tpu.memory_space<smem>>
    %600 = vector.broadcast %599 : f32 to vector<8x8xf32>
    %601 = arith.mulf %600, %586 : vector<8x8xf32>
    %602 = arith.addf %584, %601 : vector<8x8xf32>
    %c1_222 = arith.constant 1 : index
    %c1_223 = arith.constant 1 : index
    %c1_224 = arith.constant 1 : index
    %603 = vector.load %arg15[%c1_222, %c1_223, %c1_224] : memref<2x10x10xf32, #tpu.memory_space<vmem>>, vector<1x8x8xf32>
    %604 = vector.shape_cast %603 : vector<1x8x8xf32> to vector<8x8xf32>
    %c13_225 = arith.constant 13 : index
    %605 = memref.load %arg6[%c13_225] : memref<72xf32, #tpu.memory_space<smem>>
    %606 = vector.broadcast %605 : f32 to vector<8x8xf32>
    %607 = arith.mulf %606, %604 : vector<8x8xf32>
    %608 = arith.addf %590, %607 : vector<8x8xf32>
    %c31_226 = arith.constant 31 : index
    %609 = memref.load %arg6[%c31_226] : memref<72xf32, #tpu.memory_space<smem>>
    %610 = vector.broadcast %609 : f32 to vector<8x8xf32>
    %611 = arith.mulf %610, %604 : vector<8x8xf32>
    %612 = arith.addf %594, %611 : vector<8x8xf32>
    %c49 = arith.constant 49 : index
    %613 = memref.load %arg6[%c49] : memref<72xf32, #tpu.memory_space<smem>>
    %614 = vector.broadcast %613 : f32 to vector<8x8xf32>
    %615 = arith.mulf %614, %604 : vector<8x8xf32>
    %616 = arith.addf %598, %615 : vector<8x8xf32>
    %c67 = arith.constant 67 : index
    %617 = memref.load %arg6[%c67] : memref<72xf32, #tpu.memory_space<smem>>
    %618 = vector.broadcast %617 : f32 to vector<8x8xf32>
    %619 = arith.mulf %618, %604 : vector<8x8xf32>
    %620 = arith.addf %602, %619 : vector<8x8xf32>
    %c1_227 = arith.constant 1 : index
    %c1_228 = arith.constant 1 : index
    %c2_229 = arith.constant 2 : index
    %621 = vector.load %arg15[%c1_227, %c1_228, %c2_229] : memref<2x10x10xf32, #tpu.memory_space<vmem>>, vector<1x8x8xf32>
    %622 = vector.shape_cast %621 : vector<1x8x8xf32> to vector<8x8xf32>
    %c14_230 = arith.constant 14 : index
    %623 = memref.load %arg6[%c14_230] : memref<72xf32, #tpu.memory_space<smem>>
    %624 = vector.broadcast %623 : f32 to vector<8x8xf32>
    %625 = arith.mulf %624, %622 : vector<8x8xf32>
    %626 = arith.addf %608, %625 : vector<8x8xf32>
    %c32_231 = arith.constant 32 : index
    %627 = memref.load %arg6[%c32_231] : memref<72xf32, #tpu.memory_space<smem>>
    %628 = vector.broadcast %627 : f32 to vector<8x8xf32>
    %629 = arith.mulf %628, %622 : vector<8x8xf32>
    %630 = arith.addf %612, %629 : vector<8x8xf32>
    %c50 = arith.constant 50 : index
    %631 = memref.load %arg6[%c50] : memref<72xf32, #tpu.memory_space<smem>>
    %632 = vector.broadcast %631 : f32 to vector<8x8xf32>
    %633 = arith.mulf %632, %622 : vector<8x8xf32>
    %634 = arith.addf %616, %633 : vector<8x8xf32>
    %c68 = arith.constant 68 : index
    %635 = memref.load %arg6[%c68] : memref<72xf32, #tpu.memory_space<smem>>
    %636 = vector.broadcast %635 : f32 to vector<8x8xf32>
    %637 = arith.mulf %636, %622 : vector<8x8xf32>
    %638 = arith.addf %620, %637 : vector<8x8xf32>
    %c1_232 = arith.constant 1 : index
    %c2_233 = arith.constant 2 : index
    %c0_234 = arith.constant 0 : index
    %639 = vector.load %arg15[%c1_232, %c2_233, %c0_234] : memref<2x10x10xf32, #tpu.memory_space<vmem>>, vector<1x8x8xf32>
    %640 = vector.shape_cast %639 : vector<1x8x8xf32> to vector<8x8xf32>
    %c15_235 = arith.constant 15 : index
    %641 = memref.load %arg6[%c15_235] : memref<72xf32, #tpu.memory_space<smem>>
    %642 = vector.broadcast %641 : f32 to vector<8x8xf32>
    %643 = arith.mulf %642, %640 : vector<8x8xf32>
    %644 = arith.addf %626, %643 : vector<8x8xf32>
    %c33_236 = arith.constant 33 : index
    %645 = memref.load %arg6[%c33_236] : memref<72xf32, #tpu.memory_space<smem>>
    %646 = vector.broadcast %645 : f32 to vector<8x8xf32>
    %647 = arith.mulf %646, %640 : vector<8x8xf32>
    %648 = arith.addf %630, %647 : vector<8x8xf32>
    %c51 = arith.constant 51 : index
    %649 = memref.load %arg6[%c51] : memref<72xf32, #tpu.memory_space<smem>>
    %650 = vector.broadcast %649 : f32 to vector<8x8xf32>
    %651 = arith.mulf %650, %640 : vector<8x8xf32>
    %652 = arith.addf %634, %651 : vector<8x8xf32>
    %c69 = arith.constant 69 : index
    %653 = memref.load %arg6[%c69] : memref<72xf32, #tpu.memory_space<smem>>
    %654 = vector.broadcast %653 : f32 to vector<8x8xf32>
    %655 = arith.mulf %654, %640 : vector<8x8xf32>
    %656 = arith.addf %638, %655 : vector<8x8xf32>
    %c1_237 = arith.constant 1 : index
    %c2_238 = arith.constant 2 : index
    %c1_239 = arith.constant 1 : index
    %657 = vector.load %arg15[%c1_237, %c2_238, %c1_239] : memref<2x10x10xf32, #tpu.memory_space<vmem>>, vector<1x8x8xf32>
    %658 = vector.shape_cast %657 : vector<1x8x8xf32> to vector<8x8xf32>
    %c16_240 = arith.constant 16 : index
    %659 = memref.load %arg6[%c16_240] : memref<72xf32, #tpu.memory_space<smem>>
    %660 = vector.broadcast %659 : f32 to vector<8x8xf32>
    %661 = arith.mulf %660, %658 : vector<8x8xf32>
    %662 = arith.addf %644, %661 : vector<8x8xf32>
    %c34_241 = arith.constant 34 : index
    %663 = memref.load %arg6[%c34_241] : memref<72xf32, #tpu.memory_space<smem>>
    %664 = vector.broadcast %663 : f32 to vector<8x8xf32>
    %665 = arith.mulf %664, %658 : vector<8x8xf32>
    %666 = arith.addf %648, %665 : vector<8x8xf32>
    %c52 = arith.constant 52 : index
    %667 = memref.load %arg6[%c52] : memref<72xf32, #tpu.memory_space<smem>>
    %668 = vector.broadcast %667 : f32 to vector<8x8xf32>
    %669 = arith.mulf %668, %658 : vector<8x8xf32>
    %670 = arith.addf %652, %669 : vector<8x8xf32>
    %c70 = arith.constant 70 : index
    %671 = memref.load %arg6[%c70] : memref<72xf32, #tpu.memory_space<smem>>
    %672 = vector.broadcast %671 : f32 to vector<8x8xf32>
    %673 = arith.mulf %672, %658 : vector<8x8xf32>
    %674 = arith.addf %656, %673 : vector<8x8xf32>
    %c1_242 = arith.constant 1 : index
    %c2_243 = arith.constant 2 : index
    %c2_244 = arith.constant 2 : index
    %675 = vector.load %arg15[%c1_242, %c2_243, %c2_244] : memref<2x10x10xf32, #tpu.memory_space<vmem>>, vector<1x8x8xf32>
    %676 = vector.shape_cast %675 : vector<1x8x8xf32> to vector<8x8xf32>
    %c17_245 = arith.constant 17 : index
    %677 = memref.load %arg6[%c17_245] : memref<72xf32, #tpu.memory_space<smem>>
    %678 = vector.broadcast %677 : f32 to vector<8x8xf32>
    %679 = arith.mulf %678, %676 : vector<8x8xf32>
    %680 = arith.addf %662, %679 : vector<8x8xf32>
    %c35_246 = arith.constant 35 : index
    %681 = memref.load %arg6[%c35_246] : memref<72xf32, #tpu.memory_space<smem>>
    %682 = vector.broadcast %681 : f32 to vector<8x8xf32>
    %683 = arith.mulf %682, %676 : vector<8x8xf32>
    %684 = arith.addf %666, %683 : vector<8x8xf32>
    %c53 = arith.constant 53 : index
    %685 = memref.load %arg6[%c53] : memref<72xf32, #tpu.memory_space<smem>>
    %686 = vector.broadcast %685 : f32 to vector<8x8xf32>
    %687 = arith.mulf %686, %676 : vector<8x8xf32>
    %688 = arith.addf %670, %687 : vector<8x8xf32>
    %c71 = arith.constant 71 : index
    %689 = memref.load %arg6[%c71] : memref<72xf32, #tpu.memory_space<smem>>
    %690 = vector.broadcast %689 : f32 to vector<8x8xf32>
    %691 = arith.mulf %690, %676 : vector<8x8xf32>
    %692 = arith.addf %674, %691 : vector<8x8xf32>
    %c0_247 = arith.constant 0 : index
    %693 = memref.load %arg7[%c0_247] : memref<4xf32, #tpu.memory_space<smem>>
    %694 = vector.broadcast %693 : f32 to vector<8x8xf32>
    %695 = arith.addf %680, %694 : vector<8x8xf32>
    %cst_248 = arith.constant 0.000000e+00 : f32
    %696 = vector.broadcast %cst_248 : f32 to vector<8x8xf32>
    %697 = arith.maximumf %695, %696 : vector<8x8xf32>
    %c1_249 = arith.constant 1 : index
    %698 = memref.load %arg7[%c1_249] : memref<4xf32, #tpu.memory_space<smem>>
    %699 = vector.broadcast %698 : f32 to vector<8x8xf32>
    %700 = arith.addf %684, %699 : vector<8x8xf32>
    %cst_250 = arith.constant 0.000000e+00 : f32
    %701 = vector.broadcast %cst_250 : f32 to vector<8x8xf32>
    %702 = arith.maximumf %700, %701 : vector<8x8xf32>
    %c2_251 = arith.constant 2 : index
    %703 = memref.load %arg7[%c2_251] : memref<4xf32, #tpu.memory_space<smem>>
    %704 = vector.broadcast %703 : f32 to vector<8x8xf32>
    %705 = arith.addf %688, %704 : vector<8x8xf32>
    %cst_252 = arith.constant 0.000000e+00 : f32
    %706 = vector.broadcast %cst_252 : f32 to vector<8x8xf32>
    %707 = arith.maximumf %705, %706 : vector<8x8xf32>
    %c3_253 = arith.constant 3 : index
    %708 = memref.load %arg7[%c3_253] : memref<4xf32, #tpu.memory_space<smem>>
    %709 = vector.broadcast %708 : f32 to vector<8x8xf32>
    %710 = arith.addf %692, %709 : vector<8x8xf32>
    %cst_254 = arith.constant 0.000000e+00 : f32
    %711 = vector.broadcast %cst_254 : f32 to vector<8x8xf32>
    %712 = arith.maximumf %710, %711 : vector<8x8xf32>
    %cst_255 = arith.constant 0.000000e+00 : f32
    %713 = vector.broadcast %cst_255 : f32 to vector<4x10x10xf32>
    %c0_256 = arith.constant 0 : index
    %c0_257 = arith.constant 0 : index
    %c0_258 = arith.constant 0 : index
    %714 = vector.load %arg16[%c0_256, %c0_257, %c0_258] : memref<4x10x10xf32, #tpu.memory_space<vmem>>, vector<4x10x10xf32>
    tpu.vector_store %arg16[%c0_256, %c0_257, %c0_258], %713 {strides = array<i32>} : memref<4x10x10xf32, #tpu.memory_space<vmem>>, vector<4x10x10xf32>,
    %c0_259 = arith.constant 0 : index
    %c1_260 = arith.constant 1 : index
    %c1_261 = arith.constant 1 : index
    %715 = vector.load %arg16[%c0_259, %c1_260, %c1_261] : memref<4x10x10xf32, #tpu.memory_space<vmem>>, vector<1x8x8xf32>
    %716 = vector.shape_cast %715 : vector<1x8x8xf32> to vector<8x8xf32>
    %717 = vector.shape_cast %697 : vector<8x8xf32> to vector<1x8x8xf32>
    tpu.vector_store %arg16[%c0_259, %c1_260, %c1_261], %717 {strides = array<i32>} : memref<4x10x10xf32, #tpu.memory_space<vmem>>, vector<1x8x8xf32>,
    %c1_262 = arith.constant 1 : index
    %c1_263 = arith.constant 1 : index
    %c1_264 = arith.constant 1 : index
    %718 = vector.load %arg16[%c1_262, %c1_263, %c1_264] : memref<4x10x10xf32, #tpu.memory_space<vmem>>, vector<1x8x8xf32>
    %719 = vector.shape_cast %718 : vector<1x8x8xf32> to vector<8x8xf32>
    %720 = vector.shape_cast %702 : vector<8x8xf32> to vector<1x8x8xf32>
    tpu.vector_store %arg16[%c1_262, %c1_263, %c1_264], %720 {strides = array<i32>} : memref<4x10x10xf32, #tpu.memory_space<vmem>>, vector<1x8x8xf32>,
    %c2_265 = arith.constant 2 : index
    %c1_266 = arith.constant 1 : index
    %c1_267 = arith.constant 1 : index
    %721 = vector.load %arg16[%c2_265, %c1_266, %c1_267] : memref<4x10x10xf32, #tpu.memory_space<vmem>>, vector<1x8x8xf32>
    %722 = vector.shape_cast %721 : vector<1x8x8xf32> to vector<8x8xf32>
    %723 = vector.shape_cast %707 : vector<8x8xf32> to vector<1x8x8xf32>
    tpu.vector_store %arg16[%c2_265, %c1_266, %c1_267], %723 {strides = array<i32>} : memref<4x10x10xf32, #tpu.memory_space<vmem>>, vector<1x8x8xf32>,
    %c3_268 = arith.constant 3 : index
    %c1_269 = arith.constant 1 : index
    %c1_270 = arith.constant 1 : index
    %724 = vector.load %arg16[%c3_268, %c1_269, %c1_270] : memref<4x10x10xf32, #tpu.memory_space<vmem>>, vector<1x8x8xf32>
    %725 = vector.shape_cast %724 : vector<1x8x8xf32> to vector<8x8xf32>
    %726 = vector.shape_cast %712 : vector<8x8xf32> to vector<1x8x8xf32>
    tpu.vector_store %arg16[%c3_268, %c1_269, %c1_270], %726 {strides = array<i32>} : memref<4x10x10xf32, #tpu.memory_space<vmem>>, vector<1x8x8xf32>,
    %cst_271 = arith.constant 0.000000e+00 : f32
    %727 = vector.broadcast %cst_271 : f32 to vector<8x8xf32>
    %cst_272 = arith.constant 0.000000e+00 : f32
    %728 = vector.broadcast %cst_272 : f32 to vector<8x8xf32>
    %cst_273 = arith.constant 0.000000e+00 : f32
    %729 = vector.broadcast %cst_273 : f32 to vector<8x8xf32>
    %cst_274 = arith.constant 0.000000e+00 : f32
    %730 = vector.broadcast %cst_274 : f32 to vector<8x8xf32>
    %c0_275 = arith.constant 0 : index
    %c0_276 = arith.constant 0 : index
    %c0_277 = arith.constant 0 : index
    %731 = vector.load %arg16[%c0_275, %c0_276, %c0_277] : memref<4x10x10xf32, #tpu.memory_space<vmem>>, vector<1x8x8xf32>
    %732 = vector.shape_cast %731 : vector<1x8x8xf32> to vector<8x8xf32>
    %c0_278 = arith.constant 0 : index
    %733 = memref.load %arg8[%c0_278] : memref<144xf32, #tpu.memory_space<smem>>
    %734 = vector.broadcast %733 : f32 to vector<8x8xf32>
    %735 = arith.mulf %734, %732 : vector<8x8xf32>
    %736 = arith.addf %727, %735 : vector<8x8xf32>
    %c36_279 = arith.constant 36 : index
    %737 = memref.load %arg8[%c36_279] : memref<144xf32, #tpu.memory_space<smem>>
    %738 = vector.broadcast %737 : f32 to vector<8x8xf32>
    %739 = arith.mulf %738, %732 : vector<8x8xf32>
    %740 = arith.addf %728, %739 : vector<8x8xf32>
    %c72 = arith.constant 72 : index
    %741 = memref.load %arg8[%c72] : memref<144xf32, #tpu.memory_space<smem>>
    %742 = vector.broadcast %741 : f32 to vector<8x8xf32>
    %743 = arith.mulf %742, %732 : vector<8x8xf32>
    %744 = arith.addf %729, %743 : vector<8x8xf32>
    %c108 = arith.constant 108 : index
    %745 = memref.load %arg8[%c108] : memref<144xf32, #tpu.memory_space<smem>>
    %746 = vector.broadcast %745 : f32 to vector<8x8xf32>
    %747 = arith.mulf %746, %732 : vector<8x8xf32>
    %748 = arith.addf %730, %747 : vector<8x8xf32>
    %c0_280 = arith.constant 0 : index
    %c0_281 = arith.constant 0 : index
    %c1_282 = arith.constant 1 : index
    %749 = vector.load %arg16[%c0_280, %c0_281, %c1_282] : memref<4x10x10xf32, #tpu.memory_space<vmem>>, vector<1x8x8xf32>
    %750 = vector.shape_cast %749 : vector<1x8x8xf32> to vector<8x8xf32>
    %c1_283 = arith.constant 1 : index
    %751 = memref.load %arg8[%c1_283] : memref<144xf32, #tpu.memory_space<smem>>
    %752 = vector.broadcast %751 : f32 to vector<8x8xf32>
    %753 = arith.mulf %752, %750 : vector<8x8xf32>
    %754 = arith.addf %736, %753 : vector<8x8xf32>
    %c37_284 = arith.constant 37 : index
    %755 = memref.load %arg8[%c37_284] : memref<144xf32, #tpu.memory_space<smem>>
    %756 = vector.broadcast %755 : f32 to vector<8x8xf32>
    %757 = arith.mulf %756, %750 : vector<8x8xf32>
    %758 = arith.addf %740, %757 : vector<8x8xf32>
    %c73 = arith.constant 73 : index
    %759 = memref.load %arg8[%c73] : memref<144xf32, #tpu.memory_space<smem>>
    %760 = vector.broadcast %759 : f32 to vector<8x8xf32>
    %761 = arith.mulf %760, %750 : vector<8x8xf32>
    %762 = arith.addf %744, %761 : vector<8x8xf32>
    %c109 = arith.constant 109 : index
    %763 = memref.load %arg8[%c109] : memref<144xf32, #tpu.memory_space<smem>>
    %764 = vector.broadcast %763 : f32 to vector<8x8xf32>
    %765 = arith.mulf %764, %750 : vector<8x8xf32>
    %766 = arith.addf %748, %765 : vector<8x8xf32>
    %c0_285 = arith.constant 0 : index
    %c0_286 = arith.constant 0 : index
    %c2_287 = arith.constant 2 : index
    %767 = vector.load %arg16[%c0_285, %c0_286, %c2_287] : memref<4x10x10xf32, #tpu.memory_space<vmem>>, vector<1x8x8xf32>
    %768 = vector.shape_cast %767 : vector<1x8x8xf32> to vector<8x8xf32>
    %c2_288 = arith.constant 2 : index
    %769 = memref.load %arg8[%c2_288] : memref<144xf32, #tpu.memory_space<smem>>
    %770 = vector.broadcast %769 : f32 to vector<8x8xf32>
    %771 = arith.mulf %770, %768 : vector<8x8xf32>
    %772 = arith.addf %754, %771 : vector<8x8xf32>
    %c38_289 = arith.constant 38 : index
    %773 = memref.load %arg8[%c38_289] : memref<144xf32, #tpu.memory_space<smem>>
    %774 = vector.broadcast %773 : f32 to vector<8x8xf32>
    %775 = arith.mulf %774, %768 : vector<8x8xf32>
    %776 = arith.addf %758, %775 : vector<8x8xf32>
    %c74 = arith.constant 74 : index
    %777 = memref.load %arg8[%c74] : memref<144xf32, #tpu.memory_space<smem>>
    %778 = vector.broadcast %777 : f32 to vector<8x8xf32>
    %779 = arith.mulf %778, %768 : vector<8x8xf32>
    %780 = arith.addf %762, %779 : vector<8x8xf32>
    %c110 = arith.constant 110 : index
    %781 = memref.load %arg8[%c110] : memref<144xf32, #tpu.memory_space<smem>>
    %782 = vector.broadcast %781 : f32 to vector<8x8xf32>
    %783 = arith.mulf %782, %768 : vector<8x8xf32>
    %784 = arith.addf %766, %783 : vector<8x8xf32>
    %c0_290 = arith.constant 0 : index
    %c1_291 = arith.constant 1 : index
    %c0_292 = arith.constant 0 : index
    %785 = vector.load %arg16[%c0_290, %c1_291, %c0_292] : memref<4x10x10xf32, #tpu.memory_space<vmem>>, vector<1x8x8xf32>
    %786 = vector.shape_cast %785 : vector<1x8x8xf32> to vector<8x8xf32>
    %c3_293 = arith.constant 3 : index
    %787 = memref.load %arg8[%c3_293] : memref<144xf32, #tpu.memory_space<smem>>
    %788 = vector.broadcast %787 : f32 to vector<8x8xf32>
    %789 = arith.mulf %788, %786 : vector<8x8xf32>
    %790 = arith.addf %772, %789 : vector<8x8xf32>
    %c39_294 = arith.constant 39 : index
    %791 = memref.load %arg8[%c39_294] : memref<144xf32, #tpu.memory_space<smem>>
    %792 = vector.broadcast %791 : f32 to vector<8x8xf32>
    %793 = arith.mulf %792, %786 : vector<8x8xf32>
    %794 = arith.addf %776, %793 : vector<8x8xf32>
    %c75 = arith.constant 75 : index
    %795 = memref.load %arg8[%c75] : memref<144xf32, #tpu.memory_space<smem>>
    %796 = vector.broadcast %795 : f32 to vector<8x8xf32>
    %797 = arith.mulf %796, %786 : vector<8x8xf32>
    %798 = arith.addf %780, %797 : vector<8x8xf32>
    %c111 = arith.constant 111 : index
    %799 = memref.load %arg8[%c111] : memref<144xf32, #tpu.memory_space<smem>>
    %800 = vector.broadcast %799 : f32 to vector<8x8xf32>
    %801 = arith.mulf %800, %786 : vector<8x8xf32>
    %802 = arith.addf %784, %801 : vector<8x8xf32>
    %c0_295 = arith.constant 0 : index
    %c1_296 = arith.constant 1 : index
    %c1_297 = arith.constant 1 : index
    %803 = vector.load %arg16[%c0_295, %c1_296, %c1_297] : memref<4x10x10xf32, #tpu.memory_space<vmem>>, vector<1x8x8xf32>
    %804 = vector.shape_cast %803 : vector<1x8x8xf32> to vector<8x8xf32>
    %c4_298 = arith.constant 4 : index
    %805 = memref.load %arg8[%c4_298] : memref<144xf32, #tpu.memory_space<smem>>
    %806 = vector.broadcast %805 : f32 to vector<8x8xf32>
    %807 = arith.mulf %806, %804 : vector<8x8xf32>
    %808 = arith.addf %790, %807 : vector<8x8xf32>
    %c40_299 = arith.constant 40 : index
    %809 = memref.load %arg8[%c40_299] : memref<144xf32, #tpu.memory_space<smem>>
    %810 = vector.broadcast %809 : f32 to vector<8x8xf32>
    %811 = arith.mulf %810, %804 : vector<8x8xf32>
    %812 = arith.addf %794, %811 : vector<8x8xf32>
    %c76 = arith.constant 76 : index
    %813 = memref.load %arg8[%c76] : memref<144xf32, #tpu.memory_space<smem>>
    %814 = vector.broadcast %813 : f32 to vector<8x8xf32>
    %815 = arith.mulf %814, %804 : vector<8x8xf32>
    %816 = arith.addf %798, %815 : vector<8x8xf32>
    %c112 = arith.constant 112 : index
    %817 = memref.load %arg8[%c112] : memref<144xf32, #tpu.memory_space<smem>>
    %818 = vector.broadcast %817 : f32 to vector<8x8xf32>
    %819 = arith.mulf %818, %804 : vector<8x8xf32>
    %820 = arith.addf %802, %819 : vector<8x8xf32>
    %c0_300 = arith.constant 0 : index
    %c1_301 = arith.constant 1 : index
    %c2_302 = arith.constant 2 : index
    %821 = vector.load %arg16[%c0_300, %c1_301, %c2_302] : memref<4x10x10xf32, #tpu.memory_space<vmem>>, vector<1x8x8xf32>
    %822 = vector.shape_cast %821 : vector<1x8x8xf32> to vector<8x8xf32>
    %c5_303 = arith.constant 5 : index
    %823 = memref.load %arg8[%c5_303] : memref<144xf32, #tpu.memory_space<smem>>
    %824 = vector.broadcast %823 : f32 to vector<8x8xf32>
    %825 = arith.mulf %824, %822 : vector<8x8xf32>
    %826 = arith.addf %808, %825 : vector<8x8xf32>
    %c41_304 = arith.constant 41 : index
    %827 = memref.load %arg8[%c41_304] : memref<144xf32, #tpu.memory_space<smem>>
    %828 = vector.broadcast %827 : f32 to vector<8x8xf32>
    %829 = arith.mulf %828, %822 : vector<8x8xf32>
    %830 = arith.addf %812, %829 : vector<8x8xf32>
    %c77 = arith.constant 77 : index
    %831 = memref.load %arg8[%c77] : memref<144xf32, #tpu.memory_space<smem>>
    %832 = vector.broadcast %831 : f32 to vector<8x8xf32>
    %833 = arith.mulf %832, %822 : vector<8x8xf32>
    %834 = arith.addf %816, %833 : vector<8x8xf32>
    %c113 = arith.constant 113 : index
    %835 = memref.load %arg8[%c113] : memref<144xf32, #tpu.memory_space<smem>>
    %836 = vector.broadcast %835 : f32 to vector<8x8xf32>
    %837 = arith.mulf %836, %822 : vector<8x8xf32>
    %838 = arith.addf %820, %837 : vector<8x8xf32>
    %c0_305 = arith.constant 0 : index
    %c2_306 = arith.constant 2 : index
    %c0_307 = arith.constant 0 : index
    %839 = vector.load %arg16[%c0_305, %c2_306, %c0_307] : memref<4x10x10xf32, #tpu.memory_space<vmem>>, vector<1x8x8xf32>
    %840 = vector.shape_cast %839 : vector<1x8x8xf32> to vector<8x8xf32>
    %c6_308 = arith.constant 6 : index
    %841 = memref.load %arg8[%c6_308] : memref<144xf32, #tpu.memory_space<smem>>
    %842 = vector.broadcast %841 : f32 to vector<8x8xf32>
    %843 = arith.mulf %842, %840 : vector<8x8xf32>
    %844 = arith.addf %826, %843 : vector<8x8xf32>
    %c42_309 = arith.constant 42 : index
    %845 = memref.load %arg8[%c42_309] : memref<144xf32, #tpu.memory_space<smem>>
    %846 = vector.broadcast %845 : f32 to vector<8x8xf32>
    %847 = arith.mulf %846, %840 : vector<8x8xf32>
    %848 = arith.addf %830, %847 : vector<8x8xf32>
    %c78 = arith.constant 78 : index
    %849 = memref.load %arg8[%c78] : memref<144xf32, #tpu.memory_space<smem>>
    %850 = vector.broadcast %849 : f32 to vector<8x8xf32>
    %851 = arith.mulf %850, %840 : vector<8x8xf32>
    %852 = arith.addf %834, %851 : vector<8x8xf32>
    %c114 = arith.constant 114 : index
    %853 = memref.load %arg8[%c114] : memref<144xf32, #tpu.memory_space<smem>>
    %854 = vector.broadcast %853 : f32 to vector<8x8xf32>
    %855 = arith.mulf %854, %840 : vector<8x8xf32>
    %856 = arith.addf %838, %855 : vector<8x8xf32>
    %c0_310 = arith.constant 0 : index
    %c2_311 = arith.constant 2 : index
    %c1_312 = arith.constant 1 : index
    %857 = vector.load %arg16[%c0_310, %c2_311, %c1_312] : memref<4x10x10xf32, #tpu.memory_space<vmem>>, vector<1x8x8xf32>
    %858 = vector.shape_cast %857 : vector<1x8x8xf32> to vector<8x8xf32>
    %c7_313 = arith.constant 7 : index
    %859 = memref.load %arg8[%c7_313] : memref<144xf32, #tpu.memory_space<smem>>
    %860 = vector.broadcast %859 : f32 to vector<8x8xf32>
    %861 = arith.mulf %860, %858 : vector<8x8xf32>
    %862 = arith.addf %844, %861 : vector<8x8xf32>
    %c43_314 = arith.constant 43 : index
    %863 = memref.load %arg8[%c43_314] : memref<144xf32, #tpu.memory_space<smem>>
    %864 = vector.broadcast %863 : f32 to vector<8x8xf32>
    %865 = arith.mulf %864, %858 : vector<8x8xf32>
    %866 = arith.addf %848, %865 : vector<8x8xf32>
    %c79 = arith.constant 79 : index
    %867 = memref.load %arg8[%c79] : memref<144xf32, #tpu.memory_space<smem>>
    %868 = vector.broadcast %867 : f32 to vector<8x8xf32>
    %869 = arith.mulf %868, %858 : vector<8x8xf32>
    %870 = arith.addf %852, %869 : vector<8x8xf32>
    %c115 = arith.constant 115 : index
    %871 = memref.load %arg8[%c115] : memref<144xf32, #tpu.memory_space<smem>>
    %872 = vector.broadcast %871 : f32 to vector<8x8xf32>
    %873 = arith.mulf %872, %858 : vector<8x8xf32>
    %874 = arith.addf %856, %873 : vector<8x8xf32>
    %c0_315 = arith.constant 0 : index
    %c2_316 = arith.constant 2 : index
    %c2_317 = arith.constant 2 : index
    %875 = vector.load %arg16[%c0_315, %c2_316, %c2_317] : memref<4x10x10xf32, #tpu.memory_space<vmem>>, vector<1x8x8xf32>
    %876 = vector.shape_cast %875 : vector<1x8x8xf32> to vector<8x8xf32>
    %c8_318 = arith.constant 8 : index
    %877 = memref.load %arg8[%c8_318] : memref<144xf32, #tpu.memory_space<smem>>
    %878 = vector.broadcast %877 : f32 to vector<8x8xf32>
    %879 = arith.mulf %878, %876 : vector<8x8xf32>
    %880 = arith.addf %862, %879 : vector<8x8xf32>
    %c44_319 = arith.constant 44 : index
    %881 = memref.load %arg8[%c44_319] : memref<144xf32, #tpu.memory_space<smem>>
    %882 = vector.broadcast %881 : f32 to vector<8x8xf32>
    %883 = arith.mulf %882, %876 : vector<8x8xf32>
    %884 = arith.addf %866, %883 : vector<8x8xf32>
    %c80 = arith.constant 80 : index
    %885 = memref.load %arg8[%c80] : memref<144xf32, #tpu.memory_space<smem>>
    %886 = vector.broadcast %885 : f32 to vector<8x8xf32>
    %887 = arith.mulf %886, %876 : vector<8x8xf32>
    %888 = arith.addf %870, %887 : vector<8x8xf32>
    %c116 = arith.constant 116 : index
    %889 = memref.load %arg8[%c116] : memref<144xf32, #tpu.memory_space<smem>>
    %890 = vector.broadcast %889 : f32 to vector<8x8xf32>
    %891 = arith.mulf %890, %876 : vector<8x8xf32>
    %892 = arith.addf %874, %891 : vector<8x8xf32>
    %c1_320 = arith.constant 1 : index
    %c0_321 = arith.constant 0 : index
    %c0_322 = arith.constant 0 : index
    %893 = vector.load %arg16[%c1_320, %c0_321, %c0_322] : memref<4x10x10xf32, #tpu.memory_space<vmem>>, vector<1x8x8xf32>
    %894 = vector.shape_cast %893 : vector<1x8x8xf32> to vector<8x8xf32>
    %c9_323 = arith.constant 9 : index
    %895 = memref.load %arg8[%c9_323] : memref<144xf32, #tpu.memory_space<smem>>
    %896 = vector.broadcast %895 : f32 to vector<8x8xf32>
    %897 = arith.mulf %896, %894 : vector<8x8xf32>
    %898 = arith.addf %880, %897 : vector<8x8xf32>
    %c45_324 = arith.constant 45 : index
    %899 = memref.load %arg8[%c45_324] : memref<144xf32, #tpu.memory_space<smem>>
    %900 = vector.broadcast %899 : f32 to vector<8x8xf32>
    %901 = arith.mulf %900, %894 : vector<8x8xf32>
    %902 = arith.addf %884, %901 : vector<8x8xf32>
    %c81 = arith.constant 81 : index
    %903 = memref.load %arg8[%c81] : memref<144xf32, #tpu.memory_space<smem>>
    %904 = vector.broadcast %903 : f32 to vector<8x8xf32>
    %905 = arith.mulf %904, %894 : vector<8x8xf32>
    %906 = arith.addf %888, %905 : vector<8x8xf32>
    %c117 = arith.constant 117 : index
    %907 = memref.load %arg8[%c117] : memref<144xf32, #tpu.memory_space<smem>>
    %908 = vector.broadcast %907 : f32 to vector<8x8xf32>
    %909 = arith.mulf %908, %894 : vector<8x8xf32>
    %910 = arith.addf %892, %909 : vector<8x8xf32>
    %c1_325 = arith.constant 1 : index
    %c0_326 = arith.constant 0 : index
    %c1_327 = arith.constant 1 : index
    %911 = vector.load %arg16[%c1_325, %c0_326, %c1_327] : memref<4x10x10xf32, #tpu.memory_space<vmem>>, vector<1x8x8xf32>
    %912 = vector.shape_cast %911 : vector<1x8x8xf32> to vector<8x8xf32>
    %c10_328 = arith.constant 10 : index
    %913 = memref.load %arg8[%c10_328] : memref<144xf32, #tpu.memory_space<smem>>
    %914 = vector.broadcast %913 : f32 to vector<8x8xf32>
    %915 = arith.mulf %914, %912 : vector<8x8xf32>
    %916 = arith.addf %898, %915 : vector<8x8xf32>
    %c46_329 = arith.constant 46 : index
    %917 = memref.load %arg8[%c46_329] : memref<144xf32, #tpu.memory_space<smem>>
    %918 = vector.broadcast %917 : f32 to vector<8x8xf32>
    %919 = arith.mulf %918, %912 : vector<8x8xf32>
    %920 = arith.addf %902, %919 : vector<8x8xf32>
    %c82 = arith.constant 82 : index
    %921 = memref.load %arg8[%c82] : memref<144xf32, #tpu.memory_space<smem>>
    %922 = vector.broadcast %921 : f32 to vector<8x8xf32>
    %923 = arith.mulf %922, %912 : vector<8x8xf32>
    %924 = arith.addf %906, %923 : vector<8x8xf32>
    %c118 = arith.constant 118 : index
    %925 = memref.load %arg8[%c118] : memref<144xf32, #tpu.memory_space<smem>>
    %926 = vector.broadcast %925 : f32 to vector<8x8xf32>
    %927 = arith.mulf %926, %912 : vector<8x8xf32>
    %928 = arith.addf %910, %927 : vector<8x8xf32>
    %c1_330 = arith.constant 1 : index
    %c0_331 = arith.constant 0 : index
    %c2_332 = arith.constant 2 : index
    %929 = vector.load %arg16[%c1_330, %c0_331, %c2_332] : memref<4x10x10xf32, #tpu.memory_space<vmem>>, vector<1x8x8xf32>
    %930 = vector.shape_cast %929 : vector<1x8x8xf32> to vector<8x8xf32>
    %c11_333 = arith.constant 11 : index
    %931 = memref.load %arg8[%c11_333] : memref<144xf32, #tpu.memory_space<smem>>
    %932 = vector.broadcast %931 : f32 to vector<8x8xf32>
    %933 = arith.mulf %932, %930 : vector<8x8xf32>
    %934 = arith.addf %916, %933 : vector<8x8xf32>
    %c47_334 = arith.constant 47 : index
    %935 = memref.load %arg8[%c47_334] : memref<144xf32, #tpu.memory_space<smem>>
    %936 = vector.broadcast %935 : f32 to vector<8x8xf32>
    %937 = arith.mulf %936, %930 : vector<8x8xf32>
    %938 = arith.addf %920, %937 : vector<8x8xf32>
    %c83 = arith.constant 83 : index
    %939 = memref.load %arg8[%c83] : memref<144xf32, #tpu.memory_space<smem>>
    %940 = vector.broadcast %939 : f32 to vector<8x8xf32>
    %941 = arith.mulf %940, %930 : vector<8x8xf32>
    %942 = arith.addf %924, %941 : vector<8x8xf32>
    %c119 = arith.constant 119 : index
    %943 = memref.load %arg8[%c119] : memref<144xf32, #tpu.memory_space<smem>>
    %944 = vector.broadcast %943 : f32 to vector<8x8xf32>
    %945 = arith.mulf %944, %930 : vector<8x8xf32>
    %946 = arith.addf %928, %945 : vector<8x8xf32>
    %c1_335 = arith.constant 1 : index
    %c1_336 = arith.constant 1 : index
    %c0_337 = arith.constant 0 : index
    %947 = vector.load %arg16[%c1_335, %c1_336, %c0_337] : memref<4x10x10xf32, #tpu.memory_space<vmem>>, vector<1x8x8xf32>
    %948 = vector.shape_cast %947 : vector<1x8x8xf32> to vector<8x8xf32>
    %c12_338 = arith.constant 12 : index
    %949 = memref.load %arg8[%c12_338] : memref<144xf32, #tpu.memory_space<smem>>
    %950 = vector.broadcast %949 : f32 to vector<8x8xf32>
    %951 = arith.mulf %950, %948 : vector<8x8xf32>
    %952 = arith.addf %934, %951 : vector<8x8xf32>
    %c48_339 = arith.constant 48 : index
    %953 = memref.load %arg8[%c48_339] : memref<144xf32, #tpu.memory_space<smem>>
    %954 = vector.broadcast %953 : f32 to vector<8x8xf32>
    %955 = arith.mulf %954, %948 : vector<8x8xf32>
    %956 = arith.addf %938, %955 : vector<8x8xf32>
    %c84 = arith.constant 84 : index
    %957 = memref.load %arg8[%c84] : memref<144xf32, #tpu.memory_space<smem>>
    %958 = vector.broadcast %957 : f32 to vector<8x8xf32>
    %959 = arith.mulf %958, %948 : vector<8x8xf32>
    %960 = arith.addf %942, %959 : vector<8x8xf32>
    %c120 = arith.constant 120 : index
    %961 = memref.load %arg8[%c120] : memref<144xf32, #tpu.memory_space<smem>>
    %962 = vector.broadcast %961 : f32 to vector<8x8xf32>
    %963 = arith.mulf %962, %948 : vector<8x8xf32>
    %964 = arith.addf %946, %963 : vector<8x8xf32>
    %c1_340 = arith.constant 1 : index
    %c1_341 = arith.constant 1 : index
    %c1_342 = arith.constant 1 : index
    %965 = vector.load %arg16[%c1_340, %c1_341, %c1_342] : memref<4x10x10xf32, #tpu.memory_space<vmem>>, vector<1x8x8xf32>
    %966 = vector.shape_cast %965 : vector<1x8x8xf32> to vector<8x8xf32>
    %c13_343 = arith.constant 13 : index
    %967 = memref.load %arg8[%c13_343] : memref<144xf32, #tpu.memory_space<smem>>
    %968 = vector.broadcast %967 : f32 to vector<8x8xf32>
    %969 = arith.mulf %968, %966 : vector<8x8xf32>
    %970 = arith.addf %952, %969 : vector<8x8xf32>
    %c49_344 = arith.constant 49 : index
    %971 = memref.load %arg8[%c49_344] : memref<144xf32, #tpu.memory_space<smem>>
    %972 = vector.broadcast %971 : f32 to vector<8x8xf32>
    %973 = arith.mulf %972, %966 : vector<8x8xf32>
    %974 = arith.addf %956, %973 : vector<8x8xf32>
    %c85 = arith.constant 85 : index
    %975 = memref.load %arg8[%c85] : memref<144xf32, #tpu.memory_space<smem>>
    %976 = vector.broadcast %975 : f32 to vector<8x8xf32>
    %977 = arith.mulf %976, %966 : vector<8x8xf32>
    %978 = arith.addf %960, %977 : vector<8x8xf32>
    %c121 = arith.constant 121 : index
    %979 = memref.load %arg8[%c121] : memref<144xf32, #tpu.memory_space<smem>>
    %980 = vector.broadcast %979 : f32 to vector<8x8xf32>
    %981 = arith.mulf %980, %966 : vector<8x8xf32>
    %982 = arith.addf %964, %981 : vector<8x8xf32>
    %c1_345 = arith.constant 1 : index
    %c1_346 = arith.constant 1 : index
    %c2_347 = arith.constant 2 : index
    %983 = vector.load %arg16[%c1_345, %c1_346, %c2_347] : memref<4x10x10xf32, #tpu.memory_space<vmem>>, vector<1x8x8xf32>
    %984 = vector.shape_cast %983 : vector<1x8x8xf32> to vector<8x8xf32>
    %c14_348 = arith.constant 14 : index
    %985 = memref.load %arg8[%c14_348] : memref<144xf32, #tpu.memory_space<smem>>
    %986 = vector.broadcast %985 : f32 to vector<8x8xf32>
    %987 = arith.mulf %986, %984 : vector<8x8xf32>
    %988 = arith.addf %970, %987 : vector<8x8xf32>
    %c50_349 = arith.constant 50 : index
    %989 = memref.load %arg8[%c50_349] : memref<144xf32, #tpu.memory_space<smem>>
    %990 = vector.broadcast %989 : f32 to vector<8x8xf32>
    %991 = arith.mulf %990, %984 : vector<8x8xf32>
    %992 = arith.addf %974, %991 : vector<8x8xf32>
    %c86 = arith.constant 86 : index
    %993 = memref.load %arg8[%c86] : memref<144xf32, #tpu.memory_space<smem>>
    %994 = vector.broadcast %993 : f32 to vector<8x8xf32>
    %995 = arith.mulf %994, %984 : vector<8x8xf32>
    %996 = arith.addf %978, %995 : vector<8x8xf32>
    %c122 = arith.constant 122 : index
    %997 = memref.load %arg8[%c122] : memref<144xf32, #tpu.memory_space<smem>>
    %998 = vector.broadcast %997 : f32 to vector<8x8xf32>
    %999 = arith.mulf %998, %984 : vector<8x8xf32>
    %1000 = arith.addf %982, %999 : vector<8x8xf32>
    %c1_350 = arith.constant 1 : index
    %c2_351 = arith.constant 2 : index
    %c0_352 = arith.constant 0 : index
    %1001 = vector.load %arg16[%c1_350, %c2_351, %c0_352] : memref<4x10x10xf32, #tpu.memory_space<vmem>>, vector<1x8x8xf32>
    %1002 = vector.shape_cast %1001 : vector<1x8x8xf32> to vector<8x8xf32>
    %c15_353 = arith.constant 15 : index
    %1003 = memref.load %arg8[%c15_353] : memref<144xf32, #tpu.memory_space<smem>>
    %1004 = vector.broadcast %1003 : f32 to vector<8x8xf32>
    %1005 = arith.mulf %1004, %1002 : vector<8x8xf32>
    %1006 = arith.addf %988, %1005 : vector<8x8xf32>
    %c51_354 = arith.constant 51 : index
    %1007 = memref.load %arg8[%c51_354] : memref<144xf32, #tpu.memory_space<smem>>
    %1008 = vector.broadcast %1007 : f32 to vector<8x8xf32>
    %1009 = arith.mulf %1008, %1002 : vector<8x8xf32>
    %1010 = arith.addf %992, %1009 : vector<8x8xf32>
    %c87 = arith.constant 87 : index
    %1011 = memref.load %arg8[%c87] : memref<144xf32, #tpu.memory_space<smem>>
    %1012 = vector.broadcast %1011 : f32 to vector<8x8xf32>
    %1013 = arith.mulf %1012, %1002 : vector<8x8xf32>
    %1014 = arith.addf %996, %1013 : vector<8x8xf32>
    %c123 = arith.constant 123 : index
    %1015 = memref.load %arg8[%c123] : memref<144xf32, #tpu.memory_space<smem>>
    %1016 = vector.broadcast %1015 : f32 to vector<8x8xf32>
    %1017 = arith.mulf %1016, %1002 : vector<8x8xf32>
    %1018 = arith.addf %1000, %1017 : vector<8x8xf32>
    %c1_355 = arith.constant 1 : index
    %c2_356 = arith.constant 2 : index
    %c1_357 = arith.constant 1 : index
    %1019 = vector.load %arg16[%c1_355, %c2_356, %c1_357] : memref<4x10x10xf32, #tpu.memory_space<vmem>>, vector<1x8x8xf32>
    %1020 = vector.shape_cast %1019 : vector<1x8x8xf32> to vector<8x8xf32>
    %c16_358 = arith.constant 16 : index
    %1021 = memref.load %arg8[%c16_358] : memref<144xf32, #tpu.memory_space<smem>>
    %1022 = vector.broadcast %1021 : f32 to vector<8x8xf32>
    %1023 = arith.mulf %1022, %1020 : vector<8x8xf32>
    %1024 = arith.addf %1006, %1023 : vector<8x8xf32>
    %c52_359 = arith.constant 52 : index
    %1025 = memref.load %arg8[%c52_359] : memref<144xf32, #tpu.memory_space<smem>>
    %1026 = vector.broadcast %1025 : f32 to vector<8x8xf32>
    %1027 = arith.mulf %1026, %1020 : vector<8x8xf32>
    %1028 = arith.addf %1010, %1027 : vector<8x8xf32>
    %c88 = arith.constant 88 : index
    %1029 = memref.load %arg8[%c88] : memref<144xf32, #tpu.memory_space<smem>>
    %1030 = vector.broadcast %1029 : f32 to vector<8x8xf32>
    %1031 = arith.mulf %1030, %1020 : vector<8x8xf32>
    %1032 = arith.addf %1014, %1031 : vector<8x8xf32>
    %c124 = arith.constant 124 : index
    %1033 = memref.load %arg8[%c124] : memref<144xf32, #tpu.memory_space<smem>>
    %1034 = vector.broadcast %1033 : f32 to vector<8x8xf32>
    %1035 = arith.mulf %1034, %1020 : vector<8x8xf32>
    %1036 = arith.addf %1018, %1035 : vector<8x8xf32>
    %c1_360 = arith.constant 1 : index
    %c2_361 = arith.constant 2 : index
    %c2_362 = arith.constant 2 : index
    %1037 = vector.load %arg16[%c1_360, %c2_361, %c2_362] : memref<4x10x10xf32, #tpu.memory_space<vmem>>, vector<1x8x8xf32>
    %1038 = vector.shape_cast %1037 : vector<1x8x8xf32> to vector<8x8xf32>
    %c17_363 = arith.constant 17 : index
    %1039 = memref.load %arg8[%c17_363] : memref<144xf32, #tpu.memory_space<smem>>
    %1040 = vector.broadcast %1039 : f32 to vector<8x8xf32>
    %1041 = arith.mulf %1040, %1038 : vector<8x8xf32>
    %1042 = arith.addf %1024, %1041 : vector<8x8xf32>
    %c53_364 = arith.constant 53 : index
    %1043 = memref.load %arg8[%c53_364] : memref<144xf32, #tpu.memory_space<smem>>
    %1044 = vector.broadcast %1043 : f32 to vector<8x8xf32>
    %1045 = arith.mulf %1044, %1038 : vector<8x8xf32>
    %1046 = arith.addf %1028, %1045 : vector<8x8xf32>
    %c89 = arith.constant 89 : index
    %1047 = memref.load %arg8[%c89] : memref<144xf32, #tpu.memory_space<smem>>
    %1048 = vector.broadcast %1047 : f32 to vector<8x8xf32>
    %1049 = arith.mulf %1048, %1038 : vector<8x8xf32>
    %1050 = arith.addf %1032, %1049 : vector<8x8xf32>
    %c125 = arith.constant 125 : index
    %1051 = memref.load %arg8[%c125] : memref<144xf32, #tpu.memory_space<smem>>
    %1052 = vector.broadcast %1051 : f32 to vector<8x8xf32>
    %1053 = arith.mulf %1052, %1038 : vector<8x8xf32>
    %1054 = arith.addf %1036, %1053 : vector<8x8xf32>
    %c2_365 = arith.constant 2 : index
    %c0_366 = arith.constant 0 : index
    %c0_367 = arith.constant 0 : index
    %1055 = vector.load %arg16[%c2_365, %c0_366, %c0_367] : memref<4x10x10xf32, #tpu.memory_space<vmem>>, vector<1x8x8xf32>
    %1056 = vector.shape_cast %1055 : vector<1x8x8xf32> to vector<8x8xf32>
    %c18_368 = arith.constant 18 : index
    %1057 = memref.load %arg8[%c18_368] : memref<144xf32, #tpu.memory_space<smem>>
    %1058 = vector.broadcast %1057 : f32 to vector<8x8xf32>
    %1059 = arith.mulf %1058, %1056 : vector<8x8xf32>
    %1060 = arith.addf %1042, %1059 : vector<8x8xf32>
    %c54_369 = arith.constant 54 : index
    %1061 = memref.load %arg8[%c54_369] : memref<144xf32, #tpu.memory_space<smem>>
    %1062 = vector.broadcast %1061 : f32 to vector<8x8xf32>
    %1063 = arith.mulf %1062, %1056 : vector<8x8xf32>
    %1064 = arith.addf %1046, %1063 : vector<8x8xf32>
    %c90 = arith.constant 90 : index
    %1065 = memref.load %arg8[%c90] : memref<144xf32, #tpu.memory_space<smem>>
    %1066 = vector.broadcast %1065 : f32 to vector<8x8xf32>
    %1067 = arith.mulf %1066, %1056 : vector<8x8xf32>
    %1068 = arith.addf %1050, %1067 : vector<8x8xf32>
    %c126 = arith.constant 126 : index
    %1069 = memref.load %arg8[%c126] : memref<144xf32, #tpu.memory_space<smem>>
    %1070 = vector.broadcast %1069 : f32 to vector<8x8xf32>
    %1071 = arith.mulf %1070, %1056 : vector<8x8xf32>
    %1072 = arith.addf %1054, %1071 : vector<8x8xf32>
    %c2_370 = arith.constant 2 : index
    %c0_371 = arith.constant 0 : index
    %c1_372 = arith.constant 1 : index
    %1073 = vector.load %arg16[%c2_370, %c0_371, %c1_372] : memref<4x10x10xf32, #tpu.memory_space<vmem>>, vector<1x8x8xf32>
    %1074 = vector.shape_cast %1073 : vector<1x8x8xf32> to vector<8x8xf32>
    %c19_373 = arith.constant 19 : index
    %1075 = memref.load %arg8[%c19_373] : memref<144xf32, #tpu.memory_space<smem>>
    %1076 = vector.broadcast %1075 : f32 to vector<8x8xf32>
    %1077 = arith.mulf %1076, %1074 : vector<8x8xf32>
    %1078 = arith.addf %1060, %1077 : vector<8x8xf32>
    %c55_374 = arith.constant 55 : index
    %1079 = memref.load %arg8[%c55_374] : memref<144xf32, #tpu.memory_space<smem>>
    %1080 = vector.broadcast %1079 : f32 to vector<8x8xf32>
    %1081 = arith.mulf %1080, %1074 : vector<8x8xf32>
    %1082 = arith.addf %1064, %1081 : vector<8x8xf32>
    %c91 = arith.constant 91 : index
    %1083 = memref.load %arg8[%c91] : memref<144xf32, #tpu.memory_space<smem>>
    %1084 = vector.broadcast %1083 : f32 to vector<8x8xf32>
    %1085 = arith.mulf %1084, %1074 : vector<8x8xf32>
    %1086 = arith.addf %1068, %1085 : vector<8x8xf32>
    %c127 = arith.constant 127 : index
    %1087 = memref.load %arg8[%c127] : memref<144xf32, #tpu.memory_space<smem>>
    %1088 = vector.broadcast %1087 : f32 to vector<8x8xf32>
    %1089 = arith.mulf %1088, %1074 : vector<8x8xf32>
    %1090 = arith.addf %1072, %1089 : vector<8x8xf32>
    %c2_375 = arith.constant 2 : index
    %c0_376 = arith.constant 0 : index
    %c2_377 = arith.constant 2 : index
    %1091 = vector.load %arg16[%c2_375, %c0_376, %c2_377] : memref<4x10x10xf32, #tpu.memory_space<vmem>>, vector<1x8x8xf32>
    %1092 = vector.shape_cast %1091 : vector<1x8x8xf32> to vector<8x8xf32>
    %c20_378 = arith.constant 20 : index
    %1093 = memref.load %arg8[%c20_378] : memref<144xf32, #tpu.memory_space<smem>>
    %1094 = vector.broadcast %1093 : f32 to vector<8x8xf32>
    %1095 = arith.mulf %1094, %1092 : vector<8x8xf32>
    %1096 = arith.addf %1078, %1095 : vector<8x8xf32>
    %c56_379 = arith.constant 56 : index
    %1097 = memref.load %arg8[%c56_379] : memref<144xf32, #tpu.memory_space<smem>>
    %1098 = vector.broadcast %1097 : f32 to vector<8x8xf32>
    %1099 = arith.mulf %1098, %1092 : vector<8x8xf32>
    %1100 = arith.addf %1082, %1099 : vector<8x8xf32>
    %c92 = arith.constant 92 : index
    %1101 = memref.load %arg8[%c92] : memref<144xf32, #tpu.memory_space<smem>>
    %1102 = vector.broadcast %1101 : f32 to vector<8x8xf32>
    %1103 = arith.mulf %1102, %1092 : vector<8x8xf32>
    %1104 = arith.addf %1086, %1103 : vector<8x8xf32>
    %c128 = arith.constant 128 : index
    %1105 = memref.load %arg8[%c128] : memref<144xf32, #tpu.memory_space<smem>>
    %1106 = vector.broadcast %1105 : f32 to vector<8x8xf32>
    %1107 = arith.mulf %1106, %1092 : vector<8x8xf32>
    %1108 = arith.addf %1090, %1107 : vector<8x8xf32>
    %c2_380 = arith.constant 2 : index
    %c1_381 = arith.constant 1 : index
    %c0_382 = arith.constant 0 : index
    %1109 = vector.load %arg16[%c2_380, %c1_381, %c0_382] : memref<4x10x10xf32, #tpu.memory_space<vmem>>, vector<1x8x8xf32>
    %1110 = vector.shape_cast %1109 : vector<1x8x8xf32> to vector<8x8xf32>
    %c21_383 = arith.constant 21 : index
    %1111 = memref.load %arg8[%c21_383] : memref<144xf32, #tpu.memory_space<smem>>
    %1112 = vector.broadcast %1111 : f32 to vector<8x8xf32>
    %1113 = arith.mulf %1112, %1110 : vector<8x8xf32>
    %1114 = arith.addf %1096, %1113 : vector<8x8xf32>
    %c57_384 = arith.constant 57 : index
    %1115 = memref.load %arg8[%c57_384] : memref<144xf32, #tpu.memory_space<smem>>
    %1116 = vector.broadcast %1115 : f32 to vector<8x8xf32>
    %1117 = arith.mulf %1116, %1110 : vector<8x8xf32>
    %1118 = arith.addf %1100, %1117 : vector<8x8xf32>
    %c93 = arith.constant 93 : index
    %1119 = memref.load %arg8[%c93] : memref<144xf32, #tpu.memory_space<smem>>
    %1120 = vector.broadcast %1119 : f32 to vector<8x8xf32>
    %1121 = arith.mulf %1120, %1110 : vector<8x8xf32>
    %1122 = arith.addf %1104, %1121 : vector<8x8xf32>
    %c129 = arith.constant 129 : index
    %1123 = memref.load %arg8[%c129] : memref<144xf32, #tpu.memory_space<smem>>
    %1124 = vector.broadcast %1123 : f32 to vector<8x8xf32>
    %1125 = arith.mulf %1124, %1110 : vector<8x8xf32>
    %1126 = arith.addf %1108, %1125 : vector<8x8xf32>
    %c2_385 = arith.constant 2 : index
    %c1_386 = arith.constant 1 : index
    %c1_387 = arith.constant 1 : index
    %1127 = vector.load %arg16[%c2_385, %c1_386, %c1_387] : memref<4x10x10xf32, #tpu.memory_space<vmem>>, vector<1x8x8xf32>
    %1128 = vector.shape_cast %1127 : vector<1x8x8xf32> to vector<8x8xf32>
    %c22_388 = arith.constant 22 : index
    %1129 = memref.load %arg8[%c22_388] : memref<144xf32, #tpu.memory_space<smem>>
    %1130 = vector.broadcast %1129 : f32 to vector<8x8xf32>
    %1131 = arith.mulf %1130, %1128 : vector<8x8xf32>
    %1132 = arith.addf %1114, %1131 : vector<8x8xf32>
    %c58_389 = arith.constant 58 : index
    %1133 = memref.load %arg8[%c58_389] : memref<144xf32, #tpu.memory_space<smem>>
    %1134 = vector.broadcast %1133 : f32 to vector<8x8xf32>
    %1135 = arith.mulf %1134, %1128 : vector<8x8xf32>
    %1136 = arith.addf %1118, %1135 : vector<8x8xf32>
    %c94 = arith.constant 94 : index
    %1137 = memref.load %arg8[%c94] : memref<144xf32, #tpu.memory_space<smem>>
    %1138 = vector.broadcast %1137 : f32 to vector<8x8xf32>
    %1139 = arith.mulf %1138, %1128 : vector<8x8xf32>
    %1140 = arith.addf %1122, %1139 : vector<8x8xf32>
    %c130 = arith.constant 130 : index
    %1141 = memref.load %arg8[%c130] : memref<144xf32, #tpu.memory_space<smem>>
    %1142 = vector.broadcast %1141 : f32 to vector<8x8xf32>
    %1143 = arith.mulf %1142, %1128 : vector<8x8xf32>
    %1144 = arith.addf %1126, %1143 : vector<8x8xf32>
    %c2_390 = arith.constant 2 : index
    %c1_391 = arith.constant 1 : index
    %c2_392 = arith.constant 2 : index
    %1145 = vector.load %arg16[%c2_390, %c1_391, %c2_392] : memref<4x10x10xf32, #tpu.memory_space<vmem>>, vector<1x8x8xf32>
    %1146 = vector.shape_cast %1145 : vector<1x8x8xf32> to vector<8x8xf32>
    %c23_393 = arith.constant 23 : index
    %1147 = memref.load %arg8[%c23_393] : memref<144xf32, #tpu.memory_space<smem>>
    %1148 = vector.broadcast %1147 : f32 to vector<8x8xf32>
    %1149 = arith.mulf %1148, %1146 : vector<8x8xf32>
    %1150 = arith.addf %1132, %1149 : vector<8x8xf32>
    %c59_394 = arith.constant 59 : index
    %1151 = memref.load %arg8[%c59_394] : memref<144xf32, #tpu.memory_space<smem>>
    %1152 = vector.broadcast %1151 : f32 to vector<8x8xf32>
    %1153 = arith.mulf %1152, %1146 : vector<8x8xf32>
    %1154 = arith.addf %1136, %1153 : vector<8x8xf32>
    %c95 = arith.constant 95 : index
    %1155 = memref.load %arg8[%c95] : memref<144xf32, #tpu.memory_space<smem>>
    %1156 = vector.broadcast %1155 : f32 to vector<8x8xf32>
    %1157 = arith.mulf %1156, %1146 : vector<8x8xf32>
    %1158 = arith.addf %1140, %1157 : vector<8x8xf32>
    %c131 = arith.constant 131 : index
    %1159 = memref.load %arg8[%c131] : memref<144xf32, #tpu.memory_space<smem>>
    %1160 = vector.broadcast %1159 : f32 to vector<8x8xf32>
    %1161 = arith.mulf %1160, %1146 : vector<8x8xf32>
    %1162 = arith.addf %1144, %1161 : vector<8x8xf32>
    %c2_395 = arith.constant 2 : index
    %c2_396 = arith.constant 2 : index
    %c0_397 = arith.constant 0 : index
    %1163 = vector.load %arg16[%c2_395, %c2_396, %c0_397] : memref<4x10x10xf32, #tpu.memory_space<vmem>>, vector<1x8x8xf32>
    %1164 = vector.shape_cast %1163 : vector<1x8x8xf32> to vector<8x8xf32>
    %c24_398 = arith.constant 24 : index
    %1165 = memref.load %arg8[%c24_398] : memref<144xf32, #tpu.memory_space<smem>>
    %1166 = vector.broadcast %1165 : f32 to vector<8x8xf32>
    %1167 = arith.mulf %1166, %1164 : vector<8x8xf32>
    %1168 = arith.addf %1150, %1167 : vector<8x8xf32>
    %c60_399 = arith.constant 60 : index
    %1169 = memref.load %arg8[%c60_399] : memref<144xf32, #tpu.memory_space<smem>>
    %1170 = vector.broadcast %1169 : f32 to vector<8x8xf32>
    %1171 = arith.mulf %1170, %1164 : vector<8x8xf32>
    %1172 = arith.addf %1154, %1171 : vector<8x8xf32>
    %c96 = arith.constant 96 : index
    %1173 = memref.load %arg8[%c96] : memref<144xf32, #tpu.memory_space<smem>>
    %1174 = vector.broadcast %1173 : f32 to vector<8x8xf32>
    %1175 = arith.mulf %1174, %1164 : vector<8x8xf32>
    %1176 = arith.addf %1158, %1175 : vector<8x8xf32>
    %c132 = arith.constant 132 : index
    %1177 = memref.load %arg8[%c132] : memref<144xf32, #tpu.memory_space<smem>>
    %1178 = vector.broadcast %1177 : f32 to vector<8x8xf32>
    %1179 = arith.mulf %1178, %1164 : vector<8x8xf32>
    %1180 = arith.addf %1162, %1179 : vector<8x8xf32>
    %c2_400 = arith.constant 2 : index
    %c2_401 = arith.constant 2 : index
    %c1_402 = arith.constant 1 : index
    %1181 = vector.load %arg16[%c2_400, %c2_401, %c1_402] : memref<4x10x10xf32, #tpu.memory_space<vmem>>, vector<1x8x8xf32>
    %1182 = vector.shape_cast %1181 : vector<1x8x8xf32> to vector<8x8xf32>
    %c25_403 = arith.constant 25 : index
    %1183 = memref.load %arg8[%c25_403] : memref<144xf32, #tpu.memory_space<smem>>
    %1184 = vector.broadcast %1183 : f32 to vector<8x8xf32>
    %1185 = arith.mulf %1184, %1182 : vector<8x8xf32>
    %1186 = arith.addf %1168, %1185 : vector<8x8xf32>
    %c61_404 = arith.constant 61 : index
    %1187 = memref.load %arg8[%c61_404] : memref<144xf32, #tpu.memory_space<smem>>
    %1188 = vector.broadcast %1187 : f32 to vector<8x8xf32>
    %1189 = arith.mulf %1188, %1182 : vector<8x8xf32>
    %1190 = arith.addf %1172, %1189 : vector<8x8xf32>
    %c97 = arith.constant 97 : index
    %1191 = memref.load %arg8[%c97] : memref<144xf32, #tpu.memory_space<smem>>
    %1192 = vector.broadcast %1191 : f32 to vector<8x8xf32>
    %1193 = arith.mulf %1192, %1182 : vector<8x8xf32>
    %1194 = arith.addf %1176, %1193 : vector<8x8xf32>
    %c133 = arith.constant 133 : index
    %1195 = memref.load %arg8[%c133] : memref<144xf32, #tpu.memory_space<smem>>
    %1196 = vector.broadcast %1195 : f32 to vector<8x8xf32>
    %1197 = arith.mulf %1196, %1182 : vector<8x8xf32>
    %1198 = arith.addf %1180, %1197 : vector<8x8xf32>
    %c2_405 = arith.constant 2 : index
    %c2_406 = arith.constant 2 : index
    %c2_407 = arith.constant 2 : index
    %1199 = vector.load %arg16[%c2_405, %c2_406, %c2_407] : memref<4x10x10xf32, #tpu.memory_space<vmem>>, vector<1x8x8xf32>
    %1200 = vector.shape_cast %1199 : vector<1x8x8xf32> to vector<8x8xf32>
    %c26_408 = arith.constant 26 : index
    %1201 = memref.load %arg8[%c26_408] : memref<144xf32, #tpu.memory_space<smem>>
    %1202 = vector.broadcast %1201 : f32 to vector<8x8xf32>
    %1203 = arith.mulf %1202, %1200 : vector<8x8xf32>
    %1204 = arith.addf %1186, %1203 : vector<8x8xf32>
    %c62_409 = arith.constant 62 : index
    %1205 = memref.load %arg8[%c62_409] : memref<144xf32, #tpu.memory_space<smem>>
    %1206 = vector.broadcast %1205 : f32 to vector<8x8xf32>
    %1207 = arith.mulf %1206, %1200 : vector<8x8xf32>
    %1208 = arith.addf %1190, %1207 : vector<8x8xf32>
    %c98 = arith.constant 98 : index
    %1209 = memref.load %arg8[%c98] : memref<144xf32, #tpu.memory_space<smem>>
    %1210 = vector.broadcast %1209 : f32 to vector<8x8xf32>
    %1211 = arith.mulf %1210, %1200 : vector<8x8xf32>
    %1212 = arith.addf %1194, %1211 : vector<8x8xf32>
    %c134 = arith.constant 134 : index
    %1213 = memref.load %arg8[%c134] : memref<144xf32, #tpu.memory_space<smem>>
    %1214 = vector.broadcast %1213 : f32 to vector<8x8xf32>
    %1215 = arith.mulf %1214, %1200 : vector<8x8xf32>
    %1216 = arith.addf %1198, %1215 : vector<8x8xf32>
    %c3_410 = arith.constant 3 : index
    %c0_411 = arith.constant 0 : index
    %c0_412 = arith.constant 0 : index
    %1217 = vector.load %arg16[%c3_410, %c0_411, %c0_412] : memref<4x10x10xf32, #tpu.memory_space<vmem>>, vector<1x8x8xf32>
    %1218 = vector.shape_cast %1217 : vector<1x8x8xf32> to vector<8x8xf32>
    %c27_413 = arith.constant 27 : index
    %1219 = memref.load %arg8[%c27_413] : memref<144xf32, #tpu.memory_space<smem>>
    %1220 = vector.broadcast %1219 : f32 to vector<8x8xf32>
    %1221 = arith.mulf %1220, %1218 : vector<8x8xf32>
    %1222 = arith.addf %1204, %1221 : vector<8x8xf32>
    %c63_414 = arith.constant 63 : index
    %1223 = memref.load %arg8[%c63_414] : memref<144xf32, #tpu.memory_space<smem>>
    %1224 = vector.broadcast %1223 : f32 to vector<8x8xf32>
    %1225 = arith.mulf %1224, %1218 : vector<8x8xf32>
    %1226 = arith.addf %1208, %1225 : vector<8x8xf32>
    %c99 = arith.constant 99 : index
    %1227 = memref.load %arg8[%c99] : memref<144xf32, #tpu.memory_space<smem>>
    %1228 = vector.broadcast %1227 : f32 to vector<8x8xf32>
    %1229 = arith.mulf %1228, %1218 : vector<8x8xf32>
    %1230 = arith.addf %1212, %1229 : vector<8x8xf32>
    %c135 = arith.constant 135 : index
    %1231 = memref.load %arg8[%c135] : memref<144xf32, #tpu.memory_space<smem>>
    %1232 = vector.broadcast %1231 : f32 to vector<8x8xf32>
    %1233 = arith.mulf %1232, %1218 : vector<8x8xf32>
    %1234 = arith.addf %1216, %1233 : vector<8x8xf32>
    %c3_415 = arith.constant 3 : index
    %c0_416 = arith.constant 0 : index
    %c1_417 = arith.constant 1 : index
    %1235 = vector.load %arg16[%c3_415, %c0_416, %c1_417] : memref<4x10x10xf32, #tpu.memory_space<vmem>>, vector<1x8x8xf32>
    %1236 = vector.shape_cast %1235 : vector<1x8x8xf32> to vector<8x8xf32>
    %c28_418 = arith.constant 28 : index
    %1237 = memref.load %arg8[%c28_418] : memref<144xf32, #tpu.memory_space<smem>>
    %1238 = vector.broadcast %1237 : f32 to vector<8x8xf32>
    %1239 = arith.mulf %1238, %1236 : vector<8x8xf32>
    %1240 = arith.addf %1222, %1239 : vector<8x8xf32>
    %c64_419 = arith.constant 64 : index
    %1241 = memref.load %arg8[%c64_419] : memref<144xf32, #tpu.memory_space<smem>>
    %1242 = vector.broadcast %1241 : f32 to vector<8x8xf32>
    %1243 = arith.mulf %1242, %1236 : vector<8x8xf32>
    %1244 = arith.addf %1226, %1243 : vector<8x8xf32>
    %c100 = arith.constant 100 : index
    %1245 = memref.load %arg8[%c100] : memref<144xf32, #tpu.memory_space<smem>>
    %1246 = vector.broadcast %1245 : f32 to vector<8x8xf32>
    %1247 = arith.mulf %1246, %1236 : vector<8x8xf32>
    %1248 = arith.addf %1230, %1247 : vector<8x8xf32>
    %c136 = arith.constant 136 : index
    %1249 = memref.load %arg8[%c136] : memref<144xf32, #tpu.memory_space<smem>>
    %1250 = vector.broadcast %1249 : f32 to vector<8x8xf32>
    %1251 = arith.mulf %1250, %1236 : vector<8x8xf32>
    %1252 = arith.addf %1234, %1251 : vector<8x8xf32>
    %c3_420 = arith.constant 3 : index
    %c0_421 = arith.constant 0 : index
    %c2_422 = arith.constant 2 : index
    %1253 = vector.load %arg16[%c3_420, %c0_421, %c2_422] : memref<4x10x10xf32, #tpu.memory_space<vmem>>, vector<1x8x8xf32>
    %1254 = vector.shape_cast %1253 : vector<1x8x8xf32> to vector<8x8xf32>
    %c29_423 = arith.constant 29 : index
    %1255 = memref.load %arg8[%c29_423] : memref<144xf32, #tpu.memory_space<smem>>
    %1256 = vector.broadcast %1255 : f32 to vector<8x8xf32>
    %1257 = arith.mulf %1256, %1254 : vector<8x8xf32>
    %1258 = arith.addf %1240, %1257 : vector<8x8xf32>
    %c65_424 = arith.constant 65 : index
    %1259 = memref.load %arg8[%c65_424] : memref<144xf32, #tpu.memory_space<smem>>
    %1260 = vector.broadcast %1259 : f32 to vector<8x8xf32>
    %1261 = arith.mulf %1260, %1254 : vector<8x8xf32>
    %1262 = arith.addf %1244, %1261 : vector<8x8xf32>
    %c101 = arith.constant 101 : index
    %1263 = memref.load %arg8[%c101] : memref<144xf32, #tpu.memory_space<smem>>
    %1264 = vector.broadcast %1263 : f32 to vector<8x8xf32>
    %1265 = arith.mulf %1264, %1254 : vector<8x8xf32>
    %1266 = arith.addf %1248, %1265 : vector<8x8xf32>
    %c137 = arith.constant 137 : index
    %1267 = memref.load %arg8[%c137] : memref<144xf32, #tpu.memory_space<smem>>
    %1268 = vector.broadcast %1267 : f32 to vector<8x8xf32>
    %1269 = arith.mulf %1268, %1254 : vector<8x8xf32>
    %1270 = arith.addf %1252, %1269 : vector<8x8xf32>
    %c3_425 = arith.constant 3 : index
    %c1_426 = arith.constant 1 : index
    %c0_427 = arith.constant 0 : index
    %1271 = vector.load %arg16[%c3_425, %c1_426, %c0_427] : memref<4x10x10xf32, #tpu.memory_space<vmem>>, vector<1x8x8xf32>
    %1272 = vector.shape_cast %1271 : vector<1x8x8xf32> to vector<8x8xf32>
    %c30_428 = arith.constant 30 : index
    %1273 = memref.load %arg8[%c30_428] : memref<144xf32, #tpu.memory_space<smem>>
    %1274 = vector.broadcast %1273 : f32 to vector<8x8xf32>
    %1275 = arith.mulf %1274, %1272 : vector<8x8xf32>
    %1276 = arith.addf %1258, %1275 : vector<8x8xf32>
    %c66_429 = arith.constant 66 : index
    %1277 = memref.load %arg8[%c66_429] : memref<144xf32, #tpu.memory_space<smem>>
    %1278 = vector.broadcast %1277 : f32 to vector<8x8xf32>
    %1279 = arith.mulf %1278, %1272 : vector<8x8xf32>
    %1280 = arith.addf %1262, %1279 : vector<8x8xf32>
    %c102 = arith.constant 102 : index
    %1281 = memref.load %arg8[%c102] : memref<144xf32, #tpu.memory_space<smem>>
    %1282 = vector.broadcast %1281 : f32 to vector<8x8xf32>
    %1283 = arith.mulf %1282, %1272 : vector<8x8xf32>
    %1284 = arith.addf %1266, %1283 : vector<8x8xf32>
    %c138 = arith.constant 138 : index
    %1285 = memref.load %arg8[%c138] : memref<144xf32, #tpu.memory_space<smem>>
    %1286 = vector.broadcast %1285 : f32 to vector<8x8xf32>
    %1287 = arith.mulf %1286, %1272 : vector<8x8xf32>
    %1288 = arith.addf %1270, %1287 : vector<8x8xf32>
    %c3_430 = arith.constant 3 : index
    %c1_431 = arith.constant 1 : index
    %c1_432 = arith.constant 1 : index
    %1289 = vector.load %arg16[%c3_430, %c1_431, %c1_432] : memref<4x10x10xf32, #tpu.memory_space<vmem>>, vector<1x8x8xf32>
    %1290 = vector.shape_cast %1289 : vector<1x8x8xf32> to vector<8x8xf32>
    %c31_433 = arith.constant 31 : index
    %1291 = memref.load %arg8[%c31_433] : memref<144xf32, #tpu.memory_space<smem>>
    %1292 = vector.broadcast %1291 : f32 to vector<8x8xf32>
    %1293 = arith.mulf %1292, %1290 : vector<8x8xf32>
    %1294 = arith.addf %1276, %1293 : vector<8x8xf32>
    %c67_434 = arith.constant 67 : index
    %1295 = memref.load %arg8[%c67_434] : memref<144xf32, #tpu.memory_space<smem>>
    %1296 = vector.broadcast %1295 : f32 to vector<8x8xf32>
    %1297 = arith.mulf %1296, %1290 : vector<8x8xf32>
    %1298 = arith.addf %1280, %1297 : vector<8x8xf32>
    %c103 = arith.constant 103 : index
    %1299 = memref.load %arg8[%c103] : memref<144xf32, #tpu.memory_space<smem>>
    %1300 = vector.broadcast %1299 : f32 to vector<8x8xf32>
    %1301 = arith.mulf %1300, %1290 : vector<8x8xf32>
    %1302 = arith.addf %1284, %1301 : vector<8x8xf32>
    %c139 = arith.constant 139 : index
    %1303 = memref.load %arg8[%c139] : memref<144xf32, #tpu.memory_space<smem>>
    %1304 = vector.broadcast %1303 : f32 to vector<8x8xf32>
    %1305 = arith.mulf %1304, %1290 : vector<8x8xf32>
    %1306 = arith.addf %1288, %1305 : vector<8x8xf32>
    %c3_435 = arith.constant 3 : index
    %c1_436 = arith.constant 1 : index
    %c2_437 = arith.constant 2 : index
    %1307 = vector.load %arg16[%c3_435, %c1_436, %c2_437] : memref<4x10x10xf32, #tpu.memory_space<vmem>>, vector<1x8x8xf32>
    %1308 = vector.shape_cast %1307 : vector<1x8x8xf32> to vector<8x8xf32>
    %c32_438 = arith.constant 32 : index
    %1309 = memref.load %arg8[%c32_438] : memref<144xf32, #tpu.memory_space<smem>>
    %1310 = vector.broadcast %1309 : f32 to vector<8x8xf32>
    %1311 = arith.mulf %1310, %1308 : vector<8x8xf32>
    %1312 = arith.addf %1294, %1311 : vector<8x8xf32>
    %c68_439 = arith.constant 68 : index
    %1313 = memref.load %arg8[%c68_439] : memref<144xf32, #tpu.memory_space<smem>>
    %1314 = vector.broadcast %1313 : f32 to vector<8x8xf32>
    %1315 = arith.mulf %1314, %1308 : vector<8x8xf32>
    %1316 = arith.addf %1298, %1315 : vector<8x8xf32>
    %c104 = arith.constant 104 : index
    %1317 = memref.load %arg8[%c104] : memref<144xf32, #tpu.memory_space<smem>>
    %1318 = vector.broadcast %1317 : f32 to vector<8x8xf32>
    %1319 = arith.mulf %1318, %1308 : vector<8x8xf32>
    %1320 = arith.addf %1302, %1319 : vector<8x8xf32>
    %c140 = arith.constant 140 : index
    %1321 = memref.load %arg8[%c140] : memref<144xf32, #tpu.memory_space<smem>>
    %1322 = vector.broadcast %1321 : f32 to vector<8x8xf32>
    %1323 = arith.mulf %1322, %1308 : vector<8x8xf32>
    %1324 = arith.addf %1306, %1323 : vector<8x8xf32>
    %c3_440 = arith.constant 3 : index
    %c2_441 = arith.constant 2 : index
    %c0_442 = arith.constant 0 : index
    %1325 = vector.load %arg16[%c3_440, %c2_441, %c0_442] : memref<4x10x10xf32, #tpu.memory_space<vmem>>, vector<1x8x8xf32>
    %1326 = vector.shape_cast %1325 : vector<1x8x8xf32> to vector<8x8xf32>
    %c33_443 = arith.constant 33 : index
    %1327 = memref.load %arg8[%c33_443] : memref<144xf32, #tpu.memory_space<smem>>
    %1328 = vector.broadcast %1327 : f32 to vector<8x8xf32>
    %1329 = arith.mulf %1328, %1326 : vector<8x8xf32>
    %1330 = arith.addf %1312, %1329 : vector<8x8xf32>
    %c69_444 = arith.constant 69 : index
    %1331 = memref.load %arg8[%c69_444] : memref<144xf32, #tpu.memory_space<smem>>
    %1332 = vector.broadcast %1331 : f32 to vector<8x8xf32>
    %1333 = arith.mulf %1332, %1326 : vector<8x8xf32>
    %1334 = arith.addf %1316, %1333 : vector<8x8xf32>
    %c105 = arith.constant 105 : index
    %1335 = memref.load %arg8[%c105] : memref<144xf32, #tpu.memory_space<smem>>
    %1336 = vector.broadcast %1335 : f32 to vector<8x8xf32>
    %1337 = arith.mulf %1336, %1326 : vector<8x8xf32>
    %1338 = arith.addf %1320, %1337 : vector<8x8xf32>
    %c141 = arith.constant 141 : index
    %1339 = memref.load %arg8[%c141] : memref<144xf32, #tpu.memory_space<smem>>
    %1340 = vector.broadcast %1339 : f32 to vector<8x8xf32>
    %1341 = arith.mulf %1340, %1326 : vector<8x8xf32>
    %1342 = arith.addf %1324, %1341 : vector<8x8xf32>
    %c3_445 = arith.constant 3 : index
    %c2_446 = arith.constant 2 : index
    %c1_447 = arith.constant 1 : index
    %1343 = vector.load %arg16[%c3_445, %c2_446, %c1_447] : memref<4x10x10xf32, #tpu.memory_space<vmem>>, vector<1x8x8xf32>
    %1344 = vector.shape_cast %1343 : vector<1x8x8xf32> to vector<8x8xf32>
    %c34_448 = arith.constant 34 : index
    %1345 = memref.load %arg8[%c34_448] : memref<144xf32, #tpu.memory_space<smem>>
    %1346 = vector.broadcast %1345 : f32 to vector<8x8xf32>
    %1347 = arith.mulf %1346, %1344 : vector<8x8xf32>
    %1348 = arith.addf %1330, %1347 : vector<8x8xf32>
    %c70_449 = arith.constant 70 : index
    %1349 = memref.load %arg8[%c70_449] : memref<144xf32, #tpu.memory_space<smem>>
    %1350 = vector.broadcast %1349 : f32 to vector<8x8xf32>
    %1351 = arith.mulf %1350, %1344 : vector<8x8xf32>
    %1352 = arith.addf %1334, %1351 : vector<8x8xf32>
    %c106 = arith.constant 106 : index
    %1353 = memref.load %arg8[%c106] : memref<144xf32, #tpu.memory_space<smem>>
    %1354 = vector.broadcast %1353 : f32 to vector<8x8xf32>
    %1355 = arith.mulf %1354, %1344 : vector<8x8xf32>
    %1356 = arith.addf %1338, %1355 : vector<8x8xf32>
    %c142 = arith.constant 142 : index
    %1357 = memref.load %arg8[%c142] : memref<144xf32, #tpu.memory_space<smem>>
    %1358 = vector.broadcast %1357 : f32 to vector<8x8xf32>
    %1359 = arith.mulf %1358, %1344 : vector<8x8xf32>
    %1360 = arith.addf %1342, %1359 : vector<8x8xf32>
    %c3_450 = arith.constant 3 : index
    %c2_451 = arith.constant 2 : index
    %c2_452 = arith.constant 2 : index
    %1361 = vector.load %arg16[%c3_450, %c2_451, %c2_452] : memref<4x10x10xf32, #tpu.memory_space<vmem>>, vector<1x8x8xf32>
    %1362 = vector.shape_cast %1361 : vector<1x8x8xf32> to vector<8x8xf32>
    %c35_453 = arith.constant 35 : index
    %1363 = memref.load %arg8[%c35_453] : memref<144xf32, #tpu.memory_space<smem>>
    %1364 = vector.broadcast %1363 : f32 to vector<8x8xf32>
    %1365 = arith.mulf %1364, %1362 : vector<8x8xf32>
    %1366 = arith.addf %1348, %1365 : vector<8x8xf32>
    %c71_454 = arith.constant 71 : index
    %1367 = memref.load %arg8[%c71_454] : memref<144xf32, #tpu.memory_space<smem>>
    %1368 = vector.broadcast %1367 : f32 to vector<8x8xf32>
    %1369 = arith.mulf %1368, %1362 : vector<8x8xf32>
    %1370 = arith.addf %1352, %1369 : vector<8x8xf32>
    %c107 = arith.constant 107 : index
    %1371 = memref.load %arg8[%c107] : memref<144xf32, #tpu.memory_space<smem>>
    %1372 = vector.broadcast %1371 : f32 to vector<8x8xf32>
    %1373 = arith.mulf %1372, %1362 : vector<8x8xf32>
    %1374 = arith.addf %1356, %1373 : vector<8x8xf32>
    %c143 = arith.constant 143 : index
    %1375 = memref.load %arg8[%c143] : memref<144xf32, #tpu.memory_space<smem>>
    %1376 = vector.broadcast %1375 : f32 to vector<8x8xf32>
    %1377 = arith.mulf %1376, %1362 : vector<8x8xf32>
    %1378 = arith.addf %1360, %1377 : vector<8x8xf32>
    %c0_455 = arith.constant 0 : index
    %1379 = memref.load %arg9[%c0_455] : memref<4xf32, #tpu.memory_space<smem>>
    %1380 = vector.broadcast %1379 : f32 to vector<8x8xf32>
    %1381 = arith.addf %1366, %1380 : vector<8x8xf32>
    %cst_456 = arith.constant 0.000000e+00 : f32
    %1382 = vector.broadcast %cst_456 : f32 to vector<8x8xf32>
    %1383 = arith.maximumf %1381, %1382 : vector<8x8xf32>
    %c1_457 = arith.constant 1 : index
    %1384 = memref.load %arg9[%c1_457] : memref<4xf32, #tpu.memory_space<smem>>
    %1385 = vector.broadcast %1384 : f32 to vector<8x8xf32>
    %1386 = arith.addf %1370, %1385 : vector<8x8xf32>
    %cst_458 = arith.constant 0.000000e+00 : f32
    %1387 = vector.broadcast %cst_458 : f32 to vector<8x8xf32>
    %1388 = arith.maximumf %1386, %1387 : vector<8x8xf32>
    %c2_459 = arith.constant 2 : index
    %1389 = memref.load %arg9[%c2_459] : memref<4xf32, #tpu.memory_space<smem>>
    %1390 = vector.broadcast %1389 : f32 to vector<8x8xf32>
    %1391 = arith.addf %1374, %1390 : vector<8x8xf32>
    %cst_460 = arith.constant 0.000000e+00 : f32
    %1392 = vector.broadcast %cst_460 : f32 to vector<8x8xf32>
    %1393 = arith.maximumf %1391, %1392 : vector<8x8xf32>
    %c3_461 = arith.constant 3 : index
    %1394 = memref.load %arg9[%c3_461] : memref<4xf32, #tpu.memory_space<smem>>
    %1395 = vector.broadcast %1394 : f32 to vector<8x8xf32>
    %1396 = arith.addf %1378, %1395 : vector<8x8xf32>
    %cst_462 = arith.constant 0.000000e+00 : f32
    %1397 = vector.broadcast %cst_462 : f32 to vector<8x8xf32>
    %1398 = arith.maximumf %1396, %1397 : vector<8x8xf32>
    %1399 = tpu.iota {dimensions = array<i32: 0>} : vector<4x8xi32>
    %1400 = tpu.iota {dimensions = array<i32: 1>} : vector<4x8xi32>
    %c2_i32_463 = arith.constant 2 : i32
    %1401 = vector.broadcast %c2_i32_463 : i32 to vector<4x8xi32>
    %1402 = arith.muli %1401, %1399 : vector<4x8xi32>
    %c0_i32_464 = arith.constant 0 : i32
    %1403 = vector.broadcast %c0_i32_464 : i32 to vector<4x8xi32>
    %1404 = arith.addi %1402, %1403 : vector<4x8xi32>
    %1405 = arith.cmpi eq, %1400, %1404 : vector<4x8xi32>
    %1406 = arith.extui %1405 : vector<4x8xi1> to vector<4x8xi32>
    %1407 = arith.sitofp %1406 : vector<4x8xi32> to vector<4x8xf32>
    %1408 = tpu.iota {dimensions = array<i32: 0>} : vector<4x8xi32>
    %1409 = tpu.iota {dimensions = array<i32: 1>} : vector<4x8xi32>
    %c2_i32_465 = arith.constant 2 : i32
    %1410 = vector.broadcast %c2_i32_465 : i32 to vector<4x8xi32>
    %1411 = arith.muli %1410, %1408 : vector<4x8xi32>
    %c1_i32_466 = arith.constant 1 : i32
    %1412 = vector.broadcast %c1_i32_466 : i32 to vector<4x8xi32>
    %1413 = arith.addi %1411, %1412 : vector<4x8xi32>
    %1414 = arith.cmpi eq, %1409, %1413 : vector<4x8xi32>
    %1415 = arith.extui %1414 : vector<4x8xi1> to vector<4x8xi32>
    %1416 = arith.sitofp %1415 : vector<4x8xi32> to vector<4x8xf32>
    %1417 = tpu.iota {dimensions = array<i32: 0>} : vector<8x4xi32>
    %1418 = tpu.iota {dimensions = array<i32: 1>} : vector<8x4xi32>
    %c2_i32_467 = arith.constant 2 : i32
    %1419 = vector.broadcast %c2_i32_467 : i32 to vector<8x4xi32>
    %1420 = arith.muli %1419, %1418 : vector<8x4xi32>
    %c0_i32_468 = arith.constant 0 : i32
    %1421 = vector.broadcast %c0_i32_468 : i32 to vector<8x4xi32>
    %1422 = arith.addi %1420, %1421 : vector<8x4xi32>
    %1423 = arith.cmpi eq, %1417, %1422 : vector<8x4xi32>
    %1424 = arith.extui %1423 : vector<8x4xi1> to vector<8x4xi32>
    %1425 = arith.sitofp %1424 : vector<8x4xi32> to vector<8x4xf32>
    %1426 = tpu.iota {dimensions = array<i32: 0>} : vector<8x4xi32>
    %1427 = tpu.iota {dimensions = array<i32: 1>} : vector<8x4xi32>
    %c2_i32_469 = arith.constant 2 : i32
    %1428 = vector.broadcast %c2_i32_469 : i32 to vector<8x4xi32>
    %1429 = arith.muli %1428, %1427 : vector<8x4xi32>
    %c1_i32_470 = arith.constant 1 : i32
    %1430 = vector.broadcast %c1_i32_470 : i32 to vector<8x4xi32>
    %1431 = arith.addi %1429, %1430 : vector<8x4xi32>
    %1432 = arith.cmpi eq, %1426, %1431 : vector<8x4xi32>
    %1433 = arith.extui %1432 : vector<8x4xi1> to vector<8x4xi32>
    %1434 = arith.sitofp %1433 : vector<8x4xi32> to vector<8x4xf32>
    %cst_471 = arith.constant dense<0.000000e+00> : vector<4x8xf32>
    %1435 = tpu.matmul %1407, %1383, %cst_471 {dimension_numbers = #tpu.dot_dimension_numbers<[1], [0], [0], [1], [0, 0, 1, 1], [], []>} : vector<4x8xf32>, vector<8x8xf32>, vector<4x8xf32> -> vector<4x8xf32>
    %cst_472 = arith.constant dense<0.000000e+00> : vector<4x8xf32>
    %1436 = tpu.matmul %1416, %1383, %cst_472 {dimension_numbers = #tpu.dot_dimension_numbers<[1], [0], [0], [1], [0, 0, 1, 1], [], []>} : vector<4x8xf32>, vector<8x8xf32>, vector<4x8xf32> -> vector<4x8xf32>
    %1437 = arith.maximumf %1435, %1436 : vector<4x8xf32>
    %cst_473 = arith.constant dense<0.000000e+00> : vector<4x4xf32>
    %1438 = tpu.matmul %1437, %1425, %cst_473 {dimension_numbers = #tpu.dot_dimension_numbers<[1], [0], [0], [1], [0, 0, 1, 1], [], []>} : vector<4x8xf32>, vector<8x4xf32>, vector<4x4xf32> -> vector<4x4xf32>
    %cst_474 = arith.constant dense<0.000000e+00> : vector<4x4xf32>
    %1439 = tpu.matmul %1437, %1434, %cst_474 {dimension_numbers = #tpu.dot_dimension_numbers<[1], [0], [0], [1], [0, 0, 1, 1], [], []>} : vector<4x8xf32>, vector<8x4xf32>, vector<4x4xf32> -> vector<4x4xf32>
    %1440 = arith.maximumf %1438, %1439 : vector<4x4xf32>
    %cst_475 = arith.constant dense<0.000000e+00> : vector<4x8xf32>
    %1441 = tpu.matmul %1407, %1388, %cst_475 {dimension_numbers = #tpu.dot_dimension_numbers<[1], [0], [0], [1], [0, 0, 1, 1], [], []>} : vector<4x8xf32>, vector<8x8xf32>, vector<4x8xf32> -> vector<4x8xf32>
    %cst_476 = arith.constant dense<0.000000e+00> : vector<4x8xf32>
    %1442 = tpu.matmul %1416, %1388, %cst_476 {dimension_numbers = #tpu.dot_dimension_numbers<[1], [0], [0], [1], [0, 0, 1, 1], [], []>} : vector<4x8xf32>, vector<8x8xf32>, vector<4x8xf32> -> vector<4x8xf32>
    %1443 = arith.maximumf %1441, %1442 : vector<4x8xf32>
    %cst_477 = arith.constant dense<0.000000e+00> : vector<4x4xf32>
    %1444 = tpu.matmul %1443, %1425, %cst_477 {dimension_numbers = #tpu.dot_dimension_numbers<[1], [0], [0], [1], [0, 0, 1, 1], [], []>} : vector<4x8xf32>, vector<8x4xf32>, vector<4x4xf32> -> vector<4x4xf32>
    %cst_478 = arith.constant dense<0.000000e+00> : vector<4x4xf32>
    %1445 = tpu.matmul %1443, %1434, %cst_478 {dimension_numbers = #tpu.dot_dimension_numbers<[1], [0], [0], [1], [0, 0, 1, 1], [], []>} : vector<4x8xf32>, vector<8x4xf32>, vector<4x4xf32> -> vector<4x4xf32>
    %1446 = arith.maximumf %1444, %1445 : vector<4x4xf32>
    %cst_479 = arith.constant dense<0.000000e+00> : vector<4x8xf32>
    %1447 = tpu.matmul %1407, %1393, %cst_479 {dimension_numbers = #tpu.dot_dimension_numbers<[1], [0], [0], [1], [0, 0, 1, 1], [], []>} : vector<4x8xf32>, vector<8x8xf32>, vector<4x8xf32> -> vector<4x8xf32>
    %cst_480 = arith.constant dense<0.000000e+00> : vector<4x8xf32>
    %1448 = tpu.matmul %1416, %1393, %cst_480 {dimension_numbers = #tpu.dot_dimension_numbers<[1], [0], [0], [1], [0, 0, 1, 1], [], []>} : vector<4x8xf32>, vector<8x8xf32>, vector<4x8xf32> -> vector<4x8xf32>
    %1449 = arith.maximumf %1447, %1448 : vector<4x8xf32>
    %cst_481 = arith.constant dense<0.000000e+00> : vector<4x4xf32>
    %1450 = tpu.matmul %1449, %1425, %cst_481 {dimension_numbers = #tpu.dot_dimension_numbers<[1], [0], [0], [1], [0, 0, 1, 1], [], []>} : vector<4x8xf32>, vector<8x4xf32>, vector<4x4xf32> -> vector<4x4xf32>
    %cst_482 = arith.constant dense<0.000000e+00> : vector<4x4xf32>
    %1451 = tpu.matmul %1449, %1434, %cst_482 {dimension_numbers = #tpu.dot_dimension_numbers<[1], [0], [0], [1], [0, 0, 1, 1], [], []>} : vector<4x8xf32>, vector<8x4xf32>, vector<4x4xf32> -> vector<4x4xf32>
    %1452 = arith.maximumf %1450, %1451 : vector<4x4xf32>
    %cst_483 = arith.constant dense<0.000000e+00> : vector<4x8xf32>
    %1453 = tpu.matmul %1407, %1398, %cst_483 {dimension_numbers = #tpu.dot_dimension_numbers<[1], [0], [0], [1], [0, 0, 1, 1], [], []>} : vector<4x8xf32>, vector<8x8xf32>, vector<4x8xf32> -> vector<4x8xf32>
    %cst_484 = arith.constant dense<0.000000e+00> : vector<4x8xf32>
    %1454 = tpu.matmul %1416, %1398, %cst_484 {dimension_numbers = #tpu.dot_dimension_numbers<[1], [0], [0], [1], [0, 0, 1, 1], [], []>} : vector<4x8xf32>, vector<8x8xf32>, vector<4x8xf32> -> vector<4x8xf32>
    %1455 = arith.maximumf %1453, %1454 : vector<4x8xf32>
    %cst_485 = arith.constant dense<0.000000e+00> : vector<4x4xf32>
    %1456 = tpu.matmul %1455, %1425, %cst_485 {dimension_numbers = #tpu.dot_dimension_numbers<[1], [0], [0], [1], [0, 0, 1, 1], [], []>} : vector<4x8xf32>, vector<8x4xf32>, vector<4x4xf32> -> vector<4x4xf32>
    %cst_486 = arith.constant dense<0.000000e+00> : vector<4x4xf32>
    %1457 = tpu.matmul %1455, %1434, %cst_486 {dimension_numbers = #tpu.dot_dimension_numbers<[1], [0], [0], [1], [0, 0, 1, 1], [], []>} : vector<4x8xf32>, vector<8x4xf32>, vector<4x4xf32> -> vector<4x4xf32>
    %1458 = arith.maximumf %1456, %1457 : vector<4x4xf32>
    %cst_487 = arith.constant 0.000000e+00 : f32
    %1459 = vector.broadcast %cst_487 : f32 to vector<4x32xf32>
    %c0_488 = arith.constant 0 : index
    %c0_489 = arith.constant 0 : index
    %c0_490 = arith.constant 0 : index
    %1460 = vector.load %arg11[%c0_488, %c0_489, %c0_490] : memref<3x1x32xf32, #tpu.memory_space<vmem>>, vector<1x1x32xf32>
    %1461 = vector.shape_cast %1460 : vector<1x1x32xf32> to vector<1x32xf32>
    %1462 = vector.broadcast %1461 : vector<1x32xf32> to vector<4x32xf32>
    %1463 = arith.addf %1459, %1462 : vector<4x32xf32>
    %c0_491 = arith.constant 0 : index
    %c0_492 = arith.constant 0 : index
    %c0_493 = arith.constant 0 : index
    %c0_494 = arith.constant 0 : index
    %1464 = vector.load %arg10[%c0_491, %c0_492, %c0_493, %c0_494] : memref<3x4x4x32xf32, #tpu.memory_space<vmem>>, vector<1x1x4x32xf32>
    %1465 = vector.shape_cast %1464 : vector<1x1x4x32xf32> to vector<4x32xf32>
    %cst_495 = arith.constant dense<0.000000e+00> : vector<4x32xf32>
    %1466 = tpu.matmul %1440, %1465, %cst_495 {dimension_numbers = #tpu.dot_dimension_numbers<[0], [0], [1], [1], [0, 1, 1, 1], [], []>} : vector<4x4xf32>, vector<4x32xf32>, vector<4x32xf32> -> vector<4x32xf32>
    %1467 = arith.addf %1463, %1466 : vector<4x32xf32>
    %c0_496 = arith.constant 0 : index
    %c1_497 = arith.constant 1 : index
    %c0_498 = arith.constant 0 : index
    %c0_499 = arith.constant 0 : index
    %1468 = vector.load %arg10[%c0_496, %c1_497, %c0_498, %c0_499] : memref<3x4x4x32xf32, #tpu.memory_space<vmem>>, vector<1x1x4x32xf32>
    %1469 = vector.shape_cast %1468 : vector<1x1x4x32xf32> to vector<4x32xf32>
    %cst_500 = arith.constant dense<0.000000e+00> : vector<4x32xf32>
    %1470 = tpu.matmul %1446, %1469, %cst_500 {dimension_numbers = #tpu.dot_dimension_numbers<[0], [0], [1], [1], [0, 1, 1, 1], [], []>} : vector<4x4xf32>, vector<4x32xf32>, vector<4x32xf32> -> vector<4x32xf32>
    %1471 = arith.addf %1467, %1470 : vector<4x32xf32>
    %c0_501 = arith.constant 0 : index
    %c2_502 = arith.constant 2 : index
    %c0_503 = arith.constant 0 : index
    %c0_504 = arith.constant 0 : index
    %1472 = vector.load %arg10[%c0_501, %c2_502, %c0_503, %c0_504] : memref<3x4x4x32xf32, #tpu.memory_space<vmem>>, vector<1x1x4x32xf32>
    %1473 = vector.shape_cast %1472 : vector<1x1x4x32xf32> to vector<4x32xf32>
    %cst_505 = arith.constant dense<0.000000e+00> : vector<4x32xf32>
    %1474 = tpu.matmul %1452, %1473, %cst_505 {dimension_numbers = #tpu.dot_dimension_numbers<[0], [0], [1], [1], [0, 1, 1, 1], [], []>} : vector<4x4xf32>, vector<4x32xf32>, vector<4x32xf32> -> vector<4x32xf32>
    %1475 = arith.addf %1471, %1474 : vector<4x32xf32>
    %c0_506 = arith.constant 0 : index
    %c3_507 = arith.constant 3 : index
    %c0_508 = arith.constant 0 : index
    %c0_509 = arith.constant 0 : index
    %1476 = vector.load %arg10[%c0_506, %c3_507, %c0_508, %c0_509] : memref<3x4x4x32xf32, #tpu.memory_space<vmem>>, vector<1x1x4x32xf32>
    %1477 = vector.shape_cast %1476 : vector<1x1x4x32xf32> to vector<4x32xf32>
    %cst_510 = arith.constant dense<0.000000e+00> : vector<4x32xf32>
    %1478 = tpu.matmul %1458, %1477, %cst_510 {dimension_numbers = #tpu.dot_dimension_numbers<[0], [0], [1], [1], [0, 1, 1, 1], [], []>} : vector<4x4xf32>, vector<4x32xf32>, vector<4x32xf32> -> vector<4x32xf32>
    %1479 = arith.addf %1475, %1478 : vector<4x32xf32>
    %c0_511 = arith.constant 0 : index
    %c0_512 = arith.constant 0 : index
    %c0_513 = arith.constant 0 : index
    %c0_514 = arith.constant 0 : index
    %1480 = vector.load %arg12[%c0_511, %c0_512, %c0_513, %c0_514] : memref<4x1x3x32xf32, #tpu.memory_space<vmem>>, vector<4x1x1x32xf32>
    %1481 = vector.shape_cast %1480 : vector<4x1x1x32xf32> to vector<4x32xf32>
    %1482 = vector.shape_cast %1479 : vector<4x32xf32> to vector<4x1x1x32xf32>
    tpu.vector_store %arg12[%c0_511, %c0_512, %c0_513, %c0_514], %1482 {strides = array<i32>} : memref<4x1x3x32xf32, #tpu.memory_space<vmem>>, vector<4x1x1x32xf32>,
    %cst_515 = arith.constant 0.000000e+00 : f32
    %1483 = vector.broadcast %cst_515 : f32 to vector<4x32xf32>
    %c1_516 = arith.constant 1 : index
    %c0_517 = arith.constant 0 : index
    %c0_518 = arith.constant 0 : index
    %1484 = vector.load %arg11[%c1_516, %c0_517, %c0_518] : memref<3x1x32xf32, #tpu.memory_space<vmem>>, vector<1x1x32xf32>
    %1485 = vector.shape_cast %1484 : vector<1x1x32xf32> to vector<1x32xf32>
    %1486 = vector.broadcast %1485 : vector<1x32xf32> to vector<4x32xf32>
    %1487 = arith.addf %1483, %1486 : vector<4x32xf32>
    %c1_519 = arith.constant 1 : index
    %c0_520 = arith.constant 0 : index
    %c0_521 = arith.constant 0 : index
    %c0_522 = arith.constant 0 : index
    %1488 = vector.load %arg10[%c1_519, %c0_520, %c0_521, %c0_522] : memref<3x4x4x32xf32, #tpu.memory_space<vmem>>, vector<1x1x4x32xf32>
    %1489 = vector.shape_cast %1488 : vector<1x1x4x32xf32> to vector<4x32xf32>
    %cst_523 = arith.constant dense<0.000000e+00> : vector<4x32xf32>
    %1490 = tpu.matmul %1440, %1489, %cst_523 {dimension_numbers = #tpu.dot_dimension_numbers<[0], [0], [1], [1], [0, 1, 1, 1], [], []>} : vector<4x4xf32>, vector<4x32xf32>, vector<4x32xf32> -> vector<4x32xf32>
    %1491 = arith.addf %1487, %1490 : vector<4x32xf32>
    %c1_524 = arith.constant 1 : index
    %c1_525 = arith.constant 1 : index
    %c0_526 = arith.constant 0 : index
    %c0_527 = arith.constant 0 : index
    %1492 = vector.load %arg10[%c1_524, %c1_525, %c0_526, %c0_527] : memref<3x4x4x32xf32, #tpu.memory_space<vmem>>, vector<1x1x4x32xf32>
    %1493 = vector.shape_cast %1492 : vector<1x1x4x32xf32> to vector<4x32xf32>
    %cst_528 = arith.constant dense<0.000000e+00> : vector<4x32xf32>
    %1494 = tpu.matmul %1446, %1493, %cst_528 {dimension_numbers = #tpu.dot_dimension_numbers<[0], [0], [1], [1], [0, 1, 1, 1], [], []>} : vector<4x4xf32>, vector<4x32xf32>, vector<4x32xf32> -> vector<4x32xf32>
    %1495 = arith.addf %1491, %1494 : vector<4x32xf32>
    %c1_529 = arith.constant 1 : index
    %c2_530 = arith.constant 2 : index
    %c0_531 = arith.constant 0 : index
    %c0_532 = arith.constant 0 : index
    %1496 = vector.load %arg10[%c1_529, %c2_530, %c0_531, %c0_532] : memref<3x4x4x32xf32, #tpu.memory_space<vmem>>, vector<1x1x4x32xf32>
    %1497 = vector.shape_cast %1496 : vector<1x1x4x32xf32> to vector<4x32xf32>
    %cst_533 = arith.constant dense<0.000000e+00> : vector<4x32xf32>
    %1498 = tpu.matmul %1452, %1497, %cst_533 {dimension_numbers = #tpu.dot_dimension_numbers<[0], [0], [1], [1], [0, 1, 1, 1], [], []>} : vector<4x4xf32>, vector<4x32xf32>, vector<4x32xf32> -> vector<4x32xf32>
    %1499 = arith.addf %1495, %1498 : vector<4x32xf32>
    %c1_534 = arith.constant 1 : index
    %c3_535 = arith.constant 3 : index
    %c0_536 = arith.constant 0 : index
    %c0_537 = arith.constant 0 : index
    %1500 = vector.load %arg10[%c1_534, %c3_535, %c0_536, %c0_537] : memref<3x4x4x32xf32, #tpu.memory_space<vmem>>, vector<1x1x4x32xf32>
    %1501 = vector.shape_cast %1500 : vector<1x1x4x32xf32> to vector<4x32xf32>
    %cst_538 = arith.constant dense<0.000000e+00> : vector<4x32xf32>
    %1502 = tpu.matmul %1458, %1501, %cst_538 {dimension_numbers = #tpu.dot_dimension_numbers<[0], [0], [1], [1], [0, 1, 1, 1], [], []>} : vector<4x4xf32>, vector<4x32xf32>, vector<4x32xf32> -> vector<4x32xf32>
    %1503 = arith.addf %1499, %1502 : vector<4x32xf32>
    %c0_539 = arith.constant 0 : index
    %c0_540 = arith.constant 0 : index
    %c1_541 = arith.constant 1 : index
    %c0_542 = arith.constant 0 : index
    %1504 = vector.load %arg12[%c0_539, %c0_540, %c1_541, %c0_542] : memref<4x1x3x32xf32, #tpu.memory_space<vmem>>, vector<4x1x1x32xf32>
    %1505 = vector.shape_cast %1504 : vector<4x1x1x32xf32> to vector<4x32xf32>
    %1506 = vector.shape_cast %1503 : vector<4x32xf32> to vector<4x1x1x32xf32>
    tpu.vector_store %arg12[%c0_539, %c0_540, %c1_541, %c0_542], %1506 {strides = array<i32>} : memref<4x1x3x32xf32, #tpu.memory_space<vmem>>, vector<4x1x1x32xf32>,
    %cst_543 = arith.constant 0.000000e+00 : f32
    %1507 = vector.broadcast %cst_543 : f32 to vector<4x32xf32>
    %c2_544 = arith.constant 2 : index
    %c0_545 = arith.constant 0 : index
    %c0_546 = arith.constant 0 : index
    %1508 = vector.load %arg11[%c2_544, %c0_545, %c0_546] : memref<3x1x32xf32, #tpu.memory_space<vmem>>, vector<1x1x32xf32>
    %1509 = vector.shape_cast %1508 : vector<1x1x32xf32> to vector<1x32xf32>
    %1510 = vector.broadcast %1509 : vector<1x32xf32> to vector<4x32xf32>
    %1511 = arith.addf %1507, %1510 : vector<4x32xf32>
    %c2_547 = arith.constant 2 : index
    %c0_548 = arith.constant 0 : index
    %c0_549 = arith.constant 0 : index
    %c0_550 = arith.constant 0 : index
    %1512 = vector.load %arg10[%c2_547, %c0_548, %c0_549, %c0_550] : memref<3x4x4x32xf32, #tpu.memory_space<vmem>>, vector<1x1x4x32xf32>
    %1513 = vector.shape_cast %1512 : vector<1x1x4x32xf32> to vector<4x32xf32>
    %cst_551 = arith.constant dense<0.000000e+00> : vector<4x32xf32>
    %1514 = tpu.matmul %1440, %1513, %cst_551 {dimension_numbers = #tpu.dot_dimension_numbers<[0], [0], [1], [1], [0, 1, 1, 1], [], []>} : vector<4x4xf32>, vector<4x32xf32>, vector<4x32xf32> -> vector<4x32xf32>
    %1515 = arith.addf %1511, %1514 : vector<4x32xf32>
    %c2_552 = arith.constant 2 : index
    %c1_553 = arith.constant 1 : index
    %c0_554 = arith.constant 0 : index
    %c0_555 = arith.constant 0 : index
    %1516 = vector.load %arg10[%c2_552, %c1_553, %c0_554, %c0_555] : memref<3x4x4x32xf32, #tpu.memory_space<vmem>>, vector<1x1x4x32xf32>
    %1517 = vector.shape_cast %1516 : vector<1x1x4x32xf32> to vector<4x32xf32>
    %cst_556 = arith.constant dense<0.000000e+00> : vector<4x32xf32>
    %1518 = tpu.matmul %1446, %1517, %cst_556 {dimension_numbers = #tpu.dot_dimension_numbers<[0], [0], [1], [1], [0, 1, 1, 1], [], []>} : vector<4x4xf32>, vector<4x32xf32>, vector<4x32xf32> -> vector<4x32xf32>
    %1519 = arith.addf %1515, %1518 : vector<4x32xf32>
    %c2_557 = arith.constant 2 : index
    %c2_558 = arith.constant 2 : index
    %c0_559 = arith.constant 0 : index
    %c0_560 = arith.constant 0 : index
    %1520 = vector.load %arg10[%c2_557, %c2_558, %c0_559, %c0_560] : memref<3x4x4x32xf32, #tpu.memory_space<vmem>>, vector<1x1x4x32xf32>
    %1521 = vector.shape_cast %1520 : vector<1x1x4x32xf32> to vector<4x32xf32>
    %cst_561 = arith.constant dense<0.000000e+00> : vector<4x32xf32>
    %1522 = tpu.matmul %1452, %1521, %cst_561 {dimension_numbers = #tpu.dot_dimension_numbers<[0], [0], [1], [1], [0, 1, 1, 1], [], []>} : vector<4x4xf32>, vector<4x32xf32>, vector<4x32xf32> -> vector<4x32xf32>
    %1523 = arith.addf %1519, %1522 : vector<4x32xf32>
    %c2_562 = arith.constant 2 : index
    %c3_563 = arith.constant 3 : index
    %c0_564 = arith.constant 0 : index
    %c0_565 = arith.constant 0 : index
    %1524 = vector.load %arg10[%c2_562, %c3_563, %c0_564, %c0_565] : memref<3x4x4x32xf32, #tpu.memory_space<vmem>>, vector<1x1x4x32xf32>
    %1525 = vector.shape_cast %1524 : vector<1x1x4x32xf32> to vector<4x32xf32>
    %cst_566 = arith.constant dense<0.000000e+00> : vector<4x32xf32>
    %1526 = tpu.matmul %1458, %1525, %cst_566 {dimension_numbers = #tpu.dot_dimension_numbers<[0], [0], [1], [1], [0, 1, 1, 1], [], []>} : vector<4x4xf32>, vector<4x32xf32>, vector<4x32xf32> -> vector<4x32xf32>
    %1527 = arith.addf %1523, %1526 : vector<4x32xf32>
    %c0_567 = arith.constant 0 : index
    %c0_568 = arith.constant 0 : index
    %c2_569 = arith.constant 2 : index
    %c0_570 = arith.constant 0 : index
    %1528 = vector.load %arg12[%c0_567, %c0_568, %c2_569, %c0_570] : memref<4x1x3x32xf32, #tpu.memory_space<vmem>>, vector<4x1x1x32xf32>
    %1529 = vector.shape_cast %1528 : vector<4x1x1x32xf32> to vector<4x32xf32>
    %1530 = vector.shape_cast %1527 : vector<4x32xf32> to vector<4x1x1x32xf32>
    tpu.vector_store %arg12[%c0_567, %c0_568, %c2_569, %c0_570], %1530 {strides = array<i32>} : memref<4x1x3x32xf32, #tpu.memory_space<vmem>>, vector<4x1x1x32xf32>,
    return
  }
  func.func @transform_0(%arg0: i32) -> (i32, i32, i32) {
    %c0_i32 = arith.constant 0 : i32
    %c0_i32_0 = arith.constant 0 : i32
    %c0_i32_1 = arith.constant 0 : i32
    return %arg0, %c0_i32, %c0_i32_0 : i32, i32, i32
  }
  func.func @transform_1(%arg0: i32) -> i32 {
    %c0_i32 = arith.constant 0 : i32
    %c0_i32_0 = arith.constant 0 : i32
    return %c0_i32 : i32
  }
  func.func @transform_2(%arg0: i32) -> i32 {
    %c0_i32 = arith.constant 0 : i32
    %c0_i32_0 = arith.constant 0 : i32
    return %c0_i32 : i32
  }
  func.func @transform_3(%arg0: i32) -> i32 {
    %c0_i32 = arith.constant 0 : i32
    %c0_i32_0 = arith.constant 0 : i32
    return %c0_i32 : i32
  }
  func.func @transform_4(%arg0: i32) -> i32 {
    %c0_i32 = arith.constant 0 : i32
    %c0_i32_0 = arith.constant 0 : i32
    return %c0_i32 : i32
  }
  func.func @transform_5(%arg0: i32) -> i32 {
    %c0_i32 = arith.constant 0 : i32
    %c0_i32_0 = arith.constant 0 : i32
    return %c0_i32 : i32
  }
  func.func @transform_6(%arg0: i32) -> i32 {
    %c0_i32 = arith.constant 0 : i32
    %c0_i32_0 = arith.constant 0 : i32
    return %c0_i32 : i32
  }
  func.func @transform_7(%arg0: i32) -> i32 {
    %c0_i32 = arith.constant 0 : i32
    %c0_i32_0 = arith.constant 0 : i32
    return %c0_i32 : i32
  }
  func.func @transform_8(%arg0: i32) -> i32 {
    %c0_i32 = arith.constant 0 : i32
    %c0_i32_0 = arith.constant 0 : i32
    return %c0_i32 : i32
  }
  func.func @transform_9(%arg0: i32) -> (i32, i32, i32, i32) {
    %c0_i32 = arith.constant 0 : i32
    %c0_i32_0 = arith.constant 0 : i32
    %c0_i32_1 = arith.constant 0 : i32
    %c0_i32_2 = arith.constant 0 : i32
    %c0_i32_3 = arith.constant 0 : i32
    return %c0_i32, %c0_i32_0, %c0_i32_1, %c0_i32_2 : i32, i32, i32, i32
  }
  func.func @transform_10(%arg0: i32) -> (i32, i32, i32) {
    %c0_i32 = arith.constant 0 : i32
    %c0_i32_0 = arith.constant 0 : i32
    %c0_i32_1 = arith.constant 0 : i32
    %c0_i32_2 = arith.constant 0 : i32
    return %c0_i32, %c0_i32_0, %c0_i32_1 : i32, i32, i32
  }
  func.func @transform_11(%arg0: i32) -> (i32, i32, i32, i32) {
    %c0_i32 = arith.constant 0 : i32
    %c0_i32_0 = arith.constant 0 : i32
    %c0_i32_1 = arith.constant 0 : i32
    %c0_i32_2 = arith.constant 0 : i32
    return %c0_i32, %arg0, %c0_i32_0, %c0_i32_1 : i32, i32, i32, i32
  }
}

module attributes {stable_mosaic.version = 11 : i64} {
  func.func @_gru_kernel(%arg0: i32, %arg1: memref<4x2x3x32xf32, #tpu.memory_space<vmem>>, %arg2: memref<3x32x32xf32, #tpu.memory_space<vmem>>, %arg3: memref<3x1x32xf32, #tpu.memory_space<vmem>>, %arg4: memref<32x8xf32, #tpu.memory_space<vmem>>, %arg5: memref<1x8xf32, #tpu.memory_space<vmem>>, %arg6: memref<8x8xf32, #tpu.memory_space<vmem>>, %arg7: memref<2x32xf32, #tpu.memory_space<vmem>>, %arg8: memref<8x32xf32, #tpu.memory_space<vmem>>) attributes {dimension_semantics = [#tpu.dimension_semantics<arbitrary>], iteration_bounds = array<i64: 1>, scalar_prefetch = 0 : i64, scratch_operands = 2 : i64, tpu.core_type = #tpu.core_type<tc>, window_params = [{transform_indices = @transform_0, window_bounds = array<i64: 4, 2, 3, 32>}, {pipeline_mode = #tpu.pipeline_mode<synchronous>, transform_indices = @transform_1, window_bounds = array<i64: 3, 32, 32>}, {pipeline_mode = #tpu.pipeline_mode<synchronous>, transform_indices = @transform_2, window_bounds = array<i64: 3, 1, 32>}, {pipeline_mode = #tpu.pipeline_mode<synchronous>, transform_indices = @transform_3, window_bounds = array<i64: 32, 8>}, {pipeline_mode = #tpu.pipeline_mode<synchronous>, transform_indices = @transform_4, window_bounds = array<i64: 1, 8>}, {transform_indices = @transform_5, window_bounds = array<i64: 8, 8>}]} {
    %c0_i32 = arith.constant 0 : i32
    %0 = arith.cmpi eq, %arg0, %c0_i32 : i32
    %1 = arith.extui %0 : i1 to i32
    %c0_i32_0 = arith.constant 0 : i32
    %2 = arith.cmpi ne, %1, %c0_i32_0 : i32
    scf.if %2 {
      %cst_143 = arith.constant 0.000000e+00 : f32
      %228 = vector.broadcast %cst_143 : f32 to vector<2x32xf32>
      %c0_144 = arith.constant 0 : index
      %c0_145 = arith.constant 0 : index
      %229 = vector.load %arg7[%c0_144, %c0_145] : memref<2x32xf32, #tpu.memory_space<vmem>>, vector<2x32xf32>
      tpu.vector_store %arg7[%c0_144, %c0_145], %228 {strides = array<i32>} : memref<2x32xf32, #tpu.memory_space<vmem>>, vector<2x32xf32>,
    } else {
    }
    %c0 = arith.constant 0 : index
    %c0_1 = arith.constant 0 : index
    %3 = vector.load %arg7[%c0, %c0_1] : memref<2x32xf32, #tpu.memory_space<vmem>>, vector<2x32xf32>
    %c0_2 = arith.constant 0 : index
    %c0_3 = arith.constant 0 : index
    %c0_4 = arith.constant 0 : index
    %c0_5 = arith.constant 0 : index
    %4 = vector.load %arg1[%c0_2, %c0_3, %c0_4, %c0_5] : memref<4x2x3x32xf32, #tpu.memory_space<vmem>>, vector<1x2x3x32xf32>
    %5 = vector.shape_cast %4 : vector<1x2x3x32xf32> to vector<2x3x32xf32>
    %c0_6 = arith.constant 0 : index
    %c0_7 = arith.constant 0 : index
    %c0_8 = arith.constant 0 : index
    %6 = vector.load %arg2[%c0_6, %c0_7, %c0_8] : memref<3x32x32xf32, #tpu.memory_space<vmem>>, vector<1x32x32xf32>
    %7 = vector.shape_cast %6 : vector<1x32x32xf32> to vector<32x32xf32>
    %cst = arith.constant dense<0.000000e+00> : vector<2x32xf32>
    %8 = tpu.matmul %3, %7, %cst {dimension_numbers = #tpu.dot_dimension_numbers<[1], [0], [0], [1], [0, 0, 1, 1], [], []>} : vector<2x32xf32>, vector<32x32xf32>, vector<2x32xf32> -> vector<2x32xf32>
    %c0_9 = arith.constant 0 : index
    %c0_10 = arith.constant 0 : index
    %c0_11 = arith.constant 0 : index
    %9 = vector.load %arg3[%c0_9, %c0_10, %c0_11] : memref<3x1x32xf32, #tpu.memory_space<vmem>>, vector<1x1x32xf32>
    %10 = vector.shape_cast %9 : vector<1x1x32xf32> to vector<1x32xf32>
    %11 = vector.broadcast %10 : vector<1x32xf32> to vector<2x32xf32>
    %12 = arith.addf %8, %11 : vector<2x32xf32>
    %c1 = arith.constant 1 : index
    %c0_12 = arith.constant 0 : index
    %c0_13 = arith.constant 0 : index
    %13 = vector.load %arg2[%c1, %c0_12, %c0_13] : memref<3x32x32xf32, #tpu.memory_space<vmem>>, vector<1x32x32xf32>
    %14 = vector.shape_cast %13 : vector<1x32x32xf32> to vector<32x32xf32>
    %cst_14 = arith.constant dense<0.000000e+00> : vector<2x32xf32>
    %15 = tpu.matmul %3, %14, %cst_14 {dimension_numbers = #tpu.dot_dimension_numbers<[1], [0], [0], [1], [0, 0, 1, 1], [], []>} : vector<2x32xf32>, vector<32x32xf32>, vector<2x32xf32> -> vector<2x32xf32>
    %c1_15 = arith.constant 1 : index
    %c0_16 = arith.constant 0 : index
    %c0_17 = arith.constant 0 : index
    %16 = vector.load %arg3[%c1_15, %c0_16, %c0_17] : memref<3x1x32xf32, #tpu.memory_space<vmem>>, vector<1x1x32xf32>
    %17 = vector.shape_cast %16 : vector<1x1x32xf32> to vector<1x32xf32>
    %18 = vector.broadcast %17 : vector<1x32xf32> to vector<2x32xf32>
    %19 = arith.addf %15, %18 : vector<2x32xf32>
    %c2 = arith.constant 2 : index
    %c0_18 = arith.constant 0 : index
    %c0_19 = arith.constant 0 : index
    %20 = vector.load %arg2[%c2, %c0_18, %c0_19] : memref<3x32x32xf32, #tpu.memory_space<vmem>>, vector<1x32x32xf32>
    %21 = vector.shape_cast %20 : vector<1x32x32xf32> to vector<32x32xf32>
    %cst_20 = arith.constant dense<0.000000e+00> : vector<2x32xf32>
    %22 = tpu.matmul %3, %21, %cst_20 {dimension_numbers = #tpu.dot_dimension_numbers<[1], [0], [0], [1], [0, 0, 1, 1], [], []>} : vector<2x32xf32>, vector<32x32xf32>, vector<2x32xf32> -> vector<2x32xf32>
    %c2_21 = arith.constant 2 : index
    %c0_22 = arith.constant 0 : index
    %c0_23 = arith.constant 0 : index
    %23 = vector.load %arg3[%c2_21, %c0_22, %c0_23] : memref<3x1x32xf32, #tpu.memory_space<vmem>>, vector<1x1x32xf32>
    %24 = vector.shape_cast %23 : vector<1x1x32xf32> to vector<1x32xf32>
    %25 = vector.broadcast %24 : vector<1x32xf32> to vector<2x32xf32>
    %26 = arith.addf %22, %25 : vector<2x32xf32>
    %27 = vector.extract_strided_slice %5 {offsets = [0, 0, 0], sizes = [2, 1, 32], strides = [1, 1, 1]} : vector<2x3x32xf32> to vector<2x1x32xf32>
    %28 = vector.shape_cast %27 : vector<2x1x32xf32> to vector<2x32xf32>
    %29 = arith.addf %28, %12 : vector<2x32xf32>
    %cst_24 = arith.constant 0.000000e+00 : f32
    %30 = vector.broadcast %cst_24 : f32 to vector<2x32xf32>
    %31 = arith.subf %30, %29 : vector<2x32xf32>
    %32 = math.exp %31 : vector<2x32xf32>
    %cst_25 = arith.constant 1.000000e+00 : f32
    %33 = vector.broadcast %cst_25 : f32 to vector<2x32xf32>
    %34 = arith.addf %33, %32 : vector<2x32xf32>
    %cst_26 = arith.constant 1.000000e+00 : f32
    %35 = vector.broadcast %cst_26 : f32 to vector<2x32xf32>
    %36 = arith.divf %35, %34 : vector<2x32xf32>
    %37 = vector.extract_strided_slice %5 {offsets = [0, 1, 0], sizes = [2, 1, 32], strides = [1, 1, 1]} : vector<2x3x32xf32> to vector<2x1x32xf32>
    %38 = vector.shape_cast %37 : vector<2x1x32xf32> to vector<2x32xf32>
    %39 = arith.addf %38, %19 : vector<2x32xf32>
    %cst_27 = arith.constant 0.000000e+00 : f32
    %40 = vector.broadcast %cst_27 : f32 to vector<2x32xf32>
    %41 = arith.subf %40, %39 : vector<2x32xf32>
    %42 = math.exp %41 : vector<2x32xf32>
    %cst_28 = arith.constant 1.000000e+00 : f32
    %43 = vector.broadcast %cst_28 : f32 to vector<2x32xf32>
    %44 = arith.addf %43, %42 : vector<2x32xf32>
    %cst_29 = arith.constant 1.000000e+00 : f32
    %45 = vector.broadcast %cst_29 : f32 to vector<2x32xf32>
    %46 = arith.divf %45, %44 : vector<2x32xf32>
    %47 = vector.extract_strided_slice %5 {offsets = [0, 2, 0], sizes = [2, 1, 32], strides = [1, 1, 1]} : vector<2x3x32xf32> to vector<2x1x32xf32>
    %48 = vector.shape_cast %47 : vector<2x1x32xf32> to vector<2x32xf32>
    %49 = arith.mulf %36, %26 : vector<2x32xf32>
    %50 = arith.addf %48, %49 : vector<2x32xf32>
    %51 = math.tanh %50 : vector<2x32xf32>
    %cst_30 = arith.constant 1.000000e+00 : f32
    %52 = vector.broadcast %cst_30 : f32 to vector<2x32xf32>
    %53 = arith.subf %52, %46 : vector<2x32xf32>
    %54 = arith.mulf %53, %51 : vector<2x32xf32>
    %55 = arith.mulf %46, %3 : vector<2x32xf32>
    %56 = arith.addf %54, %55 : vector<2x32xf32>
    %c0_31 = arith.constant 0 : index
    %c0_32 = arith.constant 0 : index
    %57 = vector.load %arg8[%c0_31, %c0_32] : memref<8x32xf32, #tpu.memory_space<vmem>>, vector<2x32xf32>
    tpu.vector_store %arg8[%c0_31, %c0_32], %56 {strides = array<i32>} : memref<8x32xf32, #tpu.memory_space<vmem>>, vector<2x32xf32>,
    %c1_33 = arith.constant 1 : index
    %c0_34 = arith.constant 0 : index
    %c0_35 = arith.constant 0 : index
    %c0_36 = arith.constant 0 : index
    %58 = vector.load %arg1[%c1_33, %c0_34, %c0_35, %c0_36] : memref<4x2x3x32xf32, #tpu.memory_space<vmem>>, vector<1x2x3x32xf32>
    %59 = vector.shape_cast %58 : vector<1x2x3x32xf32> to vector<2x3x32xf32>
    %c0_37 = arith.constant 0 : index
    %c0_38 = arith.constant 0 : index
    %c0_39 = arith.constant 0 : index
    %60 = vector.load %arg2[%c0_37, %c0_38, %c0_39] : memref<3x32x32xf32, #tpu.memory_space<vmem>>, vector<1x32x32xf32>
    %61 = vector.shape_cast %60 : vector<1x32x32xf32> to vector<32x32xf32>
    %cst_40 = arith.constant dense<0.000000e+00> : vector<2x32xf32>
    %62 = tpu.matmul %56, %61, %cst_40 {dimension_numbers = #tpu.dot_dimension_numbers<[1], [0], [0], [1], [0, 0, 1, 1], [], []>} : vector<2x32xf32>, vector<32x32xf32>, vector<2x32xf32> -> vector<2x32xf32>
    %c0_41 = arith.constant 0 : index
    %c0_42 = arith.constant 0 : index
    %c0_43 = arith.constant 0 : index
    %63 = vector.load %arg3[%c0_41, %c0_42, %c0_43] : memref<3x1x32xf32, #tpu.memory_space<vmem>>, vector<1x1x32xf32>
    %64 = vector.shape_cast %63 : vector<1x1x32xf32> to vector<1x32xf32>
    %65 = vector.broadcast %64 : vector<1x32xf32> to vector<2x32xf32>
    %66 = arith.addf %62, %65 : vector<2x32xf32>
    %c1_44 = arith.constant 1 : index
    %c0_45 = arith.constant 0 : index
    %c0_46 = arith.constant 0 : index
    %67 = vector.load %arg2[%c1_44, %c0_45, %c0_46] : memref<3x32x32xf32, #tpu.memory_space<vmem>>, vector<1x32x32xf32>
    %68 = vector.shape_cast %67 : vector<1x32x32xf32> to vector<32x32xf32>
    %cst_47 = arith.constant dense<0.000000e+00> : vector<2x32xf32>
    %69 = tpu.matmul %56, %68, %cst_47 {dimension_numbers = #tpu.dot_dimension_numbers<[1], [0], [0], [1], [0, 0, 1, 1], [], []>} : vector<2x32xf32>, vector<32x32xf32>, vector<2x32xf32> -> vector<2x32xf32>
    %c1_48 = arith.constant 1 : index
    %c0_49 = arith.constant 0 : index
    %c0_50 = arith.constant 0 : index
    %70 = vector.load %arg3[%c1_48, %c0_49, %c0_50] : memref<3x1x32xf32, #tpu.memory_space<vmem>>, vector<1x1x32xf32>
    %71 = vector.shape_cast %70 : vector<1x1x32xf32> to vector<1x32xf32>
    %72 = vector.broadcast %71 : vector<1x32xf32> to vector<2x32xf32>
    %73 = arith.addf %69, %72 : vector<2x32xf32>
    %c2_51 = arith.constant 2 : index
    %c0_52 = arith.constant 0 : index
    %c0_53 = arith.constant 0 : index
    %74 = vector.load %arg2[%c2_51, %c0_52, %c0_53] : memref<3x32x32xf32, #tpu.memory_space<vmem>>, vector<1x32x32xf32>
    %75 = vector.shape_cast %74 : vector<1x32x32xf32> to vector<32x32xf32>
    %cst_54 = arith.constant dense<0.000000e+00> : vector<2x32xf32>
    %76 = tpu.matmul %56, %75, %cst_54 {dimension_numbers = #tpu.dot_dimension_numbers<[1], [0], [0], [1], [0, 0, 1, 1], [], []>} : vector<2x32xf32>, vector<32x32xf32>, vector<2x32xf32> -> vector<2x32xf32>
    %c2_55 = arith.constant 2 : index
    %c0_56 = arith.constant 0 : index
    %c0_57 = arith.constant 0 : index
    %77 = vector.load %arg3[%c2_55, %c0_56, %c0_57] : memref<3x1x32xf32, #tpu.memory_space<vmem>>, vector<1x1x32xf32>
    %78 = vector.shape_cast %77 : vector<1x1x32xf32> to vector<1x32xf32>
    %79 = vector.broadcast %78 : vector<1x32xf32> to vector<2x32xf32>
    %80 = arith.addf %76, %79 : vector<2x32xf32>
    %81 = vector.extract_strided_slice %59 {offsets = [0, 0, 0], sizes = [2, 1, 32], strides = [1, 1, 1]} : vector<2x3x32xf32> to vector<2x1x32xf32>
    %82 = vector.shape_cast %81 : vector<2x1x32xf32> to vector<2x32xf32>
    %83 = arith.addf %82, %66 : vector<2x32xf32>
    %cst_58 = arith.constant 0.000000e+00 : f32
    %84 = vector.broadcast %cst_58 : f32 to vector<2x32xf32>
    %85 = arith.subf %84, %83 : vector<2x32xf32>
    %86 = math.exp %85 : vector<2x32xf32>
    %cst_59 = arith.constant 1.000000e+00 : f32
    %87 = vector.broadcast %cst_59 : f32 to vector<2x32xf32>
    %88 = arith.addf %87, %86 : vector<2x32xf32>
    %cst_60 = arith.constant 1.000000e+00 : f32
    %89 = vector.broadcast %cst_60 : f32 to vector<2x32xf32>
    %90 = arith.divf %89, %88 : vector<2x32xf32>
    %91 = vector.extract_strided_slice %59 {offsets = [0, 1, 0], sizes = [2, 1, 32], strides = [1, 1, 1]} : vector<2x3x32xf32> to vector<2x1x32xf32>
    %92 = vector.shape_cast %91 : vector<2x1x32xf32> to vector<2x32xf32>
    %93 = arith.addf %92, %73 : vector<2x32xf32>
    %cst_61 = arith.constant 0.000000e+00 : f32
    %94 = vector.broadcast %cst_61 : f32 to vector<2x32xf32>
    %95 = arith.subf %94, %93 : vector<2x32xf32>
    %96 = math.exp %95 : vector<2x32xf32>
    %cst_62 = arith.constant 1.000000e+00 : f32
    %97 = vector.broadcast %cst_62 : f32 to vector<2x32xf32>
    %98 = arith.addf %97, %96 : vector<2x32xf32>
    %cst_63 = arith.constant 1.000000e+00 : f32
    %99 = vector.broadcast %cst_63 : f32 to vector<2x32xf32>
    %100 = arith.divf %99, %98 : vector<2x32xf32>
    %101 = vector.extract_strided_slice %59 {offsets = [0, 2, 0], sizes = [2, 1, 32], strides = [1, 1, 1]} : vector<2x3x32xf32> to vector<2x1x32xf32>
    %102 = vector.shape_cast %101 : vector<2x1x32xf32> to vector<2x32xf32>
    %103 = arith.mulf %90, %80 : vector<2x32xf32>
    %104 = arith.addf %102, %103 : vector<2x32xf32>
    %105 = math.tanh %104 : vector<2x32xf32>
    %cst_64 = arith.constant 1.000000e+00 : f32
    %106 = vector.broadcast %cst_64 : f32 to vector<2x32xf32>
    %107 = arith.subf %106, %100 : vector<2x32xf32>
    %108 = arith.mulf %107, %105 : vector<2x32xf32>
    %109 = arith.mulf %100, %56 : vector<2x32xf32>
    %110 = arith.addf %108, %109 : vector<2x32xf32>
    %c2_65 = arith.constant 2 : index
    %c0_66 = arith.constant 0 : index
    %111 = vector.load %arg8[%c2_65, %c0_66] : memref<8x32xf32, #tpu.memory_space<vmem>>, vector<2x32xf32>
    tpu.vector_store %arg8[%c2_65, %c0_66], %110 {strides = array<i32>} : memref<8x32xf32, #tpu.memory_space<vmem>>, vector<2x32xf32>,
    %c2_67 = arith.constant 2 : index
    %c0_68 = arith.constant 0 : index
    %c0_69 = arith.constant 0 : index
    %c0_70 = arith.constant 0 : index
    %112 = vector.load %arg1[%c2_67, %c0_68, %c0_69, %c0_70] : memref<4x2x3x32xf32, #tpu.memory_space<vmem>>, vector<1x2x3x32xf32>
    %113 = vector.shape_cast %112 : vector<1x2x3x32xf32> to vector<2x3x32xf32>
    %c0_71 = arith.constant 0 : index
    %c0_72 = arith.constant 0 : index
    %c0_73 = arith.constant 0 : index
    %114 = vector.load %arg2[%c0_71, %c0_72, %c0_73] : memref<3x32x32xf32, #tpu.memory_space<vmem>>, vector<1x32x32xf32>
    %115 = vector.shape_cast %114 : vector<1x32x32xf32> to vector<32x32xf32>
    %cst_74 = arith.constant dense<0.000000e+00> : vector<2x32xf32>
    %116 = tpu.matmul %110, %115, %cst_74 {dimension_numbers = #tpu.dot_dimension_numbers<[1], [0], [0], [1], [0, 0, 1, 1], [], []>} : vector<2x32xf32>, vector<32x32xf32>, vector<2x32xf32> -> vector<2x32xf32>
    %c0_75 = arith.constant 0 : index
    %c0_76 = arith.constant 0 : index
    %c0_77 = arith.constant 0 : index
    %117 = vector.load %arg3[%c0_75, %c0_76, %c0_77] : memref<3x1x32xf32, #tpu.memory_space<vmem>>, vector<1x1x32xf32>
    %118 = vector.shape_cast %117 : vector<1x1x32xf32> to vector<1x32xf32>
    %119 = vector.broadcast %118 : vector<1x32xf32> to vector<2x32xf32>
    %120 = arith.addf %116, %119 : vector<2x32xf32>
    %c1_78 = arith.constant 1 : index
    %c0_79 = arith.constant 0 : index
    %c0_80 = arith.constant 0 : index
    %121 = vector.load %arg2[%c1_78, %c0_79, %c0_80] : memref<3x32x32xf32, #tpu.memory_space<vmem>>, vector<1x32x32xf32>
    %122 = vector.shape_cast %121 : vector<1x32x32xf32> to vector<32x32xf32>
    %cst_81 = arith.constant dense<0.000000e+00> : vector<2x32xf32>
    %123 = tpu.matmul %110, %122, %cst_81 {dimension_numbers = #tpu.dot_dimension_numbers<[1], [0], [0], [1], [0, 0, 1, 1], [], []>} : vector<2x32xf32>, vector<32x32xf32>, vector<2x32xf32> -> vector<2x32xf32>
    %c1_82 = arith.constant 1 : index
    %c0_83 = arith.constant 0 : index
    %c0_84 = arith.constant 0 : index
    %124 = vector.load %arg3[%c1_82, %c0_83, %c0_84] : memref<3x1x32xf32, #tpu.memory_space<vmem>>, vector<1x1x32xf32>
    %125 = vector.shape_cast %124 : vector<1x1x32xf32> to vector<1x32xf32>
    %126 = vector.broadcast %125 : vector<1x32xf32> to vector<2x32xf32>
    %127 = arith.addf %123, %126 : vector<2x32xf32>
    %c2_85 = arith.constant 2 : index
    %c0_86 = arith.constant 0 : index
    %c0_87 = arith.constant 0 : index
    %128 = vector.load %arg2[%c2_85, %c0_86, %c0_87] : memref<3x32x32xf32, #tpu.memory_space<vmem>>, vector<1x32x32xf32>
    %129 = vector.shape_cast %128 : vector<1x32x32xf32> to vector<32x32xf32>
    %cst_88 = arith.constant dense<0.000000e+00> : vector<2x32xf32>
    %130 = tpu.matmul %110, %129, %cst_88 {dimension_numbers = #tpu.dot_dimension_numbers<[1], [0], [0], [1], [0, 0, 1, 1], [], []>} : vector<2x32xf32>, vector<32x32xf32>, vector<2x32xf32> -> vector<2x32xf32>
    %c2_89 = arith.constant 2 : index
    %c0_90 = arith.constant 0 : index
    %c0_91 = arith.constant 0 : index
    %131 = vector.load %arg3[%c2_89, %c0_90, %c0_91] : memref<3x1x32xf32, #tpu.memory_space<vmem>>, vector<1x1x32xf32>
    %132 = vector.shape_cast %131 : vector<1x1x32xf32> to vector<1x32xf32>
    %133 = vector.broadcast %132 : vector<1x32xf32> to vector<2x32xf32>
    %134 = arith.addf %130, %133 : vector<2x32xf32>
    %135 = vector.extract_strided_slice %113 {offsets = [0, 0, 0], sizes = [2, 1, 32], strides = [1, 1, 1]} : vector<2x3x32xf32> to vector<2x1x32xf32>
    %136 = vector.shape_cast %135 : vector<2x1x32xf32> to vector<2x32xf32>
    %137 = arith.addf %136, %120 : vector<2x32xf32>
    %cst_92 = arith.constant 0.000000e+00 : f32
    %138 = vector.broadcast %cst_92 : f32 to vector<2x32xf32>
    %139 = arith.subf %138, %137 : vector<2x32xf32>
    %140 = math.exp %139 : vector<2x32xf32>
    %cst_93 = arith.constant 1.000000e+00 : f32
    %141 = vector.broadcast %cst_93 : f32 to vector<2x32xf32>
    %142 = arith.addf %141, %140 : vector<2x32xf32>
    %cst_94 = arith.constant 1.000000e+00 : f32
    %143 = vector.broadcast %cst_94 : f32 to vector<2x32xf32>
    %144 = arith.divf %143, %142 : vector<2x32xf32>
    %145 = vector.extract_strided_slice %113 {offsets = [0, 1, 0], sizes = [2, 1, 32], strides = [1, 1, 1]} : vector<2x3x32xf32> to vector<2x1x32xf32>
    %146 = vector.shape_cast %145 : vector<2x1x32xf32> to vector<2x32xf32>
    %147 = arith.addf %146, %127 : vector<2x32xf32>
    %cst_95 = arith.constant 0.000000e+00 : f32
    %148 = vector.broadcast %cst_95 : f32 to vector<2x32xf32>
    %149 = arith.subf %148, %147 : vector<2x32xf32>
    %150 = math.exp %149 : vector<2x32xf32>
    %cst_96 = arith.constant 1.000000e+00 : f32
    %151 = vector.broadcast %cst_96 : f32 to vector<2x32xf32>
    %152 = arith.addf %151, %150 : vector<2x32xf32>
    %cst_97 = arith.constant 1.000000e+00 : f32
    %153 = vector.broadcast %cst_97 : f32 to vector<2x32xf32>
    %154 = arith.divf %153, %152 : vector<2x32xf32>
    %155 = vector.extract_strided_slice %113 {offsets = [0, 2, 0], sizes = [2, 1, 32], strides = [1, 1, 1]} : vector<2x3x32xf32> to vector<2x1x32xf32>
    %156 = vector.shape_cast %155 : vector<2x1x32xf32> to vector<2x32xf32>
    %157 = arith.mulf %144, %134 : vector<2x32xf32>
    %158 = arith.addf %156, %157 : vector<2x32xf32>
    %159 = math.tanh %158 : vector<2x32xf32>
    %cst_98 = arith.constant 1.000000e+00 : f32
    %160 = vector.broadcast %cst_98 : f32 to vector<2x32xf32>
    %161 = arith.subf %160, %154 : vector<2x32xf32>
    %162 = arith.mulf %161, %159 : vector<2x32xf32>
    %163 = arith.mulf %154, %110 : vector<2x32xf32>
    %164 = arith.addf %162, %163 : vector<2x32xf32>
    %c4 = arith.constant 4 : index
    %c0_99 = arith.constant 0 : index
    %165 = vector.load %arg8[%c4, %c0_99] : memref<8x32xf32, #tpu.memory_space<vmem>>, vector<2x32xf32>
    tpu.vector_store %arg8[%c4, %c0_99], %164 {strides = array<i32>} : memref<8x32xf32, #tpu.memory_space<vmem>>, vector<2x32xf32>,
    %c3 = arith.constant 3 : index
    %c0_100 = arith.constant 0 : index
    %c0_101 = arith.constant 0 : index
    %c0_102 = arith.constant 0 : index
    %166 = vector.load %arg1[%c3, %c0_100, %c0_101, %c0_102] : memref<4x2x3x32xf32, #tpu.memory_space<vmem>>, vector<1x2x3x32xf32>
    %167 = vector.shape_cast %166 : vector<1x2x3x32xf32> to vector<2x3x32xf32>
    %c0_103 = arith.constant 0 : index
    %c0_104 = arith.constant 0 : index
    %c0_105 = arith.constant 0 : index
    %168 = vector.load %arg2[%c0_103, %c0_104, %c0_105] : memref<3x32x32xf32, #tpu.memory_space<vmem>>, vector<1x32x32xf32>
    %169 = vector.shape_cast %168 : vector<1x32x32xf32> to vector<32x32xf32>
    %cst_106 = arith.constant dense<0.000000e+00> : vector<2x32xf32>
    %170 = tpu.matmul %164, %169, %cst_106 {dimension_numbers = #tpu.dot_dimension_numbers<[1], [0], [0], [1], [0, 0, 1, 1], [], []>} : vector<2x32xf32>, vector<32x32xf32>, vector<2x32xf32> -> vector<2x32xf32>
    %c0_107 = arith.constant 0 : index
    %c0_108 = arith.constant 0 : index
    %c0_109 = arith.constant 0 : index
    %171 = vector.load %arg3[%c0_107, %c0_108, %c0_109] : memref<3x1x32xf32, #tpu.memory_space<vmem>>, vector<1x1x32xf32>
    %172 = vector.shape_cast %171 : vector<1x1x32xf32> to vector<1x32xf32>
    %173 = vector.broadcast %172 : vector<1x32xf32> to vector<2x32xf32>
    %174 = arith.addf %170, %173 : vector<2x32xf32>
    %c1_110 = arith.constant 1 : index
    %c0_111 = arith.constant 0 : index
    %c0_112 = arith.constant 0 : index
    %175 = vector.load %arg2[%c1_110, %c0_111, %c0_112] : memref<3x32x32xf32, #tpu.memory_space<vmem>>, vector<1x32x32xf32>
    %176 = vector.shape_cast %175 : vector<1x32x32xf32> to vector<32x32xf32>
    %cst_113 = arith.constant dense<0.000000e+00> : vector<2x32xf32>
    %177 = tpu.matmul %164, %176, %cst_113 {dimension_numbers = #tpu.dot_dimension_numbers<[1], [0], [0], [1], [0, 0, 1, 1], [], []>} : vector<2x32xf32>, vector<32x32xf32>, vector<2x32xf32> -> vector<2x32xf32>
    %c1_114 = arith.constant 1 : index
    %c0_115 = arith.constant 0 : index
    %c0_116 = arith.constant 0 : index
    %178 = vector.load %arg3[%c1_114, %c0_115, %c0_116] : memref<3x1x32xf32, #tpu.memory_space<vmem>>, vector<1x1x32xf32>
    %179 = vector.shape_cast %178 : vector<1x1x32xf32> to vector<1x32xf32>
    %180 = vector.broadcast %179 : vector<1x32xf32> to vector<2x32xf32>
    %181 = arith.addf %177, %180 : vector<2x32xf32>
    %c2_117 = arith.constant 2 : index
    %c0_118 = arith.constant 0 : index
    %c0_119 = arith.constant 0 : index
    %182 = vector.load %arg2[%c2_117, %c0_118, %c0_119] : memref<3x32x32xf32, #tpu.memory_space<vmem>>, vector<1x32x32xf32>
    %183 = vector.shape_cast %182 : vector<1x32x32xf32> to vector<32x32xf32>
    %cst_120 = arith.constant dense<0.000000e+00> : vector<2x32xf32>
    %184 = tpu.matmul %164, %183, %cst_120 {dimension_numbers = #tpu.dot_dimension_numbers<[1], [0], [0], [1], [0, 0, 1, 1], [], []>} : vector<2x32xf32>, vector<32x32xf32>, vector<2x32xf32> -> vector<2x32xf32>
    %c2_121 = arith.constant 2 : index
    %c0_122 = arith.constant 0 : index
    %c0_123 = arith.constant 0 : index
    %185 = vector.load %arg3[%c2_121, %c0_122, %c0_123] : memref<3x1x32xf32, #tpu.memory_space<vmem>>, vector<1x1x32xf32>
    %186 = vector.shape_cast %185 : vector<1x1x32xf32> to vector<1x32xf32>
    %187 = vector.broadcast %186 : vector<1x32xf32> to vector<2x32xf32>
    %188 = arith.addf %184, %187 : vector<2x32xf32>
    %189 = vector.extract_strided_slice %167 {offsets = [0, 0, 0], sizes = [2, 1, 32], strides = [1, 1, 1]} : vector<2x3x32xf32> to vector<2x1x32xf32>
    %190 = vector.shape_cast %189 : vector<2x1x32xf32> to vector<2x32xf32>
    %191 = arith.addf %190, %174 : vector<2x32xf32>
    %cst_124 = arith.constant 0.000000e+00 : f32
    %192 = vector.broadcast %cst_124 : f32 to vector<2x32xf32>
    %193 = arith.subf %192, %191 : vector<2x32xf32>
    %194 = math.exp %193 : vector<2x32xf32>
    %cst_125 = arith.constant 1.000000e+00 : f32
    %195 = vector.broadcast %cst_125 : f32 to vector<2x32xf32>
    %196 = arith.addf %195, %194 : vector<2x32xf32>
    %cst_126 = arith.constant 1.000000e+00 : f32
    %197 = vector.broadcast %cst_126 : f32 to vector<2x32xf32>
    %198 = arith.divf %197, %196 : vector<2x32xf32>
    %199 = vector.extract_strided_slice %167 {offsets = [0, 1, 0], sizes = [2, 1, 32], strides = [1, 1, 1]} : vector<2x3x32xf32> to vector<2x1x32xf32>
    %200 = vector.shape_cast %199 : vector<2x1x32xf32> to vector<2x32xf32>
    %201 = arith.addf %200, %181 : vector<2x32xf32>
    %cst_127 = arith.constant 0.000000e+00 : f32
    %202 = vector.broadcast %cst_127 : f32 to vector<2x32xf32>
    %203 = arith.subf %202, %201 : vector<2x32xf32>
    %204 = math.exp %203 : vector<2x32xf32>
    %cst_128 = arith.constant 1.000000e+00 : f32
    %205 = vector.broadcast %cst_128 : f32 to vector<2x32xf32>
    %206 = arith.addf %205, %204 : vector<2x32xf32>
    %cst_129 = arith.constant 1.000000e+00 : f32
    %207 = vector.broadcast %cst_129 : f32 to vector<2x32xf32>
    %208 = arith.divf %207, %206 : vector<2x32xf32>
    %209 = vector.extract_strided_slice %167 {offsets = [0, 2, 0], sizes = [2, 1, 32], strides = [1, 1, 1]} : vector<2x3x32xf32> to vector<2x1x32xf32>
    %210 = vector.shape_cast %209 : vector<2x1x32xf32> to vector<2x32xf32>
    %211 = arith.mulf %198, %188 : vector<2x32xf32>
    %212 = arith.addf %210, %211 : vector<2x32xf32>
    %213 = math.tanh %212 : vector<2x32xf32>
    %cst_130 = arith.constant 1.000000e+00 : f32
    %214 = vector.broadcast %cst_130 : f32 to vector<2x32xf32>
    %215 = arith.subf %214, %208 : vector<2x32xf32>
    %216 = arith.mulf %215, %213 : vector<2x32xf32>
    %217 = arith.mulf %208, %164 : vector<2x32xf32>
    %218 = arith.addf %216, %217 : vector<2x32xf32>
    %c6 = arith.constant 6 : index
    %c0_131 = arith.constant 0 : index
    %219 = vector.load %arg8[%c6, %c0_131] : memref<8x32xf32, #tpu.memory_space<vmem>>, vector<2x32xf32>
    tpu.vector_store %arg8[%c6, %c0_131], %218 {strides = array<i32>} : memref<8x32xf32, #tpu.memory_space<vmem>>, vector<2x32xf32>,
    %c0_132 = arith.constant 0 : index
    %c0_133 = arith.constant 0 : index
    %220 = vector.load %arg7[%c0_132, %c0_133] : memref<2x32xf32, #tpu.memory_space<vmem>>, vector<2x32xf32>
    tpu.vector_store %arg7[%c0_132, %c0_133], %218 {strides = array<i32>} : memref<2x32xf32, #tpu.memory_space<vmem>>, vector<2x32xf32>,
    %c0_134 = arith.constant 0 : index
    %c0_135 = arith.constant 0 : index
    %221 = vector.load %arg8[%c0_134, %c0_135] : memref<8x32xf32, #tpu.memory_space<vmem>>, vector<8x32xf32>
    %c0_136 = arith.constant 0 : index
    %c0_137 = arith.constant 0 : index
    %222 = vector.load %arg4[%c0_136, %c0_137] : memref<32x8xf32, #tpu.memory_space<vmem>>, vector<32x8xf32>
    %cst_138 = arith.constant dense<0.000000e+00> : vector<8x8xf32>
    %223 = tpu.matmul %221, %222, %cst_138 {dimension_numbers = #tpu.dot_dimension_numbers<[1], [0], [0], [1], [0, 0, 1, 1], [], []>} : vector<8x32xf32>, vector<32x8xf32>, vector<8x8xf32> -> vector<8x8xf32>
    %c0_139 = arith.constant 0 : index
    %c0_140 = arith.constant 0 : index
    %224 = vector.load %arg5[%c0_139, %c0_140] : memref<1x8xf32, #tpu.memory_space<vmem>>, vector<1x8xf32>
    %225 = vector.broadcast %224 : vector<1x8xf32> to vector<8x8xf32>
    %226 = arith.addf %223, %225 : vector<8x8xf32>
    %c0_141 = arith.constant 0 : index
    %c0_142 = arith.constant 0 : index
    %227 = vector.load %arg6[%c0_141, %c0_142] : memref<8x8xf32, #tpu.memory_space<vmem>>, vector<8x8xf32>
    tpu.vector_store %arg6[%c0_141, %c0_142], %226 {strides = array<i32>} : memref<8x8xf32, #tpu.memory_space<vmem>>, vector<8x8xf32>,
    return
  }
  func.func @transform_0(%arg0: i32) -> (i32, i32, i32, i32) {
    %c0_i32 = arith.constant 0 : i32
    %c0_i32_0 = arith.constant 0 : i32
    %c0_i32_1 = arith.constant 0 : i32
    %c0_i32_2 = arith.constant 0 : i32
    return %arg0, %c0_i32, %c0_i32_0, %c0_i32_1 : i32, i32, i32, i32
  }
  func.func @transform_1(%arg0: i32) -> (i32, i32, i32) {
    %c0_i32 = arith.constant 0 : i32
    %c0_i32_0 = arith.constant 0 : i32
    %c0_i32_1 = arith.constant 0 : i32
    %c0_i32_2 = arith.constant 0 : i32
    return %c0_i32, %c0_i32_0, %c0_i32_1 : i32, i32, i32
  }
  func.func @transform_2(%arg0: i32) -> (i32, i32, i32) {
    %c0_i32 = arith.constant 0 : i32
    %c0_i32_0 = arith.constant 0 : i32
    %c0_i32_1 = arith.constant 0 : i32
    %c0_i32_2 = arith.constant 0 : i32
    return %c0_i32, %c0_i32_0, %c0_i32_1 : i32, i32, i32
  }
  func.func @transform_3(%arg0: i32) -> (i32, i32) {
    %c0_i32 = arith.constant 0 : i32
    %c0_i32_0 = arith.constant 0 : i32
    %c0_i32_1 = arith.constant 0 : i32
    return %c0_i32, %c0_i32_0 : i32, i32
  }
  func.func @transform_4(%arg0: i32) -> (i32, i32) {
    %c0_i32 = arith.constant 0 : i32
    %c0_i32_0 = arith.constant 0 : i32
    %c0_i32_1 = arith.constant 0 : i32
    return %c0_i32, %c0_i32_0 : i32, i32
  }
  func.func @transform_5(%arg0: i32) -> (i32, i32) {
    %c0_i32 = arith.constant 0 : i32
    %c0_i32_0 = arith.constant 0 : i32
    return %arg0, %c0_i32 : i32, i32
  }
}

</mosaic_0001>

<bundles_post_ra>
// kernel: img2seq_forward.3
= control target key start
LH: loop header
LB: loop body
LE: loop exit
PB: predicated region body
PF: predicated region fallthrough
CT: control target
= control target key end

     0   :  { %vm24_vm0 = vcmask 254976   ;;  %v1857_v0 = vmov 0.0|0.0   ;;  %vm1858_vm1 = vmmov 0   ;;  %v1859_v4 = vmov 0.0   ;;  %s2146_s1 = inlined_call_operand.vmem [shape: f32[3,32,32], index: 1, kind: input, shape index: {}]   ;;  %s2147_s2 = inlined_call_operand.vmem [shape: f32[3,1,32], index: 2, kind: input, shape index: {}]   ;;  %s2148_s0 = inlined_call_operand.vmem [shape: f32[4,2,3,32], index: 0, kind: input, shape index: {}]   ;;  %s2149_s3 = inlined_call_operand.vmem [shape: f32[32,8], index: 3, kind: input, shape index: {}]   ;;  %s2150_s4 = inlined_call_operand.vmem [shape: f32[1,8], index: 4, kind: input, shape index: {}]   ;;  %s2151_s5 = inlined_call_operand.vmem [shape: f32[8,8], index: 5, kind: output, shape index: {}]  }
   0x1   :  { %1696 = vmatprep.subr.bf16.mxu0 %v1857_v0  ;;  %v29_v1 = vld [vmem:[%s2146_s1] sm:$0xff]  ;;  %v30_v2 = vld [vmem:[%s2146_s1 + $0x8] sm:$0xff]  ;;  %v31_v3 = vld [vmem:[%s2146_s1 + $0x10] sm:$0xff]  ;;  %1561 = vmatprep.mubr.msk.f32.mxu0 %vm1858_vm1, %v1859_v4  ;;  %25 = vst.msk [vmem:[#allocation2] sm:$0x3] %vm24_vm0, %v1859_v4  ;;  %vm40_vm2 = vcmask 261120  }
   0x2   :  { %v1903_v5 = vpack.c.bf16 %v30_v2, %v29_v1  ;;  %v32_v6 = vld [vmem:[%s2146_s1 + $0x18] sm:$0xff]  ;;  %1702 = vmatprep.subr.bf16.mxu1 %v1857_v0  ;;  %v1418_v7 = vld [vmem:[%s2146_s1 + $0x20] sm:$0xff]  ;;  %v1419_v8 = vld [vmem:[%s2146_s1 + $0x28] sm:$0xff]  ;;  %1572 = vmatprep.mubr.msk.f32.mxu1 %vm1858_vm1, %v1859_v4  ;;  %vm372_vm3 = vcmask 1041409   ;;  %vm352_vm4 = vcmask 1042434   ;;  %vm355_vm5 = vcmask 256001  }
   0x3   :  { %v1917_v9 = vpack.c.bf16 %v1419_v8, %v1418_v7  ;;  %v1420_v10 = vld [vmem:[%s2146_s1 + $0x30] sm:$0xff]  ;;  %v1421_v11 = vld [vmem:[%s2146_s1 + $0x38] sm:$0xff]  ;;  %v1926_v12 = vpack.c.bf16 %v32_v6, %v31_v3  ;;  %v1425_v14 = vld [vmem:[%s2146_s1 + $0x40] sm:$0xff]  ;;  %vm1410_vm6 = vcmask 64512  }
   0x4   :  { %1698 = vmatpush3.bf16.msra.mxu0 %v1903_v5  ;;  %v1930_v13 = vpack.c.bf16 %v1421_v11, %v1420_v10  ;;  %v1426_v15 = vld [vmem:[%s2146_s1 + $0x48] sm:$0xff]  ;;  %v1427_v18 = vld [vmem:[%s2146_s1 + $0x50] sm:$0xff]  ;;  %v1428_v19 = vld [vmem:[%s2146_s1 + $0x58] sm:$0xff] }
   0x5   :  { %1699 = vmatprep.subr.bf16.mxu0 %v1857_v0  ;;  %1704 = vmatpush3.bf16.msra.mxu1 %v1917_v9  ;;  %v1942_v17 = vpack.c.bf16 %v1426_v15, %v1425_v14  ;;  %v1958_v20 = vpack.c.bf16 %v1428_v19, %v1427_v18  ;;  %v1982_v21 = vld [vmem:[%s2147_s2] ss:$0 sm:$0xff]  ;;  %v1987_v22 = vld [vmem:[%s2147_s2 + $0x1] ss:$0 sm:$0xff]  ;;  %v28_v28 = vld [vmem:[%s2148_s0 + $0x4] sm:$0x7] }
   0x6   :  { %1705 = vmatprep.subr.bf16.mxu1 %v1857_v0  ;;  %v27_v23 = vld [vmem:[%s2148_s0] sm:$0x7] }
   0x7   :  { %v2000_v51 = vld [vmem:[%s2147_s2 + $0x2] ss:$0 sm:$0xff] }
   0x8   :  { %1701 = vmatpush3.bf16.msra.mxu0 %v1926_v12  ;;  %v1940_v16 = vld [vmem:[#allocation2] sm:$0x3] }
   0x9   :  { %1707 = vmatpush3.bf16.msra.mxu1 %v1930_v13  ;;  %1708 = vmatprep.subr.bf16.mxu0 %v1857_v0  ;;  %v342_v8 = vrot.slane %v1940_v16, 7 }
   0xa   :  { %1714 = vmatprep.subr.bf16.mxu1 %v1857_v0 }
   0xb   :  { %1562 = vmatmul.mubr.msk.f32.vlgmr.msra.gmra.mrb[0].mxu0 %vm40_vm2, %v1940_v16 }
   0xc   :  { %1573 = vmatmul.mubr.msk.f32.vlgmr.msra.gmra.mrb[0].mxu1 %vm40_vm2, %v1940_v16  ;;  %1710 = vmatpush3.bf16.msra.mxu0 %v1942_v17 }
   0xd   :  { %1711 = vmatprep.subr.bf16.mxu0 %v1857_v0  ;;  %1583 = vmatprep.mubr.msk.f32.mxu0 %vm1858_vm1, %v1859_v4 }
   0xe   :  { %1716 = vmatpush3.bf16.msra.mxu1 %v1903_v5  ;;  %1594 = vmatprep.mubr.msk.f32.mxu1 %vm1858_vm1, %v1859_v4 }
   0xf   :  { %1717 = vmatprep.subr.bf16.mxu1 %v1857_v0 }
  0x10   :  { %1713 = vmatpush3.bf16.msra.mxu0 %v1958_v20 }
  0x11   :  { %1720 = vmatprep.subr.bf16.mxu0 %v1857_v0 }
  0x12   :  { %1719 = vmatpush3.bf16.msra.mxu1 %v1926_v12 }
  0x13   :  { %1584 = vmatmul.mubr.msk.f32.vlgmr.msra.gmra.mrb[2].mxu0 %vm40_vm2, %v1940_v16  ;;  %1726 = vmatprep.subr.bf16.mxu1 %v1857_v0 }
  0x14   :  { %1722 = vmatpush3.bf16.msra.mxu0 %v1917_v9  ;;  %1605 = vmatprep.mubr.msk.f32.mxu0 %vm1858_vm1, %v1859_v4 }
  0x15   :  { %1723 = vmatprep.subr.bf16.mxu0 %v1857_v0 }
  0x18   :  { %1725 = vmatpush3.bf16.msra.mxu0 %v1930_v13 }
  0x19   :  { %1732 = vmatprep.subr.bf16.mxu0 %v1857_v0 }
  0xde   :  { %v110_v24 = vpop.f32.mrb[0].mxu0 }
  0xdf   :  { %v111_v25 = vadd.f32 %v1982_v21, %v110_v24  ;;  %v1563_v26 = vpop.f32.mrb[1].mxu0  ;;  %v193_v27 = vpop.f32.mrb[0].mxu1 }
  0xe0   :  { %v194_v29 = vadd.f32 %v1987_v22, %v193_v27  ;;  %v1574_v30 = vpop.f32.mrb[1].mxu1 }
  0xe1   :  { %v281_v31 = vrot.slane %v111_v25, 1  ;;  %v284_v32 = vadd.f32 %v111_v25, %v27_v23 }
  0xe2   :  { %v299_v33 = vrot.slane %v194_v29, 7  ;;  %v303_v41 = vadd.f32 %v194_v29, %v28_v28 }
  0xe3   :  { %v285_v34 = vadd.f32 %v281_v31, %v28_v28  ;;  %v286_v35 = vsub.f32 0.0, %v284_v32 }
  0xe4   :  { %v302_v36 = vadd.f32 %v299_v33, %v27_v23  ;;  %v305_v44 = vsub.f32 0.0, %v303_v41 }
  0xe5   :  { %v287_v37 = vsub.f32 0.0, %v285_v34  ;;  %v288_v38 = vmul.f32 1.442695, %v286_v35 }
  0xe6   :  { %v276_v39 = vpop.f32.mrb[2].mxu0  ;;  %v304_v43 = vsub.f32 0.0, %v302_v36  ;;  %v308_v46 = vmul.f32 1.442695, %v305_v44 }
  0xe7   :  { %1777 = vpow2.f32 %v288_v38  ;;  %v290_v40 = vmul.f32 1.442695, %v287_v37  ;;  %v1585_v42 = vpop.f32.mrb[3].mxu0  ;;  %v277_v52 = vadd.f32 %v2000_v51, %v276_v39 }
  0xe8   :  { %v306_v45 = vmul.f32 1.442695, %v304_v43 }
  0xe9   :  { %1779 = vpow2.f32 %v290_v40  ;;  %v317_v56 = vrot.slane %v277_v52, 1  ;;  %v1433_v40 = vld [vmem:[%s2148_s0 + $0xc] sm:$0x7] }
  0xea   :  { %1781 = vpow2.f32 %v306_v45 }
  0xeb   :  { %1783 = vpow2.f32 %v308_v46 }
  0xf1   :  { %v1778_v47 = vpop.eup %1777 }
  0xf2   :  { %v292_v48 = vadd.f32 1.0, %v1778_v47 }
  0xf3   :  { %v1780_v49 = vpop.eup %1779 }
  0xf4   :  { %v293_v50 = vadd.f32 1.0, %v1780_v49  ;;  %1785 = vrcp.f32 %v292_v48  ;;  %v1782_v53 = vpop.eup %1781 }
  0xf5   :  { %v1784_v54 = vpop.eup %1783  ;;  %v310_v55 = vadd.f32 1.0, %v1782_v53 }
  0xf6   :  { %1787 = vrcp.f32 %v293_v50  ;;  %v311_v60 = vadd.f32 1.0, %v1784_v54 }
  0xf7   :  { %1789 = vrcp.f32 %v310_v55 }
  0xf8   :  { %1791 = vrcp.f32 %v311_v60 }
  0xfe   :  { %v1786_v57 = vpop.eup %1785 }
  0xff   :  { %v320_v58 = vmul.f32 %v1786_v57, %v277_v52 }
 0x100   :  { %v1788_v59 = vpop.eup %1787 }
 0x101   :  { %v321_v61 = vmul.f32 %v1788_v59, %v317_v56  ;;  %v324_v62 = vrot.slane %v320_v58, 6  ;;  %v1790_v3 = vpop.eup %1789 }
 0x102   :  { %v1792_v6 = vpop.eup %1791  ;;  %v332_v7 = vsub.f32 1.0, %v1790_v3  ;;  %v345_v19 = vmul.f32 %v1790_v3, %v342_v8 }
 0x103   :  { %v325_v63 = vrot.slane %v321_v61, 6  ;;  %v328_v1 = vadd.f32 %v324_v62, %v27_v23  ;;  %v333_v24 = vsub.f32 1.0, %v1792_v6  ;;  %v346_v23 = vmul.f32 %v1792_v6, %v1940_v16  ;;  %v1432_v16 = vld [vmem:[%s2148_s0 + $0x8] sm:$0x7] }
 0x105   :  { %v329_v2 = vadd.f32 %v325_v63, %v28_v28  ;;  %1793 = vtanh.f32 %v328_v1 }
 0x107   :  { %1795 = vtanh.f32 %v329_v2 }
 0x10f   :  { %v1794_v10 = vpop.eup %1793 }
 0x110   :  { %v336_v11 = vrot.slane %v1794_v10, 1 }
 0x111   :  { %v1796_v14 = vpop.eup %1795 }
 0x112   :  { %v337_v15 = vrot.slane %v1796_v14, 1  ;;  %v340_v18 = vmul.f32 %v336_v11, %v332_v7 }
 0x114   :  { %v2004_v25 = vadd.f32 %v345_v19, %v340_v18  ;;  %v341_v26 = vmul.f32 %v337_v15, %v333_v24 }
 0x116   :  { %v2007_v27 = vadd.f32 %v346_v23, %v341_v26  ;;  %v371_v28 = vrot.slane %v2004_v25, 1 }
 0x118   :  { %v351_v29 = vrot.slane %v2007_v27, 7  ;;  %v373_v30 = vsel %vm372_vm3, %v2007_v27, %v371_v28 }
 0x119   :  { %1595 = vmatmul.mubr.msk.f32.vlgmr.msra.gmra.mrb[2].mxu1 %vm40_vm2, %v373_v30  ;;  %1606 = vmatmul.mubr.msk.f32.vlgmr.msra.gmra.mrb[4].mxu0 %vm40_vm2, %v373_v30 }
 0x11a   :  { %v353_v31 = vsel %vm352_vm4, %v351_v29, %v2004_v25  ;;  %1728 = vmatpush3.bf16.msra.mxu1 %v1942_v17  ;;  %1616 = vmatprep.mubr.msk.f32.mxu1 %vm1858_vm1, %v1859_v4 }
 0x11b   :  { %356 = vst.msk [vmem:[#allocation3 - $0x1] sm:$0x6] %vm355_vm5, %v353_v31  ;;  %1729 = vmatprep.subr.bf16.mxu1 %v1857_v0  ;;  %1734 = vmatpush3.bf16.msra.mxu0 %v1903_v5 }
 0x11c   :  { %1735 = vmatprep.subr.bf16.mxu0 %v1857_v0  ;;  %1627 = vmatprep.mubr.msk.f32.mxu0 %vm1858_vm1, %v1859_v4 }
 0x11e   :  { %1731 = vmatpush3.bf16.msra.mxu1 %v1958_v20 }
 0x11f   :  { %1738 = vmatprep.subr.bf16.mxu1 %v1857_v0  ;;  %1737 = vmatpush3.bf16.msra.mxu0 %v1926_v12 }
 0x120   :  { %1744 = vmatprep.subr.bf16.mxu0 %v1857_v0 }
 0x121   :  { %1617 = vmatmul.mubr.msk.f32.vlgmr.msra.gmra.mrb[4].mxu1 %vm40_vm2, %v373_v30 }
 0x122   :  { %1740 = vmatpush3.bf16.msra.mxu1 %v1917_v9  ;;  %1638 = vmatprep.mubr.msk.f32.mxu1 %vm1858_vm1, %v1859_v4 }
 0x123   :  { %1741 = vmatprep.subr.bf16.mxu1 %v1857_v0 }
 0x126   :  { %1743 = vmatpush3.bf16.msra.mxu1 %v1930_v13 }
 0x127   :  { %1750 = vmatprep.subr.bf16.mxu1 %v1857_v0 }
 0x1ec   :  { %v442_v32 = vpop.f32.mrb[2].mxu1  ;;  %v523_v33 = vpop.f32.mrb[4].mxu0 }
 0x1ed   :  { %v443_v34 = vadd.f32 %v1982_v21, %v442_v32  ;;  %v524_v35 = vadd.f32 %v1987_v22, %v523_v33  ;;  %v1596_v36 = vpop.f32.mrb[3].mxu1  ;;  %v1607_v37 = vpop.f32.mrb[5].mxu0 }
 0x1ef   :  { %v609_v38 = vrot.slane %v443_v34, 1  ;;  %v612_v39 = vadd.f32 %v1432_v16, %v443_v34  ;;  %v627_v41 = vrot.slane %v524_v35, 7  ;;  %v631_v49 = vadd.f32 %v1433_v40, %v524_v35 }
 0x1f1   :  { %v613_v42 = vadd.f32 %v1433_v40, %v609_v38  ;;  %v614_v43 = vsub.f32 0.0, %v612_v39  ;;  %v630_v46 = vadd.f32 %v1432_v16, %v627_v41  ;;  %v633_v53 = vsub.f32 0.0, %v631_v49 }
 0x1f3   :  { %v615_v44 = vsub.f32 0.0, %v613_v42  ;;  %v616_v45 = vmul.f32 1.442695, %v614_v43  ;;  %v632_v52 = vsub.f32 0.0, %v630_v46  ;;  %v636_v55 = vmul.f32 1.442695, %v633_v53 }
 0x1f4   :  { %v604_v47 = vpop.f32.mrb[4].mxu1 }
 0x1f5   :  { %1797 = vpow2.f32 %v616_v45  ;;  %v618_v48 = vmul.f32 1.442695, %v615_v44  ;;  %v1618_v50 = vpop.f32.mrb[5].mxu1  ;;  %v634_v54 = vmul.f32 1.442695, %v632_v52  ;;  %v605_v60 = vadd.f32 %v2000_v51, %v604_v47 }
 0x1f7   :  { %1799 = vpow2.f32 %v618_v48  ;;  %v645_v2 = vrot.slane %v605_v60, 1 }
 0x1f8   :  { %1801 = vpow2.f32 %v634_v54 }
 0x1f9   :  { %1803 = vpow2.f32 %v636_v55 }
 0x1ff   :  { %v1798_v56 = vpop.eup %1797 }
 0x200   :  { %v620_v57 = vadd.f32 1.0, %v1798_v56 }
 0x201   :  { %v1800_v58 = vpop.eup %1799 }
 0x202   :  { %v621_v59 = vadd.f32 1.0, %v1800_v58  ;;  %1805 = vrcp.f32 %v620_v57  ;;  %v1802_v61 = vpop.eup %1801 }
 0x203   :  { %v1804_v62 = vpop.eup %1803  ;;  %v638_v1 = vadd.f32 1.0, %v1802_v61 }
 0x204   :  { %1807 = vrcp.f32 %v621_v59  ;;  %v639_v7 = vadd.f32 1.0, %v1804_v62 }
 0x205   :  { %1809 = vrcp.f32 %v638_v1 }
 0x206   :  { %1811 = vrcp.f32 %v639_v7 }
 0x20c   :  { %v1806_v63 = vpop.eup %1805 }
 0x20d   :  { %v648_v3 = vmul.f32 %v1806_v63, %v605_v60 }
 0x20e   :  { %v1808_v6 = vpop.eup %1807 }
 0x20f   :  { %v649_v8 = vmul.f32 %v1808_v6, %v645_v2  ;;  %v652_v10 = vrot.slane %v648_v3, 6  ;;  %v1810_v18 = vpop.eup %1809 }
 0x210   :  { %v1812_v19 = vpop.eup %1811  ;;  %v660_v26 = vsub.f32 1.0, %v1810_v18  ;;  %v670_v31 = vmul.f32 %v1810_v18, %v2004_v25 }
 0x211   :  { %v653_v11 = vrot.slane %v649_v8, 6  ;;  %v656_v14 = vadd.f32 %v1432_v16, %v652_v10  ;;  %v661_v32 = vsub.f32 1.0, %v1812_v19  ;;  %v671_v16 = vmul.f32 %v1812_v19, %v2007_v27 }
 0x213   :  { %v657_v15 = vadd.f32 %v1433_v40, %v653_v11  ;;  %1813 = vtanh.f32 %v656_v14 }
 0x215   :  { %1815 = vtanh.f32 %v657_v15 }
 0x21d   :  { %v1814_v24 = vpop.eup %1813 }
 0x21e   :  { %v664_v23 = vrot.slane %v1814_v24, 1 }
 0x21f   :  { %v1816_v28 = vpop.eup %1815 }
 0x220   :  { %v665_v29 = vrot.slane %v1816_v28, 1  ;;  %v668_v30 = vmul.f32 %v664_v23, %v660_v26 }
 0x222   :  { %v2047_v33 = vadd.f32 %v670_v31, %v668_v30  ;;  %v669_v34 = vmul.f32 %v665_v29, %v661_v32 }
 0x224   :  { %v2050_v35 = vadd.f32 %v671_v16, %v669_v34  ;;  %v694_v36 = vrot.slane %v2047_v33, 1 }
 0x226   :  { %v676_v37 = vrot.slane %v2050_v35, 7  ;;  %v695_v38 = vsel %vm372_vm3, %v2050_v35, %v694_v36 }
 0x227   :  { %1628 = vmatmul.mubr.msk.f32.vlgmr.msra.gmra.mrb[6].mxu0 %vm40_vm2, %v695_v38  ;;  %1639 = vmatmul.mubr.msk.f32.vlgmr.msra.gmra.mrb[6].mxu1 %vm40_vm2, %v695_v38 }
 0x228   :  { %v677_v25 = vsel %vm352_vm4, %v676_v37, %v2047_v33  ;;  %1746 = vmatpush3.bf16.msra.mxu0 %v1942_v17  ;;  %1649 = vmatprep.mubr.msk.f32.mxu0 %vm1858_vm1, %v1859_v4 }
 0x229   :  { %679 = vst.msk [vmem:[#allocation3 + $0x1] sm:$0x6] %vm355_vm5, %v677_v25  ;;  %1747 = vmatprep.subr.bf16.mxu0 %v1857_v0  ;;  %1752 = vmatpush3.bf16.msra.mxu1 %v1903_v5  ;;  %v1450_v5 = vld [vmem:[%s2148_s0 + $0x10] sm:$0x7] }
 0x22a   :  { %1753 = vmatprep.subr.bf16.mxu1 %v1857_v0  ;;  %1660 = vmatprep.mubr.msk.f32.mxu1 %vm1858_vm1, %v1859_v4 }
 0x22c   :  { %1749 = vmatpush3.bf16.msra.mxu0 %v1958_v20 }
 0x22d   :  { %1756 = vmatprep.subr.bf16.mxu0 %v1857_v0  ;;  %1755 = vmatpush3.bf16.msra.mxu1 %v1926_v12 }
 0x22e   :  { %1762 = vmatprep.subr.bf16.mxu1 %v1857_v0 }
 0x22f   :  { %1650 = vmatmul.mubr.msk.f32.vlgmr.msra.gmra.mrb[8].mxu0 %vm40_vm2, %v695_v38 }
 0x230   :  { %1758 = vmatpush3.bf16.msra.mxu0 %v1917_v9  ;;  %1671 = vmatprep.mubr.msk.f32.mxu0 %vm1858_vm1, %v1859_v4 }
 0x231   :  { %1759 = vmatprep.subr.bf16.mxu0 %v1857_v0 }
 0x234   :  { %1761 = vmatpush3.bf16.msra.mxu0 %v1930_v13  ;;  %v1451_v13 = vld [vmem:[%s2148_s0 + $0x14] sm:$0x7] }
 0x235   :  { %1768 = vmatprep.subr.bf16.mxu0 %v1857_v0 }
 0x2fa   :  { %v764_v12 = vpop.f32.mrb[6].mxu0  ;;  %v845_v27 = vpop.f32.mrb[6].mxu1 }
 0x2fb   :  { %v765_v39 = vadd.f32 %v1982_v21, %v764_v12  ;;  %v846_v40 = vadd.f32 %v1987_v22, %v845_v27  ;;  %v1629_v9 = vpop.f32.mrb[7].mxu0  ;;  %v1640_v41 = vpop.f32.mrb[7].mxu1 }
 0x2fc   :  { %v1328_v9 = vld [vmem:[%s2149_s3 + $0x10] sm:$0xff]  ;;  %v1468_v41 = vld [vmem:[%s2148_s0 + $0x18] sm:$0x7] }
 0x2fd   :  { %v931_v42 = vrot.slane %v765_v39, 1  ;;  %v934_v43 = vadd.f32 %v1450_v5, %v765_v39  ;;  %v949_v44 = vrot.slane %v846_v40, 7  ;;  %v953_v53 = vadd.f32 %v1451_v13, %v846_v40 }
 0x2ff   :  { %v935_v45 = vadd.f32 %v1451_v13, %v931_v42  ;;  %v936_v46 = vsub.f32 0.0, %v934_v43  ;;  %v952_v49 = vadd.f32 %v1450_v5, %v949_v44  ;;  %v955_v56 = vsub.f32 0.0, %v953_v53 }
 0x301   :  { %v937_v47 = vsub.f32 0.0, %v935_v45  ;;  %v938_v48 = vmul.f32 1.442695, %v936_v46  ;;  %v954_v55 = vsub.f32 0.0, %v952_v49  ;;  %v958_v58 = vmul.f32 1.442695, %v955_v56 }
 0x302   :  { %v926_v50 = vpop.f32.mrb[8].mxu0  ;;  %v1469_v49 = vld [vmem:[%s2148_s0 + $0x1c] sm:$0x7] }
 0x303   :  { %1817 = vpow2.f32 %v938_v48  ;;  %v940_v52 = vmul.f32 1.442695, %v937_v47  ;;  %v1651_v54 = vpop.f32.mrb[9].mxu0  ;;  %v956_v57 = vmul.f32 1.442695, %v954_v55  ;;  %v927_v63 = vadd.f32 %v2000_v51, %v926_v50 }
 0x305   :  { %1819 = vpow2.f32 %v940_v52  ;;  %v967_v7 = vrot.slane %v927_v63, 1 }
 0x306   :  { %1821 = vpow2.f32 %v956_v57 }
 0x307   :  { %1823 = vpow2.f32 %v958_v58 }
 0x30d   :  { %v1818_v59 = vpop.eup %1817 }
 0x30e   :  { %v942_v60 = vadd.f32 1.0, %v1818_v59 }
 0x30f   :  { %v1820_v61 = vpop.eup %1819 }
 0x310   :  { %v943_v62 = vadd.f32 1.0, %v1820_v61  ;;  %1825 = vrcp.f32 %v942_v60  ;;  %v1822_v1 = vpop.eup %1821 }
 0x311   :  { %v1824_v2 = vpop.eup %1823  ;;  %v960_v6 = vadd.f32 1.0, %v1822_v1 }
 0x312   :  { %1827 = vrcp.f32 %v943_v62  ;;  %v961_v11 = vadd.f32 1.0, %v1824_v2 }
 0x313   :  { %1829 = vrcp.f32 %v960_v6 }
 0x314   :  { %1831 = vrcp.f32 %v961_v11 }
 0x31a   :  { %v1826_v3 = vpop.eup %1825 }
 0x31b   :  { %v970_v8 = vmul.f32 %v1826_v3, %v927_v63 }
 0x31c   :  { %v1828_v10 = vpop.eup %1827 }
 0x31d   :  { %v971_v14 = vmul.f32 %v1828_v10, %v967_v7  ;;  %v974_v15 = vrot.slane %v970_v8, 6  ;;  %v1830_v26 = vpop.eup %1829 }
 0x31e   :  { %v1832_v23 = vpop.eup %1831  ;;  %v982_v29 = vsub.f32 1.0, %v1830_v26  ;;  %v992_v16 = vmul.f32 %v1830_v26, %v2047_v33 }
 0x31f   :  { %v975_v18 = vrot.slane %v971_v14, 6  ;;  %v978_v19 = vadd.f32 %v1450_v5, %v974_v15  ;;  %v983_v36 = vsub.f32 1.0, %v1832_v23  ;;  %v993_v25 = vmul.f32 %v1832_v23, %v2050_v35  ;;  %v1326_v35 = vld [vmem:[%s2149_s3] sm:$0xff] }
 0x321   :  { %v979_v24 = vadd.f32 %v1451_v13, %v975_v18  ;;  %1833 = vtanh.f32 %v978_v19 }
 0x323   :  { %1835 = vtanh.f32 %v979_v24 }
 0x32b   :  { %v1834_v28 = vpop.eup %1833 }
 0x32c   :  { %v986_v30 = vrot.slane %v1834_v28, 1 }
 0x32d   :  { %v1836_v31 = vpop.eup %1835 }
 0x32e   :  { %v987_v32 = vrot.slane %v1836_v31, 1  ;;  %v990_v34 = vmul.f32 %v986_v30, %v982_v29 }
 0x330   :  { %v2090_v37 = vadd.f32 %v992_v16, %v990_v34  ;;  %v991_v38 = vmul.f32 %v987_v32, %v983_v36 }
 0x332   :  { %v2093_v5 = vadd.f32 %v993_v25, %v991_v38  ;;  %v1016_v12 = vrot.slane %v2090_v37, 1 }
 0x334   :  { %v998_v27 = vrot.slane %v2093_v5, 7  ;;  %v1017_v39 = vsel %vm372_vm3, %v2093_v5, %v1016_v12 }
 0x335   :  { %1661 = vmatmul.mubr.msk.f32.vlgmr.msra.gmra.mrb[8].mxu1 %vm40_vm2, %v1017_v39  ;;  %1672 = vmatmul.mubr.msk.f32.vlgmr.msra.gmra.mrb[10].mxu0 %vm40_vm2, %v1017_v39 }
 0x336   :  { %v999_v33 = vsel %vm352_vm4, %v998_v27, %v2090_v37  ;;  %1764 = vmatpush3.bf16.msra.mxu1 %v1942_v17  ;;  %1682 = vmatprep.mubr.msk.f32.mxu1 %vm1858_vm1, %v1859_v4  ;;  %v1327_v17 = vld [vmem:[%s2149_s3 + $0x8] sm:$0xff] }
 0x337   :  { %1001 = vst.msk [vmem:[#allocation3 + $0x3] sm:$0x6] %vm355_vm5, %v999_v33  ;;  %1765 = vmatprep.subr.bf16.mxu1 %v1857_v0  ;;  %1693 = vmatprep.mubr.msk.f32.mxu0 %vm1858_vm1, %v1859_v4  ;;  %v1769_v40 = vpack.c.bf16 %v1327_v17, %v1326_v35  ;;  %v1329_v4 = vld [vmem:[%s2149_s3 + $0x18] sm:$0xff] }
 0x339   :  { %1770 = vmatpush3.bf16.msra.mxu0 %v1769_v40 }
 0x33a   :  { %1767 = vmatpush3.bf16.msra.mxu1 %v1958_v20  ;;  %v1772_v20 = vpack.c.bf16 %v1329_v4, %v1328_v9  ;;  %1771 = vmatprep.subr.bf16.mxu0 %v1857_v0  ;;  %v1486_v9 = vld [vmem:[%s2150_s4] ss:$0 sm:$0xff] }
 0x33d   :  { %1683 = vmatmul.mubr.msk.f32.vlgmr.msra.gmra.mrb[10].mxu1 %vm40_vm2, %v1017_v39  ;;  %1773 = vmatpush3.bf16.msra.mxu0 %v1772_v20 }
 0x408   :  { %v1086_v42 = vpop.f32.mrb[8].mxu1  ;;  %v1167_v43 = vpop.f32.mrb[10].mxu0 }
 0x409   :  { %v1087_v13 = vadd.f32 %v1982_v21, %v1086_v42  ;;  %v1168_v44 = vadd.f32 %v1987_v22, %v1167_v43  ;;  %v1662_v45 = vpop.f32.mrb[9].mxu1  ;;  %v1673_v46 = vpop.f32.mrb[11].mxu0 }
 0x40b   :  { %v1253_v47 = vrot.slane %v1087_v13, 1  ;;  %v1256_v48 = vadd.f32 %v1468_v41, %v1087_v13  ;;  %v1271_v0 = vrot.slane %v1168_v44, 7  ;;  %v1275_v21 = vadd.f32 %v1469_v49, %v1168_v44 }
 0x40d   :  { %v1257_v50 = vadd.f32 %v1469_v49, %v1253_v47  ;;  %v1258_v52 = vsub.f32 0.0, %v1256_v48  ;;  %v1274_v55 = vadd.f32 %v1468_v41, %v1271_v0  ;;  %v1277_v59 = vsub.f32 0.0, %v1275_v21 }
 0x40f   :  { %v1259_v53 = vsub.f32 0.0, %v1257_v50  ;;  %v1260_v54 = vmul.f32 1.442695, %v1258_v52  ;;  %v1276_v22 = vsub.f32 0.0, %v1274_v55  ;;  %v1280_v61 = vmul.f32 1.442695, %v1277_v59 }
 0x410   :  { %v1248_v56 = vpop.f32.mrb[10].mxu1 }
 0x411   :  { %1837 = vpow2.f32 %v1260_v54  ;;  %v1262_v57 = vmul.f32 1.442695, %v1259_v53  ;;  %v1684_v58 = vpop.f32.mrb[11].mxu1  ;;  %v1278_v60 = vmul.f32 1.442695, %v1276_v22  ;;  %v1249_v3 = vadd.f32 %v2000_v51, %v1248_v56 }
 0x413   :  { %1839 = vpow2.f32 %v1262_v57  ;;  %v1289_v11 = vrot.slane %v1249_v3, 1 }
 0x414   :  { %1841 = vpow2.f32 %v1278_v60 }
 0x415   :  { %1843 = vpow2.f32 %v1280_v61 }
 0x41b   :  { %v1838_v62 = vpop.eup %1837 }
 0x41c   :  { %v1264_v63 = vadd.f32 1.0, %v1838_v62 }
 0x41d   :  { %v1840_v1 = vpop.eup %1839 }
 0x41e   :  { %v1265_v2 = vadd.f32 1.0, %v1840_v1  ;;  %1845 = vrcp.f32 %v1264_v63  ;;  %v1842_v6 = vpop.eup %1841 }
 0x41f   :  { %v1844_v7 = vpop.eup %1843  ;;  %v1282_v10 = vadd.f32 1.0, %v1842_v6 }
 0x420   :  { %1847 = vrcp.f32 %v1265_v2  ;;  %v1283_v18 = vadd.f32 1.0, %v1844_v7 }
 0x421   :  { %1849 = vrcp.f32 %v1282_v10 }
 0x422   :  { %1851 = vrcp.f32 %v1283_v18 }
 0x428   :  { %v1846_v8 = vpop.eup %1845 }
 0x429   :  { %v1292_v14 = vmul.f32 %v1846_v8, %v1249_v3 }
 0x42a   :  { %v1848_v15 = vpop.eup %1847 }
 0x42b   :  { %v1293_v19 = vmul.f32 %v1848_v15, %v1289_v11  ;;  %v1296_v24 = vrot.slane %v1292_v14, 6  ;;  %v1850_v29 = vpop.eup %1849 }
 0x42c   :  { %v1852_v30 = vpop.eup %1851  ;;  %v1304_v31 = vsub.f32 1.0, %v1850_v29  ;;  %v1314_v25 = vmul.f32 %v1850_v29, %v2090_v37 }
 0x42d   :  { %v1297_v26 = vrot.slane %v1293_v19, 6  ;;  %v1300_v23 = vadd.f32 %v1468_v41, %v1296_v24  ;;  %v1305_v16 = vsub.f32 1.0, %v1852_v30  ;;  %v1315_v27 = vmul.f32 %v1852_v30, %v2093_v5 }
 0x42f   :  { %v1301_v28 = vadd.f32 %v1469_v49, %v1297_v26  ;;  %1853 = vtanh.f32 %v1300_v23 }
 0x431   :  { %1855 = vtanh.f32 %v1301_v28 }
 0x439   :  { %v1854_v51 = vpop.eup %1853 }
 0x43a   :  { %v1308_v32 = vrot.slane %v1854_v51, 1 }
 0x43b   :  { %v1856_v34 = vpop.eup %1855 }
 0x43c   :  { %v1309_v36 = vrot.slane %v1856_v34, 1  ;;  %v1312_v38 = vmul.f32 %v1308_v32, %v1304_v31 }
 0x43e   :  { %v1313_v12 = vmul.f32 %v1309_v36, %v1305_v16  ;;  %v1316_v39 = vadd.f32 %v1314_v25, %v1312_v38 }
 0x440   :  { %v1317_v33 = vadd.f32 %v1315_v27, %v1313_v12 }
 0x442   :  { %v1320_v35 = vrot.slane %v1317_v33, 7 }
 0x444   :  { %v1321_v17 = vsel %vm352_vm4, %v1320_v35, %v1316_v39 }
 0x445   :  { %1323 = vst.msk [vmem:[#allocation3 + $0x5] sm:$0x6] %vm355_vm5, %v1321_v17  ;;  %1324 = vst.msk [vmem:[#allocation2 - $0x1] sm:$0x6] %vm355_vm5, %v1321_v17 }
 0x44c   :  { %v1325_v40 = vld [vmem:[#allocation3] sm:$0xff] }
 0x44d   :  { %1694 = vmatmul.mubr.msk.f32.vlgmr.msra.gmra.mrb[12].mxu0 %vm40_vm2, %v1325_v40 }
 0x520   :  { %v1406_v37 = vpop.f32.mrb[12].mxu0 }
 0x521   :  { %v1407_v4 = vadd.f32 %v1486_v9, %v1406_v37  ;;  %v1695_v5 = vpop.f32.mrb[13].mxu0 }
 0x523   :  { %1411 = vst.msk [vmem:[%s2151_s5] sm:$0xff] %vm1410_vm6, %v1407_v4 }

// kernel: img2seq_forward.2
= control target key start
LH: loop header
LB: loop body
LE: loop exit
PB: predicated region body
PF: predicated region fallthrough
CT: control target
= control target key end

     0   :  { %s8701_s0 = inlined_call_operand.hbm [shape: f32[2,16,16], index: 0, kind: input, shape index: {}]   ;;  %s8702_s1 = inlined_call_operand.vmem [shape: f32[18], index: 1, kind: input, shape index: {}]   ;;  %s8703_s2 = inlined_call_operand.hbm [shape: f32[2], index: 2, kind: input, shape index: {}]   ;;  %s8704_s3 = inlined_call_operand.vmem [shape: f32[36], index: 3, kind: input, shape index: {}]   ;;  %s8705_s4 = inlined_call_operand.hbm [shape: f32[2], index: 4, kind: input, shape index: {}]   ;;  %s8706_s5 = inlined_call_operand.vmem [shape: f32[72], index: 5, kind: input, shape index: {}]   ;;  %s8707_s6 = inlined_call_operand.hbm [shape: f32[4], index: 6, kind: input, shape index: {}]   ;;  %s8708_s7 = inlined_call_operand.vmem [shape: f32[144], index: 7, kind: input, shape index: {}]   ;;  %s8709_s8 = inlined_call_operand.hbm [shape: f32[4], index: 8, kind: input, shape index: {}]   ;;  %s8710_s9 = inlined_call_operand.vmem [shape: f32[3,4,4,32], index: 9, kind: input, shape index: {}]   ;;  %s8711_s10 = inlined_call_operand.hbm [shape: f32[3,1,32], index: 10, kind: input, shape index: {}]   ;;  %s8712_s11 = inlined_call_operand.vmem [shape: f32[4,2,3,32], index: 11, kind: output, shape index: {}]  }
   0x1   :  { %8715 = sst [smem:[#allocation35_spill]] %s8702_s1 }
   0x2   :  { %8716 = sst [smem:[#allocation36_spill]] %s8703_s2 }
   0x3   :  { %16 = vsyncpa [#allocation7], 0 }
   0x4   :  { %18 = vsyncpa [#allocation7 + $0x1], 0 }
   0x5   :  { %19 = vsyncpa [#allocation9], 0 }
   0x6   :  { %20 = vsyncpa [#allocation8], 0 }
   0x7   :  { %21 = vsyncpa [#allocation13], 0 }
   0x8   :  { %22 = vsyncpa [#allocation15], 0 }
   0x9   :  { %23 = vsyncpa [#allocation19], 0 }
   0xa   :  { %24 = vsyncpa [#allocation21], 0 }
   0xb   :  { %25 = vsyncpa [#allocation23], 0  ;;  %s7082_s17 = smov 0   ;;  %s7084_s18 = smov 0  }
   0xc   :  { %s7086_s19 = smov 0   ;;  %s7088_s20 = smov 0  }
   0xd LB: > { %s331_s23 = sshll.u32 %s8704_s3, 4  ;;  %s7106_s24 = sadd.s32 4294967295, %s6997_s20   ;;  %s6997_s20 = sphi %s7088_s20, %s8753_s20   ;;  %s6993_s19 = sphi %s7086_s19, %s8752_s19   ;;  %s6989_s18 = sphi %s7084_s18, %s8751_s18   ;;  %s6985_s17 = sphi %s7082_s17, %s8750_s17   ;;  %s332_s23 = int_to_ptr.vmem [resolvable:$true] %s331_s23 }
   0xe   : > { %p5892_p0 = scmp.ge.s32.totalorder %s6997_s20, 1  ;;  %p8713_p1 = scmp.eq.s32.totalorder %s7106_s24, 0 }
   0xf   : > { %p298_p2 = scmp.lt.s32.totalorder %s6997_s20, 3  ;;  %s8718_s1 = sld [smem:[#allocation35_spill]] }
  0x10   : > { %s351_s13 = sshll.u32 %s8706_s5, 4  ;;  %s6757_s14 = scalar_lea.vmem %s332_s23, 16  ;;  %s7131_s13 = int_to_ptr.vmem [resolvable:$true] %s351_s13 }
  0x11   : > { %p7111_p3 = pnand %p5892_p0, %p298_p2  ;;  %p6758_p6 = scmp.ne.s32.totalorder %s332_s23, %s6757_s14 }
  0x12   : > { %p6765_p10 = scmp.lt.s32.totalorder %s332_s23, %s332_s23  ;;  %p6766_p11 = scmp.lt.s32.totalorder %s6757_s14, %s6757_s14 }
  0x13   : > { %s8717_s25 = scalar_select %p7111_p3, 1, 0 }
  0x14   : > { %p6640_p4 = pneg %p7111_p3  ;;  %p6767_p12 = por %p6766_p11, %p6765_p10 }
  0x15   : > { %s311_s28 = sshll.u32 %s8718_s1, 4  ;;  %s7120_s28 = int_to_ptr.vmem [resolvable:$true] %s311_s28 }
  0x16   : > { %p7124_p5 = pnand %p6640_p4, %p8713_p1 }
  0x18   : > { %p7135_p7 = pneg %p7124_p5 }
  0x1a   : > { %p6760_p8 = pnand %p7135_p7, %p6758_p6 }
  0x1c   : > { %p6761_p9 = pneg %p6760_p8 }
  0x1e   : > { %p6768_p13 = pnand %p6767_p12, %p6761_p9 }
  0x20   : > { %6771 = shalt.err (!%p6768_p13)
}
  0x21   : > { %s6999_s16 = smov [#allocation12]   ;;  %s6772_s26 = scalar_lea.hbm %s8705_s4, 16 }
  0x22   : > { %6649 = dma.vmem_to_smem (!%p7124_p5), %s332_s23, 16, %s6999_s16, [#allocation13]  }
  0x23   : > { %p6773_p0 = scmp.ne.s32.totalorder %s8705_s4, %s6772_s26  ;;  %p6779_p6 = scmp.lt.u32.totalorder %s6772_s26, %s8705_s4 }
  0x25   : > { %p6775_p2 = pnand %p6773_p0, %p7135_p7 }
  0x27   : > { %p6776_p4 = pneg %p6775_p2 }
  0x29   : > { %p6781_p8 = pnand %p6779_p6, %p6776_p4 }
  0x2b   : > { %6784 = shalt.err (!%p6781_p8)
}
  0x2c   : > { %s7000_s1 = smov [#allocation14]   ;;  %s6785_s21 = scalar_lea.vmem %s7120_s28, 16 }
  0x2d   : > { %6652 = dma.hbm_to_smem (!%p7124_p5), %s8705_s4, 16, %s7000_s1, [#allocation15]  }
  0x2e   : > { %p6786_p9 = scmp.ne.s32.totalorder %s7120_s28, %s6785_s21  ;;  %p6793_p12 = scmp.lt.s32.totalorder %s7120_s28, %s7120_s28 }
  0x2f   : > { %p6794_p13 = scmp.lt.s32.totalorder %s6785_s21, %s6785_s21 }
  0x30   : > { %p6788_p10 = pnand %p6786_p9, %p7135_p7 }
  0x31   : > { %p6795_p0 = por %p6794_p13, %p6793_p12 }
  0x32   : > { %p6789_p11 = pneg %p6788_p10 }
  0x34   : > { %p6796_p2 = pnand %p6795_p0, %p6789_p11 }
  0x36   : > { %6799 = shalt.err (!%p6796_p2)
}
  0x37   : > { %s7001_s22 = smov [#allocation10]   ;;  %s8721_s2 = sld [smem:[#allocation36_spill]] }
  0x38   : > { %6643 = dma.vmem_to_smem (!%p7124_p5), %s7120_s28, 16, %s7001_s22, [#allocation9]  }
  0x3d   : > { %s6800_s1 = scalar_lea.hbm %s8721_s2, 16 }
  0x3e   : > { %p6801_p4 = scmp.ne.s32.totalorder %s8721_s2, %s6800_s1  ;;  %p6807_p9 = scmp.lt.u32.totalorder %s6800_s1, %s8721_s2 }
  0x40   : > { %p6803_p6 = pnand %p6801_p4, %p7135_p7 }
  0x42   : > { %p6804_p8 = pneg %p6803_p6 }
  0x44   : > { %p6809_p10 = pnand %p6807_p9, %p6804_p8 }
  0x46   : > { %6812 = shalt.err (!%p6809_p10)
}
  0x47   : > { %s7002_s16 = smov [#allocation11]   ;;  %s6813_s22 = scalar_lea.vmem %s7131_s13, 16 }
  0x48   : > { %6646 = dma.hbm_to_smem (!%p7124_p5), %s8721_s2, 16, %s7002_s16, [#allocation8]  }
  0x49   : > { %p6814_p11 = scmp.ne.s32.totalorder %s7131_s13, %s6813_s22  ;;  %p6821_p0 = scmp.lt.s32.totalorder %s7131_s13, %s7131_s13 }
  0x4a   : > { %p6822_p2 = scmp.lt.s32.totalorder %s6813_s22, %s6813_s22 }
  0x4b   : > { %p6816_p12 = pnand %p6814_p11, %p7135_p7 }
  0x4c   : > { %p6823_p4 = por %p6822_p2, %p6821_p0 }
  0x4d   : > { %p6817_p13 = pneg %p6816_p12 }
  0x4f   : > { %p6824_p6 = pnand %p6823_p4, %p6817_p13 }
  0x51   : > { %6827 = shalt.err (!%p6824_p6)
}
  0x52   : > { %s7003_s26 = smov [#allocation16]   ;;  %s6828_s30 = scalar_lea.hbm %s8707_s6, 16 }
  0x53   : > { %6655 = dma.vmem_to_smem (!%p7124_p5), %s7131_s13, 16, %s7003_s26, [#allocation13]  }
  0x54   : > { %p6829_p8 = scmp.ne.s32.totalorder %s8707_s6, %s6828_s30  ;;  %p6835_p11 = scmp.lt.u32.totalorder %s6828_s30, %s8707_s6 }
  0x56   : > { %p6831_p9 = pnand %p6829_p8, %p7135_p7 }
  0x58   : > { %p6832_p10 = pneg %p6831_p9 }
  0x5a   : > { %p6837_p12 = pnand %p6835_p11, %p6832_p10 }
  0x5c   : > { %6840 = shalt.err (!%p6837_p12)
}
  0x5d   : > { %s7004_s28 = smov [#allocation17]   ;;  %s371_s27 = sshll.u32 %s8708_s7, 4  ;;  %s372_s27 = int_to_ptr.vmem [resolvable:$true] %s371_s27 }
  0x5e   : > { %6658 = dma.hbm_to_smem (!%p7124_p5), %s8707_s6, 16, %s7004_s28, [#allocation15]  }
  0x5f   : > { %s6841_s1 = scalar_lea.vmem %s372_s27, 32  ;;  %p6849_p4 = scmp.lt.s32.totalorder %s372_s27, %s372_s27 }
  0x60   : > { %p6842_p13 = scmp.ne.s32.totalorder %s372_s27, %s6841_s1  ;;  %p6850_p6 = scmp.lt.s32.totalorder %s6841_s1, %s6841_s1 }
  0x62   : > { %p6844_p0 = pnand %p6842_p13, %p7135_p7  ;;  %p6851_p8 = por %p6850_p6, %p6849_p4 }
  0x64   : > { %p6845_p2 = pneg %p6844_p0 }
  0x66   : > { %p6852_p9 = pnand %p6851_p8, %p6845_p2 }
  0x68   : > { %6855 = shalt.err (!%p6852_p9)
}
  0x69   : > { %s7005_s30 = smov [#allocation18]   ;;  %s6856_s23 = scalar_lea.hbm %s8709_s8, 16 }
  0x6a   : > { %6661 = dma.vmem_to_smem (!%p7124_p5), %s372_s27, 32, %s7005_s30, [#allocation19]  }
  0x6b   : > { %p6857_p10 = scmp.ne.s32.totalorder %s8709_s8, %s6856_s23  ;;  %p6863_p13 = scmp.lt.u32.totalorder %s6856_s23, %s8709_s8 }
  0x6d   : > { %p6859_p11 = pnand %p6857_p10, %p7135_p7 }
  0x6f   : > { %p6860_p12 = pneg %p6859_p11 }
  0x71   : > { %p6865_p0 = pnand %p6863_p13, %p6860_p12 }
  0x73   : > { %6868 = shalt.err (!%p6865_p0)
}
  0x74   : > { %s7006_s22 = smov [#allocation20]   ;;  %s7007_s1 = smov [#allocation22]  }
  0x75   : > { %6664 = dma.hbm_to_smem (!%p7124_p5), %s8709_s8, 16, %s7006_s22, [#allocation21]  }
  0x76   : > { %s393_s30 = sshll.u32 %s7007_s1, 4  ;;  %s6869_s16 = scalar_lea.hbm %s8711_s10, 48  ;;  %s394_s30 = int_to_ptr.vmem [resolvable:$true] %s393_s30 }
  0x77   : > { %p6870_p2 = scmp.ne.s32.totalorder %s8711_s10, %s6869_s16  ;;  %p6876_p8 = scmp.lt.u32.totalorder %s6869_s16, %s8711_s10 }
  0x79   : > { %p6872_p4 = pnand %p6870_p2, %p7135_p7 }
  0x7b   : > { %p6873_p6 = pneg %p6872_p4 }
  0x7d   : > { %p6878_p9 = pnand %p6876_p8, %p6873_p6 }
  0x7f   : > { %6881 = shalt.err (!%p6878_p9)
}
  0x80   : > { %s6882_s22 = scalar_lea.vmem %s394_s30, 48  ;;  %s6889_s26 = scalar_lea.vmem %s394_s30, 64 }
  0x81   : > { %p6883_p10 = scmp.ne.s32.totalorder %s394_s30, %s6882_s22  ;;  %p6890_p13 = scmp.lt.s32.totalorder %s394_s30, %s394_s30 }
  0x82   : > { %p6891_p0 = scmp.lt.s32.totalorder %s6889_s26, %s6882_s22 }
  0x83   : > { %p6885_p11 = pnand %p6883_p10, %p7135_p7 }
  0x84   : > { %p6892_p1 = por %p6891_p0, %p6890_p13 }
  0x85   : > { %p6886_p12 = pneg %p6885_p11 }
  0x87   : > { %p6893_p3 = pnand %p6892_p1, %p6886_p12 }
  0x89   : > { %6896 = shalt.err (!%p6893_p3)
}
  0x8a   : > { %s7008_s27 = smov 16   ;;  %s7009_s15 = smov 1  }
  0x8b   : > { %6667 = dma.hbm_to_vmem [thread:$0]  (!%p7124_p5), %s8711_s10, 48, %s394_s30, [#allocation23], %s7008_s27, %s7008_s27, %s7009_s15  }
  0x8c   : > { %s7251_s14 = sadd.s32 1, %s6997_s20   ;;  %s38_s28 = sadd.s32 1, %s6993_s19 }
  0x8d   : > { %s35_s16 = ssub.s32 %s6997_s20, %s7251_s14  ;;  %p45_p3 = scmp.ne.s32.totalorder %s6993_s19, %s6989_s18 }
  0x8e   : > { %p36_p1 = scmp.eq.s32.totalorder %s35_s16, 0  ;;  %p46_p7 = scmp.eq.s32.totalorder %s6997_s20, 0 }
  0x8f   : > { %p51_p2 = scmp.ne.s32.totalorder %s6989_s18, %s6985_s17  ;;  %p8722_p6 = scmp.eq.s32.totalorder %s7106_s24, 0 }
  0x90   : > { %s7262_s13 = scalar_select %p36_p1, %s6993_s19, %s38_s28  }
  0x91   : > { %p47_p4 = por %p46_p7, %p45_p3  ;;  %p7266_p8 = por %p8722_p6, %p51_p2 }
  0x92   : > { %p285_p9 = scmp.eq.s32.totalorder %s7106_s24, 1  ;;  %p6681_p10 = scmp.lt.s32.totalorder %s6997_s20, 2 }
  0x93   : > { %s407_s29 = sand.u32 1, %s6993_s19   ;;  %s6280_s30 = sshll.u32 %s6997_s20, 8 }
  0x94   : > { %p7274_p5 = por %p285_p9, %p45_p3  ;;  %s5903_s22 = sshll.u32 %s407_s29, 4 }
  0x95   : > { %s7281_s17 = scalar_lea.hbm %s8701_s0, %s6280_s30  ;;  %p7283_p11 = pnand %p6681_p10, %p47_p4 }
  0x96   : > { %s8724_s21 = scalar_select %p7274_p5, 1, 0 }
  0x97   : > { %s411_s20 = scalar_lea.vmem [#allocation6], %s5903_s22  ;;  %s7289_s12 = scalar_lea.sflag [#allocation7], %s407_s29 }
  0x98   : > { %s418_s1 = sshll.u32 %s411_s20, 4  ;;  %s6897_s16 = scalar_lea.hbm %s7281_s17, 256  ;;  %s7287_s1 = int_to_ptr.vmem [resolvable:$true] %s418_s1 }
  0x99   : > { %p6898_p12 = scmp.ne.s32.totalorder %s7281_s17, %s6897_s16  ;;  %p6899_p13 = pneg %p7283_p11 }
  0x9a   : > { %s6902_s26 = scalar_lea.hbm %s8701_s0, 512  ;;  %p6903_p3 = scmp.lt.u32.totalorder %s7281_s17, %s8701_s0 }
  0x9b   : > { %p6900_p0 = pnand %p6899_p13, %p6898_p12  ;;  %p6904_p7 = scmp.lt.u32.totalorder %s6902_s26, %s6897_s16 }
  0x9c   : > { %p6906_p4 = scmp.lt.u32.totalorder %s6897_s16, %s7281_s17 }
  0x9d   : > { %p6901_p1 = pneg %p6900_p0  ;;  %p6905_p2 = por %p6904_p7, %p6903_p3 }
  0x9f   : > { %p6907_p6 = por %p6906_p4, %p6905_p2 }
  0xa1   : > { %p6908_p9 = pnand %p6907_p6, %p6901_p1 }
  0xa3   : > { %6911 = shalt.err (!%p6908_p9)
}
  0xa4   : > { %s6912_s29 = scalar_lea.vmem %s7287_s1, 256  ;;  %s7010_s22 = smov [#allocation6]  }
  0xa5   : > { %p6913_p10 = scmp.ne.s32.totalorder %s7287_s1, %s6912_s29  ;;  %s6917_s20 = sshll.u32 %s7010_s22, 4  ;;  %s6918_s20 = int_to_ptr.vmem [resolvable:$false] %s6917_s20 }
  0xa6   : > { %s6919_s2 = scalar_lea.vmem %s6918_s20, 512  ;;  %p6920_p5 = scmp.lt.s32.totalorder %s7287_s1, %s6918_s20 }
  0xa7   : > { %p6915_p12 = pnand %p6913_p10, %p6899_p13  ;;  %p6921_p3 = scmp.lt.s32.totalorder %s6919_s2, %s6912_s29 }
  0xa9   : > { %p6916_p0 = pneg %p6915_p12  ;;  %p6922_p7 = por %p6921_p3, %p6920_p5 }
  0xab   : > { %p6923_p2 = pnand %p6922_p7, %p6916_p0 }
  0xad   : > { %6926 = shalt.err (!%p6923_p2)
}
  0xae   : > { %s7011_s16 = smov 128   ;;  %s7012_s28 = smov 8  }
  0xaf   : > { %6671 = dma.hbm_to_vmem [thread:$0]  (!%p7283_p11), %s7281_s17, 256, %s7287_s1, %s7289_s12, %s7011_s16, %s7011_s16, %s7012_s28  }
  0xb0   : > { %p8726_p13 = scmp.ne.s32.totalorder %s8717_s25, 0 }
  0xb1   : > { %s432_s30 = sand.u32 (!%p8726_p13), 1, %s6989_s18  }
  0xb2   : > { %430 = sbr.rel (%p8726_p13) target bundleno = 3499 (0xdab), region = 64  ;;  %s7320_s26 = sshll.u32 (!%p8726_p13), %s432_s30, 4 }
  0xb3   : > { %s433_s27 = scalar_lea.sflag (!%p8726_p13), [#allocation7], %s432_s30  ;;  %s436_s29 = scalar_lea.vmem (!%p8726_p13), [#allocation6], %s7320_s26 }
  0xb9   : > { %6944 = dma.done.wait (%p7266_p8), %s433_s27, 256  }
  0xba   : > { %6946 = vsyncadd (%p7266_p8), %s433_s27, 4294967040  ;;  %p8727_p5 = scmp.eq.s32.totalorder %s7106_s24, 0 }
  0xbc   : > { %6948 = dma.done.wait (%p8727_p5), [#allocation9], 16   ;;  %p8728_p11 = pmov %p8727_p5 }
  0xbd   : > { %p8729_p1 = pmov %p8727_p5 }
  0xbe   : > { %6950 = vsyncadd (%p8728_p11), [#allocation9], 4294967280 }
  0xbf   : > { %6952 = dma.done.wait (%p8729_p1), [#allocation8], 16   ;;  %p8730_p4 = pmov %p8729_p1 }
  0xc0   : > { %p8731_p6 = pmov %p8729_p1 }
  0xc1   : > { %6954 = vsyncadd (%p8730_p4), [#allocation8], 4294967280 }
  0xc2   : > { %6956 = dma.done.wait (%p8731_p6), [#allocation13], 16   ;;  %p8732_p9 = pmov %p8729_p1 }
  0xc3   : > { %p8733_p8 = pmov %p8729_p1 }
  0xc4   : > { %6958 = vsyncadd (%p8732_p9), [#allocation13], 4294967280 }
  0xc5   : > { %6960 = dma.done.wait (%p8733_p8), [#allocation15], 16   ;;  %p8734_p10 = pmov %p8729_p1 }
  0xc6   : > { %p8735_p12 = pmov %p8729_p1 }
  0xc7   : > { %6962 = vsyncadd (%p8734_p10), [#allocation15], 4294967280 }
  0xc8   : > { %6964 = dma.done.wait (%p8735_p12), [#allocation13], 16   ;;  %p8736_p0 = pmov %p8729_p1 }
  0xca   : > { %6966 = vsyncadd (%p8736_p0), [#allocation13], 4294967280  ;;  %p8737_p3 = pmov %p8736_p0 }
  0xcb   : > { %p8738_p7 = pmov %p8736_p0 }
  0xcc   : > { %6968 = dma.done.wait (%p8737_p3), [#allocation15], 16  }
  0xcd   : > { %6970 = vsyncadd (%p8738_p7), [#allocation15], 4294967280  ;;  %p8739_p2 = pmov %p8736_p0 }
  0xce   : > { %p8740_p13 = pmov %p8736_p0 }
  0xcf   : > { %6972 = dma.done.wait (%p8739_p2), [#allocation19], 32  }
  0xd0   : > { %6974 = vsyncadd (%p8740_p13), [#allocation19], 4294967264  ;;  %p8741_p5 = pmov %p8736_p0 }
  0xd1   : > { %p8742_p11 = pmov %p8736_p0 }
  0xd2   : > { %6976 = dma.done.wait (%p8741_p5), [#allocation21], 16  }
  0xd3   : > { %6978 = vsyncadd (%p8742_p11), [#allocation21], 4294967280  ;;  %p8743_p1 = pmov %p8736_p0 }
  0xd4   : > { %p8744_p4 = pmov %p8736_p0 }
  0xd5   : > { %6980 = dma.done.wait (%p8743_p1), [#allocation23], 48  }
  0xd6   : > { %6982 = vsyncadd (%p8744_p4), [#allocation23], 4294967248 }
  0xd7   : > { %477 = sfence }
  0xd8   : > { %v511_v0 = vld [vmem:[%s436_s29] sm:$0xff]  ;;  %vm513_vm0 = vcmask 146432   ;;  %s7013_s25 = smov 1   ;;  %v7014_v1 = vmov 0.0   ;;  %vm516_vm1 = vcmask 140288   ;;  %v512_v2 = vld [vmem:[%s436_s29 + $0x8] sm:$0xff] }
  0xd9   : > { %520 = vrot.lane.b32.xlu0 %v511_v0, %s7013_s25  ;;  %514 = vst.msk [vmem:[#allocation2] sm:$0xff] %vm513_vm0, %v7014_v1  ;;  %515 = vst.msk [vmem:[#allocation2 + $0x8] sm:$0xff] %vm513_vm0, %v7014_v1  ;;  %vm526_vm2 = vcmask 138248   ;;  %s5921_s23 = sld [smem:[#allocation10 + $0x2]]  ;;  %s5919_s17 = sld [smem:[#allocation10 + $0x1]]  ;;  %vm7018_vm3 = vmmov 0  }
  0xda   : > { %751 = vst.msk [vmem:[#allocation3] sm:$0xff] %vm513_vm0, %v7014_v1  ;;  %752 = vst.msk [vmem:[#allocation3 + $0x8] sm:$0xff] %vm513_vm0, %v7014_v1  ;;  %s7379_s15 = sld [smem:[#allocation10 + $0x4]]  ;;  %s7382_s1 = sld [smem:[#allocation10 + $0x5]]  ;;  %6365 = vmatprep.mubr.msk.f32.mxu1 %vm7018_vm3, %v7014_v1  ;;  %6393 = vmatprep.mubr.msk.f32.mxu0 %vm7018_vm3, %v7014_v1  ;;  %vm1237_vm5 = vcmask 130048   ;;  %vm1814_vm13 = vcmask 80896  }
  0xdb   : > { %754 = vst.msk [vmem:[#allocation3 + $0x18] sm:$0xff] %vm513_vm0, %v7014_v1  ;;  %755 = vst.msk [vmem:[#allocation3 + $0x20] sm:$0xff] %vm513_vm0, %v7014_v1  ;;  %s7391_s12 = sld [smem:[#allocation10 + $0x7]]  ;;  %s7015_s22 = smov 126   ;;  %vm1816_vm14 = vcmask 74752   ;;  %vm1824_vm15 = vcmask 72712  }
  0xdc   : > { %517 = vst.msk [vmem:[#allocation2 + $0x10] sm:$0x3] %vm516_vm1, %v7014_v1  ;;  %753 = vst.msk [vmem:[#allocation3 + $0x10] sm:$0x3] %vm516_vm1, %v7014_v1  ;;  %s7016_s20 = smov 127   ;;  %s7400_s2 = sld [smem:[#allocation10 + $0x8]] }
  0xdd   : > { %756 = vst.msk [vmem:[#allocation3 + $0x28] sm:$0x3] %vm516_vm1, %v7014_v1  ;;  %522 = vrot.lane.b32.xlu0 %v512_v2, %s7013_s25  ;;  %s5920_s16 = sld [smem:[#allocation10 + $0xa]]  ;;  %s5922_s28 = sld [smem:[#allocation10 + $0xb]]  ;;  %vm3353_vm0 = vcmask 64512   ;;  %vm4543_vm1 = vcmask 1043456  }
  0xde   : > { %s5926_s30 = sld [smem:[#allocation10 + $0xd]]  ;;  %s5928_s27 = sld [smem:[#allocation10 + $0xe]]  ;;  %1815 = vst.msk [vmem:[#allocation4] sm:$0xff] %vm1814_vm13, %v7014_v1  ;;  %1818 = vst.msk [vmem:[#allocation4 + $0x10] sm:$0xff] %vm1814_vm13, %v7014_v1 }
  0xdf   : > { %v572_v5 = vstv %s5921_s23  ;;  %v544_v6 = vstv %s5919_s17  ;;  %s5932_s29 = sld [smem:[#allocation10 + $0x10]]  ;;  %s5934_s23 = sld [smem:[#allocation10 + $0x11]]  ;;  %1817 = vst.msk [vmem:[#allocation4 + $0x8] sm:$0x3] %vm1816_vm14, %v7014_v1  ;;  %1819 = vst.msk [vmem:[#allocation4 + $0x18] sm:$0x3] %vm1816_vm14, %v7014_v1 }
  0xe0   : > { %v614_v11 = vstv %s7379_s15  ;;  %v642_v15 = vstv %s7382_s1  ;;  %s531_s17 = sld [smem:[#allocation10]]  ;;  %s5923_s15 = sld [smem:[#allocation10 + $0x3]]  ;;  %2334 = vst.msk [vmem:[#allocation5] sm:$0xff] %vm1814_vm13, %v7014_v1  ;;  %2336 = vst.msk [vmem:[#allocation5 + $0x10] sm:$0xff] %vm1814_vm13, %v7014_v1 }
  0xe1   : > { %v684_v19 = vstv %s7391_s12  ;;  %s7452_s1 = sld [smem:[#allocation10 + $0x6]]  ;;  %s7458_s12 = sld [smem:[#allocation11]]  ;;  %2335 = vst.msk [vmem:[#allocation5 + $0x8] sm:$0x3] %vm1816_vm14, %v7014_v1  ;;  %2337 = vst.msk [vmem:[#allocation5 + $0x18] sm:$0x3] %vm1816_vm14, %v7014_v1 }
  0xe2   : > { %v712_v23 = vstv %s7400_s2  ;;  %s7462_s2 = sld [smem:[#allocation10 + $0x9]]  ;;  %2338 = vst.msk [vmem:[#allocation5 + $0x20] sm:$0xff] %vm1814_vm13, %v7014_v1  ;;  %2340 = vst.msk [vmem:[#allocation5 + $0x30] sm:$0xff] %vm1814_vm13, %v7014_v1  ;;  %p8749_p6 = scmp.ne.s32.totalorder %s8724_s21, 0 }
  0xe3   : > { %v558_v26 = vstv %s5920_s16  ;;  %v586_v30 = vstv %s5922_s28  ;;  %s7464_s16 = sld [smem:[#allocation10 + $0xc]]  ;;  %s7471_s28 = sld [smem:[#allocation10 + $0xf]]  ;;  %2339 = vst.msk [vmem:[#allocation5 + $0x28] sm:$0x3] %vm1816_vm14, %v7014_v1  ;;  %2341 = vst.msk [vmem:[#allocation5 + $0x38] sm:$0x3] %vm1816_vm14, %v7014_v1 }
  0xe4   : > { %v628_v33 = vstv %s5926_s30  ;;  %v656_v36 = vstv %s5928_s27  ;;  %s5935_s30 = sld [smem:[#allocation11 + $0x1]] }
  0xe5   : > { %v698_v39 = vstv %s5932_s29  ;;  %v726_v42 = vstv %s5934_s23  ;;  %s5937_s27 = sld [smem:[#allocation12 + $0x1]]  ;;  %s5939_s29 = sld [smem:[#allocation12 + $0x2]] }
  0xe6   : > { %v532_v47 = vstv %s531_s17  ;;  %v602_v51 = vstv %s5923_s15  ;;  %s5943_s23 = sld [smem:[#allocation12 + $0x4]]  ;;  %s7488_s17 = sld [smem:[#allocation12 + $0x5]] }
  0xe7   : > { %v672_v59 = vstv %s7452_s1  ;;  %s7494_s15 = sld [smem:[#allocation12 + $0x7]]  ;;  %s7502_s1 = sld [smem:[#allocation12 + $0x8]] }
 0x14b   : > { %v521_v3 = vpop.permute.xlu0 %520 }
 0x14c   : > { %527 = vst.msk [vmem:[#allocation2 + $0x1] sm:$0xff] %vm526_vm2, %v521_v3 }
 0x14f   : > { %v523_v4 = vpop.permute.xlu0 %522 }
 0x150   : > { %528 = vst.msk [vmem:[#allocation2 + $0x9] sm:$0xff] %vm526_vm2, %v523_v4 }
 0x153   : > { %v7384_v7 = vld [vmem:[#allocation2] sm:$0xff] }
 0x154   : > { %v573_v8 = vmul.f32 %v572_v5, %v7384_v7  ;;  %v545_v9 = vmul.f32 %v544_v6, %v7384_v7  ;;  %v7388_v10 = vld [vmem:[#allocation2 + $0x1] sm:$0xff]  ;;  %v559_v28 = vmul.f32 %v558_v26, %v7384_v7  ;;  %v587_v31 = vmul.f32 %v586_v30, %v7384_v7 }
 0x155   : > { %v615_v14 = vmul.f32 %v614_v11, %v7388_v10  ;;  %v643_v16 = vmul.f32 %v642_v15, %v7388_v10  ;;  %v629_v34 = vmul.f32 %v628_v33, %v7388_v10  ;;  %v657_v37 = vmul.f32 %v656_v36, %v7388_v10 }
 0x156   : > { %577 = vrot.lane.b32.xlu0 %v573_v8, %s7015_s22  ;;  %549 = vrot.lane.b32.xlu1 %v545_v9, %s7016_s20  ;;  %v533_v48 = vmul.f32 %v532_v47, %v7384_v7  ;;  %v603_v54 = vmul.f32 %v602_v51, %v7388_v10 }
 0x157   : > { %v7395_v12 = vld [vmem:[#allocation2 + $0x8] sm:$0xff] }
 0x158   : > { %v546_v13 = vmul.f32 %v544_v6, %v7395_v12  ;;  %v574_v17 = vmul.f32 %v572_v5, %v7395_v12  ;;  %v7406_v18 = vld [vmem:[#allocation2 + $0x2] sm:$0xff]  ;;  %v7420_v27 = vld [vmem:[#allocation2 + $0xa] sm:$0xff]  ;;  %v560_v35 = vmul.f32 %v558_v26, %v7395_v12  ;;  %v588_v38 = vmul.f32 %v586_v30, %v7395_v12 }
 0x159   : > { %v7409_v20 = vld [vmem:[#allocation2 + $0x9] sm:$0xff]  ;;  %v685_v21 = vmul.f32 %v684_v19, %v7406_v18  ;;  %v713_v24 = vmul.f32 %v712_v23, %v7406_v18  ;;  %v686_v29 = vmul.f32 %v684_v19, %v7420_v27  ;;  %v714_v32 = vmul.f32 %v712_v23, %v7420_v27 }
 0x15a   : > { %619 = vrot.lane.b32.xlu0 %v615_v14, %s7016_s20  ;;  %551 = vrot.lane.b32.xlu1 %v546_v13, %s7016_s20  ;;  %v616_v22 = vmul.f32 %v614_v11, %v7409_v20  ;;  %v644_v25 = vmul.f32 %v642_v15, %v7409_v20  ;;  %v699_v40 = vmul.f32 %v698_v39, %v7406_v18  ;;  %v740_v15 = vstv %s7458_s12  ;;  %s7513_s12 = sld [smem:[#allocation12 + $0xa]] }
 0x15b   : > { %v630_v41 = vmul.f32 %v628_v33, %v7409_v20  ;;  %v727_v43 = vmul.f32 %v726_v42, %v7406_v18  ;;  %v658_v44 = vmul.f32 %v656_v36, %v7409_v20  ;;  %v700_v45 = vmul.f32 %v698_v39, %v7420_v27 }
 0x15c   : > { %v728_v46 = vmul.f32 %v726_v42, %v7420_v27  ;;  %v534_v57 = vmul.f32 %v532_v47, %v7395_v12  ;;  %v604_v3 = vmul.f32 %v602_v51, %v7409_v20  ;;  %v673_v4 = vmul.f32 %v672_v59, %v7406_v18 }
 0x15d   : > { %v608_v30 = vstv %s7464_s16  ;;  %s7530_s16 = sld [smem:[#allocation12 + $0xd]] }
 0x15e   : > { %647 = vrot.lane.b32.xlu0 %v643_v16, %s7015_s22  ;;  %579 = vrot.lane.b32.xlu1 %v574_v17, %s7015_s22 }
 0x162   : > { %689 = vrot.lane.b32.xlu0 %v685_v21, %s7016_s20  ;;  %621 = vrot.lane.b32.xlu1 %v616_v22, %s7016_s20  ;;  %v674_v21 = vmul.f32 %v672_v59, %v7420_v27  ;;  %v538_v22 = vstv %s7462_s2  ;;  %s7521_s2 = sld [smem:[#allocation12 + $0xb]] }
 0x166   : > { %717 = vrot.lane.b32.xlu0 %v713_v24, %s7015_s22  ;;  %649 = vrot.lane.b32.xlu1 %v644_v25, %s7015_s22 }
 0x16a   : > { %563 = vrot.lane.b32.xlu0 %v559_v28, %s7016_s20  ;;  %691 = vrot.lane.b32.xlu1 %v686_v29, %s7016_s20  ;;  %v539_v28 = vmul.f32 %v538_v22, %v7384_v7  ;;  %v540_v7 = vmul.f32 %v538_v22, %v7395_v12  ;;  %v891_v22 = vstv %s7488_s17  ;;  %s7585_s17 = sld [smem:[#allocation12 + $0x16]] }
 0x16e   : > { %591 = vrot.lane.b32.xlu0 %v587_v31, %s7015_s22  ;;  %719 = vrot.lane.b32.xlu1 %v714_v32, %s7015_s22 }
 0x172   : > { %633 = vrot.lane.b32.xlu0 %v629_v34, %s7016_s20  ;;  %565 = vrot.lane.b32.xlu1 %v560_v35, %s7016_s20 }
 0x176   : > { %661 = vrot.lane.b32.xlu0 %v657_v37, %s7015_s22  ;;  %593 = vrot.lane.b32.xlu1 %v588_v38, %s7015_s22  ;;  %v609_v37 = vmul.f32 %v608_v30, %v7388_v10 }
 0x17a   : > { %703 = vrot.lane.b32.xlu0 %v699_v40, %s7016_s20  ;;  %635 = vrot.lane.b32.xlu1 %v630_v41, %s7016_s20 }
 0x17e   : > { %731 = vrot.lane.b32.xlu0 %v727_v43, %s7015_s22  ;;  %663 = vrot.lane.b32.xlu1 %v658_v44, %s7015_s22  ;;  %v678_v43 = vstv %s7471_s28  ;;  %s7540_s28 = sld [smem:[#allocation12 + $0xe]] }
 0x17f   : > { %v679_v10 = vmul.f32 %v678_v43, %v7406_v18 }
 0x182   : > { %705 = vrot.lane.b32.xlu1 %v700_v45, %s7016_s20 }
 0x186   : > { %733 = vrot.lane.b32.xlu1 %v728_v46, %s7015_s22 }
 0x1c8   : > { %v550_v49 = vpop.permute.xlu1 %549  ;;  %v578_v50 = vpop.permute.xlu0 %577 }
 0x1c9   : > { %v555_v52 = vadd.f32 %v550_v49, %v533_v48 }
 0x1cb   : > { %v583_v53 = vadd.f32 %v578_v50, %v555_v52  ;;  %v610_v50 = vmul.f32 %v608_v30, %v7409_v20 }
 0x1cc   : > { %v552_v55 = vpop.permute.xlu1 %551  ;;  %v620_v56 = vpop.permute.xlu0 %619 }
 0x1cd   : > { %v605_v58 = vadd.f32 %v603_v54, %v583_v53  ;;  %v556_v60 = vadd.f32 %v552_v55, %v534_v57  ;;  %v746_v57 = vstv %s5935_s30  ;;  %s7549_s30 = sld [smem:[#allocation12 + $0x10]] }
 0x1cf   : > { %v625_v61 = vadd.f32 %v620_v56, %v605_v58 }
 0x1d0   : > { %v580_v62 = vpop.permute.xlu1 %579  ;;  %v648_v63 = vpop.permute.xlu0 %647 }
 0x1d1   : > { %v584_v0 = vadd.f32 %v580_v62, %v556_v60  ;;  %v653_v2 = vadd.f32 %v648_v63, %v625_v61  ;;  %v680_v61 = vmul.f32 %v678_v43, %v7420_v27 }
 0x1d3   : > { %v606_v5 = vadd.f32 %v604_v3, %v584_v0  ;;  %v675_v6 = vadd.f32 %v673_v4, %v653_v2 }
 0x1d4   : > { %v622_v8 = vpop.permute.xlu1 %621  ;;  %v690_v9 = vpop.permute.xlu0 %689 }
 0x1d5   : > { %v626_v11 = vadd.f32 %v622_v8, %v606_v5  ;;  %v695_v13 = vadd.f32 %v690_v9, %v675_v6  ;;  %v793_v8 = vstv %s5937_s27  ;;  %s7558_s27 = sld [smem:[#allocation12 + $0x11]] }
 0x1d8   : > { %v650_v14 = vpop.permute.xlu1 %649  ;;  %v718_v16 = vpop.permute.xlu0 %717 }
 0x1d9   : > { %v654_v17 = vadd.f32 %v650_v14, %v626_v11  ;;  %v723_v19 = vadd.f32 %v718_v16, %v695_v13  ;;  %v821_v13 = vstv %s5939_s29  ;;  %v863_v16 = vstv %s5943_s23  ;;  %s7569_s29 = sld [smem:[#allocation12 + $0x13]]  ;;  %s7576_s23 = sld [smem:[#allocation12 + $0x14]] }
 0x1db   : > { %v741_v23 = vadd.f32 %v740_v15, %v723_v19  ;;  %v676_v24 = vadd.f32 %v674_v21, %v654_v17 }
 0x1dc   : > { %v692_v25 = vpop.permute.xlu1 %691  ;;  %v564_v26 = vpop.permute.xlu0 %563 }
 0x1dd   : > { %v743_v29 = vmax.f32 %v741_v23, 0.0  ;;  %v696_v31 = vadd.f32 %v692_v25, %v676_v24  ;;  %v569_v32 = vadd.f32 %v564_v26, %v539_v28  ;;  %v933_v28 = vstv %s7494_s15  ;;  %s7594_s15 = sld [smem:[#allocation12 + $0x17]] }
 0x1df   : > { %759 = vrot.lane.b32.xlu0 %v743_v29, %s7013_s25 }
 0x1e0   : > { %v720_v33 = vpop.permute.xlu1 %719  ;;  %v592_v34 = vpop.permute.xlu0 %591 }
 0x1e1   : > { %v724_v35 = vadd.f32 %v720_v33, %v696_v31  ;;  %v597_v36 = vadd.f32 %v592_v34, %v569_v32  ;;  %v961_v32 = vstv %s7502_s1  ;;  %s5950_s1 = sld [smem:[#allocation12 + $0x19]] }
 0x1e3   : > { %v742_v38 = vadd.f32 %v740_v15, %v724_v35  ;;  %v611_v39 = vadd.f32 %v609_v37, %v597_v36  ;;  %v1003_v36 = vstv %s7513_s12  ;;  %s5952_s12 = sld [smem:[#allocation12 + $0x1a]] }
 0x1e4   : > { %v566_v40 = vpop.permute.xlu1 %565  ;;  %v634_v41 = vpop.permute.xlu0 %633 }
 0x1e5   : > { %v744_v42 = vmax.f32 %v742_v38, 0.0  ;;  %v570_v44 = vadd.f32 %v566_v40, %v540_v7  ;;  %v639_v45 = vadd.f32 %v634_v41, %v611_v39  ;;  %v1031_v41 = vstv %s7521_s2  ;;  %s5956_s2 = sld [smem:[#allocation12 + $0x1c]] }
 0x1e7   : > { %761 = vrot.lane.b32.xlu1 %v744_v42, %s7013_s25 }
 0x1e8   : > { %v594_v46 = vpop.permute.xlu1 %593  ;;  %v662_v47 = vpop.permute.xlu0 %661 }
 0x1e9   : > { %v598_v48 = vadd.f32 %v594_v46, %v570_v44  ;;  %v667_v49 = vadd.f32 %v662_v47, %v639_v45  ;;  %v1073_v44 = vstv %s7530_s16  ;;  %s5958_s16 = sld [smem:[#allocation12 + $0x1d]] }
 0x1eb   : > { %v612_v51 = vadd.f32 %v610_v50, %v598_v48  ;;  %v681_v52 = vadd.f32 %v679_v10, %v667_v49  ;;  %v1101_v48 = vstv %s7540_s28  ;;  %s5962_s28 = sld [smem:[#allocation12 + $0x1f]] }
 0x1ec   : > { %v636_v53 = vpop.permute.xlu1 %635  ;;  %v704_v54 = vpop.permute.xlu0 %703 }
 0x1ed   : > { %v640_v12 = vadd.f32 %v636_v53, %v612_v51  ;;  %v709_v55 = vadd.f32 %v704_v54, %v681_v52  ;;  %v1143_v52 = vstv %s7549_s30  ;;  %s5964_s30 = sld [smem:[#allocation12 + $0x20]] }
 0x1f0   : > { %v664_v56 = vpop.permute.xlu1 %663  ;;  %v732_v58 = vpop.permute.xlu0 %731 }
 0x1f1   : > { %v668_v59 = vadd.f32 %v664_v56, %v640_v12  ;;  %v737_v60 = vadd.f32 %v732_v58, %v709_v55  ;;  %v1171_v12 = vstv %s7558_s27  ;;  %v807_v58 = vstv %s7569_s29  ;;  %s5968_s27 = sld [smem:[#allocation12 + $0x22]]  ;;  %s5970_s29 = sld [smem:[#allocation12 + $0x23]] }
 0x1f3   : > { %v747_v62 = vadd.f32 %v746_v57, %v737_v60  ;;  %v682_v63 = vadd.f32 %v680_v61, %v668_v59  ;;  %v7017_v59 = vmov 0.0|0.0  }
 0x1f4   : > { %v706_v0 = vpop.permute.xlu1 %705  ;;  %6557 = vmatprep.subr.bf16.mxu1 %v7017_v59  ;;  %6569 = vmatprep.subr.bf16.mxu0 %v7017_v59 }
 0x1f5   : > { %v749_v2 = vmax.f32 %v747_v62, 0.0  ;;  %v710_v20 = vadd.f32 %v706_v0, %v682_v63  ;;  %v835_v62 = vstv %s7576_s23  ;;  %s780_s23 = sld [smem:[#allocation12]] }
 0x1f7   : > { %769 = vrot.lane.b32.xlu0 %v749_v2, %s7013_s25  ;;  %v877_v2 = vstv %s7585_s17  ;;  %s5941_s17 = sld [smem:[#allocation12 + $0x3]] }
 0x1f8   : > { %v734_v18 = vpop.permute.xlu1 %733 }
 0x1f9   : > { %v738_v3 = vadd.f32 %v734_v18, %v710_v20 }
 0x1fb   : > { %v748_v4 = vadd.f32 %v746_v57, %v738_v3  ;;  %v905_v3 = vstv %s7594_s15  ;;  %s7653_s15 = sld [smem:[#allocation12 + $0x6]] }
 0x1fd   : > { %v750_v5 = vmax.f32 %v748_v4, 0.0 }
 0x1ff   : > { %771 = vrot.lane.b32.xlu1 %v750_v5, %s7013_s25 }
 0x251   : > { %v760_v6 = vpop.permute.xlu0 %759 }
 0x252   : > { %765 = vst.msk [vmem:[#allocation3 + $0x1] sm:$0xff] %vm526_vm2, %v760_v6  ;;  %v947_v6 = vstv %s5950_s1  ;;  %s7658_s1 = sld [smem:[#allocation12 + $0x9]] }
 0x259   : > { %v762_v27 = vpop.permute.xlu1 %761  ;;  %v7484_v9 = vld [vmem:[#allocation3] sm:$0xff] }
 0x25a   : > { %766 = vst.msk [vmem:[#allocation3 + $0x9] sm:$0xff] %vm526_vm2, %v762_v27  ;;  %v794_v11 = vmul.f32 %v793_v8, %v7484_v9  ;;  %v822_v14 = vmul.f32 %v821_v13, %v7484_v9  ;;  %v7492_v15 = vld [vmem:[#allocation3 + $0x1] sm:$0xff]  ;;  %v808_v61 = vmul.f32 %v807_v58, %v7484_v9  ;;  %v836_v0 = vmul.f32 %v835_v62, %v7484_v9 }
 0x25b   : > { %v864_v21 = vmul.f32 %v863_v16, %v7492_v15  ;;  %v892_v24 = vmul.f32 %v891_v22, %v7492_v15  ;;  %v878_v18 = vmul.f32 %v877_v2, %v7492_v15  ;;  %v906_v5 = vmul.f32 %v905_v3, %v7492_v15 }
 0x25c   : > { %798 = vrot.lane.b32.xlu0 %v794_v11, %s7016_s20  ;;  %v975_v11 = vstv %s5952_s12  ;;  %s7663_s12 = sld [smem:[#allocation12 + $0xc]] }
 0x260   : > { %826 = vrot.lane.b32.xlu0 %v822_v14, %s7015_s22 }
 0x261   : > { %v7497_v17 = vld [vmem:[#allocation3 + $0x8] sm:$0xff] }
 0x262   : > { %v795_v19 = vmul.f32 %v793_v8, %v7497_v17  ;;  %v823_v23 = vmul.f32 %v821_v13, %v7497_v17  ;;  %v7508_v25 = vld [vmem:[#allocation3 + $0x9] sm:$0xff]  ;;  %v809_v20 = vmul.f32 %v807_v58, %v7497_v17  ;;  %v837_v4 = vmul.f32 %v835_v62, %v7497_v17 }
 0x263   : > { %v7510_v26 = vld [vmem:[#allocation3 + $0x2] sm:$0xff]  ;;  %v865_v30 = vmul.f32 %v863_v16, %v7508_v25  ;;  %v893_v33 = vmul.f32 %v891_v22, %v7508_v25  ;;  %v7527_v35 = vld [vmem:[#allocation3 + $0xa] sm:$0xff]  ;;  %v879_v8 = vmul.f32 %v877_v2, %v7508_v25  ;;  %v907_v13 = vmul.f32 %v905_v3, %v7508_v25 }
 0x264   : > { %800 = vrot.lane.b32.xlu1 %v795_v19, %s7016_s20  ;;  %868 = vrot.lane.b32.xlu0 %v864_v21, %s7016_s20  ;;  %v934_v31 = vmul.f32 %v933_v28, %v7510_v26  ;;  %v962_v34 = vmul.f32 %v961_v32, %v7510_v26  ;;  %v935_v39 = vmul.f32 %v933_v28, %v7527_v35  ;;  %v1017_v16 = vstv %s5956_s2  ;;  %s7668_s2 = sld [smem:[#allocation12 + $0xf]] }
 0x265   : > { %v963_v7 = vmul.f32 %v961_v32, %v7527_v35  ;;  %v948_v27 = vmul.f32 %v947_v6, %v7510_v26  ;;  %v976_v14 = vmul.f32 %v975_v11, %v7510_v26  ;;  %v949_v19 = vmul.f32 %v947_v6, %v7527_v35 }
 0x266   : > { %v1045_v22 = vstv %s5958_s16  ;;  %v1087_v28 = vstv %s5962_s28  ;;  %v921_v58 = vstv %s7653_s15  ;;  %s7675_s16 = sld [smem:[#allocation12 + $0x12]]  ;;  %s1198_s28 = sld [smem:[#allocation14]] }
 0x267   : > { %s5971_s15 = sld [smem:[#allocation14 + $0x1]] }
 0x268   : > { %828 = vrot.lane.b32.xlu1 %v823_v23, %s7015_s22  ;;  %896 = vrot.lane.b32.xlu0 %v892_v24, %s7015_s22  ;;  %v977_v23 = vmul.f32 %v975_v11, %v7527_v35 }
 0x269   : > { %v770_v29 = vpop.permute.xlu0 %769 }
 0x26a   : > { %776 = vst.msk [vmem:[#allocation3 + $0x19] sm:$0xff] %vm526_vm2, %v770_v29 }
 0x26c   : > { %870 = vrot.lane.b32.xlu1 %v865_v30, %s7016_s20  ;;  %938 = vrot.lane.b32.xlu0 %v934_v31, %s7016_s20  ;;  %v1115_v31 = vstv %s5964_s30  ;;  %s7677_s30 = sld [smem:[#allocation12 + $0x15]] }
 0x270   : > { %898 = vrot.lane.b32.xlu1 %v893_v33, %s7015_s22  ;;  %966 = vrot.lane.b32.xlu0 %v962_v34, %s7015_s22  ;;  %v1157_v34 = vstv %s5968_s27  ;;  %s7682_s27 = sld [smem:[#allocation12 + $0x18]] }
 0x271   : > { %v772_v37 = vpop.permute.xlu1 %771  ;;  %v7534_v38 = vld [vmem:[#allocation3 + $0x18] sm:$0xff] }
 0x272   : > { %777 = vst.msk [vmem:[#allocation3 + $0x21] sm:$0xff] %vm526_vm2, %v772_v37  ;;  %v1004_v40 = vmul.f32 %v1003_v36, %v7534_v38  ;;  %v1032_v42 = vmul.f32 %v1031_v41, %v7534_v38  ;;  %v7546_v43 = vld [vmem:[#allocation3 + $0x19] sm:$0xff]  ;;  %v1018_v21 = vmul.f32 %v1017_v16, %v7534_v38  ;;  %v1046_v24 = vmul.f32 %v1045_v22, %v7534_v38 }
 0x273   : > { %v1074_v47 = vmul.f32 %v1073_v44, %v7546_v43  ;;  %v1102_v50 = vmul.f32 %v1101_v48, %v7546_v43  ;;  %v1088_v30 = vmul.f32 %v1087_v28, %v7546_v43  ;;  %v1116_v33 = vmul.f32 %v1115_v31, %v7546_v43 }
 0x274   : > { %940 = vrot.lane.b32.xlu1 %v935_v39, %s7016_s20  ;;  %1008 = vrot.lane.b32.xlu0 %v1004_v40, %s7016_s20  ;;  %v1185_v39 = vstv %s5970_s29  ;;  %s7694_s29 = sld [smem:[#allocation12 + $0x1b]]  ;;  %vm4539_vm2 = vcmask 31744  }
 0x278   : > { %968 = vrot.lane.b32.xlu1 %v963_v7, %s7015_s22  ;;  %1036 = vrot.lane.b32.xlu0 %v1032_v42, %s7015_s22 }
 0x279   : > { %v7553_v45 = vld [vmem:[#allocation3 + $0x20] sm:$0xff] }
 0x27a   : > { %v1005_v46 = vmul.f32 %v1003_v36, %v7553_v45  ;;  %v1033_v49 = vmul.f32 %v1031_v41, %v7553_v45  ;;  %v7564_v10 = vld [vmem:[#allocation3 + $0x21] sm:$0xff]  ;;  %v1019_v29 = vmul.f32 %v1017_v16, %v7553_v45  ;;  %v1047_v32 = vmul.f32 %v1045_v22, %v7553_v45 }
 0x27b   : > { %v7566_v51 = vld [vmem:[#allocation3 + $0x1a] sm:$0xff]  ;;  %v1075_v53 = vmul.f32 %v1073_v44, %v7564_v10  ;;  %v1103_v55 = vmul.f32 %v1101_v48, %v7564_v10  ;;  %v7582_v57 = vld [vmem:[#allocation3 + $0x22] sm:$0xff]  ;;  %v1089_v36 = vmul.f32 %v1087_v28, %v7564_v10  ;;  %v1117_v40 = vmul.f32 %v1115_v31, %v7564_v10 }
 0x27c   : > { %1010 = vrot.lane.b32.xlu1 %v1005_v46, %s7016_s20  ;;  %1078 = vrot.lane.b32.xlu0 %v1074_v47, %s7016_s20  ;;  %v1144_v54 = vmul.f32 %v1143_v52, %v7566_v51  ;;  %v1172_v56 = vmul.f32 %v1171_v12, %v7566_v51  ;;  %v1145_v60 = vmul.f32 %v1143_v52, %v7582_v57  ;;  %v781_v44 = vstv %s780_s23  ;;  %s7711_s23 = sld [smem:[#allocation12 + $0x1e]] }
 0x27d   : > { %v1173_v63 = vmul.f32 %v1171_v12, %v7582_v57  ;;  %v1158_v37 = vmul.f32 %v1157_v34, %v7566_v51  ;;  %v1186_v41 = vmul.f32 %v1185_v39, %v7566_v51  ;;  %v1159_v7 = vmul.f32 %v1157_v34, %v7582_v57 }
 0x27e   : > { %v1187_v42 = vmul.f32 %v1185_v39, %v7582_v57  ;;  %v782_v47 = vmul.f32 %v781_v44, %v7484_v9  ;;  %v851_v48 = vstv %s5941_s17  ;;  %s5966_s17 = sld [smem:[#allocation12 + $0x21]] }
 0x280   : > { %1038 = vrot.lane.b32.xlu1 %v1033_v49, %s7015_s22  ;;  %1106 = vrot.lane.b32.xlu0 %v1102_v50, %s7015_s22 }
 0x284   : > { %1080 = vrot.lane.b32.xlu1 %v1075_v53, %s7016_s20  ;;  %1148 = vrot.lane.b32.xlu0 %v1144_v54, %s7016_s20  ;;  %v852_v53 = vmul.f32 %v851_v48, %v7492_v15 }
 0x288   : > { %1108 = vrot.lane.b32.xlu1 %v1103_v55, %s7015_s22  ;;  %1176 = vrot.lane.b32.xlu0 %v1172_v56, %s7015_s22  ;;  %v783_v56 = vmul.f32 %v781_v44, %v7497_v17 }
 0x28c   : > { %1150 = vrot.lane.b32.xlu1 %v1145_v60, %s7016_s20  ;;  %812 = vrot.lane.b32.xlu0 %v808_v61, %s7016_s20 }
 0x290   : > { %1178 = vrot.lane.b32.xlu1 %v1173_v63, %s7015_s22  ;;  %840 = vrot.lane.b32.xlu0 %v836_v0, %s7015_s22 }
 0x294   : > { %814 = vrot.lane.b32.xlu1 %v809_v20, %s7016_s20  ;;  %882 = vrot.lane.b32.xlu0 %v878_v18, %s7016_s20  ;;  %v853_v20 = vmul.f32 %v851_v48, %v7508_v25  ;;  %v922_v18 = vmul.f32 %v921_v58, %v7510_v26 }
 0x298   : > { %842 = vrot.lane.b32.xlu1 %v837_v4, %s7015_s22  ;;  %910 = vrot.lane.b32.xlu0 %v906_v5, %s7015_s22 }
 0x29c   : > { %884 = vrot.lane.b32.xlu1 %v879_v8, %s7016_s20  ;;  %952 = vrot.lane.b32.xlu0 %v948_v27, %s7016_s20  ;;  %v991_v8 = vstv %s7658_s1  ;;  %s5997_s1 = sld [smem:[#allocation16 + $0x1]] }
 0x29d   : > { %v992_v22 = vmul.f32 %v991_v8, %v7534_v38  ;;  %v993_v39 = vmul.f32 %v991_v8, %v7553_v45 }
 0x2a0   : > { %912 = vrot.lane.b32.xlu1 %v907_v13, %s7015_s22  ;;  %980 = vrot.lane.b32.xlu0 %v976_v14, %s7015_s22 }
 0x2a4   : > { %954 = vrot.lane.b32.xlu1 %v949_v19, %s7016_s20  ;;  %1022 = vrot.lane.b32.xlu0 %v1018_v21, %s7016_s20  ;;  %v923_v21 = vmul.f32 %v921_v58, %v7527_v35 }
 0x2a8   : > { %982 = vrot.lane.b32.xlu1 %v977_v23, %s7015_s22  ;;  %1050 = vrot.lane.b32.xlu0 %v1046_v24, %s7015_s22 }
 0x2ac   : > { %1024 = vrot.lane.b32.xlu1 %v1019_v29, %s7016_s20  ;;  %1092 = vrot.lane.b32.xlu0 %v1088_v30, %s7016_s20  ;;  %v1061_v30 = vstv %s7663_s12  ;;  %s6009_s12 = sld [smem:[#allocation16 + $0x4]] }
 0x2b0   : > { %1052 = vrot.lane.b32.xlu1 %v1047_v32, %s7015_s22  ;;  %1120 = vrot.lane.b32.xlu0 %v1116_v33, %s7015_s22 }
 0x2b4   : > { %1094 = vrot.lane.b32.xlu1 %v1089_v36, %s7016_s20  ;;  %1162 = vrot.lane.b32.xlu0 %v1158_v37, %s7016_s20 }
 0x2b8   : > { %1122 = vrot.lane.b32.xlu1 %v1117_v40, %s7015_s22  ;;  %1190 = vrot.lane.b32.xlu0 %v1186_v41, %s7015_s22  ;;  %v1062_v40 = vmul.f32 %v1061_v30, %v7546_v43 }
 0x2bc   : > { %1164 = vrot.lane.b32.xlu1 %v1159_v7, %s7016_s20 }
 0x2c0   : > { %1192 = vrot.lane.b32.xlu1 %v1187_v42, %s7015_s22 }
 0x2ce   : > { %v799_v46 = vpop.permute.xlu0 %798 }
 0x2cf   : > { %v804_v49 = vadd.f32 %v799_v46, %v782_v47  ;;  %v1131_v46 = vstv %s7668_s2  ;;  %s6021_s2 = sld [smem:[#allocation16 + $0x7]] }
 0x2d2   : > { %v827_v50 = vpop.permute.xlu0 %826 }
 0x2d3   : > { %v832_v52 = vadd.f32 %v827_v50, %v804_v49 }
 0x2d5   : > { %v854_v54 = vadd.f32 %v852_v53, %v832_v52 }
 0x2d6   : > { %v801_v12 = vpop.permute.xlu1 %800  ;;  %v869_v55 = vpop.permute.xlu0 %868 }
 0x2d7   : > { %v805_v60 = vadd.f32 %v801_v12, %v783_v56  ;;  %v874_v61 = vadd.f32 %v869_v55, %v854_v54  ;;  %v1063_v54 = vmul.f32 %v1061_v30, %v7564_v10  ;;  %v1132_v12 = vmul.f32 %v1131_v46, %v7566_v51 }
 0x2da   : > { %v829_v62 = vpop.permute.xlu1 %828  ;;  %v897_v63 = vpop.permute.xlu0 %896 }
 0x2db   : > { %v833_v0 = vadd.f32 %v829_v62, %v805_v60  ;;  %v902_v2 = vadd.f32 %v897_v63, %v874_v61 }
 0x2dd   : > { %v855_v3 = vadd.f32 %v853_v20, %v833_v0  ;;  %v924_v4 = vadd.f32 %v922_v18, %v902_v2  ;;  %v1133_v2 = vmul.f32 %v1131_v46, %v7582_v57  ;;  %v787_v20 = vstv %s7675_s16  ;;  %s5998_s16 = sld [smem:[#allocation16 + $0x13]] }
 0x2de   : > { %v871_v5 = vpop.permute.xlu1 %870  ;;  %v939_v6 = vpop.permute.xlu0 %938  ;;  %v1210_v18 = vlaneseq }
 0x2df   : > { %v875_v27 = vadd.f32 %v871_v5, %v855_v3  ;;  %v944_v11 = vadd.f32 %v939_v6, %v924_v4 }
 0x2e0   : > { %v7688_v30 = vand.u32 127, %v1210_v18 }
 0x2e2   : > { %v899_v13 = vpop.permute.xlu1 %898  ;;  %v967_v14 = vpop.permute.xlu0 %966 }
 0x2e3   : > { %v903_v16 = vadd.f32 %v899_v13, %v875_v27  ;;  %v972_v19 = vadd.f32 %v967_v14, %v944_v11  ;;  %v788_v27 = vmul.f32 %v787_v20, %v7484_v9  ;;  %v1199_v11 = vstv %s1198_s28  ;;  %s6002_s28 = sld [smem:[#allocation16 + $0x14]] }
 0x2e4   : > { %v857_v13 = vstv %s7677_s30  ;;  %v7685_v14 = vshrl.u32 %v1210_v18, 7  ;;  %s6010_s30 = sld [smem:[#allocation16 + $0x16]] }
 0x2e5   : > { %v925_v23 = vadd.f32 %v923_v21, %v903_v16  ;;  %v994_v24 = vadd.f32 %v992_v22, %v972_v19 }
 0x2e6   : > { %v941_v28 = vpop.permute.xlu1 %940  ;;  %v1009_v29 = vpop.permute.xlu0 %1008  ;;  %v1214_v9 = vmul.u32 2, %v7685_v14 }
 0x2e7   : > { %v945_v31 = vadd.f32 %v941_v28, %v925_v23  ;;  %v1014_v32 = vadd.f32 %v1009_v29, %v994_v24  ;;  %v858_v29 = vmul.f32 %v857_v13, %v7492_v15 }
 0x2e8   : > { %vm1215_vm4 = vcmp.eq.s32.totalorder %v7688_v30, %v1214_v9 }
 0x2ea   : > { %v969_v33 = vpop.permute.xlu1 %968  ;;  %v1037_v34 = vpop.permute.xlu0 %1036 }
 0x2eb   : > { %v973_v36 = vadd.f32 %v969_v33, %v945_v31  ;;  %v1042_v37 = vadd.f32 %v1037_v34, %v1014_v32 }
 0x2ed   : > { %v995_v41 = vadd.f32 %v993_v39, %v973_v36  ;;  %v1064_v7 = vadd.f32 %v1062_v40, %v1042_v37  ;;  %v789_v36 = vmul.f32 %v787_v20, %v7497_v17  ;;  %v927_v40 = vstv %s7682_s27  ;;  %s6014_s27 = sld [smem:[#allocation16 + $0x17]] }
 0x2ee   : > { %v1011_v42 = vpop.permute.xlu1 %1010  ;;  %v1079_v44 = vpop.permute.xlu0 %1078 }
 0x2ef   : > { %v1015_v47 = vadd.f32 %v1011_v42, %v995_v41  ;;  %v1084_v48 = vadd.f32 %v1079_v44, %v1064_v7  ;;  %v1218_v41 = vadd.s32 1, %v1214_v9 }
 0x2f1   : > { %vm1219_vm6 = vcmp.eq.s32.totalorder %v7688_v30, %v1218_v41 }
 0x2f2   : > { %v1039_v49 = vpop.permute.xlu1 %1038  ;;  %v1107_v50 = vpop.permute.xlu0 %1106 }
 0x2f3   : > { %v1043_v52 = vadd.f32 %v1039_v49, %v1015_v47  ;;  %v1112_v53 = vadd.f32 %v1107_v50, %v1084_v48  ;;  %v859_v47 = vmul.f32 %v857_v13, %v7508_v25  ;;  %v928_v48 = vmul.f32 %v927_v40, %v7510_v26 }
 0x2f4   : > { %v7699_v50 = vsel %vm1215_vm4, 1.0, %v7014_v1  ;;  %v7708_v26 = vsel %vm1219_vm6, 1.0, %v7014_v1  ;;  %vm4980_vm4 = vcmask 253952  }
 0x2f5   : > { %v1065_v55 = vadd.f32 %v1063_v54, %v1043_v52  ;;  %v1134_v56 = vadd.f32 %v1132_v12, %v1112_v53  ;;  %v997_v12 = vstv %s7694_s29  ;;  %s6022_s29 = sld [smem:[#allocation16 + $0x19]] }
 0x2f6   : > { %v1081_v58 = vpop.permute.xlu1 %1080  ;;  %v1149_v60 = vpop.permute.xlu0 %1148 }
 0x2f7   : > { %v1085_v61 = vadd.f32 %v1081_v58, %v1065_v55  ;;  %v1154_v3 = vadd.f32 %v1149_v60, %v1134_v56 }
 0x2fa   : > { %v1109_v62 = vpop.permute.xlu1 %1108  ;;  %v1177_v63 = vpop.permute.xlu0 %1176 }
 0x2fb   : > { %v1113_v0 = vadd.f32 %v1109_v62, %v1085_v61  ;;  %v1182_v8 = vadd.f32 %v1177_v63, %v1154_v3  ;;  %v929_v63 = vmul.f32 %v927_v40, %v7527_v35 }
 0x2fd   : > { %v1135_v4 = vadd.f32 %v1133_v2, %v1113_v0  ;;  %v1200_v23 = vadd.f32 %v1199_v11, %v1182_v8  ;;  %v998_v0 = vmul.f32 %v997_v12, %v7534_v38 }
 0x2fe   : > { %v1151_v5 = vpop.permute.xlu1 %1150  ;;  %v813_v6 = vpop.permute.xlu0 %812 }
 0x2ff   : > { %v1155_v16 = vadd.f32 %v1151_v5, %v1135_v4  ;;  %v818_v19 = vadd.f32 %v813_v6, %v788_v27  ;;  %v1202_v37 = vmax.f32 %v1200_v23, 0.0  ;;  %v1067_v4 = vstv %s7711_s23  ;;  %s6026_s23 = sld [smem:[#allocation16 + $0x1a]] }
 0x300   : > { %v1068_v35 = vmul.f32 %v1067_v4, %v7546_v43  ;;  %v1137_v23 = vstv %s5966_s17  ;;  %s5999_s17 = sld [smem:[#allocation16 + $0x25]] }
 0x302   : > { %v1179_v21 = vpop.permute.xlu1 %1178  ;;  %v841_v22 = vpop.permute.xlu0 %840 }
 0x303   : > { %v1183_v24 = vadd.f32 %v1179_v21, %v1155_v16  ;;  %v846_v28 = vadd.f32 %v841_v22, %v818_v19  ;;  %v999_v16 = vmul.f32 %v997_v12, %v7553_v45  ;;  %v1223_v12 = vmul.u32 2, %v7688_v30 }
 0x305   : > { %v1201_v31 = vadd.f32 %v1199_v11, %v1183_v24  ;;  %v860_v32 = vadd.f32 %v858_v29, %v846_v28  ;;  %vm7734_vm7 = vcmp.eq.s32.totalorder %v7685_v14, %v1223_v12 }
 0x306   : > { %v815_v33 = vpop.permute.xlu1 %814  ;;  %v883_v34 = vpop.permute.xlu0 %882 }
 0x307   : > { %v1203_v39 = vmax.f32 %v1201_v31, 0.0  ;;  %v819_v7 = vadd.f32 %v815_v33, %v789_v36  ;;  %v888_v15 = vadd.f32 %v883_v34, %v860_v32  ;;  %v1069_v33 = vmul.f32 %v1067_v4, %v7564_v10 }
 0x308   : > { %v1138_v34 = vmul.f32 %v1137_v23, %v7566_v51 }
 0x309   : > { %v6558_v42 = vpack.c.bf16 %v1203_v39, %v1202_v37 }
 0x30a   : > { %v843_v44 = vpop.permute.xlu1 %842  ;;  %v911_v46 = vpop.permute.xlu0 %910 }
 0x30b   : > { %v847_v49 = vadd.f32 %v843_v44, %v819_v7  ;;  %v916_v17 = vadd.f32 %v911_v46, %v888_v15  ;;  %6559 = vmatpush3.bf16.msra.mxu1 %v6558_v42  ;;  %v1139_v7 = vmul.f32 %v1137_v23, %v7582_v57  ;;  %v1222_v57 = vadd.s32 8, %v7685_v14 }
 0x30c   : > { %6560 = vmatprep.subr.bf16.mxu1 %v7017_v59  ;;  %v2012_v23 = vstv %s6021_s2  ;;  %s6023_s2 = sld [smem:[#allocation16 + $0x2b]] }
 0x30d   : > { %v861_v52 = vadd.f32 %v859_v47, %v847_v49  ;;  %v930_v53 = vadd.f32 %v928_v48, %v916_v17  ;;  %v1205_v48 = vstv %s5971_s15  ;;  %vm1225_vm8 = vcmp.eq.s32.totalorder %v1222_v57, %v1223_v12  ;;  %s6003_s15 = sld [smem:[#allocation16 + $0x26]] }
 0x30e   : > { %v885_v54 = vpop.permute.xlu1 %884  ;;  %6366 = vmatmul.mubr.msk.f32.vlgmr.msra.gmra.mrb[0].mxu1 %vm1237_vm5, %v7699_v50  ;;  %v953_v25 = vpop.permute.xlu0 %952  ;;  %vm6564_vm9 = vmpackc.low %vm1225_vm8, %vm7734_vm7 }
 0x30f   : > { %6562 = vmatpush3.bf16.msra.mxu1 %v6558_v42  ;;  %6372 = vmatprep.mubr.msk.f32.mxu1 %vm7018_vm3, %v7014_v1  ;;  %v889_v55 = vadd.f32 %v885_v54, %v861_v52  ;;  %v958_v56 = vadd.f32 %v953_v25, %v930_v53 }
 0x310   : > { %6563 = vmatprep.subr.bf16.mxu1 %v7017_v59 }
 0x312   : > { %v913_v58 = vpop.permute.xlu1 %912  ;;  %6373 = vmatmul.mubr.msk.f32.vlgmr.msra.gmra.mrb[2].mxu1 %vm1237_vm5, %v7708_v26  ;;  %v981_v60 = vpop.permute.xlu0 %980 }
 0x313   : > { %v917_v61 = vadd.f32 %v913_v58, %v889_v55  ;;  %v986_v62 = vadd.f32 %v981_v60, %v958_v56  ;;  %6379 = vmatprep.mubr.msk.f32.mxu1 %vm7018_vm3, %v7014_v1  ;;  %v7019_v56 = vmov 1.0|1.0   ;;  %v1230_v58 = vadd.s32 1, %v1223_v12 }
 0x314   : > { %6565 = vmatpush3.bf16.msk.msra.mxu1 %vm6564_vm9, %v7019_v56 }
 0x315   : > { %v931_v2 = vadd.f32 %v929_v63, %v917_v61  ;;  %v1000_v20 = vadd.f32 %v998_v0, %v986_v62  ;;  %6566 = vmatprep.subr.bf16.mxu1 %v7017_v59  ;;  %vm1232_vm10 = vcmp.eq.s32.totalorder %v1222_v57, %v1230_v58  ;;  %vm7743_vm11 = vcmp.eq.s32.totalorder %v7685_v14, %v1230_v58  ;;  %v4506_v61 = vld [vmem:[%s8710_s9] sm:$0xf] }
 0x316   : > { %v955_v18 = vpop.permute.xlu1 %954  ;;  %v1023_v3 = vpop.permute.xlu0 %1022  ;;  %vm6567_vm12 = vmpackc.low %vm1232_vm10, %vm7743_vm11 }
 0x317   : > { %v959_v5 = vadd.f32 %v955_v18, %v931_v2  ;;  %v1028_v6 = vadd.f32 %v1023_v3, %v1000_v20 }
 0x31a   : > { %v983_v8 = vpop.permute.xlu1 %982  ;;  %v1051_v27 = vpop.permute.xlu0 %1050 }
 0x31b   : > { %v987_v11 = vadd.f32 %v983_v8, %v959_v5  ;;  %v1056_v13 = vadd.f32 %v1051_v27, %v1028_v6 }
 0x31d   : > { %v1001_v38 = vadd.f32 %v999_v16, %v987_v11  ;;  %v1070_v19 = vadd.f32 %v1068_v35, %v1056_v13  ;;  %v1850_v13 = vstv %s5997_s1  ;;  %s6011_s1 = sld [smem:[#allocation16 + $0x28]] }
 0x31e   : > { %v1025_v21 = vpop.permute.xlu1 %1024  ;;  %v1093_v22 = vpop.permute.xlu0 %1092 }
 0x31f   : > { %v1029_v24 = vadd.f32 %v1025_v21, %v1001_v38  ;;  %v1098_v28 = vadd.f32 %v1093_v22, %v1070_v19  ;;  %v1931_v19 = vstv %s6009_s12  ;;  %s6015_s12 = sld [smem:[#allocation16 + $0x29]] }
 0x322   : > { %v1053_v29 = vpop.permute.xlu1 %1052  ;;  %v1121_v9 = vpop.permute.xlu0 %1120 }
 0x323   : > { %v1057_v31 = vadd.f32 %v1053_v29, %v1029_v24  ;;  %v1126_v32 = vadd.f32 %v1121_v9, %v1098_v28  ;;  %v1858_v28 = vstv %s5998_s16  ;;  %v1890_v9 = vstv %s6002_s28  ;;  %s6027_s16 = sld [smem:[#allocation16 + $0x2c]]  ;;  %s6000_s28 = sld [smem:[#allocation16 + $0x37]] }
 0x325   : > { %v1071_v36 = vadd.f32 %v1069_v33, %v1057_v31  ;;  %v1140_v37 = vadd.f32 %v1138_v34, %v1126_v32  ;;  %v1939_v32 = vstv %s6010_s30  ;;  %v1971_v34 = vstv %s6014_s27  ;;  %s6004_s30 = sld [smem:[#allocation16 + $0x38]]  ;;  %s6012_s27 = sld [smem:[#allocation16 + $0x3a]] }
 0x326   : > { %v1095_v45 = vpop.permute.xlu1 %1094  ;;  %v1163_v39 = vpop.permute.xlu0 %1162 }
 0x327   : > { %v1099_v43 = vadd.f32 %v1095_v45, %v1071_v36  ;;  %v1168_v42 = vadd.f32 %v1163_v39, %v1140_v37  ;;  %v2020_v37 = vstv %s6022_s29  ;;  %v2052_v39 = vstv %s6026_s23  ;;  %s6016_s29 = sld [smem:[#allocation16 + $0x3b]]  ;;  %s6024_s23 = sld [smem:[#allocation16 + $0x3d]] }
 0x32a   : > { %v1123_v40 = vpop.permute.xlu1 %1122  ;;  %v1191_v15 = vpop.permute.xlu0 %1190 }
 0x32b   : > { %v1127_v41 = vadd.f32 %v1123_v40, %v1099_v43  ;;  %v1196_v47 = vadd.f32 %v1191_v15, %v1168_v42  ;;  %v1866_v40 = vstv %s5999_s17  ;;  %v1947_v42 = vstv %s6011_s1  ;;  %s6028_s17 = sld [smem:[#allocation16 + $0x3e]]  ;;  %s6013_s1 = sld [smem:[#allocation16 + $0x5]] }
 0x32d   : > { %v1141_v44 = vadd.f32 %v1139_v7, %v1127_v41  ;;  %v1206_v17 = vadd.f32 %v1205_v48, %v1196_v47  ;;  %v1898_v7 = vstv %s6003_s15  ;;  %v1987_v12 = vstv %s6016_s29  ;;  %s6001_s15 = sld [smem:[#allocation16 + $0x2]] }
 0x32e   : > { %v1165_v46 = vpop.permute.xlu1 %1164  ;;  %v2036_v58 = vstv %s6024_s23  ;;  %s6019_s29 = sld [smem:[#allocation16 + $0x2a]]  ;;  %s5996_s23 = sld [smem:[#allocation16 + $0x36]] }
 0x32f   : > { %v1169_v49 = vadd.f32 %v1165_v46, %v1141_v44  ;;  %v1208_v53 = vmax.f32 %v1206_v17, 0.0  ;;  %v1979_v46 = vstv %s6015_s12  ;;  %s6025_s12 = sld [smem:[#allocation16 + $0x8]] }
 0x332   : > { %v1193_v10 = vpop.permute.xlu1 %1192 }
 0x333   : > { %v1197_v51 = vadd.f32 %v1193_v10, %v1169_v49  ;;  %v2060_v10 = vstv %s6027_s16  ;;  %s6006_s16 = sld [smem:[#allocation16 + $0x15]] }
 0x335   : > { %v1207_v52 = vadd.f32 %v1205_v48, %v1197_v51  ;;  %v2028_v48 = vstv %s6023_s2  ;;  %v1874_v51 = vstv %s6000_s28  ;;  %s5994_s2 = sld [smem:[#allocation16 + $0x12]]  ;;  %s6018_s28 = sld [smem:[#allocation16 + $0x18]] }
 0x337   : > { %v1209_v54 = vmax.f32 %v1207_v52, 0.0 }
 0x339   : > { %v6570_v25 = vpack.c.bf16 %v1209_v54, %v1208_v53  ;;  %v1906_v53 = vstv %s6004_s30  ;;  %s5995_s30 = sld [smem:[#allocation16 + $0x24]] }
 0x33b   : > { %6571 = vmatpush3.bf16.msra.mxu0 %v6570_v25 }
 0x33c   : > { %6575 = vmatprep.subr.bf16.mxu0 %v7017_v59 }
 0x33e   : > { %6394 = vmatmul.mubr.msk.f32.vlgmr.msra.gmra.mrb[0].mxu0 %vm1237_vm5, %v7699_v50 }
 0x33f   : > { %6407 = vmatprep.mubr.msk.f32.mxu0 %vm7018_vm3, %v7014_v1  ;;  %6577 = vmatpush3.bf16.msk.msra.mxu0 %vm6564_vm9, %v7019_v56 }
 0x340   : > { %6417 = vmatprep.subr.mxu0 %v7014_v1 }
 0x3e1   : > { %v1307_v60 = vpop.f32.mrb[0].mxu1 }
 0x3e2   : > { %v6367_v30 = vpop.f32.mrb[1].mxu1 }
 0x3e3   : > { %v2068_v30 = vstv %s6028_s17  ;;  %s6008_s17 = sld [smem:[#allocation16 + $0x39]] }
 0x3e5   : > { %v1380_v62 = vpop.f32.mrb[2].mxu1 }
 0x3e6   : > { %v1384_v63 = vmax.f32 %v1307_v60, %v1380_v62  ;;  %v6374_v0 = vpop.f32.mrb[3].mxu1 }
 0x3e8   : > { %6380 = vmatmul.mubr.msk.f32.vlgmr.msra.gmra.mrb[4].mxu1 %vm1237_vm5, %v1384_v63 }
 0x3e9   : > { %6568 = vmatpush3.bf16.msk.msra.mxu1 %vm6567_vm12, %v7019_v56  ;;  %6386 = vmatprep.mubr.msk.f32.mxu1 %vm7018_vm3, %v7014_v1 }
 0x3ea   : > { %6572 = vmatprep.subr.bf16.mxu1 %v7017_v59 }
 0x3ec   : > { %6387 = vmatmul.mubr.msk.f32.vlgmr.msra.gmra.mrb[6].mxu1 %vm1237_vm5, %v1384_v63 }
 0x3ed   : > { %6574 = vmatpush3.bf16.msra.mxu1 %v6570_v25  ;;  %6400 = vmatprep.mubr.msk.f32.mxu1 %vm7018_vm3, %v7014_v1  ;;  %v1955_v25 = vstv %s6012_s27  ;;  %s6007_s27 = sld [smem:[#allocation16 + $0x27]] }
 0x3ee   : > { %6578 = vmatprep.subr.bf16.mxu1 %v7017_v59 }
 0x3f0   : > { %6401 = vmatmul.mubr.msk.f32.vlgmr.msra.gmra.mrb[8].mxu1 %vm1237_vm5, %v7708_v26 }
 0x3f1   : > { %6580 = vmatpush3.bf16.msk.msra.mxu1 %vm6567_vm12, %v7019_v56  ;;  %6414 = vmatprep.mubr.msk.f32.mxu1 %vm7018_vm3, %v7014_v1 }
 0x3f2   : > { %6422 = vmatprep.subr.mxu1 %v7014_v1 }
 0x411   : > { %v1595_v2 = vpop.f32.mrb[0].mxu0 }
 0x412   : > { %v6395_v20 = vpop.f32.mrb[1].mxu0 }
 0x4bb   : > { %v1454_v59 = vpop.f32.mrb[4].mxu1 }
 0x4bc   : > { %v6381_v18 = vpop.f32.mrb[5].mxu1 }
 0x4bd   : > { %v1882_v18 = vstv %s6001_s15  ;;  %s6020_s15 = sld [smem:[#allocation16 + $0x3c]] }
 0x4bf   : > { %v1524_v3 = vpop.f32.mrb[6].mxu1 }
 0x4c0   : > { %v1528_v4 = vmax.f32 %v1454_v59, %v1524_v3  ;;  %v6388_v5 = vpop.f32.mrb[7].mxu1 }
 0x4c2   : > { %1821 = vrot.lane.b32.xlu0 %v1528_v4, %s7013_s25  ;;  %v1963_v4 = vstv %s6013_s1  ;;  %s1833_s1 = sld [smem:[#allocation16]] }
 0x4c3   : > { %v1665_v6 = vpop.f32.mrb[8].mxu1 }
 0x4c4   : > { %v1669_v8 = vmax.f32 %v1595_v2, %v1665_v6  ;;  %v6402_v27 = vpop.f32.mrb[9].mxu1  ;;  %v2044_v6 = vstv %s6025_s12  ;;  %s6005_s12 = sld [smem:[#allocation16 + $0x3]] }
 0x4c6   : > { %6408 = vmatmul.mubr.msk.f32.vlgmr.msra.gmra.mrb[2].mxu0 %vm1237_vm5, %v1669_v8  ;;  %6415 = vmatmul.mubr.msk.f32.vlgmr.msra.gmra.mrb[10].mxu1 %vm1237_vm5, %v1669_v8 }
 0x4c7   : > { %6419 = vmatprep.mubr.msk.f32.mxu0 %vm7018_vm3, %v7014_v1  ;;  %6424 = vmatprep.mubr.msk.f32.mxu1 %vm7018_vm3, %v7014_v1 }
 0x534   : > { %v1822_v11 = vpop.permute.xlu0 %1821 }
 0x535   : > { %1825 = vst.msk [vmem:[#allocation4 + $0x1] sm:$0xff] %vm1824_vm15, %v1822_v11 }
 0x53c   : > { %v7782_v16 = vld [vmem:[#allocation4] sm:$0xff] }
 0x53d   : > { %v1851_v35 = vmul.f32 %v1850_v13, %v7782_v16  ;;  %v7785_v38 = vld [vmem:[#allocation4 + $0x1] sm:$0xff]  ;;  %v1859_v29 = vmul.f32 %v1858_v28, %v7782_v16  ;;  %v1891_v31 = vmul.f32 %v1890_v9, %v7782_v16  ;;  %v1867_v41 = vmul.f32 %v1866_v40, %v7782_v16 }
 0x53e   : > { %v1932_v21 = vmul.f32 %v1931_v19, %v7785_v38  ;;  %v7789_v22 = vld [vmem:[#allocation4 + $0x2] sm:$0xff]  ;;  %v1940_v33 = vmul.f32 %v1939_v32, %v7785_v38  ;;  %v1972_v36 = vmul.f32 %v1971_v34, %v7785_v38  ;;  %v1899_v15 = vmul.f32 %v1898_v7, %v7782_v16 }
 0x53f   : > { %1853 = vrot.lane.b32.xlu0 %v1851_v35, %s7016_s20  ;;  %v2013_v24 = vmul.f32 %v2012_v23, %v7789_v22  ;;  %v2021_v45 = vmul.f32 %v2020_v37, %v7789_v22  ;;  %v2053_v43 = vmul.f32 %v2052_v39, %v7789_v22  ;;  %v1948_v44 = vmul.f32 %v1947_v42, %v7785_v38 }
 0x540   : > { %v1980_v47 = vmul.f32 %v1979_v46, %v7785_v38  ;;  %v2029_v49 = vmul.f32 %v2028_v48, %v7789_v22  ;;  %v2061_v17 = vmul.f32 %v2060_v10, %v7789_v22  ;;  %v1875_v52 = vmul.f32 %v1874_v51, %v7782_v16 }
 0x541   : > { %v1907_v54 = vmul.f32 %v1906_v53, %v7782_v16  ;;  %v1956_v57 = vmul.f32 %v1955_v25, %v7785_v38  ;;  %v1988_v56 = vmul.f32 %v1987_v12, %v7785_v38  ;;  %v2037_v60 = vmul.f32 %v2036_v58, %v7789_v22 }
 0x542   : > { %v2069_v62 = vmul.f32 %v2068_v30, %v7789_v22  ;;  %v1883_v3 = vmul.f32 %v1882_v18, %v7782_v16  ;;  %v1964_v5 = vmul.f32 %v1963_v4, %v7785_v38  ;;  %v2045_v8 = vmul.f32 %v2044_v6, %v7789_v22 }
 0x543   : > { %1934 = vrot.lane.b32.xlu0 %v1932_v21, %s7016_s20  ;;  %v1838_v35 = vstv %s5994_s2  ;;  %v1919_v23 = vstv %s6006_s16  ;;  %v1923_v42 = vstv %s6007_s27  ;;  %s6033_s2 = sld [smem:[#allocation16 + $0xa]]  ;;  %s6036_s16 = sld [smem:[#allocation16 + $0x40]] }
 0x544   : > { %v1839_v21 = vmul.f32 %v1838_v35, %v7782_v16  ;;  %v1920_v9 = vmul.f32 %v1919_v23, %v7785_v38  ;;  %v1924_v48 = vmul.f32 %v1923_v42, %v7785_v38  ;;  %v1927_v30 = vstv %s6008_s17  ;;  %s7868_s27 = sld [smem:[#allocation16 + $0x43]]  ;;  %s7876_s17 = sld [smem:[#allocation16 + $0x46]] }
 0x545   : > { %v2008_v18 = vstv %s6020_s15  ;;  %v1834_v35 = vstv %s1833_s1  ;;  %v1915_v23 = vstv %s6005_s12  ;;  %s7878_s15 = sld [smem:[#allocation16 + $0x9]]  ;;  %s7880_s1 = sld [smem:[#allocation16 + $0x1b]] }
 0x546   : > { %v2009_v6 = vmul.f32 %v2008_v18, %v7789_v22  ;;  %s7882_s12 = sld [smem:[#allocation16 + $0x2d]] }
 0x547   : > { %2015 = vrot.lane.b32.xlu0 %v2013_v24, %s7016_s20 }
 0x54b   : > { %1861 = vrot.lane.b32.xlu0 %v1859_v29, %s7016_s20 }
 0x54f   : > { %1893 = vrot.lane.b32.xlu0 %v1891_v31, %s7015_s22 }
 0x553   : > { %1942 = vrot.lane.b32.xlu0 %v1940_v33, %s7016_s20  ;;  %v2000_v33 = vstv %s6018_s28  ;;  %s6017_s28 = sld [smem:[#allocation16 + $0x6]] }
 0x557   : > { %1974 = vrot.lane.b32.xlu0 %v1972_v36, %s7015_s22 }
 0x55b   : > { %2023 = vrot.lane.b32.xlu0 %v2021_v45, %s7016_s20  ;;  %v2001_v45 = vmul.f32 %v2000_v33, %v7789_v22 }
 0x55f   : > { %2055 = vrot.lane.b32.xlu0 %v2053_v43, %s7015_s22 }
 0x563   : > { %1869 = vrot.lane.b32.xlu0 %v1867_v41, %s7016_s20  ;;  %v1842_v41 = vstv %s5995_s30  ;;  %s7866_s30 = sld [smem:[#allocation16 + $0xb]] }
 0x567   : > { %1901 = vrot.lane.b32.xlu0 %v1899_v15, %s7015_s22  ;;  %v1843_v15 = vmul.f32 %v1842_v41, %v7782_v16 }
 0x56b   : > { %1950 = vrot.lane.b32.xlu0 %v1948_v44, %s7016_s20 }
 0x56f   : > { %1982 = vrot.lane.b32.xlu0 %v1980_v47, %s7015_s22 }
 0x573   : > { %2031 = vrot.lane.b32.xlu0 %v2029_v49, %s7016_s20 }
 0x577   : > { %2063 = vrot.lane.b32.xlu0 %v2061_v17, %s7015_s22  ;;  %v2004_v17 = vstv %s6019_s29  ;;  %s7871_s29 = sld [smem:[#allocation16 + $0xd]] }
 0x57b   : > { %1877 = vrot.lane.b32.xlu0 %v1875_v52, %s7016_s20 }
 0x57f   : > { %1909 = vrot.lane.b32.xlu0 %v1907_v54, %s7015_s22  ;;  %v2005_v54 = vmul.f32 %v2004_v17, %v7789_v22 }
 0x583   : > { %1958 = vrot.lane.b32.xlu0 %v1956_v57, %s7016_s20 }
 0x587   : > { %1990 = vrot.lane.b32.xlu0 %v1988_v56, %s7015_s22  ;;  %v1846_v56 = vstv %s5996_s23  ;;  %s7873_s23 = sld [smem:[#allocation16 + $0x3f]] }
 0x58b   : > { %2039 = vrot.lane.b32.xlu0 %v2037_v60, %s7016_s20  ;;  %v1847_v60 = vmul.f32 %v1846_v56, %v7782_v16 }
 0x58f   : > { %2071 = vrot.lane.b32.xlu0 %v2069_v62, %s7015_s22 }
 0x599   : > { %v1739_v63 = vpop.f32.mrb[2].mxu0  ;;  %v1809_v0 = vpop.f32.mrb[10].mxu1 }
 0x59a   : > { %v1813_v2 = vmax.f32 %v1739_v63, %v1809_v0  ;;  %v6409_v20 = vpop.f32.mrb[3].mxu0  ;;  %v6416_v59 = vpop.f32.mrb[11].mxu1 }
 0x59c   : > { %1827 = vrot.lane.b32.xlu1 %v1813_v2, %s7013_s25  ;;  %v1928_v2 = vmul.f32 %v1927_v30, %v7785_v38 }
 0x5a0   : > { %1885 = vrot.lane.b32.xlu1 %v1883_v3, %s7015_s22 }
 0x5a4   : > { %1966 = vrot.lane.b32.xlu1 %v1964_v5, %s7015_s22 }
 0x5a8   : > { %2047 = vrot.lane.b32.xlu1 %v2045_v8, %s7015_s22 }
 0x5b1   : > { %v7837_v27 = vpop.permute.xlu0 %1853 }
 0x5b5   : > { %v7839_v11 = vpop.permute.xlu0 %1934 }
 0x5b9   : > { %v7841_v13 = vpop.permute.xlu0 %2015 }
 0x5bd   : > { %v1862_v19 = vpop.permute.xlu0 %1861 }
 0x5be   : > { %v1864_v24 = vadd.f32 %v1862_v19, %v1839_v21  ;;  %v1835_v21 = vmul.f32 %v1834_v35, %v7782_v16  ;;  %v2093_v16 = vstv %s6033_s2  ;;  %s7893_s2 = sld [smem:[#allocation16 + $0xe]] }
 0x5c1   : > { %v1894_v28 = vpop.permute.xlu0 %1893 }
 0x5c2   : > { %v1896_v29 = vadd.f32 %v1894_v28, %v1864_v24  ;;  %v1856_v24 = vadd.f32 %v7837_v27, %v1835_v21 }
 0x5c4   : > { %v1921_v31 = vadd.f32 %v1920_v9, %v1896_v29  ;;  %v1916_v29 = vmul.f32 %v1915_v23, %v7785_v38  ;;  %v1996_v38 = vstv %s6017_s28  ;;  %s6061_s28 = sld [smem:[#allocation16 + $0x11]] }
 0x5c5   : > { %v1943_v32 = vpop.permute.xlu0 %1942  ;;  %v1997_v42 = vmul.f32 %v1996_v38, %v7789_v22 }
 0x5c6   : > { %v1945_v34 = vadd.f32 %v1943_v32, %v1921_v31  ;;  %v2117_v31 = vstv %s6036_s16  ;;  %s7907_s16 = sld [smem:[#allocation16 + $0x10]] }
 0x5c9   : > { %v1975_v36 = vpop.permute.xlu0 %1974 }
 0x5ca   : > { %v1977_v37 = vadd.f32 %v1975_v36, %v1945_v34 }
 0x5cc   : > { %v7846_v39 = vadd.f32 %v2001_v45, %v1977_v37 }
 0x5cd   : > { %v7848_v43 = vpop.permute.xlu0 %2023 }
 0x5d1   : > { %v7850_v40 = vpop.permute.xlu0 %2055 }
 0x5d5   : > { %v1870_v7 = vpop.permute.xlu0 %1869 }
 0x5d6   : > { %v1872_v44 = vadd.f32 %v1870_v7, %v1843_v15  ;;  %v2125_v7 = vstv %s7866_s30  ;;  %v2198_v15 = vstv %s7868_s27  ;;  %s6034_s30 = sld [smem:[#allocation16 + $0x1c]]  ;;  %s6038_s27 = sld [smem:[#allocation16 + $0x1d]] }
 0x5d9   : > { %v1902_v46 = vpop.permute.xlu0 %1901 }
 0x5da   : > { %v1904_v47 = vadd.f32 %v1902_v46, %v1872_v44  ;;  %v2089_v46 = vstv %s7873_s23  ;;  %s6050_s23 = sld [smem:[#allocation16 + $0x20]] }
 0x5dc   : > { %v1925_v49 = vadd.f32 %v1924_v48, %v1904_v47  ;;  %v2026_v47 = vadd.f32 %v7848_v43, %v7846_v39  ;;  %v2085_v39 = vstv %s7882_s12  ;;  %v2133_v23 = vstv %s6038_s27  ;;  %s6039_s12 = sld [smem:[#allocation16 + $0x2f]]  ;;  %s6040_s27 = sld [smem:[#allocation16 + $0x41]] }
 0x5dd   : > { %v1951_v10 = vpop.permute.xlu0 %1950 }
 0x5de   : > { %v1953_v51 = vadd.f32 %v1951_v10, %v1925_v49  ;;  %v2058_v56 = vadd.f32 %v7850_v40, %v2026_v47 }
 0x5e1   : > { %v1983_v52 = vpop.permute.xlu0 %1982 }
 0x5e2   : > { %v1985_v53 = vadd.f32 %v1983_v52, %v1953_v51  ;;  %v2279_v52 = vstv %s7876_s17  ;;  %s6058_s17 = sld [smem:[#allocation16 + $0x22]] }
 0x5e4   : > { %v7855_v25 = vadd.f32 %v2005_v54, %v1985_v53  ;;  %v2077_v53 = vstv %s7878_s15  ;;  %v2081_v54 = vstv %s7880_s1  ;;  %s6062_s15 = sld [smem:[#allocation16 + $0x23]]  ;;  %s6035_s1 = sld [smem:[#allocation16 + $0x2e]] }
 0x5e5   : > { %v7857_v57 = vpop.permute.xlu0 %2031 }
 0x5e6   : > { %v2034_v43 = vadd.f32 %v7857_v57, %v7855_v25 }
 0x5e9   : > { %v7859_v12 = vpop.permute.xlu0 %2063 }
 0x5ed   : > { %v1878_v58 = vpop.permute.xlu0 %1877 }
 0x5ee   : > { %v1880_v62 = vadd.f32 %v1878_v58, %v1847_v60 }
 0x5f1   : > { %v1910_v63 = vpop.permute.xlu0 %1909 }
 0x5f2   : > { %v1912_v0 = vadd.f32 %v1910_v63, %v1880_v62 }
 0x5f4   : > { %v1929_v20 = vadd.f32 %v1928_v2, %v1912_v0 }
 0x5f5   : > { %v1959_v59 = vpop.permute.xlu0 %1958 }
 0x5f6   : > { %v1961_v3 = vadd.f32 %v1959_v59, %v1929_v20  ;;  %v2066_v20 = vadd.f32 %v7859_v12, %v2034_v43  ;;  %v2206_v59 = vstv %s7893_s2  ;;  %s6047_s2 = sld [smem:[#allocation16 + $0x31]] }
 0x5f9   : > { %v1991_v4 = vpop.permute.xlu0 %1990 }
 0x5fa   : > { %v1993_v5 = vadd.f32 %v1991_v4, %v1961_v3 }
 0x5fc   : > { %v2010_v8 = vadd.f32 %v2009_v6, %v1993_v5  ;;  %v2255_v6 = vstv %s7907_s16  ;;  %s6051_s16 = sld [smem:[#allocation16 + $0x32]] }
 0x5fd   : > { %v2040_v32 = vpop.permute.xlu0 %2039 }
 0x5fe   : > { %v2042_v51 = vadd.f32 %v2040_v32, %v2010_v8  ;;  %v2287_v8 = vstv %s6061_s28  ;;  %s6059_s28 = sld [smem:[#allocation16 + $0x34]] }
 0x601   : > { %v2072_v48 = vpop.permute.xlu0 %2071 }
 0x602   : > { %v2074_v60 = vadd.f32 %v2072_v48, %v2042_v51 }
 0x60e   : > { %v1828_v19 = vpop.permute.xlu1 %1827 }
 0x60f   : > { %1831 = vst.msk [vmem:[#allocation4 + $0x11] sm:$0xff] %vm1824_vm15, %v1828_v19  ;;  %v2101_v19 = vstv %s6034_s30  ;;  %s6063_s30 = sld [smem:[#allocation16 + $0x35]] }
 0x612   : > { %v1886_v28 = vpop.permute.xlu1 %1885 }
 0x613   : > { %v1888_v9 = vadd.f32 %v1886_v28, %v1856_v24 }
 0x615   : > { %v1917_v27 = vadd.f32 %v1916_v29, %v1888_v9  ;;  %v2214_v9 = vstv %s6050_s23  ;;  %v2303_v47 = vstv %s6063_s30  ;;  %s6064_s23 = sld [smem:[#allocation16 + $0x47]]  ;;  %s6055_s30 = sld [smem:[#allocation16 + $0x33]] }
 0x616   : > { %v7884_v33 = vld [vmem:[#allocation4 + $0x10] sm:$0xff]  ;;  %v1967_v41 = vpop.permute.xlu1 %1966 }
 0x617   : > { %v1937_v34 = vadd.f32 %v7839_v11, %v1917_v27  ;;  %v2094_v36 = vmul.f32 %v2093_v16, %v7884_v33  ;;  %v2118_v37 = vmul.f32 %v2117_v31, %v7884_v33  ;;  %v7889_v45 = vld [vmem:[#allocation4 + $0x11] sm:$0xff]  ;;  %v2174_v11 = vstv %s7871_s29  ;;  %s6046_s29 = sld [smem:[#allocation16 + $0x1f]] }
 0x618   : > { %v2126_v10 = vmul.f32 %v2125_v7, %v7884_v33  ;;  %v2199_v17 = vmul.f32 %v2198_v15, %v7889_v45  ;;  %v7904_v22 = vld [vmem:[#allocation4 + $0x12] sm:$0xff]  ;;  %v2175_v62 = vmul.f32 %v2174_v11, %v7889_v45  ;;  %v2090_v63 = vmul.f32 %v2089_v46, %v7884_v33 }
 0x619   : > { %v1969_v44 = vadd.f32 %v1967_v41, %v1937_v34  ;;  %2096 = vrot.lane.b32.xlu1 %v2094_v36, %s7016_s20  ;;  %2120 = vrot.lane.b32.xlu0 %v2118_v37, %s7016_s20  ;;  %v2280_v40 = vmul.f32 %v2279_v52, %v7904_v22  ;;  %v2082_v2 = vmul.f32 %v2081_v54, %v7884_v33  ;;  %v2263_v31 = vstv %s6058_s17  ;;  %s6041_s17 = sld [smem:[#allocation16 + $0xc]] }
 0x61a   : > { %v2048_v30 = vpop.permute.xlu1 %2047  ;;  %v7925_v18 = vadd.f32 %v2090_v63, %v2074_v60  ;;  %v2086_v25 = vmul.f32 %v2085_v39, %v7884_v33  ;;  %v2207_v5 = vmul.f32 %v2206_v59, %v7889_v45  ;;  %v2256_v12 = vmul.f32 %v2255_v6, %v7904_v22 }
 0x61b   : > { %v1998_v49 = vadd.f32 %v1997_v42, %v1969_v44  ;;  %v7932_v3 = vadd.f32 %v2082_v2, %v2058_v56  ;;  %v2288_v35 = vmul.f32 %v2287_v8, %v7904_v22  ;;  %v2102_v21 = vmul.f32 %v2101_v19, %v7884_v33 }
 0x61c   : > { %v7934_v4 = vadd.f32 %v2086_v25, %v2066_v20  ;;  %v2134_v24 = vmul.f32 %v2133_v23, %v7884_v33  ;;  %v2215_v16 = vmul.f32 %v2214_v9, %v7889_v45  ;;  %v2264_v32 = vmul.f32 %v2263_v31, %v7904_v22 }
 0x61d   : > { %v2018_v58 = vadd.f32 %v7841_v13, %v1998_v49  ;;  %2128 = vrot.lane.b32.xlu1 %v2126_v10, %s7015_s22  ;;  %2201 = vrot.lane.b32.xlu0 %v2199_v17, %s7016_s20  ;;  %v2078_v13 = vmul.f32 %v2077_v53, %v7884_v33  ;;  %v2182_v28 = vstv %s6046_s29  ;;  %v2295_v27 = vstv %s6062_s15  ;;  %s6052_s29 = sld [smem:[#allocation16 + $0x44]]  ;;  %s6053_s15 = sld [smem:[#allocation16 + $0xf]] }
 0x61e   : > { %v2183_v29 = vmul.f32 %v2182_v28, %v7889_v45  ;;  %v2296_v38 = vmul.f32 %v2295_v27, %v7904_v22  ;;  %v2109_v34 = vstv %s6035_s1  ;;  %v2141_v37 = vstv %s6039_s12  ;;  %s2318_s1 = sld [smem:[#allocation17]]  ;;  %s6042_s12 = sld [smem:[#allocation16 + $0x1e]] }
 0x61f   : > { %v2050_v0 = vadd.f32 %v2048_v30, %v2018_v58  ;;  %v2110_v36 = vmul.f32 %v2109_v34, %v7884_v33  ;;  %v2142_v41 = vmul.f32 %v2141_v37, %v7884_v33  ;;  %v2190_v7 = vstv %s6047_s2  ;;  %s6054_s2 = sld [smem:[#allocation16 + $0x21]] }
 0x620   : > { %v2191_v15 = vmul.f32 %v2190_v7, %v7889_v45  ;;  %v2222_v42 = vstv %s6051_s16  ;;  %v2271_v11 = vstv %s6059_s28  ;;  %v2304_v48 = vmul.f32 %v2303_v47, %v7904_v22  ;;  %s6065_s16 = sld [smem:[#allocation17 + $0x1]]  ;;  %s6043_s28 = sld [smem:[#allocation16 + $0x30]] }
 0x621   : > { %2177 = vrot.lane.b32.xlu1 %v2175_v62, %s7016_s20  ;;  %2282 = vrot.lane.b32.xlu0 %v2280_v40, %s7016_s20  ;;  %v7930_v57 = vadd.f32 %v2078_v13, %v2050_v0  ;;  %v2223_v44 = vmul.f32 %v2222_v42, %v7889_v45  ;;  %v2272_v46 = vmul.f32 %v2271_v11, %v7904_v22  ;;  %v2149_v49 = vstv %s6040_s27  ;;  %s6066_s27 = sld [smem:[#allocation17 + $0x2]] }
 0x622   : > { %v2150_v10 = vmul.f32 %v2149_v49, %v7884_v33  ;;  %v2311_v52 = vstv %s6064_s23  ;;  %v2158_v56 = vstv %s6041_s17  ;;  %s6056_s23 = sld [smem:[#allocation16 + $0x45]]  ;;  %s6067_s17 = sld [smem:[#allocation17 + $0x3]] }
 0x623   : > { %v2230_v17 = vstv %s6052_s29  ;;  %v2312_v53 = vmul.f32 %v2311_v52, %v7904_v22  ;;  %v2159_v43 = vmul.f32 %v2158_v56, %v7889_v45  ;;  %v2239_v62 = vstv %s6053_s15  ;;  %s6044_s29 = sld [smem:[#allocation16 + $0x42]] }
 0x624   : > { %v2231_v51 = vmul.f32 %v2230_v17, %v7889_v45  ;;  %v2240_v13 = vmul.f32 %v2239_v62, %v7904_v22  ;;  %v2319_v25 = vstv %s2318_s1  ;;  %v2247_v17 = vstv %s6055_s30  ;;  %s6075_s15 = sld [smem:[#allocation18 + $0x2]]  ;;  %s6071_s1 = sld [smem:[#allocation18 + $0x1]] }
 0x625   : > { %2209 = vrot.lane.b32.xlu1 %v2207_v5, %s7015_s22  ;;  %v2243_v9 = vstv %s6054_s2  ;;  %s6083_s2 = sld [smem:[#allocation18 + $0x4]]  ;;  %s6107_s30 = sld [smem:[#allocation18 + $0xa]] }
 0x626   : > { %v2244_v27 = vmul.f32 %v2243_v9, %v7904_v22 }
 0x629   : > { %2258 = vrot.lane.b32.xlu1 %v2256_v12, %s7016_s20 }
 0x62d   : > { %2290 = vrot.lane.b32.xlu1 %v2288_v35, %s7015_s22  ;;  %v2162_v35 = vstv %s6042_s12  ;;  %s6087_s12 = sld [smem:[#allocation18 + $0x5]] }
 0x631   : > { %2104 = vrot.lane.b32.xlu1 %v2102_v21, %s7016_s20 }
 0x635   : > { %2136 = vrot.lane.b32.xlu1 %v2134_v24, %s7015_s22  ;;  %v2163_v24 = vmul.f32 %v2162_v35, %v7889_v45 }
 0x639   : > { %2185 = vrot.lane.b32.xlu1 %v2183_v29, %s7016_s20 }
 0x63d   : > { %2217 = vrot.lane.b32.xlu1 %v2215_v16, %s7015_s22 }
 0x641   : > { %2266 = vrot.lane.b32.xlu1 %v2264_v32, %s7016_s20 }
 0x645   : > { %2298 = vrot.lane.b32.xlu1 %v2296_v38, %s7015_s22 }
 0x649   : > { %2112 = vrot.lane.b32.xlu1 %v2110_v36, %s7016_s20 }
 0x64d   : > { %2144 = vrot.lane.b32.xlu1 %v2142_v41, %s7015_s22 }
 0x651   : > { %2193 = vrot.lane.b32.xlu1 %v2191_v15, %s7016_s20 }
 0x655   : > { %2225 = vrot.lane.b32.xlu1 %v2223_v44, %s7015_s22  ;;  %v2166_v44 = vstv %s6043_s28  ;;  %s6095_s28 = sld [smem:[#allocation18 + $0x7]] }
 0x659   : > { %2274 = vrot.lane.b32.xlu1 %v2272_v46, %s7016_s20 }
 0x65d   : > { %2306 = vrot.lane.b32.xlu1 %v2304_v48, %s7015_s22  ;;  %v2167_v48 = vmul.f32 %v2166_v44, %v7889_v45 }
 0x661   : > { %2152 = vrot.lane.b32.xlu1 %v2150_v10, %s7015_s22 }
 0x665   : > { %2233 = vrot.lane.b32.xlu1 %v2231_v51, %s7015_s22 }
 0x669   : > { %2314 = vrot.lane.b32.xlu1 %v2312_v53, %s7015_s22 }
 0x68b   : > { %v2097_v54 = vpop.permute.xlu1 %2096 }
 0x68c   : > { %v2099_v58 = vadd.f32 %v2097_v54, %v7930_v57  ;;  %v2248_v54 = vmul.f32 %v2247_v17, %v7904_v22 }
 0x68f   : > { %v2129_v39 = vpop.permute.xlu1 %2128 }
 0x690   : > { %v2131_v33 = vadd.f32 %v2129_v39, %v2099_v58 }
 0x692   : > { %v2160_v60 = vadd.f32 %v2159_v43, %v2131_v33  ;;  %v2327_v33 = vstv %s6066_s27  ;;  %s6123_s27 = sld [smem:[#allocation18 + $0xe]] }
 0x693   : > { %v2178_v30 = vpop.permute.xlu1 %2177 }
 0x694   : > { %v2180_v63 = vadd.f32 %v2178_v30, %v2160_v60  ;;  %v2170_v30 = vstv %s6044_s29  ;;  %s6119_s29 = sld [smem:[#allocation18 + $0xd]] }
 0x697   : > { %v2210_v0 = vpop.permute.xlu1 %2209 }
 0x698   : > { %v2212_v40 = vadd.f32 %v2210_v0, %v2180_v63 }
 0x69a   : > { %v2241_v2 = vadd.f32 %v2240_v13, %v2212_v40  ;;  %v2171_v13 = vmul.f32 %v2170_v30, %v7889_v45  ;;  %v2707_v17 = vstv %s6119_s29  ;;  %s6191_s29 = sld [smem:[#allocation18 + $0x1f]] }
 0x69b   : > { %v2259_v20 = vpop.permute.xlu1 %2258 }
 0x69c   : > { %v2261_v59 = vadd.f32 %v2259_v20, %v2241_v2 }
 0x69f   : > { %v2291_v5 = vpop.permute.xlu1 %2290 }
 0x6a0   : > { %v2293_v57 = vadd.f32 %v2291_v5, %v2261_v59 }
 0x6a2   : > { %v2320_v6 = vadd.f32 %v2319_v25, %v2293_v57  ;;  %v2251_v25 = vstv %s6056_s23  ;;  %s6135_s23 = sld [smem:[#allocation18 + $0x11]] }
 0x6a3   : > { %v2105_v12 = vpop.permute.xlu1 %2104 }
 0x6a4   : > { %v2321_v8 = vmax.f32 %v2320_v6, 0.0  ;;  %v2107_v19 = vadd.f32 %v2105_v12, %v7932_v3  ;;  %v2323_v3 = vstv %s6065_s16  ;;  %v2252_v6 = vmul.f32 %v2251_v25, %v7904_v22  ;;  %s6099_s16 = sld [smem:[#allocation18 + $0x8]] }
 0x6a5   : > { %v2383_v22 = vstv %s6071_s1  ;;  %s6143_s1 = sld [smem:[#allocation18 + $0x13]] }
 0x6a6   : > { %2343 = vrot.lane.b32.xlu0 %v2321_v8, %s7013_s25 }
 0x6a7   : > { %v2137_v21 = vpop.permute.xlu1 %2136 }
 0x6a8   : > { %v2139_v23 = vadd.f32 %v2137_v21, %v2107_v19  ;;  %v2331_v19 = vstv %s6067_s17  ;;  %s6131_s17 = sld [smem:[#allocation18 + $0x10]] }
 0x6aa   : > { %v2164_v28 = vadd.f32 %v2163_v24, %v2139_v23 }
 0x6ab   : > { %v2186_v29 = vpop.permute.xlu1 %2185 }
 0x6ac   : > { %v2188_v16 = vadd.f32 %v2186_v29, %v2164_v28  ;;  %v2415_v29 = vstv %s6075_s15  ;;  %s6147_s15 = sld [smem:[#allocation18 + $0x14]] }
 0x6af   : > { %v2218_v31 = vpop.permute.xlu1 %2217 }
 0x6b0   : > { %v2220_v32 = vadd.f32 %v2218_v31, %v2188_v16 }
 0x6b2   : > { %v2245_v38 = vadd.f32 %v2244_v27, %v2220_v32  ;;  %v2496_v27 = vstv %s6087_s12  ;;  %s6159_s12 = sld [smem:[#allocation18 + $0x17]] }
 0x6b3   : > { %v2267_v34 = vpop.permute.xlu1 %2266 }
 0x6b4   : > { %v2269_v36 = vadd.f32 %v2267_v34, %v2245_v38  ;;  %v2464_v38 = vstv %s6083_s2  ;;  %s6155_s2 = sld [smem:[#allocation18 + $0x16]] }
 0x6b7   : > { %v2299_v37 = vpop.permute.xlu1 %2298 }
 0x6b8   : > { %v2301_v41 = vadd.f32 %v2299_v37, %v2269_v36  ;;  %v2577_v37 = vstv %s6099_s16  ;;  %s6171_s16 = sld [smem:[#allocation18 + $0x1a]] }
 0x6ba   : > { %v2324_v7 = vadd.f32 %v2323_v3, %v2301_v41  ;;  %v2545_v41 = vstv %s6095_s28  ;;  %s6167_s28 = sld [smem:[#allocation18 + $0x19]] }
 0x6bb   : > { %v2113_v15 = vpop.permute.xlu1 %2112 }
 0x6bc   : > { %v2325_v42 = vmax.f32 %v2324_v7, 0.0  ;;  %v2115_v11 = vadd.f32 %v2113_v15, %v7934_v4  ;;  %v2121_v4 = vpop.permute.xlu0 %2120 }
 0x6bd   : > { %v2123_v62 = vadd.f32 %v2121_v4, %v7925_v18 }
 0x6be   : > { %2348 = vrot.lane.b32.xlu1 %v2325_v42, %s7013_s25 }
 0x6bf   : > { %v2145_v46 = vpop.permute.xlu1 %2144 }
 0x6c0   : > { %v2147_v47 = vadd.f32 %v2145_v46, %v2115_v11  ;;  %v2202_v59 = vpop.permute.xlu0 %2201  ;;  %v2626_v11 = vstv %s6107_s30  ;;  %v3031_v25 = vstv %s6167_s28  ;;  %s6179_s30 = sld [smem:[#allocation18 + $0x1c]]  ;;  %s6096_s28 = sld [smem:[#allocation18 + $0x2b]] }
 0x6c2   : > { %v2168_v49 = vadd.f32 %v2167_v48, %v2147_v47 }
 0x6c3   : > { %v2194_v10 = vpop.permute.xlu1 %2193 }
 0x6c4   : > { %v2196_v51 = vadd.f32 %v2194_v10, %v2168_v49  ;;  %v2283_v35 = vpop.permute.xlu0 %2282  ;;  %v2739_v10 = vstv %s6123_s27  ;;  %s6195_s27 = sld [smem:[#allocation18 + $0x20]] }
 0x6c7   : > { %v2226_v52 = vpop.permute.xlu1 %2225 }
 0x6c8   : > { %v2228_v53 = vadd.f32 %v2226_v52, %v2196_v51 }
 0x6ca   : > { %v2249_v56 = vadd.f32 %v2248_v54, %v2228_v53  ;;  %v2820_v54 = vstv %s6135_s23  ;;  %s6207_s23 = sld [smem:[#allocation18 + $0x23]] }
 0x6cb   : > { %v2275_v58 = vpop.permute.xlu1 %2274 }
 0x6cc   : > { %v2277_v39 = vadd.f32 %v2275_v58, %v2249_v56  ;;  %v2788_v56 = vstv %s6131_s17  ;;  %s6203_s17 = sld [smem:[#allocation18 + $0x22]] }
 0x6cf   : > { %v2307_v43 = vpop.permute.xlu1 %2306 }
 0x6d0   : > { %v2309_v60 = vadd.f32 %v2307_v43, %v2277_v39  ;;  %v2869_v43 = vstv %s6143_s1  ;;  %s6072_s1 = sld [smem:[#allocation18 + $0x25]] }
 0x6d2   : > { %v2328_v63 = vadd.f32 %v2327_v33, %v2309_v60  ;;  %v2901_v33 = vstv %s6147_s15  ;;  %s6076_s15 = sld [smem:[#allocation18 + $0x26]] }
 0x6d3   : > { %v2153_v0 = vpop.permute.xlu1 %2152 }
 0x6d4   : > { %v2329_v40 = vmax.f32 %v2328_v63, 0.0  ;;  %v2155_v2 = vadd.f32 %v2153_v0, %v2123_v62  ;;  %v2982_v0 = vstv %s6159_s12  ;;  %s6088_s12 = sld [smem:[#allocation18 + $0x29]] }
 0x6d6   : > { %v2172_v20 = vadd.f32 %v2171_v13, %v2155_v2  ;;  %2354 = vrot.lane.b32.xlu0 %v2329_v40, %s7013_s25  ;;  %v2950_v40 = vstv %s6155_s2  ;;  %s6084_s2 = sld [smem:[#allocation18 + $0x28]] }
 0x6d7   : > { %v2234_v57 = vpop.permute.xlu1 %2233 }
 0x6d8   : > { %v2204_v5 = vadd.f32 %v2202_v59, %v2172_v20  ;;  %v3063_v59 = vstv %s6171_s16  ;;  %s6100_s16 = sld [smem:[#allocation18 + $0x2c]] }
 0x6da   : > { %v2236_v12 = vadd.f32 %v2234_v57, %v2204_v5 }
 0x6db   : > { %v2315_v21 = vpop.permute.xlu1 %2314 }
 0x6dc   : > { %v2253_v8 = vadd.f32 %v2252_v6, %v2236_v12 }
 0x6de   : > { %v2285_v18 = vadd.f32 %v2283_v35, %v2253_v8  ;;  %v3112_v8 = vstv %s6179_s30  ;;  %s6108_s30 = sld [smem:[#allocation18 + $0x2e]] }
 0x6e0   : > { %v2317_v23 = vadd.f32 %v2315_v21, %v2285_v18 }
 0x6e2   : > { %v2332_v24 = vadd.f32 %v2331_v19, %v2317_v23  ;;  %v3225_v23 = vstv %s6195_s27  ;;  %s6124_s27 = sld [smem:[#allocation18 + $0x32]] }
 0x6e4   : > { %v2333_v45 = vmax.f32 %v2332_v24, 0.0  ;;  %v3193_v24 = vstv %s6191_s29  ;;  %s6120_s29 = sld [smem:[#allocation18 + $0x31]] }
 0x6e6   : > { %2360 = vrot.lane.b32.xlu1 %v2333_v45, %s7013_s25  ;;  %s6111_s25 = sld [smem:[#allocation18 + $0xb]] }
 0x6ec   : > { %v2658_v44 = vstv %s6111_s25  ;;  %s6183_s25 = sld [smem:[#allocation18 + $0x1d]] }
 0x6f2   : > { %v3144_v12 = vstv %s6183_s25  ;;  %s6112_s25 = sld [smem:[#allocation18 + $0x2f]] }
 0x718   : > { %v2344_v28 = vpop.permute.xlu0 %2343 }
 0x719   : > { %2346 = vst.msk [vmem:[#allocation5 + $0x1] sm:$0xff] %vm1824_vm15, %v2344_v28 }
 0x720   : > { %v7990_v9 = vld [vmem:[#allocation5] sm:$0xff] }
 0x721   : > { %v2416_v16 = vmul.f32 %v2415_v29, %v7990_v9  ;;  %v2384_v31 = vmul.f32 %v2383_v22, %v7990_v9  ;;  %v7994_v32 = vld [vmem:[#allocation5 + $0x1] sm:$0xff]  ;;  %v3306_v22 = vstv %s6207_s23  ;;  %s6136_s23 = sld [smem:[#allocation18 + $0x35]] }
 0x722   : > { %v2497_v34 = vmul.f32 %v2496_v27, %v7994_v32  ;;  %v2465_v36 = vmul.f32 %v2464_v38, %v7994_v32  ;;  %v8000_v3 = vld [vmem:[#allocation5 + $0x2] sm:$0xff]  ;;  %v2423_v38 = vstv %s6076_s15  ;;  %s6148_s15 = sld [smem:[#allocation18 + $0x38]] }
 0x723   : > { %2418 = vrot.lane.b32.xlu1 %v2416_v16, %s7015_s22  ;;  %2386 = vrot.lane.b32.xlu0 %v2384_v31, %s7016_s20  ;;  %v2578_v7 = vmul.f32 %v2577_v37, %v8000_v3  ;;  %v2546_v15 = vmul.f32 %v2545_v41, %v8000_v3  ;;  %v3274_v16 = vstv %s6203_s17  ;;  %v2504_v41 = vstv %s6088_s12  ;;  %s6132_s17 = sld [smem:[#allocation18 + $0x34]]  ;;  %s6160_s12 = sld [smem:[#allocation18 + $0x3b]] }
 0x727   : > { %2499 = vrot.lane.b32.xlu1 %v2497_v34, %s7015_s22  ;;  %2467 = vrot.lane.b32.xlu0 %v2465_v36, %s7016_s20  ;;  %v2391_v34 = vstv %s6072_s1  ;;  %v2424_v36 = vmul.f32 %v2423_v38, %v7990_v9  ;;  %s6144_s1 = sld [smem:[#allocation18 + $0x37]] }
 0x728   : > { %v2392_v37 = vmul.f32 %v2391_v34, %v7990_v9 }
 0x72b   : > { %2580 = vrot.lane.b32.xlu1 %v2578_v7, %s7015_s22  ;;  %2548 = vrot.lane.b32.xlu0 %v2546_v15, %s7016_s20  ;;  %v2472_v7 = vstv %s6084_s2  ;;  %v2505_v15 = vmul.f32 %v2504_v41, %v7994_v32  ;;  %s6156_s2 = sld [smem:[#allocation18 + $0x3a]] }
 0x730   : > { %v2349_v42 = vpop.permute.xlu1 %2348 }
 0x731   : > { %2352 = vst.msk [vmem:[#allocation5 + $0x11] sm:$0xff] %vm1824_vm15, %v2349_v42  ;;  %v2473_v42 = vmul.f32 %v2472_v7, %v7994_v32 }
 0x738   : > { %v8009_v46 = vld [vmem:[#allocation5 + $0x10] sm:$0xff] }
 0x739   : > { %v2659_v47 = vmul.f32 %v2658_v44, %v8009_v46  ;;  %v2627_v48 = vmul.f32 %v2626_v11, %v8009_v46  ;;  %v8013_v49 = vld [vmem:[#allocation5 + $0x11] sm:$0xff]  ;;  %v2585_v44 = vstv %s6100_s16  ;;  %v2553_v11 = vstv %s6096_s28  ;;  %s6172_s16 = sld [smem:[#allocation18 + $0x3e]]  ;;  %s6168_s28 = sld [smem:[#allocation18 + $0x3d]] }
 0x73a   : > { %v2740_v51 = vmul.f32 %v2739_v10, %v8013_v49  ;;  %v2708_v52 = vmul.f32 %v2707_v17, %v8013_v49  ;;  %v8019_v53 = vld [vmem:[#allocation5 + $0x12] sm:$0xff]  ;;  %v2666_v10 = vstv %s6112_s25  ;;  %v2634_v17 = vstv %s6108_s30  ;;  %s6184_s25 = sld [smem:[#allocation18 + $0x41]]  ;;  %s6180_s30 = sld [smem:[#allocation18 + $0x40]] }
 0x73b   : > { %2661 = vrot.lane.b32.xlu1 %v2659_v47, %s7015_s22  ;;  %2629 = vrot.lane.b32.xlu0 %v2627_v48, %s7016_s20  ;;  %v2821_v58 = vmul.f32 %v2820_v54, %v8019_v53  ;;  %v2789_v39 = vmul.f32 %v2788_v56, %v8019_v53  ;;  %v2586_v47 = vmul.f32 %v2585_v44, %v8000_v3  ;;  %v2747_v54 = vstv %s6124_s27  ;;  %s2366_s27 = sld [smem:[#allocation18]] }
 0x73c   : > { %v2554_v48 = vmul.f32 %v2553_v11, %v8000_v3  ;;  %v2715_v56 = vstv %s6120_s29  ;;  %s6196_s29 = sld [smem:[#allocation18 + $0x44]] }
 0x73f   : > { %2742 = vrot.lane.b32.xlu1 %v2740_v51, %s7015_s22  ;;  %2710 = vrot.lane.b32.xlu0 %v2708_v52, %s7016_s20  ;;  %v2667_v51 = vmul.f32 %v2666_v10, %v8009_v46  ;;  %v2635_v52 = vmul.f32 %v2634_v17, %v8009_v46 }
 0x743   : > { %2823 = vrot.lane.b32.xlu1 %v2821_v58, %s7015_s22  ;;  %2791 = vrot.lane.b32.xlu0 %v2789_v39, %s7016_s20  ;;  %v2748_v58 = vmul.f32 %v2747_v54, %v8013_v49  ;;  %v2716_v39 = vmul.f32 %v2715_v56, %v8013_v49 }
 0x748   : > { %v2355_v4 = vpop.permute.xlu0 %2354 }
 0x749   : > { %2358 = vst.msk [vmem:[#allocation5 + $0x21] sm:$0xff] %vm1824_vm15, %v2355_v4  ;;  %v2828_v4 = vstv %s6136_s23  ;;  %s6192_s23 = sld [smem:[#allocation18 + $0x43]] }
 0x750   : > { %v8028_v60 = vld [vmem:[#allocation5 + $0x20] sm:$0xff] }
 0x751   : > { %v2902_v30 = vmul.f32 %v2901_v33, %v8028_v60  ;;  %v2870_v62 = vmul.f32 %v2869_v43, %v8028_v60  ;;  %v8032_v63 = vld [vmem:[#allocation5 + $0x21] sm:$0xff]  ;;  %v2796_v33 = vstv %s6132_s17  ;;  %v2829_v43 = vmul.f32 %v2828_v4, %v8019_v53  ;;  %s8099_s17 = sld [smem:[#allocation18 + $0x3]] }
 0x752   : > { %v2983_v13 = vmul.f32 %v2982_v0, %v8032_v63  ;;  %v2951_v2 = vmul.f32 %v2950_v40, %v8032_v63  ;;  %v8038_v20 = vld [vmem:[#allocation5 + $0x22] sm:$0xff]  ;;  %v2877_v0 = vstv %s6144_s1  ;;  %s6204_s1 = sld [smem:[#allocation18 + $0x46]] }
 0x753   : > { %2904 = vrot.lane.b32.xlu1 %v2902_v30, %s7015_s22  ;;  %2872 = vrot.lane.b32.xlu0 %v2870_v62, %s7016_s20  ;;  %v3064_v57 = vmul.f32 %v3063_v59, %v8038_v20  ;;  %v3032_v6 = vmul.f32 %v3031_v25, %v8038_v20  ;;  %v2797_v30 = vmul.f32 %v2796_v33, %v8019_v53  ;;  %v2909_v62 = vstv %s6148_s15  ;;  %s6208_s15 = sld [smem:[#allocation18 + $0x47]] }
 0x754   : > { %v2910_v40 = vmul.f32 %v2909_v62, %v8028_v60  ;;  %v2958_v59 = vstv %s6156_s2  ;;  %s8107_s2 = sld [smem:[#allocation18 + $0x49]] }
 0x757   : > { %2985 = vrot.lane.b32.xlu1 %v2983_v13, %s7015_s22  ;;  %2953 = vrot.lane.b32.xlu0 %v2951_v2, %s7016_s20  ;;  %v2878_v13 = vmul.f32 %v2877_v0, %v8028_v60  ;;  %v2990_v2 = vstv %s6160_s12  ;;  %s8105_s12 = sld [smem:[#allocation18 + $0x4a]]  ;;  %v2448_v34 = vstv %s8099_s17 }
 0x758   : > { %v2361_v5 = vpop.permute.xlu1 %2360  ;;  %v2991_v25 = vmul.f32 %v2990_v2, %v8032_v63  ;;  %v3282_v41 = vstv %s6204_s1  ;;  %s6109_s17 = sld [smem:[#allocation18 + $0x52]]  ;;  %s6121_s1 = sld [smem:[#allocation18 + $0x55]] }
 0x759   : > { %2364 = vst.msk [vmem:[#allocation5 + $0x31] sm:$0xff] %vm1824_vm15, %v2361_v5  ;;  %v2959_v5 = vmul.f32 %v2958_v59, %v8032_v63 }
 0x75a   : > { %v2399_v10 = vstv %s8107_s2  ;;  %s6137_s2 = sld [smem:[#allocation18 + $0x59]] }
 0x75b   : > { %3066 = vrot.lane.b32.xlu1 %v3064_v57, %s7015_s22  ;;  %3034 = vrot.lane.b32.xlu0 %v3032_v6, %s7016_s20  ;;  %v3071_v57 = vstv %s6172_s16  ;;  %v3039_v6 = vstv %s6168_s28  ;;  %s8111_s16 = sld [smem:[#allocation18 + $0x6]]  ;;  %s8117_s28 = sld [smem:[#allocation18 + $0x4d]] }
 0x760   : > { %v8047_v35 = vld [vmem:[#allocation5 + $0x30] sm:$0xff] }
 0x761   : > { %v3145_v18 = vmul.f32 %v3144_v12, %v8047_v35  ;;  %v3113_v19 = vmul.f32 %v3112_v8, %v8047_v35  ;;  %v8051_v21 = vld [vmem:[#allocation5 + $0x31] sm:$0xff]  ;;  %v3072_v12 = vmul.f32 %v3071_v57, %v8038_v20  ;;  %v3040_v8 = vmul.f32 %v3039_v6, %v8038_v20 }
 0x762   : > { %v3226_v45 = vmul.f32 %v3225_v23, %v8051_v21  ;;  %v3194_v28 = vmul.f32 %v3193_v24, %v8051_v21  ;;  %v8057_v29 = vld [vmem:[#allocation5 + $0x32] sm:$0xff]  ;;  %v2512_v33 = vstv %s8117_s28  ;;  %s8158_s28 = sld [smem:[#allocation18 + $0x5c]] }
 0x763   : > { %3147 = vrot.lane.b32.xlu1 %v3145_v18, %s7015_s22  ;;  %3115 = vrot.lane.b32.xlu0 %v3113_v19, %s7016_s20  ;;  %v3307_v31 = vmul.f32 %v3306_v22, %v8057_v29  ;;  %v3275_v27 = vmul.f32 %v3274_v16, %v8057_v29  ;;  %v3152_v18 = vstv %s6184_s25  ;;  %v3120_v19 = vstv %s6180_s30  ;;  %s8119_s25 = sld [smem:[#allocation18 + $0x4c]]  ;;  %s8126_s30 = sld [smem:[#allocation18 + $0x9]] }
 0x764   : > { %v3153_v23 = vmul.f32 %v3152_v18, %v8047_v35  ;;  %v3121_v24 = vmul.f32 %v3120_v19, %v8047_v35  ;;  %v3201_v22 = vstv %s6192_s23  ;;  %v3283_v11 = vmul.f32 %v3282_v41, %v8057_v29  ;;  %s6113_s23 = sld [smem:[#allocation18 + $0x53]] }
 0x765   : > { %v3202_v38 = vmul.f32 %v3201_v22, %v8051_v21  ;;  %v2513_v0 = vmul.f32 %v2512_v33, %v7994_v32  ;;  %v2642_v19 = vstv %s6109_s17  ;;  %v2723_v22 = vstv %s6121_s1  ;;  %s8181_s17 = sld [smem:[#allocation18 + $0x62]]  ;;  %s6185_s1 = sld [smem:[#allocation18 + $0x65]] }
 0x767   : > { %3228 = vrot.lane.b32.xlu1 %v3226_v45, %s7015_s22  ;;  %3196 = vrot.lane.b32.xlu0 %v3194_v28, %s7016_s20  ;;  %v2367_v45 = vstv %s2366_s27  ;;  %v3233_v28 = vstv %s6196_s29  ;;  %s8130_s27 = sld [smem:[#allocation18 + $0x50]]  ;;  %s8132_s29 = sld [smem:[#allocation18 + $0x4f]] }
 0x768   : > { %v2368_v16 = vmul.f32 %v2367_v45, %v7990_v9  ;;  %v2643_v45 = vmul.f32 %v2642_v19, %v8009_v46 }
 0x76a   : > { %v2674_v18 = vstv %s6113_s23  ;;  %s8177_s23 = sld [smem:[#allocation18 + $0x12]] }
 0x76b   : > { %3309 = vrot.lane.b32.xlu1 %v3307_v31, %s7015_s22  ;;  %3277 = vrot.lane.b32.xlu0 %v3275_v27, %s7016_s20  ;;  %v3234_v27 = vmul.f32 %v3233_v28, %v8051_v21 }
 0x76d   : > { %v2593_v59 = vstv %s8130_s27  ;;  %s8168_s27 = sld [smem:[#allocation18 + $0x5f]] }
 0x76f   : > { %2426 = vrot.lane.b32.xlu1 %v2424_v36, %s7015_s22  ;;  %2394 = vrot.lane.b32.xlu0 %v2392_v37, %s7016_s20  ;;  %v3314_v37 = vstv %s6208_s15  ;;  %s6125_s15 = sld [smem:[#allocation18 + $0x56]] }
 0x770   : > { %v3315_v44 = vmul.f32 %v3314_v37, %v8057_v29 }
 0x773   : > { %2507 = vrot.lane.b32.xlu1 %v2505_v15, %s7015_s22  ;;  %2475 = vrot.lane.b32.xlu0 %v2473_v42, %s7016_s20  ;;  %v2449_v42 = vmul.f32 %v2448_v34, %v7994_v32 }
 0x775   : > { %v2755_v28 = vstv %s6125_s15  ;;  %s8183_s15 = sld [smem:[#allocation18 + $0x61]] }
 0x777   : > { %2588 = vrot.lane.b32.xlu1 %v2586_v47, %s7015_s22  ;;  %2556 = vrot.lane.b32.xlu0 %v2554_v48, %s7016_s20  ;;  %v2431_v48 = vstv %s8105_s12  ;;  %s6115_s12 = sld [smem:[#allocation18 + $0xc]] }
 0x778   : > { %v2432_v56 = vmul.f32 %v2431_v48, %v7990_v9 }
 0x77b   : > { %2669 = vrot.lane.b32.xlu1 %v2667_v51, %s7015_s22  ;;  %2637 = vrot.lane.b32.xlu0 %v2635_v52, %s7016_s20  ;;  %v2529_v51 = vstv %s8111_s16  ;;  %s6133_s16 = sld [smem:[#allocation18 + $0x58]] }
 0x77c   : > { %v2530_v4 = vmul.f32 %v2529_v51, %v8000_v3 }
 0x77f   : > { %2750 = vrot.lane.b32.xlu1 %v2748_v58, %s7015_s22  ;;  %2718 = vrot.lane.b32.xlu0 %v2716_v39, %s7016_s20  ;;  %v2400_v58 = vmul.f32 %v2399_v10, %v7990_v9 }
 0x781   : > { %v2804_v37 = vstv %s6133_s16  ;;  %s6193_s16 = sld [smem:[#allocation18 + $0x67]] }
 0x783   : > { %2831 = vrot.lane.b32.xlu1 %v2829_v43, %s7015_s22  ;;  %2799 = vrot.lane.b32.xlu0 %v2797_v30, %s7016_s20  ;;  %v2480_v43 = vstv %s8119_s25  ;;  %s8160_s25 = sld [smem:[#allocation18 + $0x5b]] }
 0x787   : > { %2912 = vrot.lane.b32.xlu1 %v2910_v40, %s7015_s22  ;;  %2880 = vrot.lane.b32.xlu0 %v2878_v13, %s7016_s20  ;;  %v2481_v40 = vmul.f32 %v2480_v43, %v7994_v32  ;;  %v2610_v13 = vstv %s8126_s30  ;;  %s8164_s30 = sld [smem:[#allocation18 + $0xf]] }
 0x788   : > { %v2611_v6 = vmul.f32 %v2610_v13, %v8009_v46 }
 0x789   : > { %v2885_v48 = vstv %s8160_s25  ;;  %s6209_s25 = sld [smem:[#allocation18 + $0x6b]] }
 0x78b   : > { %2993 = vrot.lane.b32.xlu1 %v2991_v25, %s7015_s22  ;;  %2961 = vrot.lane.b32.xlu0 %v2959_v5, %s7016_s20  ;;  %v2561_v25 = vstv %s8132_s29  ;;  %s8170_s29 = sld [smem:[#allocation18 + $0x5e]] }
 0x78f   : > { %3074 = vrot.lane.b32.xlu1 %v3072_v12, %s7015_s22  ;;  %3042 = vrot.lane.b32.xlu0 %v3040_v8, %s7016_s20  ;;  %v2594_v12 = vmul.f32 %v2593_v59, %v8000_v3  ;;  %v2562_v8 = vmul.f32 %v2561_v25, %v8000_v3  ;;  %v3047_v59 = vstv %s8183_s15  ;;  %s8221_s15 = sld [smem:[#allocation18 + $0x70]] }
 0x791   : > { %v2966_v33 = vstv %s8170_s29  ;;  %s8211_s29 = sld [smem:[#allocation18 + $0x6d]] }
 0x793   : > { %3155 = vrot.lane.b32.xlu1 %v3153_v23, %s7015_s22  ;;  %3123 = vrot.lane.b32.xlu0 %v3121_v24, %s7016_s20  ;;  %v2675_v24 = vmul.f32 %v2674_v18, %v8009_v46 }
 0x795   : > { %v2387_v31 = vpop.permute.xlu0 %2386  ;;  %v2419_v7 = vpop.permute.xlu1 %2418 }
 0x796   : > { %v2389_v36 = vadd.f32 %v2387_v31, %v2368_v16  ;;  %v2756_v31 = vmul.f32 %v2755_v28, %v8013_v49  ;;  %v3209_v28 = vstv %s6193_s16  ;;  %s8244_s16 = sld [smem:[#allocation18 + $0x77]] }
 0x797   : > { %3236 = vrot.lane.b32.xlu1 %v3234_v27, %s7015_s22  ;;  %3204 = vrot.lane.b32.xlu0 %v3202_v38, %s7016_s20  ;;  %v2724_v27 = vmul.f32 %v2723_v22, %v8013_v49  ;;  %v2691_v38 = vstv %s6115_s12  ;;  %s6181_s12 = sld [smem:[#allocation18 + $0x64]] }
 0x798   : > { %v2421_v15 = vadd.f32 %v2419_v7, %v2389_v36  ;;  %v2836_v36 = vstv %s6137_s2  ;;  %s6197_s2 = sld [smem:[#allocation18 + $0x68]] }
 0x799   : > { %v2468_v17 = vpop.permute.xlu0 %2467  ;;  %v2500_v54 = vpop.permute.xlu1 %2499 }
 0x79a   : > { %v2450_v47 = vadd.f32 %v2449_v42, %v2421_v15  ;;  %v2692_v15 = vmul.f32 %v2691_v38, %v8013_v49  ;;  %v2837_v42 = vmul.f32 %v2836_v36, %v8019_v53  ;;  %v3322_v36 = vstv %s6209_s25  ;;  %s8250_s25 = sld [smem:[#allocation18 + $0x1e]] }
 0x79b   : > { %3317 = vrot.lane.b32.xlu1 %v3315_v44, %s7015_s22  ;;  %3285 = vrot.lane.b32.xlu0 %v3283_v11, %s7016_s20  ;;  %v2805_v44 = vmul.f32 %v2804_v37, %v8019_v53 }
 0x79c   : > { %v2470_v52 = vadd.f32 %v2468_v17, %v2450_v47  ;;  %v2917_v47 = vstv %s8158_s28  ;;  %v2772_v17 = vstv %s8164_s30  ;;  %s6151_s28 = sld [smem:[#allocation18 + $0x15]]  ;;  %s6205_s30 = sld [smem:[#allocation18 + $0x6a]] }
 0x79d   : > { %v2549_v62 = vpop.permute.xlu0 %2548  ;;  %v2581_v5 = vpop.permute.xlu1 %2580  ;;  %v3128_v18 = vstv %s6181_s12  ;;  %s8232_s12 = sld [smem:[#allocation18 + $0x74]] }
 0x79e   : > { %v2502_v39 = vadd.f32 %v2500_v54, %v2470_v52  ;;  %v2918_v54 = vmul.f32 %v2917_v47, %v8028_v60  ;;  %v2407_v47 = vstv %s8211_s29  ;;  %s8266_s29 = sld [smem:[#allocation18 + $0x21]] }
 0x79f   : > { %2434 = vrot.lane.b32.xlu1 %v2432_v56, %s7015_s22  ;;  %2402 = vrot.lane.b32.xlu0 %v2400_v58, %s7016_s20  ;;  %v2886_v56 = vmul.f32 %v2885_v48, %v8028_v60 }
 0x7a0   : > { %v2531_v30 = vadd.f32 %v2530_v4, %v2502_v39  ;;  %v2773_v39 = vmul.f32 %v2772_v17, %v8019_v53  ;;  %v2998_v4 = vstv %s8168_s27  ;;  %s8209_s27 = sld [smem:[#allocation18 + $0x6e]] }
 0x7a2   : > { %v2551_v2 = vadd.f32 %v2549_v62, %v2531_v30  ;;  %v2999_v62 = vmul.f32 %v2998_v4, %v8032_v63  ;;  %v2934_v38 = vstv %s6151_s28  ;;  %v3290_v37 = vstv %s6205_s30  ;;  %s8246_s28 = sld [smem:[#allocation18 + $0x76]]  ;;  %s8257_s30 = sld [smem:[#allocation18 + $0x7a]] }
 0x7a3   : > { %2515 = vrot.lane.b32.xlu1 %v2513_v0, %s7015_s22  ;;  %2483 = vrot.lane.b32.xlu0 %v2481_v40, %s7016_s20  ;;  %v2967_v0 = vmul.f32 %v2966_v33, %v8032_v63  ;;  %v2853_v40 = vstv %s8177_s23  ;;  %s8215_s23 = sld [smem:[#allocation18 + $0x18]]  ;;  %v2488_v4 = vstv %s8221_s15  ;;  %s8274_s15 = sld [smem:[#allocation18 + $0x7c]] }
 0x7a4   : > { %v2583_v57 = vadd.f32 %v2581_v5, %v2551_v2  ;;  %v3079_v2 = vstv %s8181_s17  ;;  %s8219_s17 = sld [smem:[#allocation18 + $0x71]] }
 0x7a6   : > { %v2612_v23 = vadd.f32 %v2611_v6, %v2583_v57  ;;  %v2854_v57 = vmul.f32 %v2853_v40, %v8028_v60  ;;  %v3080_v6 = vmul.f32 %v3079_v2, %v8038_v20  ;;  %v2601_v2 = vstv %s8232_s12  ;;  %s8286_s12 = sld [smem:[#allocation18 + $0x80]] }
 0x7a7   : > { %2596 = vrot.lane.b32.xlu1 %v2594_v12, %s7015_s22  ;;  %2564 = vrot.lane.b32.xlu0 %v2562_v8, %s7016_s20  ;;  %v3048_v12 = vmul.f32 %v3047_v59, %v8038_v20  ;;  %v3160_v8 = vstv %s6185_s1  ;;  %s8228_s1 = sld [smem:[#allocation18 + $0x1b]] }
 0x7a9   : > { %v3015_v17 = vstv %s8215_s23  ;;  %s8268_s23 = sld [smem:[#allocation18 + $0x24]] }
 0x7ab   : > { %2677 = vrot.lane.b32.xlu1 %v2675_v24, %s7015_s22  ;;  %2645 = vrot.lane.b32.xlu0 %v2643_v45, %s7016_s20  ;;  %v3129_v24 = vmul.f32 %v3128_v18, %v8047_v35  ;;  %v3241_v45 = vstv %s6197_s2  ;;  %s8234_s2 = sld [smem:[#allocation18 + $0x73]] }
 0x7ad   : > { %v2630_v16 = vpop.permute.xlu0 %2629  ;;  %v2662_v41 = vpop.permute.xlu1 %2661  ;;  %v3096_v40 = vstv %s8228_s1  ;;  %s8281_s1 = sld [smem:[#allocation18 + $0x27]] }
 0x7ae   : > { %v2632_v34 = vadd.f32 %v2630_v16, %v2612_v23  ;;  %v3161_v23 = vmul.f32 %v3160_v8, %v8047_v35 }
 0x7af   : > { %2758 = vrot.lane.b32.xlu1 %v2756_v31, %s7015_s22  ;;  %2726 = vrot.lane.b32.xlu0 %v2724_v27, %s7016_s20  ;;  %v3242_v31 = vmul.f32 %v3241_v45, %v8051_v21  ;;  %v3210_v27 = vmul.f32 %v3209_v28, %v8051_v21 }
 0x7b0   : > { %v2664_v7 = vadd.f32 %v2662_v41, %v2632_v34 }
 0x7b1   : > { %v2711_v10 = vpop.permute.xlu0 %2710  ;;  %v2743_v52 = vpop.permute.xlu1 %2742  ;;  %v2569_v59 = vstv %s8234_s2  ;;  %s8288_s2 = sld [smem:[#allocation18 + $0x7f]] }
 0x7b2   : > { %v2693_v11 = vadd.f32 %v2692_v15, %v2664_v7  ;;  %v2935_v7 = vmul.f32 %v2934_v38, %v8032_v63  ;;  %v3323_v15 = vmul.f32 %v3322_v36, %v8057_v29  ;;  %v2570_v8 = vmul.f32 %v2569_v59, %v8000_v3 }
 0x7b3   : > { %2839 = vrot.lane.b32.xlu1 %v2837_v42, %s7015_s22  ;;  %2807 = vrot.lane.b32.xlu0 %v2805_v44, %s7016_s20  ;;  %v3291_v42 = vmul.f32 %v3290_v37, %v8057_v29 }
 0x7b4   : > { %v2713_v51 = vadd.f32 %v2711_v10, %v2693_v11  ;;  %v2439_v11 = vstv %s8209_s27  ;;  %s8259_s27 = sld [smem:[#allocation18 + $0x79]] }
 0x7b5   : > { %v2792_v30 = vpop.permute.xlu0 %2791  ;;  %v2824_v25 = vpop.permute.xlu1 %2823 }
 0x7b6   : > { %v2745_v58 = vadd.f32 %v2743_v52, %v2713_v51  ;;  %v2440_v52 = vmul.f32 %v2439_v11, %v7990_v9  ;;  %v2371_v11 = vstv %s8268_s23  ;;  %s8325_s23 = sld [smem:[#allocation18 + $0x2d]] }
 0x7b7   : > { %2920 = vrot.lane.b32.xlu1 %v2918_v54, %s7015_s22  ;;  %2888 = vrot.lane.b32.xlu0 %v2886_v56, %s7016_s20  ;;  %v2408_v54 = vmul.f32 %v2407_v47, %v7990_v9 }
 0x7b8   : > { %v2774_v43 = vadd.f32 %v2773_v39, %v2745_v58  ;;  %v3016_v58 = vmul.f32 %v3015_v17, %v8038_v20  ;;  %v2520_v39 = vstv %s8219_s17  ;;  %s8272_s17 = sld [smem:[#allocation18 + $0x7d]] }
 0x7ba   : > { %v2794_v13 = vadd.f32 %v2792_v30, %v2774_v43  ;;  %v2731_v36 = vstv %s8259_s27  ;;  %s8313_s27 = sld [smem:[#allocation18 + $0x86]] }
 0x7bb   : > { %3001 = vrot.lane.b32.xlu1 %v2999_v62, %s7015_s22  ;;  %2969 = vrot.lane.b32.xlu0 %v2967_v0, %s7016_s20  ;;  %v2521_v62 = vmul.f32 %v2520_v39, %v7994_v32  ;;  %v2489_v0 = vmul.f32 %v2488_v4, %v7994_v32  ;;  %v2452_v4 = vstv %s8281_s1  ;;  %s8341_s1 = sld [smem:[#allocation18 + $0x8c]] }
 0x7bc   : > { %v2826_v5 = vadd.f32 %v2824_v25, %v2794_v13 }
 0x7be   : > { %v2855_v19 = vadd.f32 %v2854_v57, %v2826_v5  ;;  %v3097_v5 = vmul.f32 %v3096_v40, %v8047_v35  ;;  %v2453_v40 = vmul.f32 %v2452_v4, %v7994_v32 }
 0x7bf   : > { %3082 = vrot.lane.b32.xlu1 %v3080_v6, %s7015_s22  ;;  %3050 = vrot.lane.b32.xlu0 %v3048_v12, %s7016_s20  ;;  %v2602_v12 = vmul.f32 %v2601_v2, %v8000_v3 }
 0x7c3   : > { %3163 = vrot.lane.b32.xlu1 %v3161_v23, %s7015_s22  ;;  %3131 = vrot.lane.b32.xlu0 %v3129_v24, %s7016_s20  ;;  %v2650_v23 = vstv %s8246_s28  ;;  %v3177_v24 = vstv %s8250_s25  ;;  %s8300_s28 = sld [smem:[#allocation18 + $0x83]]  ;;  %s8302_s25 = sld [smem:[#allocation18 + $0x82]] }
 0x7c4   : > { %v3178_v38 = vmul.f32 %v3177_v24, %v8051_v21 }
 0x7c5   : > { %v2905_v22 = vpop.permute.xlu1 %2904  ;;  %v2873_v16 = vpop.permute.xlu0 %2872 }
 0x7c6   : > { %v2875_v34 = vadd.f32 %v2873_v16, %v2855_v19  ;;  %v2682_v19 = vstv %s8244_s16  ;;  %s8293_s16 = sld [smem:[#allocation20]] }
 0x7c7   : > { %3244 = vrot.lane.b32.xlu1 %v3242_v31, %s7015_s22  ;;  %3212 = vrot.lane.b32.xlu0 %v3210_v27, %s7016_s20  ;;  %v2683_v16 = vmul.f32 %v2682_v19, %v8009_v46  ;;  %v2651_v31 = vmul.f32 %v2650_v23, %v8009_v46 }
 0x7c8   : > { %v2907_v41 = vadd.f32 %v2905_v22, %v2875_v34  ;;  %v2763_v34 = vstv %s8257_s30  ;;  %s8306_s30 = sld [smem:[#allocation18 + $0x2a]] }
 0x7c9   : > { %v2986_v48 = vpop.permute.xlu1 %2985  ;;  %v2954_v10 = vpop.permute.xlu0 %2953 }
 0x7ca   : > { %v2936_v44 = vadd.f32 %v2935_v7, %v2907_v41  ;;  %v3258_v7 = vstv %s8266_s29  ;;  %s8315_s29 = sld [smem:[#allocation18 + $0x85]] }
 0x7cb   : > { %3325 = vrot.lane.b32.xlu1 %v3323_v15, %s7015_s22  ;;  %3293 = vrot.lane.b32.xlu0 %v3291_v42, %s7016_s20  ;;  %v2764_v42 = vmul.f32 %v2763_v34, %v8013_v49 }
 0x7cc   : > { %v2956_v51 = vadd.f32 %v2954_v10, %v2936_v44  ;;  %v2732_v44 = vmul.f32 %v2731_v36, %v8013_v49  ;;  %v2812_v10 = vstv %s8274_s15  ;;  %s8331_s15 = sld [smem:[#allocation18 + $0x88]] }
 0x7cd   : > { %v3067_v43 = vpop.permute.xlu1 %3066  ;;  %v3035_v30 = vpop.permute.xlu0 %3034  ;;  %v2813_v39 = vmul.f32 %v2812_v10, %v8019_v53 }
 0x7ce   : > { %v2988_v56 = vadd.f32 %v2986_v48, %v2956_v51  ;;  %v2844_v48 = vstv %s8272_s17  ;;  %v3259_v51 = vmul.f32 %v3258_v7, %v8057_v29  ;;  %s8329_s17 = sld [smem:[#allocation18 + $0x89]]  ;;  %v2533_v32 = vstv %s8306_s30  ;;  %s6140_s30 = sld [smem:[#allocation18 + $0x36]] }
 0x7cf   : > { %2442 = vrot.lane.b32.xlu1 %v2440_v52, %s7015_s22  ;;  %2410 = vrot.lane.b32.xlu0 %v2408_v54, %s7016_s20  ;;  %v2372_v52 = vmul.f32 %v2371_v11, %v7990_v9 }
 0x7d0   : > { %v3017_v33 = vadd.f32 %v3016_v58, %v2988_v56  ;;  %v2845_v58 = vmul.f32 %v2844_v48, %v8019_v53 }
 0x7d2   : > { %v3037_v13 = vadd.f32 %v3035_v30, %v3017_v33  ;;  %v2925_v30 = vstv %s8286_s12  ;;  %s8343_s12 = sld [smem:[#allocation18 + $0x8b]] }
 0x7d3   : > { %2523 = vrot.lane.b32.xlu1 %v2521_v62, %s7015_s22  ;;  %2491 = vrot.lane.b32.xlu0 %v2489_v0, %s7016_s20  ;;  %v2893_v62 = vstv %s8288_s2  ;;  %s8347_s2 = sld [smem:[#allocation18 + $0x30]] }
 0x7d4   : > { %v3069_v25 = vadd.f32 %v3067_v43, %v3037_v13  ;;  %v3338_v13 = vstv %s8293_s16  ;;  %s8358_s16 = sld [smem:[#allocation18 + $0x8f]] }
 0x7d5   : > { %v3148_v57 = vpop.permute.xlu1 %3147  ;;  %v3116_v6 = vpop.permute.xlu0 %3115 }
 0x7d6   : > { %v3098_v18 = vadd.f32 %v3097_v5, %v3069_v25  ;;  %v2926_v25 = vmul.f32 %v2925_v30, %v8028_v60  ;;  %v2894_v5 = vmul.f32 %v2893_v62, %v8028_v60 }
 0x7d7   : > { %2604 = vrot.lane.b32.xlu1 %v2602_v12, %s7015_s22  ;;  %2572 = vrot.lane.b32.xlu0 %v2570_v8, %s7016_s20  ;;  %v3006_v12 = vstv %s8300_s28  ;;  %v2974_v8 = vstv %s8302_s25  ;;  %s8360_s28 = sld [smem:[#allocation18 + $0x8e]]  ;;  %s6128_s25 = sld [smem:[#allocation18 + $0x33]] }
 0x7d8   : > { %v3118_v45 = vadd.f32 %v3116_v6, %v3098_v18 }
 0x7d9   : > { %v3229_v28 = vpop.permute.xlu1 %3228  ;;  %v3197_v22 = vpop.permute.xlu0 %3196 }
 0x7da   : > { %v3150_v27 = vadd.f32 %v3148_v57, %v3118_v45  ;;  %v3007_v45 = vmul.f32 %v3006_v12, %v8032_v63 }
 0x7db   : > { %2685 = vrot.lane.b32.xlu1 %v2683_v16, %s7015_s22  ;;  %2653 = vrot.lane.b32.xlu0 %v2651_v31, %s7016_s20  ;;  %v3055_v16 = vstv %s8315_s29  ;;  %s6164_s29 = sld [smem:[#allocation18 + $0x3c]] }
 0x7dc   : > { %v3179_v37 = vadd.f32 %v3178_v38, %v3150_v27  ;;  %v2534_v38 = vmul.f32 %v2533_v32, %v8000_v3  ;;  %v2614_v3 = vstv %s8325_s23  ;;  %v3056_v7 = vmul.f32 %v3055_v16, %v8038_v20  ;;  %s6081_s23 = sld [smem:[#allocation18 + $0x4b]] }
 0x7dd   : > { %v3310_v41 = vpop.permute.xlu1 %3309  ;;  %v3278_v15 = vpop.permute.xlu0 %3277  ;;  %v2857_v32 = vstv %s6140_s30  ;;  %s6165_s30 = sld [smem:[#allocation18 + $0x60]] }
 0x7de   : > { %v3199_v47 = vadd.f32 %v3197_v22, %v3179_v37  ;;  %v3087_v22 = vstv %s8313_s27  ;;  %s6152_s27 = sld [smem:[#allocation18 + $0x39]] }
 0x7df   : > { %2766 = vrot.lane.b32.xlu1 %v2764_v42, %s7015_s22  ;;  %2734 = vrot.lane.b32.xlu0 %v2732_v44, %s7016_s20  ;;  %v3168_v42 = vstv %s8329_s17  ;;  %v3136_v44 = vstv %s8331_s15  ;;  %s6188_s17 = sld [smem:[#allocation18 + $0x42]]  ;;  %s8397_s15 = sld [smem:[#allocation18 + $0x4e]] }
 0x7e0   : > { %v3231_v17 = vadd.f32 %v3229_v28, %v3199_v47  ;;  %v2975_v28 = vmul.f32 %v2974_v8, %v8032_v63  ;;  %v2615_v47 = vmul.f32 %v2614_v3, %v8009_v46 }
 0x7e1   : > { %v2427_v54 = vpop.permute.xlu1 %2426  ;;  %v2395_v56 = vpop.permute.xlu0 %2394  ;;  %v3019_v3 = vstv %s6164_s29  ;;  %s6177_s29 = sld [smem:[#allocation18 + $0x63]] }
 0x7e2   : > { %v3260_v33 = vadd.f32 %v3259_v51, %v3231_v17  ;;  %v2397_v43 = vadd.f32 %v2395_v56, %v2372_v52  ;;  %v3169_v17 = vmul.f32 %v3168_v42, %v8047_v35  ;;  %v3137_v51 = vmul.f32 %v3136_v44, %v8047_v35 }
 0x7e3   : > { %2847 = vrot.lane.b32.xlu1 %v2845_v58, %s7015_s22  ;;  %2815 = vrot.lane.b32.xlu0 %v2813_v39, %s7016_s20  ;;  %v3217_v56 = vstv %s8343_s12  ;;  %v2695_v58 = vstv %s8347_s2  ;;  %v3020_v42 = vmul.f32 %v3019_v3, %v8038_v20  ;;  %s6105_s12 = sld [smem:[#allocation18 + $0x51]]  ;;  %s6117_s2 = sld [smem:[#allocation18 + $0x54]] }
 0x7e4   : > { %v3280_v9 = vadd.f32 %v3278_v15, %v3260_v33  ;;  %v2429_v0 = vadd.f32 %v2427_v54, %v2397_v43  ;;  %v3249_v54 = vstv %s8341_s1  ;;  %v3218_v43 = vmul.f32 %v3217_v56, %v8051_v21  ;;  %s6200_s1 = sld [smem:[#allocation18 + $0x45]] }
 0x7e5   : > { %v2508_v2 = vpop.permute.xlu1 %2507  ;;  %v2476_v59 = vpop.permute.xlu0 %2475  ;;  %v3250_v33 = vmul.f32 %v3249_v54, %v8051_v21  ;;  %v2696_v62 = vmul.f32 %v2695_v58, %v8013_v49 }
 0x7e6   : > { %v3312_v57 = vadd.f32 %v3310_v41, %v3280_v9  ;;  %v2454_v6 = vadd.f32 %v2453_v40, %v2429_v0  ;;  %v3088_v41 = vmul.f32 %v3087_v22, %v8038_v20  ;;  %v3330_v9 = vstv %s8358_s16  ;;  %v8403_v20 = vld [vmem:[#allocation5 + $0x1] sm:$0xff]  ;;  %s6129_s16 = sld [smem:[#allocation18 + $0x57]] }
 0x7e7   : > { %2928 = vrot.lane.b32.xlu1 %v2926_v25, %s7015_s22  ;;  %2896 = vrot.lane.b32.xlu0 %v2894_v5, %s7016_s20  ;;  %v3298_v0 = vstv %s8360_s28  ;;  %v3331_v25 = vmul.f32 %v3330_v9, %v8057_v29  ;;  %s6141_s28 = sld [smem:[#allocation18 + $0x5a]] }
 0x7e8   : > { %v3339_v18 = vadd.f32 %v3338_v13, %v3312_v57  ;;  %v2478_v19 = vadd.f32 %v2476_v59, %v2454_v6  ;;  %v2776_v13 = vstv %s6128_s25  ;;  %v3299_v5 = vmul.f32 %v3298_v0, %v8057_v29  ;;  %s6153_s25 = sld [smem:[#allocation18 + $0x5d]] }
 0x7e9   : > { %v2589_v23 = vpop.permute.xlu1 %2588  ;;  %v2557_v24 = vpop.permute.xlu0 %2556  ;;  %v2777_v21 = vmul.f32 %v2776_v13, %v8019_v53 }
 0x7ea   : > { %v3340_v31 = vmax.f32 %v3339_v18, 0.0  ;;  %v2510_v27 = vadd.f32 %v2508_v2, %v2478_v19 }
 0x7eb   : > { %3009 = vrot.lane.b32.xlu1 %v3007_v45, %s7015_s22  ;;  %2977 = vrot.lane.b32.xlu0 %v2975_v28, %s7016_s20  ;;  %v2858_v45 = vmul.f32 %v2857_v32, %v8028_v60  ;;  %v2938_v28 = vstv %s6152_s27  ;;  %s6070_s27 = sld [smem:[#allocation18 + $0x6c]] }
 0x7ec   : > { %v2535_v34 = vadd.f32 %v2534_v38, %v2510_v27  ;;  %6418 = vmatpush3.msra.mxu0 %v3340_v31  ;;  %6423 = vmatpush3.msra.mxu1 %v3340_v31  ;;  %v2939_v53 = vmul.f32 %v2938_v28, %v8032_v63  ;;  %v8399_v63 = vld [vmem:[#allocation5] sm:$0xff]  ;;  %v8416_v28 = vld [vmem:[#allocation5 + $0x10] sm:$0xff] }
 0x7ed   : > { %v2670_v36 = vpop.permute.xlu1 %2669  ;;  %6420 = vmatmul.mubr.msk.f32.vlgmr.msra.gmra.mrb[4].mxu0 %vm3353_vm0, %v7699_v50  ;;  %6425 = vmatmul.mubr.msk.f32.vlgmr.msra.gmra.mrb[12].mxu1 %vm3353_vm0, %v7708_v26  ;;  %v2638_v37 = vpop.permute.xlu0 %2637 }
 0x7ee   : > { %v2559_v15 = vadd.f32 %v2557_v24, %v2535_v34  ;;  %6427 = vmatprep.subr.mxu0 %v7014_v1  ;;  %6432 = vmatprep.subr.mxu1 %v7014_v1 }
 0x7ef   : > { %3090 = vrot.lane.b32.xlu1 %v3088_v41, %s7015_s22  ;;  %3058 = vrot.lane.b32.xlu0 %v3056_v7, %s7016_s20 }
 0x7f0   : > { %v2591_v11 = vadd.f32 %v2589_v23, %v2559_v15  ;;  %6429 = vmatprep.mubr.msk.f32.mxu0 %vm7018_vm3, %v7014_v1  ;;  %6434 = vmatprep.mubr.msk.f32.mxu1 %vm7018_vm3, %v7014_v1 }
 0x7f1   : > { %v2751_v48 = vpop.permute.xlu1 %2750  ;;  %v2719_v10 = vpop.permute.xlu0 %2718 }
 0x7f2   : > { %v2616_v52 = vadd.f32 %v2615_v47, %v2591_v11 }
 0x7f3   : > { %3171 = vrot.lane.b32.xlu1 %v3169_v17, %s7015_s22  ;;  %3139 = vrot.lane.b32.xlu0 %v3137_v51, %s7016_s20  ;;  %v2456_v17 = vstv %s6081_s23  ;;  %s8442_s23 = sld [smem:[#allocation18 + $0x72]] }
 0x7f4   : > { %v2640_v46 = vadd.f32 %v2638_v37, %v2616_v52 }
 0x7f5   : > { %v2832_v39 = vpop.permute.xlu1 %2831  ;;  %v2800_v4 = vpop.permute.xlu0 %2799 }
 0x7f6   : > { %v2672_v30 = vadd.f32 %v2670_v36, %v2640_v46  ;;  %v2457_v46 = vmul.f32 %v8403_v20, %v2456_v17  ;;  %v8424_v17 = vld [vmem:[#allocation5 + $0x12] sm:$0xff] }
 0x7f7   : > { %3252 = vrot.lane.b32.xlu1 %v3250_v33, %s7015_s22  ;;  %3220 = vrot.lane.b32.xlu0 %v3218_v43, %s7016_s20 }
 0x7f8   : > { %v2697_v40 = vadd.f32 %v2696_v62, %v2672_v30  ;;  %v3181_v30 = vstv %s6188_s17  ;;  %v2537_v62 = vstv %s8397_s15  ;;  %s6201_s17 = sld [smem:[#allocation18 + $0x69]]  ;;  %s6106_s15 = sld [smem:[#allocation18 + $0x75]] }
 0x7f9   : > { %v2913_v2 = vpop.permute.xlu1 %2912  ;;  %v2881_v59 = vpop.permute.xlu0 %2880 }
 0x7fa   : > { %v2721_v57 = vadd.f32 %v2719_v10, %v2697_v40 }
 0x7fb   : > { %3333 = vrot.lane.b32.xlu1 %v3331_v25, %s7015_s22  ;;  %3301 = vrot.lane.b32.xlu0 %v3299_v5, %s7016_s20  ;;  %s6069_s22 = sld [smem:[#allocation18 + $0x48]]  ;;  %s6176_s20 = sld [smem:[#allocation18 + $0x3f]]  ;;  %v8410_v5 = vld [vmem:[#allocation5 + $0x2] sm:$0xff] }
 0x7fc   : > { %v2753_v49 = vadd.f32 %v2751_v48, %v2721_v57  ;;  %v2538_v57 = vmul.f32 %v8410_v5, %v2537_v62 }
 0x7fd   : > { %v2994_v6 = vpop.permute.xlu1 %2993  ;;  %v2962_v12 = vpop.permute.xlu0 %2961 }
 0x7fe   : > { %v2778_v8 = vadd.f32 %v2777_v21, %v2753_v49 }
 0x800   : > { %v2802_v18 = vadd.f32 %v2800_v4, %v2778_v8  ;;  %v2618_v8 = vstv %s6105_s12  ;;  %s6130_s12 = sld [smem:[#allocation18 + $0x7b]] }
 0x801   : > { %v3075_v19 = vpop.permute.xlu1 %3074  ;;  %v3043_v23 = vpop.permute.xlu0 %3042  ;;  %v2375_v7 = vstv %s6069_s22  ;;  %v3100_v47 = vstv %s6176_s20  ;;  %s6082_s22 = sld [smem:[#allocation18 + $0x6f]]  ;;  %s8440_s20 = sld [smem:[#allocation18 + $0x66]] }
 0x802   : > { %v2834_v24 = vadd.f32 %v2832_v39, %v2802_v18  ;;  %v2376_v11 = vmul.f32 %v8399_v63, %v2375_v7  ;;  %v3101_v56 = vmul.f32 %v3100_v47, %v8047_v35  ;;  %v8421_v7 = vld [vmem:[#allocation5 + $0x11] sm:$0xff] }
 0x804   : > { %v2859_v29 = vadd.f32 %v2858_v45, %v2834_v24  ;;  %v8413_v24 = vld [vmem:[#allocation5 + $0x32] sm:$0xff] }
 0x805   : > { %v3156_v22 = vpop.permute.xlu1 %3155  ;;  %v3124_v16 = vpop.permute.xlu0 %3123 }
 0x806   : > { %v2883_v31 = vadd.f32 %v2881_v59, %v2859_v29  ;;  %v8407_v59 = vld [vmem:[#allocation5 + $0x31] sm:$0xff] }
 0x807   : > { %v3182_v35 = vmul.f32 %v8407_v59, %v3181_v30 }
 0x808   : > { %v2915_v27 = vadd.f32 %v2913_v2, %v2883_v31 }
 0x809   : > { %v3237_v38 = vpop.permute.xlu1 %3236  ;;  %v3205_v34 = vpop.permute.xlu0 %3204 }
 0x80a   : > { %v2940_v36 = vadd.f32 %v2939_v53, %v2915_v27 }
 0x80c   : > { %v2964_v37 = vadd.f32 %v2962_v12, %v2940_v36  ;;  %v2699_v36 = vstv %s6117_s2  ;;  %s6142_s2 = sld [smem:[#allocation18 + $0x7e]] }
 0x80d   : > { %v8392_v41 = vpop.permute.xlu1 %3317  ;;  %v8394_v60 = vpop.permute.xlu0 %3285 }
 0x80e   : > { %v2996_v15 = vadd.f32 %v2994_v6, %v2964_v37  ;;  %v3262_v6 = vstv %s6200_s1  ;;  %s6118_s1 = sld [smem:[#allocation18 + $0x78]] }
 0x80f   : > { %v3263_v45 = vmul.f32 %v8413_v24, %v3262_v6  ;;  %v3023_v6 = vstv %s6165_s30  ;;  %s6190_s30 = sld [smem:[#allocation18 + $0x8a]] }
 0x810   : > { %v3021_v44 = vadd.f32 %v3020_v42, %v2996_v15  ;;  %v2700_v15 = vmul.f32 %v8421_v7, %v2699_v36 }
 0x811   : > { %v2435_v48 = vpop.permute.xlu1 %2434  ;;  %v2403_v10 = vpop.permute.xlu0 %2402 }
 0x812   : > { %v3045_v51 = vadd.f32 %v3043_v23, %v3021_v44  ;;  %v2405_v52 = vadd.f32 %v2403_v10, %v2376_v11  ;;  %v2780_v44 = vstv %s6129_s16  ;;  %s6154_s16 = sld [smem:[#allocation18 + $0x81]] }
 0x814   : > { %v3077_v54 = vadd.f32 %v3075_v19, %v3045_v51  ;;  %v2437_v58 = vadd.f32 %v2435_v48, %v2405_v52  ;;  %v2781_v51 = vmul.f32 %v8424_v17, %v2780_v44 }
 0x815   : > { %v2516_v39 = vpop.permute.xlu1 %2515  ;;  %v2484_v4 = vpop.permute.xlu0 %2483 }
 0x816   : > { %v3102_v33 = vadd.f32 %v3101_v56, %v3077_v54  ;;  %v2458_v43 = vadd.f32 %v2457_v46, %v2437_v58  ;;  %v2861_v58 = vstv %s6141_s28  ;;  %s6166_s28 = sld [smem:[#allocation18 + $0x84]] }
 0x818   : > { %v3126_v9 = vadd.f32 %v3124_v16, %v3102_v33  ;;  %v2486_v0 = vadd.f32 %v2484_v4, %v2458_v43  ;;  %v8427_v43 = vld [vmem:[#allocation5 + $0x20] sm:$0xff] }
 0x819   : > { %v2597_v40 = vpop.permute.xlu1 %2596  ;;  %v2565_v13 = vpop.permute.xlu0 %2564  ;;  %v2862_v30 = vmul.f32 %v8427_v43, %v2861_v58 }
 0x81a   : > { %v3158_v2 = vadd.f32 %v3156_v22, %v3126_v9  ;;  %v2518_v25 = vadd.f32 %v2516_v39, %v2486_v0  ;;  %v2619_v22 = vmul.f32 %v8416_v28, %v2618_v8  ;;  %v2942_v9 = vstv %s6153_s25  ;;  %s6178_s25 = sld [smem:[#allocation18 + $0x87]] }
 0x81c   : > { %v3183_v49 = vadd.f32 %v3182_v35, %v3158_v2  ;;  %v2539_v21 = vadd.f32 %v2538_v57, %v2518_v25  ;;  %v8430_v35 = vld [vmem:[#allocation5 + $0x21] sm:$0xff] }
 0x81d   : > { %v2678_v12 = vpop.permute.xlu1 %2677  ;;  %v2646_v32 = vpop.permute.xlu0 %2645  ;;  %v2943_v25 = vmul.f32 %v8430_v35, %v2942_v9  ;;  %v2622_v9 = vstv %s6106_s15 }
 0x81e   : > { %v3207_v18 = vadd.f32 %v3205_v34, %v3183_v49  ;;  %v2567_v19 = vadd.f32 %v2565_v13, %v2539_v21 }
 0x820   : > { %v3239_v23 = vadd.f32 %v3237_v38, %v3207_v18  ;;  %v2599_v29 = vadd.f32 %v2597_v40, %v2567_v19  ;;  %v2379_v18 = vstv %s6070_s27  ;;  %s6202_s27 = sld [smem:[#allocation18 + $0x8d]] }
 0x821   : > { %v2759_v16 = vpop.permute.xlu1 %2758  ;;  %v2727_v31 = vpop.permute.xlu0 %2726 }
 0x822   : > { %v8419_v27 = vadd.f32 %v3263_v45, %v3239_v23  ;;  %v2620_v53 = vadd.f32 %v2619_v22, %v2599_v29  ;;  %v8437_v23 = vld [vmem:[#allocation5 + $0x22] sm:$0xff]  ;;  %v2380_v22 = vmul.f32 %v8399_v63, %v2379_v18 }
 0x823   : > { %v3024_v45 = vmul.f32 %v8437_v23, %v3023_v6 }
 0x824   : > { %v2648_v3 = vadd.f32 %v2646_v32, %v2620_v53  ;;  %v2460_v53 = vstv %s6082_s22  ;;  %s6212_s22 = sld [smem:[#allocation20 + $0x2]] }
 0x825   : > { %v2840_v34 = vpop.permute.xlu1 %2839  ;;  %v2808_v37 = vpop.permute.xlu0 %2807  ;;  %v2461_v44 = vmul.f32 %v8403_v20, %v2460_v53  ;;  %v3266_v20 = vstv %s6201_s17 }
 0x826   : > { %v2680_v38 = vadd.f32 %v2678_v12, %v2648_v3 }
 0x828   : > { %v2701_v42 = vadd.f32 %v2700_v15, %v2680_v38  ;;  %v8453_v38 = vld [vmem:[#allocation5 + $0x30] sm:$0xff] }
 0x829   : > { %v2921_v11 = vpop.permute.xlu1 %2920  ;;  %v2889_v47 = vpop.permute.xlu0 %2888 }
 0x82a   : > { %v2729_v48 = vadd.f32 %v2727_v31, %v2701_v42 }
 0x82c   : > { %v2761_v10 = vadd.f32 %v2759_v16, %v2729_v48  ;;  %v3104_v16 = vstv %s6177_s29  ;;  %v3185_v48 = vstv %s8440_s20  ;;  %s6211_s29 = sld [smem:[#allocation20 + $0x1]]  ;;  %s6213_s20 = sld [smem:[#allocation20 + $0x3]] }
 0x82d   : > { %v3002_v52 = vpop.permute.xlu1 %3001  ;;  %v2970_v54 = vpop.permute.xlu0 %2969  ;;  %v3105_v15 = vmul.f32 %v8453_v38, %v3104_v16 }
 0x82e   : > { %v2782_v56 = vadd.f32 %v2781_v51, %v2761_v10  ;;  %v2541_v51 = vstv %s8442_s23 }
 0x830   : > { %v2810_v46 = vadd.f32 %v2808_v37, %v2782_v56 }
 0x831   : > { %v3083_v39 = vpop.permute.xlu1 %3082  ;;  %v3051_v4 = vpop.permute.xlu0 %3050 }
 0x832   : > { %v2842_v33 = vadd.f32 %v2840_v34, %v2810_v46  ;;  %v7020_v34 = vmov 1.0   ;;  %v3186_v46 = vmul.f32 %v8407_v59, %v3185_v48 }
 0x833   : > { %6428 = vmatpush3.msk.msra.mxu0 %vm7734_vm7, %v7020_v34  ;;  %6433 = vmatpush3.msk.msra.mxu1 %vm7743_vm11, %v7020_v34 }
 0x834   : > { %v2863_v62 = vadd.f32 %v2862_v30, %v2842_v33  ;;  %6437 = vmatprep.subr.mxu0 %v7014_v1  ;;  %6442 = vmatprep.subr.mxu1 %v7014_v1 }
 0x835   : > { %v3164_v0 = vpop.permute.xlu1 %3163  ;;  %v3132_v40 = vpop.permute.xlu0 %3131 }
 0x836   : > { %v2891_v13 = vadd.f32 %v2889_v47, %v2863_v62 }
 0x838   : > { %v2923_v2 = vadd.f32 %v2921_v11, %v2891_v13 }
 0x839   : > { %v3245_v57 = vpop.permute.xlu1 %3244  ;;  %v3213_v49 = vpop.permute.xlu0 %3212 }
 0x83a   : > { %v2944_v21 = vadd.f32 %v2943_v25, %v2923_v2 }
 0x83c   : > { %v2972_v12 = vadd.f32 %v2970_v54, %v2944_v21 }
 0x83d   : > { %v8433_v8 = vpop.permute.xlu1 %3325  ;;  %v8435_v32 = vpop.permute.xlu0 %3293 }
 0x83e   : > { %v3004_v19 = vadd.f32 %v3002_v52, %v2972_v12 }
 0x840   : > { %v3025_v29 = vadd.f32 %v3024_v45, %v3004_v19  ;;  %v2703_v19 = vstv %s6118_s1 }
 0x841   : > { %v2411_v31 = vpop.permute.xlu0 %2410  ;;  %v2443_v37 = vpop.permute.xlu1 %2442  ;;  %v2704_v16 = vmul.f32 %v8421_v7, %v2703_v19 }
 0x842   : > { %v3053_v36 = vadd.f32 %v3051_v4, %v3025_v29  ;;  %v2413_v3 = vadd.f32 %v2411_v31, %v2380_v22  ;;  %v2542_v4 = vmul.f32 %v8410_v5, %v2541_v51 }
 0x844   : > { %v3085_v63 = vadd.f32 %v3083_v39, %v3053_v36  ;;  %v2445_v42 = vadd.f32 %v2443_v37, %v2413_v3 }
 0x845   : > { %v2492_v10 = vpop.permute.xlu0 %2491  ;;  %v2524_v56 = vpop.permute.xlu1 %2523 }
 0x846   : > { %v3106_v11 = vadd.f32 %v3105_v15, %v3085_v63  ;;  %v2462_v47 = vadd.f32 %v2461_v44, %v2445_v42  ;;  %v2865_v15 = vstv %s6142_s2 }
 0x848   : > { %v3134_v52 = vadd.f32 %v3132_v40, %v3106_v11  ;;  %v2494_v54 = vadd.f32 %v2492_v10, %v2462_v47  ;;  %v3267_v40 = vmul.f32 %v8413_v24, %v3266_v20  ;;  %v2866_v47 = vmul.f32 %v8427_v43, %v2865_v15 }
 0x849   : > { %v2573_v62 = vpop.permute.xlu0 %2572  ;;  %v2605_v25 = vpop.permute.xlu1 %2604  ;;  %v2946_v10 = vstv %s6154_s16 }
 0x84a   : > { %v3166_v58 = vadd.f32 %v3164_v0, %v3134_v52  ;;  %v2526_v39 = vadd.f32 %v2524_v56, %v2494_v54  ;;  %v2623_v0 = vmul.f32 %v8416_v28, %v2622_v9  ;;  %v2947_v56 = vmul.f32 %v8430_v35, %v2946_v10 }
 0x84c   : > { %v3187_v33 = vadd.f32 %v3186_v46, %v3166_v58  ;;  %v2543_v30 = vadd.f32 %v2542_v4, %v2526_v39  ;;  %v3027_v46 = vstv %s6166_s28 }
 0x84d   : > { %v2654_v5 = vpop.permute.xlu0 %2653  ;;  %v2686_v29 = vpop.permute.xlu1 %2685 }
 0x84e   : > { %v3215_v13 = vadd.f32 %v3213_v49, %v3187_v33  ;;  %v2575_v2 = vadd.f32 %v2573_v62, %v2543_v30  ;;  %v3028_v30 = vmul.f32 %v8437_v23, %v3027_v46  ;;  %v3108_v62 = vstv %s6178_s25 }
 0x850   : > { %v3247_v21 = vadd.f32 %v3245_v57, %v3215_v13  ;;  %v2607_v6 = vadd.f32 %v2605_v25, %v2575_v2  ;;  %v2784_v57 = vstv %s6130_s12  ;;  %v3109_v25 = vmul.f32 %v8453_v38, %v3108_v62 }
 0x851   : > { %v2735_v31 = vpop.permute.xlu0 %2734  ;;  %v2767_v36 = vpop.permute.xlu1 %2766  ;;  %v2785_v28 = vmul.f32 %v8424_v17, %v2784_v57  ;;  %v3288_v38 = vadd.f32 %v8394_v60, %v8419_v27 }
 0x852   : > { %v8463_v12 = vadd.f32 %v3267_v40, %v3247_v21  ;;  %v2624_v18 = vadd.f32 %v2623_v0, %v2607_v6  ;;  %v3189_v40 = vstv %s6190_s30 }
 0x853   : > { %v3320_v57 = vadd.f32 %v8392_v41, %v3288_v38  ;;  %v6260_v38 = vld [vmem:[%s8710_s9 + $0x1c] sm:$0xf] }
 0x854   : > { %v2656_v45 = vadd.f32 %v2654_v5, %v2624_v18  ;;  %v3190_v5 = vmul.f32 %v8407_v59, %v3189_v40  ;;  %v3296_v41 = vadd.f32 %v8435_v32, %v8463_v12 }
 0x855   : > { %v2816_v63 = vpop.permute.xlu0 %2815  ;;  %v2848_v44 = vpop.permute.xlu1 %2847 }
 0x856   : > { %v2688_v22 = vadd.f32 %v2686_v29, %v2656_v45  ;;  %v3270_v45 = vstv %s6202_s27  ;;  %v3328_v60 = vadd.f32 %v8433_v8, %v3296_v41  ;;  %v6273_v41 = vld [vmem:[%s8710_s9 + $0x2c] sm:$0xf]  ;;  %s8652_s27 = scalar_lea.vmem [#allocation24], %s7320_s26  ;;  %s6277_s26 = sshll.u32 (%p8749_p6), %s7106_s24, 2 }
 0x858   : > { %v2705_v49 = vadd.f32 %v2704_v16, %v2688_v22 }
 0x859   : > { %v2897_v48 = vpop.permute.xlu0 %2896  ;;  %v2929_v52 = vpop.permute.xlu1 %2928 }
 0x85a   : > { %v2737_v53 = vadd.f32 %v2735_v31, %v2705_v49  ;;  %v3271_v49 = vmul.f32 %v8413_v24, %v3270_v45  ;;  %v3346_v24 = vstv %s6212_s22  ;;  %v6254_v45 = vld [vmem:[%s8710_s9 + $0x14] sm:$0xf] }
 0x85c   : > { %v2769_v3 = vadd.f32 %v2767_v36, %v2737_v53  ;;  %v3342_v53 = vstv %s6211_s29 }
 0x85d   : > { %v2978_v58 = vpop.permute.xlu0 %2977  ;;  %v3010_v4 = vpop.permute.xlu1 %3009  ;;  %v3343_v36 = vadd.f32 %v3342_v53, %v3320_v57 }
 0x85e   : > { %v2786_v37 = vadd.f32 %v2785_v28, %v2769_v3 }
 0x85f   : > { %v3344_v15 = vmax.f32 %v3343_v36, 0.0 }
 0x860   : > { %v2818_v42 = vadd.f32 %v2816_v63, %v2786_v37 }
 0x861   : > { %v3059_v20 = vpop.permute.xlu0 %3058  ;;  %v3091_v13 = vpop.permute.xlu1 %3090 }
 0x862   : > { %v2850_v11 = vadd.f32 %v2848_v44, %v2818_v42 }
 0x864   : > { %v2867_v7 = vadd.f32 %v2866_v47, %v2850_v11 }
 0x865   : > { %v3140_v21 = vpop.permute.xlu0 %3139  ;;  %v3172_v0 = vpop.permute.xlu1 %3171 }
 0x866   : > { %v2899_v51 = vadd.f32 %v2897_v48, %v2867_v7  ;;  %v3347_v7 = vadd.f32 %v3346_v24, %v3328_v60  ;;  %v7021_v60 = vmov 1966171168  }
 0x867   : > { %v4953_v24 = vunpack.c.l.s4 %v7021_v60 }
 0x868   : > { %v2931_v54 = vadd.f32 %v2929_v52, %v2899_v51 }
 0x869   : > { %v3221_v23 = vpop.permute.xlu0 %3220  ;;  %v3253_v22 = vpop.permute.xlu1 %3252 }
 0x86a   : > { %v2948_v17 = vadd.f32 %v2947_v56, %v2931_v54  ;;  %v3348_v56 = vmax.f32 %v3347_v7, 0.0 }
 0x86c   : > { %v2980_v39 = vadd.f32 %v2978_v58, %v2948_v17  ;;  %v3350_v58 = vstv %s6213_s20  ;;  %s5685_s20 = scalar_lea.vmem (%p8749_p6), %s8712_s11, %s6277_s26 }
 0x86d   : > { %v3302_v8 = vpop.permute.xlu0 %3301  ;;  %v3334_v12 = vpop.permute.xlu1 %3333 }
 0x86e   : > { %v3012_v33 = vadd.f32 %v3010_v4, %v2980_v39 }
 0x870   : > { %v3029_v43 = vadd.f32 %v3028_v30, %v3012_v33 }
 0x872   : > { %v3061_v9 = vadd.f32 %v3059_v20, %v3029_v43 }
 0x874   : > { %v3093_v2 = vadd.f32 %v3091_v13, %v3061_v9 }
 0x876   : > { %v3110_v35 = vadd.f32 %v3109_v25, %v3093_v2 }
 0x878   : > { %v3142_v6 = vadd.f32 %v3140_v21, %v3110_v35 }
 0x87a   : > { %v3174_v18 = vadd.f32 %v3172_v0, %v3142_v6 }
 0x87c   : > { %v3191_v19 = vadd.f32 %v3190_v5, %v3174_v18 }
 0x87e   : > { %v3223_v29 = vadd.f32 %v3221_v23, %v3191_v19  ;;  %v6241_v23 = vld [vmem:[%s8710_s9 + $0x4] sm:$0xf] }
 0x880   : > { %v3255_v16 = vadd.f32 %v3253_v22, %v3223_v29  ;;  %v6244_v22 = vld [vmem:[%s8710_s9 + $0x8] sm:$0xf] }
 0x882   : > { %v8473_v31 = vadd.f32 %v3271_v49, %v3255_v16  ;;  %v6257_v16 = vld [vmem:[%s8710_s9 + $0x18] sm:$0xf]  ;;  %v6247_v49 = vld [vmem:[%s8710_s9 + $0xc] sm:$0xf] }
 0x884   : > { %v3304_v32 = vadd.f32 %v3302_v8, %v8473_v31 }
 0x886   : > { %v3336_v17 = vadd.f32 %v3334_v12, %v3304_v32 }
 0x888   : > { %v3351_v43 = vadd.f32 %v3350_v58, %v3336_v17 }
 0x88a   : > { %v3352_v25 = vmax.f32 %v3351_v43, 0.0 }
 0x8c0   : > { %v3422_v3 = vpop.f32.mrb[4].mxu0  ;;  %v3494_v59 = vpop.f32.mrb[12].mxu1 }
 0x8c1   : > { %v3498_v28 = vmax.f32 %v3422_v3, %v3494_v59  ;;  %v6421_v37 = vpop.f32.mrb[5].mxu0  ;;  %v6426_v63 = vpop.f32.mrb[13].mxu1 }
 0x8c2   : > { %v6267_v63 = vld [vmem:[%s8710_s9 + $0x24] sm:$0xf] }
 0x8c3   : > { %6430 = vmatmul.mubr.msk.f32.vlgmr.msra.gmra.mrb[6].mxu0 %vm3353_vm0, %v3498_v28  ;;  %6435 = vmatmul.mubr.msk.f32.vlgmr.msra.gmra.mrb[14].mxu1 %vm3353_vm0, %v3498_v28  ;;  %v6264_v28 = vld [vmem:[%s8710_s9 + $0x20] sm:$0xf] }
 0x8c4   : > { %6438 = vmatpush3.msra.mxu0 %v3344_v15  ;;  %6443 = vmatpush3.msra.mxu1 %v3344_v15  ;;  %v6270_v15 = vld [vmem:[%s8710_s9 + $0x28] sm:$0xf] }
 0x8c5   : > { %6439 = vmatprep.mubr.msk.f32.mxu0 %vm7018_vm3, %v7014_v1  ;;  %6444 = vmatprep.mubr.msk.f32.mxu1 %vm7018_vm3, %v7014_v1 }
 0x8c6   : > { %6447 = vmatprep.subr.mxu0 %v7014_v1  ;;  %6452 = vmatprep.subr.mxu1 %v7014_v1 }
 0x8c7   : > { %6440 = vmatmul.mubr.msk.f32.vlgmr.msra.gmra.mrb[8].mxu0 %vm3353_vm0, %v7699_v50  ;;  %6445 = vmatmul.mubr.msk.f32.vlgmr.msra.gmra.mrb[16].mxu1 %vm3353_vm0, %v7708_v26 }
 0x8c8   : > { %6448 = vmatpush3.msk.msra.mxu0 %vm7734_vm7, %v7020_v34  ;;  %6453 = vmatpush3.msk.msra.mxu1 %vm7743_vm11, %v7020_v34 }
 0x8c9   : > { %6449 = vmatprep.mubr.msk.f32.mxu0 %vm7018_vm3, %v7014_v1  ;;  %6454 = vmatprep.mubr.msk.f32.mxu1 %vm7018_vm3, %v7014_v1 }
 0x8ca   : > { %6457 = vmatprep.subr.mxu0 %v7014_v1  ;;  %6462 = vmatprep.subr.mxu1 %v7014_v1 }
 0x996   : > { %v3568_v27 = vpop.f32.mrb[6].mxu0  ;;  %v3638_v42 = vpop.f32.mrb[14].mxu1 }
 0x997   : > { %v3642_v44 = vmax.f32 %v3568_v27, %v3638_v42  ;;  %v6431_v11 = vpop.f32.mrb[7].mxu0  ;;  %v6436_v47 = vpop.f32.mrb[15].mxu1  ;;  %v4954_v27 = vunpack.c.0.s8 %v4953_v24  ;;  %v6238_v42 = vld [vmem:[#allocation22] ss:$0 sm:$0xff] }
 0x999   : > { %4507 = vxpose.xlu0.b32.start.end [1/1] (short) (narrow) %v3642_v44, 8  ;;  %v6250_v44 = vld [vmem:[#allocation22 + $0x1] ss:$0 sm:$0xff]  ;;  %v4957_v11 = vsub.s32 %v4954_v27, %v7685_v14 }
 0x99a   : > { %v3709_v48 = vpop.f32.mrb[8].mxu0  ;;  %v3779_v10 = vpop.f32.mrb[16].mxu1 }
 0x99b   : > { %v3783_v51 = vmax.f32 %v3709_v48, %v3779_v10  ;;  %v6441_v52 = vpop.f32.mrb[9].mxu0  ;;  %v6446_v54 = vpop.f32.mrb[17].mxu1 }
 0x99d   : > { %6450 = vmatmul.mubr.msk.f32.vlgmr.msra.gmra.mrb[10].mxu0 %vm3353_vm0, %v3783_v51  ;;  %6455 = vmatmul.mubr.msk.f32.vlgmr.msra.gmra.mrb[18].mxu1 %vm3353_vm0, %v3783_v51 }
 0x99e   : > { %6458 = vmatpush3.msra.mxu0 %v3348_v56  ;;  %6463 = vmatpush3.msra.mxu1 %v3348_v56 }
 0x99f   : > { %6459 = vmatprep.mubr.msk.f32.mxu0 %vm7018_vm3, %v7014_v1  ;;  %6464 = vmatprep.mubr.msk.f32.mxu1 %vm7018_vm3, %v7014_v1 }
 0x9a0   : > { %6467 = vmatprep.subr.mxu0 %v7014_v1  ;;  %6472 = vmatprep.subr.mxu1 %v7014_v1 }
 0x9a1   : > { %6460 = vmatmul.mubr.msk.f32.vlgmr.msra.gmra.mrb[12].mxu0 %vm3353_vm0, %v7699_v50  ;;  %6465 = vmatmul.mubr.msk.f32.vlgmr.msra.gmra.mrb[20].mxu1 %vm3353_vm0, %v7708_v26 }
 0x9a2   : > { %6468 = vmatpush3.msk.msra.mxu0 %vm7734_vm7, %v7020_v34  ;;  %6473 = vmatpush3.msk.msra.mxu1 %vm7743_vm11, %v7020_v34 }
 0x9a3   : > { %6469 = vmatprep.mubr.msk.f32.mxu0 %vm7018_vm3, %v7014_v1  ;;  %6474 = vmatprep.mubr.msk.f32.mxu1 %vm7018_vm3, %v7014_v1 }
 0x9a4   : > { %6477 = vmatprep.subr.mxu0 %v7014_v1  ;;  %6482 = vmatprep.subr.mxu1 %v7014_v1 }
 0xa19   : > { %v4523_v19 = vpop.trf.xlu0 }
 0xa70   : > { %v3853_v46 = vpop.f32.mrb[10].mxu0  ;;  %v3923_v39 = vpop.f32.mrb[18].mxu1 }
 0xa71   : > { %v3927_v4 = vmax.f32 %v3853_v46, %v3923_v39  ;;  %v6451_v33 = vpop.f32.mrb[11].mxu0  ;;  %v6456_v30 = vpop.f32.mrb[19].mxu1 }
 0xa72   : > { %v6263_v33 = vld [vmem:[#allocation22 + $0x2] ss:$0 sm:$0xff] }
 0xa73   : > { %4620 = vxpose.xlu1.b32.start.end [1/1] (short) (narrow) %v3927_v4, 8 }
 0xa74   : > { %v3994_v20 = vpop.f32.mrb[12].mxu0  ;;  %v4064_v62 = vpop.f32.mrb[20].mxu1 }
 0xa75   : > { %v4068_v9 = vmax.f32 %v3994_v20, %v4064_v62  ;;  %v6461_v13 = vpop.f32.mrb[13].mxu0  ;;  %v6466_v2 = vpop.f32.mrb[21].mxu1 }
 0xa77   : > { %6470 = vmatmul.mubr.msk.f32.vlgmr.msra.gmra.mrb[14].mxu0 %vm3353_vm0, %v4068_v9  ;;  %6475 = vmatmul.mubr.msk.f32.vlgmr.msra.gmra.mrb[22].mxu1 %vm3353_vm0, %v4068_v9 }
 0xa78   : > { %6478 = vmatpush3.msra.mxu0 %v3352_v25  ;;  %6483 = vmatpush3.msra.mxu1 %v3352_v25 }
 0xa79   : > { %6479 = vmatprep.mubr.msk.f32.mxu0 %vm7018_vm3, %v7014_v1  ;;  %6484 = vmatprep.mubr.msk.f32.mxu1 %vm7018_vm3, %v7014_v1 }
 0xa7a   : > { %6487 = vmatprep.subr.mxu0 %v7014_v1  ;;  %6492 = vmatprep.subr.mxu1 %v7014_v1 }
 0xa7b   : > { %6480 = vmatmul.mubr.msk.f32.vlgmr.msra.gmra.mrb[16].mxu0 %vm3353_vm0, %v7699_v50  ;;  %6485 = vmatmul.mubr.msk.f32.vlgmr.msra.gmra.mrb[24].mxu1 %vm3353_vm0, %v7708_v26 }
 0xa7c   : > { %6488 = vmatpush3.msk.msra.mxu0 %vm7734_vm7, %v7020_v34  ;;  %6489 = vmatprep.mubr.msk.f32.mxu0 %vm7018_vm3, %v7014_v1 }
 0xa7d   : > { %6493 = vmatpush3.msk.msra.mxu1 %vm7743_vm11, %v7020_v34  ;;  %6494 = vmatprep.mubr.msk.f32.mxu1 %vm7018_vm3, %v7014_v1  ;;  %v6251_v34 = vld [vmem:[%s8710_s9 + $0x10] sm:$0xf] }
 0xa7e   : > { %6497 = vmatprep.subr.mxu0 %v7014_v1  ;;  %6517 = vmatprep.subr.mxu1 %v7014_v1 }
 0xaf3   : > { %v4636_v29 = vpop.trf.xlu1 }
 0xb4a   : > { %v4138_v50 = vpop.f32.mrb[14].mxu0  ;;  %v4208_v26 = vpop.f32.mrb[22].mxu1 }
 0xb4b   : > { %v4212_v35 = vmax.f32 %v4138_v50, %v4208_v26  ;;  %v6471_v21 = vpop.f32.mrb[15].mxu0  ;;  %v6476_v55 = vpop.f32.mrb[23].mxu1 }
 0xb4d   : > { %4731 = vxpose.xlu0.b32.start.end [1/1] (short) (narrow) %v4212_v35, 8 }
 0xb4e   : > { %v4279_v40 = vpop.f32.mrb[16].mxu0  ;;  %v4349_v6 = vpop.f32.mrb[24].mxu1 }
 0xb4f   : > { %v4353_v0 = vmax.f32 %v4279_v40, %v4349_v6  ;;  %v6481_v18 = vpop.f32.mrb[17].mxu0  ;;  %v6486_v5 = vpop.f32.mrb[25].mxu1 }
 0xb51   : > { %6490 = vmatmul.mubr.msk.f32.vlgmr.msra.gmra.mrb[18].mxu0 %vm3353_vm0, %v4353_v0  ;;  %6495 = vmatmul.mubr.msk.f32.vlgmr.msra.gmra.mrb[26].mxu1 %vm3353_vm0, %v4353_v0 }
 0xb52   : > { %6499 = vmatprep.mubr.msk.f32.mxu0 %vm7018_vm3, %v7014_v1  ;;  %6519 = vmatprep.mubr.msk.f32.mxu1 %vm7018_vm3, %v7014_v1 }
 0xb53   : > { %6498 = vmatpush3.msk.msra.mxu0 %vm4543_vm1, %v4506_v61  ;;  %6518 = vmatpush3.msk.msra.mxu1 %vm4543_vm1, %v6251_v34 }
 0xb54   : > { %6502 = vmatprep.subr.mxu0 %v7014_v1  ;;  %6522 = vmatprep.subr.mxu1 %v7014_v1 }
 0xb55   : > { %6500 = vmatmul.mubr.msk.f32.vlgmr.msra.gmra.mrb[20].mxu0 %vm4539_vm2, %v4523_v19  ;;  %6520 = vmatmul.mubr.msk.f32.vlgmr.msra.gmra.mrb[28].mxu1 %vm4539_vm2, %v4523_v19 }
 0xb56   : > { %6503 = vmatpush3.msk.msra.mxu0 %vm4543_vm1, %v6241_v23  ;;  %6504 = vmatprep.mubr.msk.f32.mxu0 %vm7018_vm3, %v7014_v1 }
 0xb57   : > { %6523 = vmatpush3.msk.msra.mxu1 %vm4543_vm1, %v6254_v45  ;;  %6524 = vmatprep.mubr.msk.f32.mxu1 %vm7018_vm3, %v7014_v1 }
 0xb58   : > { %6507 = vmatprep.subr.mxu0 %v7014_v1  ;;  %6527 = vmatprep.subr.mxu1 %v7014_v1 }
 0xb5d   : > { %6505 = vmatmul.mubr.msk.f32.vlgmr.msra.gmra.mrb[20].mxu0 %vm4539_vm2, %v4636_v29  ;;  %6525 = vmatmul.mubr.msk.f32.vlgmr.msra.gmra.mrb[28].mxu1 %vm4539_vm2, %v4636_v29 }
 0xb5e   : > { %6508 = vmatpush3.msk.msra.mxu0 %vm4543_vm1, %v6244_v22  ;;  %6509 = vmatprep.mubr.msk.f32.mxu0 %vm7018_vm3, %v7014_v1 }
 0xb5f   : > { %6528 = vmatpush3.msk.msra.mxu1 %vm4543_vm1, %v6257_v16  ;;  %6529 = vmatprep.mubr.msk.f32.mxu1 %vm7018_vm3, %v7014_v1 }
 0xb60   : > { %6512 = vmatprep.subr.mxu0 %v7014_v1  ;;  %6532 = vmatprep.subr.mxu1 %v7014_v1 }
 0xbcd   : > { %v4747_v31 = vpop.trf.xlu0 }
 0xbce   : > { %6510 = vmatmul.mubr.msk.f32.vlgmr.msra.gmra.mrb[20].mxu0 %vm4539_vm2, %v4747_v31  ;;  %6530 = vmatmul.mubr.msk.f32.vlgmr.msra.gmra.mrb[28].mxu1 %vm4539_vm2, %v4747_v31 }
 0xbcf   : > { %6513 = vmatpush3.msk.msra.mxu0 %vm4543_vm1, %v6247_v49  ;;  %6514 = vmatprep.mubr.msk.f32.mxu0 %vm7018_vm3, %v7014_v1 }
 0xbd0   : > { %6533 = vmatpush3.msk.msra.mxu1 %vm4543_vm1, %v6260_v38  ;;  %6534 = vmatprep.mubr.msk.f32.mxu1 %vm7018_vm3, %v7014_v1 }
 0xbd1   : > { %6537 = vmatprep.subr.mxu0 %v7014_v1 }
 0xc24   : > { %v4423_v57 = vpop.f32.mrb[18].mxu0  ;;  %v4493_v53 = vpop.f32.mrb[26].mxu1 }
 0xc25   : > { %v4497_v36 = vmax.f32 %v4423_v57, %v4493_v53  ;;  %v6496_v3 = vpop.f32.mrb[27].mxu1  ;;  %v6491_v59 = vpop.f32.mrb[19].mxu0 }
 0xc27   : > { %4842 = vxpose.xlu0.b32.start.end [1/1] (short) (narrow) %v4497_v36, 8 }
 0xca7   : > { %v4858_v37 = vpop.trf.xlu0 }
 0xca8   : > { %6515 = vmatmul.mubr.msk.f32.vlgmr.msra.gmra.mrb[20].mxu0 %vm4539_vm2, %v4858_v37  ;;  %6535 = vmatmul.mubr.msk.f32.vlgmr.msra.gmra.mrb[28].mxu1 %vm4539_vm2, %v4858_v37 }
 0xca9   : > { %6538 = vmatpush3.msk.msra.mxu0 %vm4543_vm1, %v6264_v28  ;;  %6539 = vmatprep.mubr.msk.f32.mxu0 %vm7018_vm3, %v7014_v1 }
 0xcaa   : > { %6542 = vmatprep.subr.mxu0 %v7014_v1 }
 0xcac   : > { %6540 = vmatmul.mubr.msk.f32.vlgmr.msra.gmra.mrb[22].mxu0 %vm4539_vm2, %v4523_v19 }
 0xcad   : > { %6543 = vmatpush3.msk.msra.mxu0 %vm4543_vm1, %v6267_v63  ;;  %6544 = vmatprep.mubr.msk.f32.mxu0 %vm7018_vm3, %v7014_v1 }
 0xcae   : > { %6547 = vmatprep.subr.mxu0 %v7014_v1 }
 0xcb4   : > { %6545 = vmatmul.mubr.msk.f32.vlgmr.msra.gmra.mrb[22].mxu0 %vm4539_vm2, %v4636_v29 }
 0xcb5   : > { %6548 = vmatpush3.msk.msra.mxu0 %vm4543_vm1, %v6270_v15  ;;  %6549 = vmatprep.mubr.msk.f32.mxu0 %vm7018_vm3, %v7014_v1 }
 0xcb6   : > { %6552 = vmatprep.subr.mxu0 %v7014_v1 }
 0xcbc   : > { %6550 = vmatmul.mubr.msk.f32.vlgmr.msra.gmra.mrb[22].mxu0 %vm4539_vm2, %v4747_v31 }
 0xcbd   : > { %6553 = vmatpush3.msk.msra.mxu0 %vm4543_vm1, %v6273_v41  ;;  %6554 = vmatprep.mubr.msk.f32.mxu0 %vm7018_vm3, %v7014_v1 }
 0xcc4   : > { %6555 = vmatmul.mubr.msk.f32.vlgmr.msra.gmra.mrb[22].mxu0 %vm4539_vm2, %v4858_v37 }
 0xd7b   : > { %v4946_v47 = vpop.f32.mrb[20].mxu0  ;;  %v5293_v7 = vpop.f32.mrb[28].mxu1 }
 0xd7c   : > { %v6581_v48 = vadd.f32 %v6238_v42, %v4946_v47  ;;  %v6582_v10 = vadd.f32 %v6250_v44, %v5293_v7  ;;  %v6516_v51 = vpop.f32.mrb[21].mxu0  ;;  %v6536_v52 = vpop.f32.mrb[29].mxu1 }
 0xd7e   : > { %v4958_v54 = vrot.slane %v6581_v48, %v4957_v11  ;;  %v5305_v56 = vrot.slane %v6582_v10, %v4957_v11 }
 0xd80   : > { %v4959_v1 = vcombine.high %v4958_v54, %v4958_v54  ;;  %v4966_v8 = vrot.slane %v4958_v54, %v4957_v11  ;;  %v5306_v32 = vcombine.high %v5305_v56, %v5305_v56  ;;  %v5313_v12 = vrot.slane %v5305_v56, %v4957_v11 }
 0xd82   : > { %v4973_v17 = vrot.slane %v4959_v1, %v4957_v11  ;;  %v4974_v58 = vcombine.high %v4966_v8, %v4966_v8  ;;  %4981 = vst.msk [vmem:[%s8652_s27] sm:$0x1] %vm4980_vm4, %v4966_v8  ;;  %v5320_v14 = vrot.slane %v5306_v32, %v4957_v11  ;;  %v5321_v46 = vcombine.high %v5313_v12, %v5313_v12 }
 0xd83   : > { %5327 = vst.msk [vmem:[%s8652_s27 + $0x1] sm:$0x1] %vm4980_vm4, %v5313_v12 }
 0xd84   : > { %v4975_v39 = vcombine.high %v4973_v17, %v4973_v17  ;;  %4982 = vst.msk [vmem:[%s8652_s27 + $0x4] sm:$0x1] %vm4980_vm4, %v4973_v17  ;;  %4983 = vst.msk [vmem:[%s8652_s27 + $0x8] sm:$0x1] %vm4980_vm4, %v4974_v58  ;;  %v5322_v4 = vcombine.high %v5320_v14, %v5320_v14 }
 0xd85   : > { %5328 = vst.msk [vmem:[%s8652_s27 + $0x5] sm:$0x1] %vm4980_vm4, %v5320_v14  ;;  %5329 = vst.msk [vmem:[%s8652_s27 + $0x9] sm:$0x1] %vm4980_vm4, %v5321_v46 }
 0xd86   : > { %4984 = vst.msk [vmem:[%s8652_s27 + $0xc] sm:$0x1] %vm4980_vm4, %v4975_v39  ;;  %5330 = vst.msk [vmem:[%s8652_s27 + $0xd] sm:$0x1] %vm4980_vm4, %v5322_v4 }
 0xd97   : > { %v5639_v30 = vpop.f32.mrb[22].mxu0 }
 0xd98   : > { %v6583_v43 = vadd.f32 %v6263_v33, %v5639_v30  ;;  %v6556_v20 = vpop.f32.mrb[23].mxu0 }
 0xd9a   : > { %v5651_v62 = vrot.slane %v6583_v43, %v4957_v11 }
 0xd9c   : > { %v5652_v9 = vcombine.high %v5651_v62, %v5651_v62  ;;  %v5659_v13 = vrot.slane %v5651_v62, %v4957_v11  ;;  %5683 = sbr.rel (!%p8749_p6) target bundleno = 3499 (0xdab), region = 108 }
 0xd9e   : > { %v5666_v2 = vrot.slane %v5652_v9, %v4957_v11  ;;  %v5667_v25 = vcombine.high %v5659_v13, %v5659_v13  ;;  %5673 = vst.msk [vmem:[%s8652_s27 + $0x2] sm:$0x1] %vm4980_vm4, %v5659_v13 }
 0xda0   : > { %v5668_v50 = vcombine.high %v5666_v2, %v5666_v2  ;;  %5674 = vst.msk [vmem:[%s8652_s27 + $0x6] sm:$0x1] %vm4980_vm4, %v5666_v2  ;;  %5675 = vst.msk [vmem:[%s8652_s27 + $0xa] sm:$0x1] %vm4980_vm4, %v5667_v25 }
 0xda2   : > { %5676 = vst.msk [vmem:[%s8652_s27 + $0xe] sm:$0x1] %vm4980_vm4, %v5668_v50 }
 0xda5   : > { %v5701_v26 = vld [vmem:[%s8652_s27] sm:$0xf] }
 0xda6   : > { %5702 = vst [vmem:[%s5685_s20] sm:$0xf] %v5701_v26 }
 0xda7   : > { %v5703_v35 = vld [vmem:[%s8652_s27 + $0x4] sm:$0xf]  ;;  %v5705_v21 = vld [vmem:[%s8652_s27 + $0x8] sm:$0xf] }
 0xda8   : > { %5704 = vst [vmem:[%s5685_s20 + $0x8] sm:$0xf] %v5703_v35  ;;  %5706 = vst [vmem:[%s5685_s20 + $0x10] sm:$0xf] %v5705_v21 }
 0xda9   : > { %v5707_v55 = vld [vmem:[%s8652_s27 + $0xc] sm:$0xf] }
 0xdaa   : > { %5708 = vst [vmem:[%s5685_s20 + $0x18] sm:$0xf] %v5707_v55 }
 0xdab PF: > { %p28_p9 = scmp.ge.s32.totalorder %s7251_s14, 4   ;;  %s8750_s17 = smov %s6989_s18 }
 0xdac   : > { %s8751_s18 = smov %s6993_s19  ;;  %s8752_s19 = smov %s7262_s13 }
 0xdad   : > { %s8753_s20 = smov %s7251_s14  ;;  %30 = sbr.rel (!%p28_p9) target bundleno = 13 (0xd), region = 201 }
 0xdb4   :  { %5749 = vsyncpa [#allocation7], 1 }
 0xdb5   :  { %5751 = vsyncpa [#allocation7 + $0x1], 1 }
 0xdb6   :  { %5752 = vsyncpa [#allocation23], 1 }
 0xdb7   :  { %5753 = vsyncpa [#allocation8], 1 }
 0xdb8   :  { %5755 = vsyncpa [#allocation8 + $0x1], 1 }
 0xdb9   :  { %5756 = vsyncpa [#allocation15], 1 }
 0xdba   :  { %5757 = vsyncpa [#allocation21], 1 }
 0xdbb   :  { %5758 = vsyncpa [#allocation9], 1 }
 0xdbc   :  { %5760 = vsyncpa [#allocation9 + $0x1], 1 }
 0xdbd   :  { %5761 = vsyncpa [#allocation13], 1 }
 0xdbe   :  { %5762 = vsyncpa [#allocation19], 1 }

</bundles_post_ra>
